<compile_context>
chip_gen: v7x
topology: tpu7x:2x2x1
jax: 0.10.0
libtpu: 0.0.40
codegen_flags: <defaults>
</compile_context>

<pallas_src>
import functools

import jax
import jax.numpy as jnp
from jax.experimental import pallas as pl
from jax.experimental.pallas import tpu as pltpu

EPS = 1e-5
LANE = 128


def _round_up(x, m):
    return (x + m - 1) // m * m


# -----------------------------------------------------------------------------
# Pass 1: conv (27-tap shifted accumulation on the MXU) + per-channel sum/sumsq.
# -----------------------------------------------------------------------------
def conv_stats_kernel(x0_ref, x1_ref, x2_ref, w_ref,
                      h_ref, sum_ref, sumsq_ref, *, H, W, C_in):
    """One (n, d) output depth-plane per grid step.

    x{0,1,2}_ref : (H+2, W+2, C_in) bf16 input slabs at depth taps d, d+1, d+2
    w_ref        : (27, C_in, Cp)   bf16 weights, tap-major (kd*9 + kh*3 + kw)
    h_ref        : (H*W, Cp)        bf16 raw conv output (pre-BN)
    sum_ref      : (1, Cp)          f32  global per-channel sum   (accumulator)
    sumsq_ref    : (1, Cp)          f32  global per-channel sumsq (accumulator)
    """
    x_refs = (x0_ref, x1_ref, x2_ref)
    Cp = h_ref.shape[-1]

    acc = jnp.zeros((H * W, Cp), jnp.float32)
    for kd in range(3):
        for kh in range(3):
            for kw in range(3):
                tap = x_refs[kd][kh:kh + H, kw:kw + W, :].reshape(H * W, C_in)
                w_t = w_ref[kd * 9 + kh * 3 + kw]          # (C_in, Cp)
                acc = acc + jnp.dot(tap, w_t,
                                    preferred_element_type=jnp.float32)

    h_ref[...] = acc.astype(h_ref.dtype)

    # Global BatchNorm statistics, accumulated in f32 across the whole grid.
    psum = jnp.sum(acc, axis=0, keepdims=True)
    psumsq = jnp.sum(acc * acc, axis=0, keepdims=True)

    first = (pl.program_id(0) == 0) & (pl.program_id(1) == 0)

    @pl.when(first)
    def _():
        sum_ref[...] = psum
        sumsq_ref[...] = psumsq

    @pl.when(jnp.logical_not(first))
    def _():
        sum_ref[...] += psum
        sumsq_ref[...] += psumsq


# -----------------------------------------------------------------------------
# Pass 2: y = relu(h * a + c)  (a, c = folded BatchNorm scale / shift).
# -----------------------------------------------------------------------------
def bn_relu_kernel(h_ref, a_ref, c_ref, o_ref):
    y = h_ref[...].astype(jnp.float32) * a_ref[...] + c_ref[...]
    o_ref[...] = jnp.maximum(y, 0.0).astype(o_ref.dtype)


def _conv3d_bn_relu(xp, w_tap, gamma_p, beta_p, *, out_dtype):
    """xp: (N, D+2, H+2, W+2, C_in) bf16 zero-padded channels-last input.
    w_tap: (27, C_in, Cp) bf16.  gamma_p / beta_p: (1, Cp) f32.
    Returns (N, D, H*W, Cp) activations in `out_dtype`."""
    N, Dp2, Hp2, Wp2, C_in = xp.shape
    D, H, W = Dp2 - 2, Hp2 - 2, Wp2 - 2
    Cp = w_tap.shape[-1]
    HW = H * W
    M = N * D * HW                       # elements per channel for batch stats

    grid = (N, D)

    def x_spec(kd):
        return pl.BlockSpec((None, None, Hp2, Wp2, C_in),
                            lambda n, d, kd=kd: (n, d + kd, 0, 0, 0))

    kernel = functools.partial(conv_stats_kernel, H=H, W=W, C_in=C_in)

    h_raw, csum, csumsq = pl.pallas_call(
        kernel,
        grid=grid,
        in_specs=[
            x_spec(0), x_spec(1), x_spec(2),
            pl.BlockSpec((27, C_in, Cp), lambda n, d: (0, 0, 0)),
        ],
        out_specs=[
            pl.BlockSpec((None, None, HW, Cp), lambda n, d: (n, d, 0, 0)),
            pl.BlockSpec((1, Cp), lambda n, d: (0, 0)),
            pl.BlockSpec((1, Cp), lambda n, d: (0, 0)),
        ],
        out_shape=[
            jax.ShapeDtypeStruct((N, D, HW, Cp), jnp.bfloat16),
            jax.ShapeDtypeStruct((1, Cp), jnp.float32),
            jax.ShapeDtypeStruct((1, Cp), jnp.float32),
        ],
        # The stats outputs accumulate across the whole grid, so both axes must
        # stay sequential ("arbitrary"); the normalize pass below is "parallel".
        compiler_params=pltpu.CompilerParams(
            dimension_semantics=("arbitrary", "arbitrary")),
    )(xp, xp, xp, w_tap)

    # Tiny O(Cp) finalize: fold BN into a single per-channel scale + shift.
    mean = csum / M
    var = jnp.maximum(csumsq / M - mean * mean, 0.0)       # biased variance
    a = gamma_p * jax.lax.rsqrt(var + EPS)
    c = beta_p - mean * a

    y = pl.pallas_call(
        bn_relu_kernel,
        grid=grid,
        in_specs=[
            pl.BlockSpec((None, None, HW, Cp), lambda n, d: (n, d, 0, 0)),
            pl.BlockSpec((1, Cp), lambda n, d: (0, 0)),
            pl.BlockSpec((1, Cp), lambda n, d: (0, 0)),
        ],
        out_specs=pl.BlockSpec((None, None, HW, Cp), lambda n, d: (n, d, 0, 0)),
        out_shape=jax.ShapeDtypeStruct((N, D, HW, Cp), out_dtype),
        compiler_params=pltpu.CompilerParams(
            dimension_semantics=("parallel", "parallel")),
    )(h_raw, a, c)
    return y


# -----------------------------------------------------------------------------
# Plain-JAX glue: layout / padding / weight re-packing.
# -----------------------------------------------------------------------------
def _weight_to_taps(w_oi333, c_in_pad, c_out_pad):
    """(Cout, Cin, 3, 3, 3) -> (27, c_in_pad, c_out_pad) bf16, tap-major."""
    Cout, Cin = w_oi333.shape[:2]
    w = jnp.transpose(w_oi333, (2, 3, 4, 1, 0)).reshape(27, Cin, Cout)
    w = jnp.pad(w, ((0, 0), (0, c_in_pad - Cin), (0, c_out_pad - Cout)))
    return w.astype(jnp.bfloat16)


def _pad_channels(v, c_pad, fill):
    c = v.shape[0]
    return jnp.pad(v.astype(jnp.float32), (0, c_pad - c),
                   constant_values=fill).reshape(1, c_pad)


def double_conv(x_ncdhw, params):
    # Conv biases are accepted for interface parity but unused: training-mode
    # BatchNorm subtracts the batch mean, which cancels a per-channel bias exactly.
    (w1, b1, g1, be1, w2, b2, g2, be2) = params
    del b1, b2
    N, Cin, D, H, W = x_ncdhw.shape
    Cout = w1.shape[0]
    Cp = _round_up(Cout, LANE)           # lane-dense padded channel count

    # NCDHW -> NDHWC (channels = lane dim), bf16 for the MXU, zero pad = 1.
    x = jnp.transpose(x_ncdhw, (0, 2, 3, 4, 1)).astype(jnp.bfloat16)
    xp = jnp.pad(x, ((0, 0), (1, 1), (1, 1), (1, 1), (0, 0)))

    w1t = _weight_to_taps(w1, Cin, Cp)                       # (27, Cin, Cp)
    y1 = _conv3d_bn_relu(xp, w1t,
                         _pad_channels(g1, Cp, 1.0),
                         _pad_channels(be1, Cp, 0.0),
                         out_dtype=jnp.bfloat16)             # (N, D, H*W, Cp)
    y1 = y1.reshape(N, D, H, W, Cp)
    y1p = jnp.pad(y1, ((0, 0), (1, 1), (1, 1), (1, 1), (0, 0)))

    w2t = _weight_to_taps(w2, Cp, Cp)                        # (27, Cp, Cp): K aligned
    y2 = _conv3d_bn_relu(y1p, w2t,
                         _pad_channels(g2, Cp, 1.0),
                         _pad_channels(be2, Cp, 0.0),
                         out_dtype=jnp.float32)
    y2 = y2.reshape(N, D, H, W, Cp)

    return jnp.transpose(y2[..., :Cout], (0, 4, 1, 2, 3))    # back to NCDHW, f32


def init_params(key, in_channels, out_channels):
    """Deterministic synthetic init mirroring PyTorch default shapes/ranges."""
    k0, k1, k2, k3 = jax.random.split(key, 4)
    fan1 = in_channels * 27
    bound1 = 1.0 / (fan1 ** 0.5)
    w1 = jax.random.uniform(k0, (out_channels, in_channels, 3, 3, 3),
                            jnp.float32, -bound1, bound1)
    b1 = jax.random.uniform(k1, (out_channels,), jnp.float32, -bound1, bound1)
    fan2 = out_channels * 27
    bound2 = 1.0 / (fan2 ** 0.5)
    w2 = jax.random.uniform(k2, (out_channels, out_channels, 3, 3, 3),
                            jnp.float32, -bound2, bound2)
    b2 = jax.random.uniform(k3, (out_channels,), jnp.float32, -bound2, bound2)
    g1 = jnp.ones((out_channels,), jnp.float32)
    be1 = jnp.zeros((out_channels,), jnp.float32)
    g2 = jnp.ones((out_channels,), jnp.float32)
    be2 = jnp.zeros((out_channels,), jnp.float32)
    return (w1, b1, g1, be1, w2, b2, g2, be2)


if __name__ == "__main__":
    key = jax.random.PRNGKey(0)
    kx, kp = jax.random.split(key)
    N, Cin, Cout, D, H, W = 2, 4, 8, 8, 8, 8
    x = jax.random.normal(kx, (N, Cin, D, H, W), jnp.float32)   # NCDHW like PyTorch
    params = init_params(kp, Cin, Cout)

    out = jax.jit(double_conv)(x, params)
    jax.block_until_ready(out)
    assert out.shape == (N, Cout, D, H, W)
    assert bool(jnp.all(jnp.isfinite(out)))
    assert bool(jnp.all(out >= 0.0))        # ReLU output must be non-negative
    print("KERNEL_OK")
</pallas_src>

<mosaic_0001>
module attributes {stable_mosaic.version = 11 : i64} {
  func.func @conv_stats_kernel(%arg0: i32, %arg1: i32, %arg2: memref<1x1x10x10x4xbf16, #tpu.memory_space<vmem>>, %arg3: memref<1x1x10x10x4xbf16, #tpu.memory_space<vmem>>, %arg4: memref<1x1x10x10x4xbf16, #tpu.memory_space<vmem>>, %arg5: memref<27x4x128xbf16, #tpu.memory_space<vmem>>, %arg6: memref<1x1x64x128xbf16, #tpu.memory_space<vmem>>, %arg7: memref<1x128xf32, #tpu.memory_space<vmem>>, %arg8: memref<1x128xf32, #tpu.memory_space<vmem>>) attributes {dimension_semantics = [#tpu.dimension_semantics<arbitrary>, #tpu.dimension_semantics<arbitrary>], iteration_bounds = array<i64: 2, 8>, scalar_prefetch = 0 : i64, scratch_operands = 0 : i64, tpu.core_type = #tpu.core_type<tc>, window_params = [{transform_indices = @transform_0, window_bounds = array<i64: 1, 1, 10, 10, 4>}, {transform_indices = @transform_1, window_bounds = array<i64: 1, 1, 10, 10, 4>}, {transform_indices = @transform_2, window_bounds = array<i64: 1, 1, 10, 10, 4>}, {pipeline_mode = #tpu.pipeline_mode<synchronous>, transform_indices = @transform_3, window_bounds = array<i64: 27, 4, 128>}, {transform_indices = @transform_4, window_bounds = array<i64: 1, 1, 64, 128>}, {pipeline_mode = #tpu.pipeline_mode<synchronous>, transform_indices = @transform_5, window_bounds = array<i64: 1, 128>}, {pipeline_mode = #tpu.pipeline_mode<synchronous>, transform_indices = @transform_6, window_bounds = array<i64: 1, 128>}]} {
    %cst = arith.constant 0.000000e+00 : f32
    %0 = vector.broadcast %cst : f32 to vector<64x128xf32>
    %c0 = arith.constant 0 : index
    %c0_0 = arith.constant 0 : index
    %c0_1 = arith.constant 0 : index
    %c0_2 = arith.constant 0 : index
    %c0_3 = arith.constant 0 : index
    %1 = vector.load %arg2[%c0, %c0_0, %c0_1, %c0_2, %c0_3] : memref<1x1x10x10x4xbf16, #tpu.memory_space<vmem>>, vector<1x1x8x8x4xbf16>
    %2 = vector.shape_cast %1 : vector<1x1x8x8x4xbf16> to vector<8x8x4xbf16>
    %3 = vector.shape_cast %2 : vector<8x8x4xbf16> to vector<64x4xbf16>
    %c0_4 = arith.constant 0 : index
    %c0_5 = arith.constant 0 : index
    %c0_6 = arith.constant 0 : index
    %4 = vector.load %arg5[%c0_4, %c0_5, %c0_6] : memref<27x4x128xbf16, #tpu.memory_space<vmem>>, vector<1x4x128xbf16>
    %5 = vector.shape_cast %4 : vector<1x4x128xbf16> to vector<4x128xbf16>
    %cst_7 = arith.constant dense<0.000000e+00> : vector<64x128xf32>
    %6 = tpu.matmul %3, %5, %cst_7 {dimension_numbers = #tpu.dot_dimension_numbers<[1], [0], [0], [1], [0, 0, 1, 1], [], []>} : vector<64x4xbf16>, vector<4x128xbf16>, vector<64x128xf32> -> vector<64x128xf32>
    %7 = arith.addf %0, %6 : vector<64x128xf32>
    %c0_8 = arith.constant 0 : index
    %c0_9 = arith.constant 0 : index
    %c0_10 = arith.constant 0 : index
    %c1 = arith.constant 1 : index
    %c0_11 = arith.constant 0 : index
    %8 = vector.load %arg2[%c0_8, %c0_9, %c0_10, %c1, %c0_11] : memref<1x1x10x10x4xbf16, #tpu.memory_space<vmem>>, vector<1x1x8x8x4xbf16>
    %9 = vector.shape_cast %8 : vector<1x1x8x8x4xbf16> to vector<8x8x4xbf16>
    %10 = vector.shape_cast %9 : vector<8x8x4xbf16> to vector<64x4xbf16>
    %c1_12 = arith.constant 1 : index
    %c0_13 = arith.constant 0 : index
    %c0_14 = arith.constant 0 : index
    %11 = vector.load %arg5[%c1_12, %c0_13, %c0_14] : memref<27x4x128xbf16, #tpu.memory_space<vmem>>, vector<1x4x128xbf16>
    %12 = vector.shape_cast %11 : vector<1x4x128xbf16> to vector<4x128xbf16>
    %cst_15 = arith.constant dense<0.000000e+00> : vector<64x128xf32>
    %13 = tpu.matmul %10, %12, %cst_15 {dimension_numbers = #tpu.dot_dimension_numbers<[1], [0], [0], [1], [0, 0, 1, 1], [], []>} : vector<64x4xbf16>, vector<4x128xbf16>, vector<64x128xf32> -> vector<64x128xf32>
    %14 = arith.addf %7, %13 : vector<64x128xf32>
    %c0_16 = arith.constant 0 : index
    %c0_17 = arith.constant 0 : index
    %c0_18 = arith.constant 0 : index
    %c2 = arith.constant 2 : index
    %c0_19 = arith.constant 0 : index
    %15 = vector.load %arg2[%c0_16, %c0_17, %c0_18, %c2, %c0_19] : memref<1x1x10x10x4xbf16, #tpu.memory_space<vmem>>, vector<1x1x8x8x4xbf16>
    %16 = vector.shape_cast %15 : vector<1x1x8x8x4xbf16> to vector<8x8x4xbf16>
    %17 = vector.shape_cast %16 : vector<8x8x4xbf16> to vector<64x4xbf16>
    %c2_20 = arith.constant 2 : index
    %c0_21 = arith.constant 0 : index
    %c0_22 = arith.constant 0 : index
    %18 = vector.load %arg5[%c2_20, %c0_21, %c0_22] : memref<27x4x128xbf16, #tpu.memory_space<vmem>>, vector<1x4x128xbf16>
    %19 = vector.shape_cast %18 : vector<1x4x128xbf16> to vector<4x128xbf16>
    %cst_23 = arith.constant dense<0.000000e+00> : vector<64x128xf32>
    %20 = tpu.matmul %17, %19, %cst_23 {dimension_numbers = #tpu.dot_dimension_numbers<[1], [0], [0], [1], [0, 0, 1, 1], [], []>} : vector<64x4xbf16>, vector<4x128xbf16>, vector<64x128xf32> -> vector<64x128xf32>
    %21 = arith.addf %14, %20 : vector<64x128xf32>
    %c0_24 = arith.constant 0 : index
    %c0_25 = arith.constant 0 : index
    %c1_26 = arith.constant 1 : index
    %c0_27 = arith.constant 0 : index
    %c0_28 = arith.constant 0 : index
    %22 = vector.load %arg2[%c0_24, %c0_25, %c1_26, %c0_27, %c0_28] : memref<1x1x10x10x4xbf16, #tpu.memory_space<vmem>>, vector<1x1x8x8x4xbf16>
    %23 = vector.shape_cast %22 : vector<1x1x8x8x4xbf16> to vector<8x8x4xbf16>
    %24 = vector.shape_cast %23 : vector<8x8x4xbf16> to vector<64x4xbf16>
    %c3 = arith.constant 3 : index
    %c0_29 = arith.constant 0 : index
    %c0_30 = arith.constant 0 : index
    %25 = vector.load %arg5[%c3, %c0_29, %c0_30] : memref<27x4x128xbf16, #tpu.memory_space<vmem>>, vector<1x4x128xbf16>
    %26 = vector.shape_cast %25 : vector<1x4x128xbf16> to vector<4x128xbf16>
    %cst_31 = arith.constant dense<0.000000e+00> : vector<64x128xf32>
    %27 = tpu.matmul %24, %26, %cst_31 {dimension_numbers = #tpu.dot_dimension_numbers<[1], [0], [0], [1], [0, 0, 1, 1], [], []>} : vector<64x4xbf16>, vector<4x128xbf16>, vector<64x128xf32> -> vector<64x128xf32>
    %28 = arith.addf %21, %27 : vector<64x128xf32>
    %c0_32 = arith.constant 0 : index
    %c0_33 = arith.constant 0 : index
    %c1_34 = arith.constant 1 : index
    %c1_35 = arith.constant 1 : index
    %c0_36 = arith.constant 0 : index
    %29 = vector.load %arg2[%c0_32, %c0_33, %c1_34, %c1_35, %c0_36] : memref<1x1x10x10x4xbf16, #tpu.memory_space<vmem>>, vector<1x1x8x8x4xbf16>
    %30 = vector.shape_cast %29 : vector<1x1x8x8x4xbf16> to vector<8x8x4xbf16>
    %31 = vector.shape_cast %30 : vector<8x8x4xbf16> to vector<64x4xbf16>
    %c4 = arith.constant 4 : index
    %c0_37 = arith.constant 0 : index
    %c0_38 = arith.constant 0 : index
    %32 = vector.load %arg5[%c4, %c0_37, %c0_38] : memref<27x4x128xbf16, #tpu.memory_space<vmem>>, vector<1x4x128xbf16>
    %33 = vector.shape_cast %32 : vector<1x4x128xbf16> to vector<4x128xbf16>
    %cst_39 = arith.constant dense<0.000000e+00> : vector<64x128xf32>
    %34 = tpu.matmul %31, %33, %cst_39 {dimension_numbers = #tpu.dot_dimension_numbers<[1], [0], [0], [1], [0, 0, 1, 1], [], []>} : vector<64x4xbf16>, vector<4x128xbf16>, vector<64x128xf32> -> vector<64x128xf32>
    %35 = arith.addf %28, %34 : vector<64x128xf32>
    %c0_40 = arith.constant 0 : index
    %c0_41 = arith.constant 0 : index
    %c1_42 = arith.constant 1 : index
    %c2_43 = arith.constant 2 : index
    %c0_44 = arith.constant 0 : index
    %36 = vector.load %arg2[%c0_40, %c0_41, %c1_42, %c2_43, %c0_44] : memref<1x1x10x10x4xbf16, #tpu.memory_space<vmem>>, vector<1x1x8x8x4xbf16>
    %37 = vector.shape_cast %36 : vector<1x1x8x8x4xbf16> to vector<8x8x4xbf16>
    %38 = vector.shape_cast %37 : vector<8x8x4xbf16> to vector<64x4xbf16>
    %c5 = arith.constant 5 : index
    %c0_45 = arith.constant 0 : index
    %c0_46 = arith.constant 0 : index
    %39 = vector.load %arg5[%c5, %c0_45, %c0_46] : memref<27x4x128xbf16, #tpu.memory_space<vmem>>, vector<1x4x128xbf16>
    %40 = vector.shape_cast %39 : vector<1x4x128xbf16> to vector<4x128xbf16>
    %cst_47 = arith.constant dense<0.000000e+00> : vector<64x128xf32>
    %41 = tpu.matmul %38, %40, %cst_47 {dimension_numbers = #tpu.dot_dimension_numbers<[1], [0], [0], [1], [0, 0, 1, 1], [], []>} : vector<64x4xbf16>, vector<4x128xbf16>, vector<64x128xf32> -> vector<64x128xf32>
    %42 = arith.addf %35, %41 : vector<64x128xf32>
    %c0_48 = arith.constant 0 : index
    %c0_49 = arith.constant 0 : index
    %c2_50 = arith.constant 2 : index
    %c0_51 = arith.constant 0 : index
    %c0_52 = arith.constant 0 : index
    %43 = vector.load %arg2[%c0_48, %c0_49, %c2_50, %c0_51, %c0_52] : memref<1x1x10x10x4xbf16, #tpu.memory_space<vmem>>, vector<1x1x8x8x4xbf16>
    %44 = vector.shape_cast %43 : vector<1x1x8x8x4xbf16> to vector<8x8x4xbf16>
    %45 = vector.shape_cast %44 : vector<8x8x4xbf16> to vector<64x4xbf16>
    %c6 = arith.constant 6 : index
    %c0_53 = arith.constant 0 : index
    %c0_54 = arith.constant 0 : index
    %46 = vector.load %arg5[%c6, %c0_53, %c0_54] : memref<27x4x128xbf16, #tpu.memory_space<vmem>>, vector<1x4x128xbf16>
    %47 = vector.shape_cast %46 : vector<1x4x128xbf16> to vector<4x128xbf16>
    %cst_55 = arith.constant dense<0.000000e+00> : vector<64x128xf32>
    %48 = tpu.matmul %45, %47, %cst_55 {dimension_numbers = #tpu.dot_dimension_numbers<[1], [0], [0], [1], [0, 0, 1, 1], [], []>} : vector<64x4xbf16>, vector<4x128xbf16>, vector<64x128xf32> -> vector<64x128xf32>
    %49 = arith.addf %42, %48 : vector<64x128xf32>
    %c0_56 = arith.constant 0 : index
    %c0_57 = arith.constant 0 : index
    %c2_58 = arith.constant 2 : index
    %c1_59 = arith.constant 1 : index
    %c0_60 = arith.constant 0 : index
    %50 = vector.load %arg2[%c0_56, %c0_57, %c2_58, %c1_59, %c0_60] : memref<1x1x10x10x4xbf16, #tpu.memory_space<vmem>>, vector<1x1x8x8x4xbf16>
    %51 = vector.shape_cast %50 : vector<1x1x8x8x4xbf16> to vector<8x8x4xbf16>
    %52 = vector.shape_cast %51 : vector<8x8x4xbf16> to vector<64x4xbf16>
    %c7 = arith.constant 7 : index
    %c0_61 = arith.constant 0 : index
    %c0_62 = arith.constant 0 : index
    %53 = vector.load %arg5[%c7, %c0_61, %c0_62] : memref<27x4x128xbf16, #tpu.memory_space<vmem>>, vector<1x4x128xbf16>
    %54 = vector.shape_cast %53 : vector<1x4x128xbf16> to vector<4x128xbf16>
    %cst_63 = arith.constant dense<0.000000e+00> : vector<64x128xf32>
    %55 = tpu.matmul %52, %54, %cst_63 {dimension_numbers = #tpu.dot_dimension_numbers<[1], [0], [0], [1], [0, 0, 1, 1], [], []>} : vector<64x4xbf16>, vector<4x128xbf16>, vector<64x128xf32> -> vector<64x128xf32>
    %56 = arith.addf %49, %55 : vector<64x128xf32>
    %c0_64 = arith.constant 0 : index
    %c0_65 = arith.constant 0 : index
    %c2_66 = arith.constant 2 : index
    %c2_67 = arith.constant 2 : index
    %c0_68 = arith.constant 0 : index
    %57 = vector.load %arg2[%c0_64, %c0_65, %c2_66, %c2_67, %c0_68] : memref<1x1x10x10x4xbf16, #tpu.memory_space<vmem>>, vector<1x1x8x8x4xbf16>
    %58 = vector.shape_cast %57 : vector<1x1x8x8x4xbf16> to vector<8x8x4xbf16>
    %59 = vector.shape_cast %58 : vector<8x8x4xbf16> to vector<64x4xbf16>
    %c8 = arith.constant 8 : index
    %c0_69 = arith.constant 0 : index
    %c0_70 = arith.constant 0 : index
    %60 = vector.load %arg5[%c8, %c0_69, %c0_70] : memref<27x4x128xbf16, #tpu.memory_space<vmem>>, vector<1x4x128xbf16>
    %61 = vector.shape_cast %60 : vector<1x4x128xbf16> to vector<4x128xbf16>
    %cst_71 = arith.constant dense<0.000000e+00> : vector<64x128xf32>
    %62 = tpu.matmul %59, %61, %cst_71 {dimension_numbers = #tpu.dot_dimension_numbers<[1], [0], [0], [1], [0, 0, 1, 1], [], []>} : vector<64x4xbf16>, vector<4x128xbf16>, vector<64x128xf32> -> vector<64x128xf32>
    %63 = arith.addf %56, %62 : vector<64x128xf32>
    %c0_72 = arith.constant 0 : index
    %c0_73 = arith.constant 0 : index
    %c0_74 = arith.constant 0 : index
    %c0_75 = arith.constant 0 : index
    %c0_76 = arith.constant 0 : index
    %64 = vector.load %arg3[%c0_72, %c0_73, %c0_74, %c0_75, %c0_76] : memref<1x1x10x10x4xbf16, #tpu.memory_space<vmem>>, vector<1x1x8x8x4xbf16>
    %65 = vector.shape_cast %64 : vector<1x1x8x8x4xbf16> to vector<8x8x4xbf16>
    %66 = vector.shape_cast %65 : vector<8x8x4xbf16> to vector<64x4xbf16>
    %c9 = arith.constant 9 : index
    %c0_77 = arith.constant 0 : index
    %c0_78 = arith.constant 0 : index
    %67 = vector.load %arg5[%c9, %c0_77, %c0_78] : memref<27x4x128xbf16, #tpu.memory_space<vmem>>, vector<1x4x128xbf16>
    %68 = vector.shape_cast %67 : vector<1x4x128xbf16> to vector<4x128xbf16>
    %cst_79 = arith.constant dense<0.000000e+00> : vector<64x128xf32>
    %69 = tpu.matmul %66, %68, %cst_79 {dimension_numbers = #tpu.dot_dimension_numbers<[1], [0], [0], [1], [0, 0, 1, 1], [], []>} : vector<64x4xbf16>, vector<4x128xbf16>, vector<64x128xf32> -> vector<64x128xf32>
    %70 = arith.addf %63, %69 : vector<64x128xf32>
    %c0_80 = arith.constant 0 : index
    %c0_81 = arith.constant 0 : index
    %c0_82 = arith.constant 0 : index
    %c1_83 = arith.constant 1 : index
    %c0_84 = arith.constant 0 : index
    %71 = vector.load %arg3[%c0_80, %c0_81, %c0_82, %c1_83, %c0_84] : memref<1x1x10x10x4xbf16, #tpu.memory_space<vmem>>, vector<1x1x8x8x4xbf16>
    %72 = vector.shape_cast %71 : vector<1x1x8x8x4xbf16> to vector<8x8x4xbf16>
    %73 = vector.shape_cast %72 : vector<8x8x4xbf16> to vector<64x4xbf16>
    %c10 = arith.constant 10 : index
    %c0_85 = arith.constant 0 : index
    %c0_86 = arith.constant 0 : index
    %74 = vector.load %arg5[%c10, %c0_85, %c0_86] : memref<27x4x128xbf16, #tpu.memory_space<vmem>>, vector<1x4x128xbf16>
    %75 = vector.shape_cast %74 : vector<1x4x128xbf16> to vector<4x128xbf16>
    %cst_87 = arith.constant dense<0.000000e+00> : vector<64x128xf32>
    %76 = tpu.matmul %73, %75, %cst_87 {dimension_numbers = #tpu.dot_dimension_numbers<[1], [0], [0], [1], [0, 0, 1, 1], [], []>} : vector<64x4xbf16>, vector<4x128xbf16>, vector<64x128xf32> -> vector<64x128xf32>
    %77 = arith.addf %70, %76 : vector<64x128xf32>
    %c0_88 = arith.constant 0 : index
    %c0_89 = arith.constant 0 : index
    %c0_90 = arith.constant 0 : index
    %c2_91 = arith.constant 2 : index
    %c0_92 = arith.constant 0 : index
    %78 = vector.load %arg3[%c0_88, %c0_89, %c0_90, %c2_91, %c0_92] : memref<1x1x10x10x4xbf16, #tpu.memory_space<vmem>>, vector<1x1x8x8x4xbf16>
    %79 = vector.shape_cast %78 : vector<1x1x8x8x4xbf16> to vector<8x8x4xbf16>
    %80 = vector.shape_cast %79 : vector<8x8x4xbf16> to vector<64x4xbf16>
    %c11 = arith.constant 11 : index
    %c0_93 = arith.constant 0 : index
    %c0_94 = arith.constant 0 : index
    %81 = vector.load %arg5[%c11, %c0_93, %c0_94] : memref<27x4x128xbf16, #tpu.memory_space<vmem>>, vector<1x4x128xbf16>
    %82 = vector.shape_cast %81 : vector<1x4x128xbf16> to vector<4x128xbf16>
    %cst_95 = arith.constant dense<0.000000e+00> : vector<64x128xf32>
    %83 = tpu.matmul %80, %82, %cst_95 {dimension_numbers = #tpu.dot_dimension_numbers<[1], [0], [0], [1], [0, 0, 1, 1], [], []>} : vector<64x4xbf16>, vector<4x128xbf16>, vector<64x128xf32> -> vector<64x128xf32>
    %84 = arith.addf %77, %83 : vector<64x128xf32>
    %c0_96 = arith.constant 0 : index
    %c0_97 = arith.constant 0 : index
    %c1_98 = arith.constant 1 : index
    %c0_99 = arith.constant 0 : index
    %c0_100 = arith.constant 0 : index
    %85 = vector.load %arg3[%c0_96, %c0_97, %c1_98, %c0_99, %c0_100] : memref<1x1x10x10x4xbf16, #tpu.memory_space<vmem>>, vector<1x1x8x8x4xbf16>
    %86 = vector.shape_cast %85 : vector<1x1x8x8x4xbf16> to vector<8x8x4xbf16>
    %87 = vector.shape_cast %86 : vector<8x8x4xbf16> to vector<64x4xbf16>
    %c12 = arith.constant 12 : index
    %c0_101 = arith.constant 0 : index
    %c0_102 = arith.constant 0 : index
    %88 = vector.load %arg5[%c12, %c0_101, %c0_102] : memref<27x4x128xbf16, #tpu.memory_space<vmem>>, vector<1x4x128xbf16>
    %89 = vector.shape_cast %88 : vector<1x4x128xbf16> to vector<4x128xbf16>
    %cst_103 = arith.constant dense<0.000000e+00> : vector<64x128xf32>
    %90 = tpu.matmul %87, %89, %cst_103 {dimension_numbers = #tpu.dot_dimension_numbers<[1], [0], [0], [1], [0, 0, 1, 1], [], []>} : vector<64x4xbf16>, vector<4x128xbf16>, vector<64x128xf32> -> vector<64x128xf32>
    %91 = arith.addf %84, %90 : vector<64x128xf32>
    %c0_104 = arith.constant 0 : index
    %c0_105 = arith.constant 0 : index
    %c1_106 = arith.constant 1 : index
    %c1_107 = arith.constant 1 : index
    %c0_108 = arith.constant 0 : index
    %92 = vector.load %arg3[%c0_104, %c0_105, %c1_106, %c1_107, %c0_108] : memref<1x1x10x10x4xbf16, #tpu.memory_space<vmem>>, vector<1x1x8x8x4xbf16>
    %93 = vector.shape_cast %92 : vector<1x1x8x8x4xbf16> to vector<8x8x4xbf16>
    %94 = vector.shape_cast %93 : vector<8x8x4xbf16> to vector<64x4xbf16>
    %c13 = arith.constant 13 : index
    %c0_109 = arith.constant 0 : index
    %c0_110 = arith.constant 0 : index
    %95 = vector.load %arg5[%c13, %c0_109, %c0_110] : memref<27x4x128xbf16, #tpu.memory_space<vmem>>, vector<1x4x128xbf16>
    %96 = vector.shape_cast %95 : vector<1x4x128xbf16> to vector<4x128xbf16>
    %cst_111 = arith.constant dense<0.000000e+00> : vector<64x128xf32>
    %97 = tpu.matmul %94, %96, %cst_111 {dimension_numbers = #tpu.dot_dimension_numbers<[1], [0], [0], [1], [0, 0, 1, 1], [], []>} : vector<64x4xbf16>, vector<4x128xbf16>, vector<64x128xf32> -> vector<64x128xf32>
    %98 = arith.addf %91, %97 : vector<64x128xf32>
    %c0_112 = arith.constant 0 : index
    %c0_113 = arith.constant 0 : index
    %c1_114 = arith.constant 1 : index
    %c2_115 = arith.constant 2 : index
    %c0_116 = arith.constant 0 : index
    %99 = vector.load %arg3[%c0_112, %c0_113, %c1_114, %c2_115, %c0_116] : memref<1x1x10x10x4xbf16, #tpu.memory_space<vmem>>, vector<1x1x8x8x4xbf16>
    %100 = vector.shape_cast %99 : vector<1x1x8x8x4xbf16> to vector<8x8x4xbf16>
    %101 = vector.shape_cast %100 : vector<8x8x4xbf16> to vector<64x4xbf16>
    %c14 = arith.constant 14 : index
    %c0_117 = arith.constant 0 : index
    %c0_118 = arith.constant 0 : index
    %102 = vector.load %arg5[%c14, %c0_117, %c0_118] : memref<27x4x128xbf16, #tpu.memory_space<vmem>>, vector<1x4x128xbf16>
    %103 = vector.shape_cast %102 : vector<1x4x128xbf16> to vector<4x128xbf16>
    %cst_119 = arith.constant dense<0.000000e+00> : vector<64x128xf32>
    %104 = tpu.matmul %101, %103, %cst_119 {dimension_numbers = #tpu.dot_dimension_numbers<[1], [0], [0], [1], [0, 0, 1, 1], [], []>} : vector<64x4xbf16>, vector<4x128xbf16>, vector<64x128xf32> -> vector<64x128xf32>
    %105 = arith.addf %98, %104 : vector<64x128xf32>
    %c0_120 = arith.constant 0 : index
    %c0_121 = arith.constant 0 : index
    %c2_122 = arith.constant 2 : index
    %c0_123 = arith.constant 0 : index
    %c0_124 = arith.constant 0 : index
    %106 = vector.load %arg3[%c0_120, %c0_121, %c2_122, %c0_123, %c0_124] : memref<1x1x10x10x4xbf16, #tpu.memory_space<vmem>>, vector<1x1x8x8x4xbf16>
    %107 = vector.shape_cast %106 : vector<1x1x8x8x4xbf16> to vector<8x8x4xbf16>
    %108 = vector.shape_cast %107 : vector<8x8x4xbf16> to vector<64x4xbf16>
    %c15 = arith.constant 15 : index
    %c0_125 = arith.constant 0 : index
    %c0_126 = arith.constant 0 : index
    %109 = vector.load %arg5[%c15, %c0_125, %c0_126] : memref<27x4x128xbf16, #tpu.memory_space<vmem>>, vector<1x4x128xbf16>
    %110 = vector.shape_cast %109 : vector<1x4x128xbf16> to vector<4x128xbf16>
    %cst_127 = arith.constant dense<0.000000e+00> : vector<64x128xf32>
    %111 = tpu.matmul %108, %110, %cst_127 {dimension_numbers = #tpu.dot_dimension_numbers<[1], [0], [0], [1], [0, 0, 1, 1], [], []>} : vector<64x4xbf16>, vector<4x128xbf16>, vector<64x128xf32> -> vector<64x128xf32>
    %112 = arith.addf %105, %111 : vector<64x128xf32>
    %c0_128 = arith.constant 0 : index
    %c0_129 = arith.constant 0 : index
    %c2_130 = arith.constant 2 : index
    %c1_131 = arith.constant 1 : index
    %c0_132 = arith.constant 0 : index
    %113 = vector.load %arg3[%c0_128, %c0_129, %c2_130, %c1_131, %c0_132] : memref<1x1x10x10x4xbf16, #tpu.memory_space<vmem>>, vector<1x1x8x8x4xbf16>
    %114 = vector.shape_cast %113 : vector<1x1x8x8x4xbf16> to vector<8x8x4xbf16>
    %115 = vector.shape_cast %114 : vector<8x8x4xbf16> to vector<64x4xbf16>
    %c16 = arith.constant 16 : index
    %c0_133 = arith.constant 0 : index
    %c0_134 = arith.constant 0 : index
    %116 = vector.load %arg5[%c16, %c0_133, %c0_134] : memref<27x4x128xbf16, #tpu.memory_space<vmem>>, vector<1x4x128xbf16>
    %117 = vector.shape_cast %116 : vector<1x4x128xbf16> to vector<4x128xbf16>
    %cst_135 = arith.constant dense<0.000000e+00> : vector<64x128xf32>
    %118 = tpu.matmul %115, %117, %cst_135 {dimension_numbers = #tpu.dot_dimension_numbers<[1], [0], [0], [1], [0, 0, 1, 1], [], []>} : vector<64x4xbf16>, vector<4x128xbf16>, vector<64x128xf32> -> vector<64x128xf32>
    %119 = arith.addf %112, %118 : vector<64x128xf32>
    %c0_136 = arith.constant 0 : index
    %c0_137 = arith.constant 0 : index
    %c2_138 = arith.constant 2 : index
    %c2_139 = arith.constant 2 : index
    %c0_140 = arith.constant 0 : index
    %120 = vector.load %arg3[%c0_136, %c0_137, %c2_138, %c2_139, %c0_140] : memref<1x1x10x10x4xbf16, #tpu.memory_space<vmem>>, vector<1x1x8x8x4xbf16>
    %121 = vector.shape_cast %120 : vector<1x1x8x8x4xbf16> to vector<8x8x4xbf16>
    %122 = vector.shape_cast %121 : vector<8x8x4xbf16> to vector<64x4xbf16>
    %c17 = arith.constant 17 : index
    %c0_141 = arith.constant 0 : index
    %c0_142 = arith.constant 0 : index
    %123 = vector.load %arg5[%c17, %c0_141, %c0_142] : memref<27x4x128xbf16, #tpu.memory_space<vmem>>, vector<1x4x128xbf16>
    %124 = vector.shape_cast %123 : vector<1x4x128xbf16> to vector<4x128xbf16>
    %cst_143 = arith.constant dense<0.000000e+00> : vector<64x128xf32>
    %125 = tpu.matmul %122, %124, %cst_143 {dimension_numbers = #tpu.dot_dimension_numbers<[1], [0], [0], [1], [0, 0, 1, 1], [], []>} : vector<64x4xbf16>, vector<4x128xbf16>, vector<64x128xf32> -> vector<64x128xf32>
    %126 = arith.addf %119, %125 : vector<64x128xf32>
    %c0_144 = arith.constant 0 : index
    %c0_145 = arith.constant 0 : index
    %c0_146 = arith.constant 0 : index
    %c0_147 = arith.constant 0 : index
    %c0_148 = arith.constant 0 : index
    %127 = vector.load %arg4[%c0_144, %c0_145, %c0_146, %c0_147, %c0_148] : memref<1x1x10x10x4xbf16, #tpu.memory_space<vmem>>, vector<1x1x8x8x4xbf16>
    %128 = vector.shape_cast %127 : vector<1x1x8x8x4xbf16> to vector<8x8x4xbf16>
    %129 = vector.shape_cast %128 : vector<8x8x4xbf16> to vector<64x4xbf16>
    %c18 = arith.constant 18 : index
    %c0_149 = arith.constant 0 : index
    %c0_150 = arith.constant 0 : index
    %130 = vector.load %arg5[%c18, %c0_149, %c0_150] : memref<27x4x128xbf16, #tpu.memory_space<vmem>>, vector<1x4x128xbf16>
    %131 = vector.shape_cast %130 : vector<1x4x128xbf16> to vector<4x128xbf16>
    %cst_151 = arith.constant dense<0.000000e+00> : vector<64x128xf32>
    %132 = tpu.matmul %129, %131, %cst_151 {dimension_numbers = #tpu.dot_dimension_numbers<[1], [0], [0], [1], [0, 0, 1, 1], [], []>} : vector<64x4xbf16>, vector<4x128xbf16>, vector<64x128xf32> -> vector<64x128xf32>
    %133 = arith.addf %126, %132 : vector<64x128xf32>
    %c0_152 = arith.constant 0 : index
    %c0_153 = arith.constant 0 : index
    %c0_154 = arith.constant 0 : index
    %c1_155 = arith.constant 1 : index
    %c0_156 = arith.constant 0 : index
    %134 = vector.load %arg4[%c0_152, %c0_153, %c0_154, %c1_155, %c0_156] : memref<1x1x10x10x4xbf16, #tpu.memory_space<vmem>>, vector<1x1x8x8x4xbf16>
    %135 = vector.shape_cast %134 : vector<1x1x8x8x4xbf16> to vector<8x8x4xbf16>
    %136 = vector.shape_cast %135 : vector<8x8x4xbf16> to vector<64x4xbf16>
    %c19 = arith.constant 19 : index
    %c0_157 = arith.constant 0 : index
    %c0_158 = arith.constant 0 : index
    %137 = vector.load %arg5[%c19, %c0_157, %c0_158] : memref<27x4x128xbf16, #tpu.memory_space<vmem>>, vector<1x4x128xbf16>
    %138 = vector.shape_cast %137 : vector<1x4x128xbf16> to vector<4x128xbf16>
    %cst_159 = arith.constant dense<0.000000e+00> : vector<64x128xf32>
    %139 = tpu.matmul %136, %138, %cst_159 {dimension_numbers = #tpu.dot_dimension_numbers<[1], [0], [0], [1], [0, 0, 1, 1], [], []>} : vector<64x4xbf16>, vector<4x128xbf16>, vector<64x128xf32> -> vector<64x128xf32>
    %140 = arith.addf %133, %139 : vector<64x128xf32>
    %c0_160 = arith.constant 0 : index
    %c0_161 = arith.constant 0 : index
    %c0_162 = arith.constant 0 : index
    %c2_163 = arith.constant 2 : index
    %c0_164 = arith.constant 0 : index
    %141 = vector.load %arg4[%c0_160, %c0_161, %c0_162, %c2_163, %c0_164] : memref<1x1x10x10x4xbf16, #tpu.memory_space<vmem>>, vector<1x1x8x8x4xbf16>
    %142 = vector.shape_cast %141 : vector<1x1x8x8x4xbf16> to vector<8x8x4xbf16>
    %143 = vector.shape_cast %142 : vector<8x8x4xbf16> to vector<64x4xbf16>
    %c20 = arith.constant 20 : index
    %c0_165 = arith.constant 0 : index
    %c0_166 = arith.constant 0 : index
    %144 = vector.load %arg5[%c20, %c0_165, %c0_166] : memref<27x4x128xbf16, #tpu.memory_space<vmem>>, vector<1x4x128xbf16>
    %145 = vector.shape_cast %144 : vector<1x4x128xbf16> to vector<4x128xbf16>
    %cst_167 = arith.constant dense<0.000000e+00> : vector<64x128xf32>
    %146 = tpu.matmul %143, %145, %cst_167 {dimension_numbers = #tpu.dot_dimension_numbers<[1], [0], [0], [1], [0, 0, 1, 1], [], []>} : vector<64x4xbf16>, vector<4x128xbf16>, vector<64x128xf32> -> vector<64x128xf32>
    %147 = arith.addf %140, %146 : vector<64x128xf32>
    %c0_168 = arith.constant 0 : index
    %c0_169 = arith.constant 0 : index
    %c1_170 = arith.constant 1 : index
    %c0_171 = arith.constant 0 : index
    %c0_172 = arith.constant 0 : index
    %148 = vector.load %arg4[%c0_168, %c0_169, %c1_170, %c0_171, %c0_172] : memref<1x1x10x10x4xbf16, #tpu.memory_space<vmem>>, vector<1x1x8x8x4xbf16>
    %149 = vector.shape_cast %148 : vector<1x1x8x8x4xbf16> to vector<8x8x4xbf16>
    %150 = vector.shape_cast %149 : vector<8x8x4xbf16> to vector<64x4xbf16>
    %c21 = arith.constant 21 : index
    %c0_173 = arith.constant 0 : index
    %c0_174 = arith.constant 0 : index
    %151 = vector.load %arg5[%c21, %c0_173, %c0_174] : memref<27x4x128xbf16, #tpu.memory_space<vmem>>, vector<1x4x128xbf16>
    %152 = vector.shape_cast %151 : vector<1x4x128xbf16> to vector<4x128xbf16>
    %cst_175 = arith.constant dense<0.000000e+00> : vector<64x128xf32>
    %153 = tpu.matmul %150, %152, %cst_175 {dimension_numbers = #tpu.dot_dimension_numbers<[1], [0], [0], [1], [0, 0, 1, 1], [], []>} : vector<64x4xbf16>, vector<4x128xbf16>, vector<64x128xf32> -> vector<64x128xf32>
    %154 = arith.addf %147, %153 : vector<64x128xf32>
    %c0_176 = arith.constant 0 : index
    %c0_177 = arith.constant 0 : index
    %c1_178 = arith.constant 1 : index
    %c1_179 = arith.constant 1 : index
    %c0_180 = arith.constant 0 : index
    %155 = vector.load %arg4[%c0_176, %c0_177, %c1_178, %c1_179, %c0_180] : memref<1x1x10x10x4xbf16, #tpu.memory_space<vmem>>, vector<1x1x8x8x4xbf16>
    %156 = vector.shape_cast %155 : vector<1x1x8x8x4xbf16> to vector<8x8x4xbf16>
    %157 = vector.shape_cast %156 : vector<8x8x4xbf16> to vector<64x4xbf16>
    %c22 = arith.constant 22 : index
    %c0_181 = arith.constant 0 : index
    %c0_182 = arith.constant 0 : index
    %158 = vector.load %arg5[%c22, %c0_181, %c0_182] : memref<27x4x128xbf16, #tpu.memory_space<vmem>>, vector<1x4x128xbf16>
    %159 = vector.shape_cast %158 : vector<1x4x128xbf16> to vector<4x128xbf16>
    %cst_183 = arith.constant dense<0.000000e+00> : vector<64x128xf32>
    %160 = tpu.matmul %157, %159, %cst_183 {dimension_numbers = #tpu.dot_dimension_numbers<[1], [0], [0], [1], [0, 0, 1, 1], [], []>} : vector<64x4xbf16>, vector<4x128xbf16>, vector<64x128xf32> -> vector<64x128xf32>
    %161 = arith.addf %154, %160 : vector<64x128xf32>
    %c0_184 = arith.constant 0 : index
    %c0_185 = arith.constant 0 : index
    %c1_186 = arith.constant 1 : index
    %c2_187 = arith.constant 2 : index
    %c0_188 = arith.constant 0 : index
    %162 = vector.load %arg4[%c0_184, %c0_185, %c1_186, %c2_187, %c0_188] : memref<1x1x10x10x4xbf16, #tpu.memory_space<vmem>>, vector<1x1x8x8x4xbf16>
    %163 = vector.shape_cast %162 : vector<1x1x8x8x4xbf16> to vector<8x8x4xbf16>
    %164 = vector.shape_cast %163 : vector<8x8x4xbf16> to vector<64x4xbf16>
    %c23 = arith.constant 23 : index
    %c0_189 = arith.constant 0 : index
    %c0_190 = arith.constant 0 : index
    %165 = vector.load %arg5[%c23, %c0_189, %c0_190] : memref<27x4x128xbf16, #tpu.memory_space<vmem>>, vector<1x4x128xbf16>
    %166 = vector.shape_cast %165 : vector<1x4x128xbf16> to vector<4x128xbf16>
    %cst_191 = arith.constant dense<0.000000e+00> : vector<64x128xf32>
    %167 = tpu.matmul %164, %166, %cst_191 {dimension_numbers = #tpu.dot_dimension_numbers<[1], [0], [0], [1], [0, 0, 1, 1], [], []>} : vector<64x4xbf16>, vector<4x128xbf16>, vector<64x128xf32> -> vector<64x128xf32>
    %168 = arith.addf %161, %167 : vector<64x128xf32>
    %c0_192 = arith.constant 0 : index
    %c0_193 = arith.constant 0 : index
    %c2_194 = arith.constant 2 : index
    %c0_195 = arith.constant 0 : index
    %c0_196 = arith.constant 0 : index
    %169 = vector.load %arg4[%c0_192, %c0_193, %c2_194, %c0_195, %c0_196] : memref<1x1x10x10x4xbf16, #tpu.memory_space<vmem>>, vector<1x1x8x8x4xbf16>
    %170 = vector.shape_cast %169 : vector<1x1x8x8x4xbf16> to vector<8x8x4xbf16>
    %171 = vector.shape_cast %170 : vector<8x8x4xbf16> to vector<64x4xbf16>
    %c24 = arith.constant 24 : index
    %c0_197 = arith.constant 0 : index
    %c0_198 = arith.constant 0 : index
    %172 = vector.load %arg5[%c24, %c0_197, %c0_198] : memref<27x4x128xbf16, #tpu.memory_space<vmem>>, vector<1x4x128xbf16>
    %173 = vector.shape_cast %172 : vector<1x4x128xbf16> to vector<4x128xbf16>
    %cst_199 = arith.constant dense<0.000000e+00> : vector<64x128xf32>
    %174 = tpu.matmul %171, %173, %cst_199 {dimension_numbers = #tpu.dot_dimension_numbers<[1], [0], [0], [1], [0, 0, 1, 1], [], []>} : vector<64x4xbf16>, vector<4x128xbf16>, vector<64x128xf32> -> vector<64x128xf32>
    %175 = arith.addf %168, %174 : vector<64x128xf32>
    %c0_200 = arith.constant 0 : index
    %c0_201 = arith.constant 0 : index
    %c2_202 = arith.constant 2 : index
    %c1_203 = arith.constant 1 : index
    %c0_204 = arith.constant 0 : index
    %176 = vector.load %arg4[%c0_200, %c0_201, %c2_202, %c1_203, %c0_204] : memref<1x1x10x10x4xbf16, #tpu.memory_space<vmem>>, vector<1x1x8x8x4xbf16>
    %177 = vector.shape_cast %176 : vector<1x1x8x8x4xbf16> to vector<8x8x4xbf16>
    %178 = vector.shape_cast %177 : vector<8x8x4xbf16> to vector<64x4xbf16>
    %c25 = arith.constant 25 : index
    %c0_205 = arith.constant 0 : index
    %c0_206 = arith.constant 0 : index
    %179 = vector.load %arg5[%c25, %c0_205, %c0_206] : memref<27x4x128xbf16, #tpu.memory_space<vmem>>, vector<1x4x128xbf16>
    %180 = vector.shape_cast %179 : vector<1x4x128xbf16> to vector<4x128xbf16>
    %cst_207 = arith.constant dense<0.000000e+00> : vector<64x128xf32>
    %181 = tpu.matmul %178, %180, %cst_207 {dimension_numbers = #tpu.dot_dimension_numbers<[1], [0], [0], [1], [0, 0, 1, 1], [], []>} : vector<64x4xbf16>, vector<4x128xbf16>, vector<64x128xf32> -> vector<64x128xf32>
    %182 = arith.addf %175, %181 : vector<64x128xf32>
    %c0_208 = arith.constant 0 : index
    %c0_209 = arith.constant 0 : index
    %c2_210 = arith.constant 2 : index
    %c2_211 = arith.constant 2 : index
    %c0_212 = arith.constant 0 : index
    %183 = vector.load %arg4[%c0_208, %c0_209, %c2_210, %c2_211, %c0_212] : memref<1x1x10x10x4xbf16, #tpu.memory_space<vmem>>, vector<1x1x8x8x4xbf16>
    %184 = vector.shape_cast %183 : vector<1x1x8x8x4xbf16> to vector<8x8x4xbf16>
    %185 = vector.shape_cast %184 : vector<8x8x4xbf16> to vector<64x4xbf16>
    %c26 = arith.constant 26 : index
    %c0_213 = arith.constant 0 : index
    %c0_214 = arith.constant 0 : index
    %186 = vector.load %arg5[%c26, %c0_213, %c0_214] : memref<27x4x128xbf16, #tpu.memory_space<vmem>>, vector<1x4x128xbf16>
    %187 = vector.shape_cast %186 : vector<1x4x128xbf16> to vector<4x128xbf16>
    %cst_215 = arith.constant dense<0.000000e+00> : vector<64x128xf32>
    %188 = tpu.matmul %185, %187, %cst_215 {dimension_numbers = #tpu.dot_dimension_numbers<[1], [0], [0], [1], [0, 0, 1, 1], [], []>} : vector<64x4xbf16>, vector<4x128xbf16>, vector<64x128xf32> -> vector<64x128xf32>
    %189 = arith.addf %182, %188 : vector<64x128xf32>
    %190 = arith.truncf %189 : vector<64x128xf32> to vector<64x128xbf16>
    %c0_216 = arith.constant 0 : index
    %c0_217 = arith.constant 0 : index
    %c0_218 = arith.constant 0 : index
    %c0_219 = arith.constant 0 : index
    %191 = vector.load %arg6[%c0_216, %c0_217, %c0_218, %c0_219] : memref<1x1x64x128xbf16, #tpu.memory_space<vmem>>, vector<1x1x64x128xbf16>
    %192 = vector.shape_cast %191 : vector<1x1x64x128xbf16> to vector<64x128xbf16>
    %193 = vector.shape_cast %190 : vector<64x128xbf16> to vector<1x1x64x128xbf16>
    tpu.vector_store %arg6[%c0_216, %c0_217, %c0_218, %c0_219], %193 {strides = array<i32>} : memref<1x1x64x128xbf16, #tpu.memory_space<vmem>>, vector<1x1x64x128xbf16>,
    %cst_220 = arith.constant dense<0.000000e+00> : vector<128xf32>
    %194 = vector.multi_reduction <add>, %189, %cst_220 [0] : vector<64x128xf32> to vector<128xf32>
    %195 = vector.shape_cast %194 : vector<128xf32> to vector<1x128xf32>
    %196 = arith.mulf %189, %189 : vector<64x128xf32>
    %cst_221 = arith.constant dense<0.000000e+00> : vector<128xf32>
    %197 = vector.multi_reduction <add>, %196, %cst_221 [0] : vector<64x128xf32> to vector<128xf32>
    %198 = vector.shape_cast %197 : vector<128xf32> to vector<1x128xf32>
    %c0_i32 = arith.constant 0 : i32
    %199 = arith.cmpi eq, %arg0, %c0_i32 : i32
    %c0_i32_222 = arith.constant 0 : i32
    %200 = arith.cmpi eq, %arg1, %c0_i32_222 : i32
    %201 = arith.andi %199, %200 : i1
    %202 = arith.extui %201 : i1 to i32
    %c0_i32_223 = arith.constant 0 : i32
    %203 = arith.cmpi ne, %202, %c0_i32_223 : i32
    scf.if %203 {
      %c0_225 = arith.constant 0 : index
      %c0_226 = arith.constant 0 : index
      %207 = vector.load %arg7[%c0_225, %c0_226] : memref<1x128xf32, #tpu.memory_space<vmem>>, vector<1x128xf32>
      tpu.vector_store %arg7[%c0_225, %c0_226], %195 {strides = array<i32>} : memref<1x128xf32, #tpu.memory_space<vmem>>, vector<1x128xf32>,
      %c0_227 = arith.constant 0 : index
      %c0_228 = arith.constant 0 : index
      %208 = vector.load %arg8[%c0_227, %c0_228] : memref<1x128xf32, #tpu.memory_space<vmem>>, vector<1x128xf32>
      tpu.vector_store %arg8[%c0_227, %c0_228], %198 {strides = array<i32>} : memref<1x128xf32, #tpu.memory_space<vmem>>, vector<1x128xf32>,
    } else {
    }
    %true = arith.constant true
    %204 = arith.xori %201, %true : i1
    %205 = arith.extui %204 : i1 to i32
    %c0_i32_224 = arith.constant 0 : i32
    %206 = arith.cmpi ne, %205, %c0_i32_224 : i32
    scf.if %206 {
      %c0_225 = arith.constant 0 : index
      %c0_226 = arith.constant 0 : index
      %207 = vector.load %arg7[%c0_225, %c0_226] : memref<1x128xf32, #tpu.memory_space<vmem>>, vector<1x128xf32>
      %208 = arith.addf %207, %195 : vector<1x128xf32>
      %c0_227 = arith.constant 0 : index
      %c0_228 = arith.constant 0 : index
      %209 = vector.load %arg7[%c0_227, %c0_228] : memref<1x128xf32, #tpu.memory_space<vmem>>, vector<1x128xf32>
      tpu.vector_store %arg7[%c0_227, %c0_228], %208 {strides = array<i32>} : memref<1x128xf32, #tpu.memory_space<vmem>>, vector<1x128xf32>,
      %c0_229 = arith.constant 0 : index
      %c0_230 = arith.constant 0 : index
      %210 = vector.load %arg8[%c0_229, %c0_230] : memref<1x128xf32, #tpu.memory_space<vmem>>, vector<1x128xf32>
      %211 = arith.addf %210, %198 : vector<1x128xf32>
      %c0_231 = arith.constant 0 : index
      %c0_232 = arith.constant 0 : index
      %212 = vector.load %arg8[%c0_231, %c0_232] : memref<1x128xf32, #tpu.memory_space<vmem>>, vector<1x128xf32>
      tpu.vector_store %arg8[%c0_231, %c0_232], %211 {strides = array<i32>} : memref<1x128xf32, #tpu.memory_space<vmem>>, vector<1x128xf32>,
    } else {
    }
    return
  }
  func.func @transform_0(%arg0: i32, %arg1: i32) -> (i32, i32, i32, i32, i32) {
    %c0_i32 = arith.constant 0 : i32
    %0 = arith.addi %arg1, %c0_i32 : i32
    %c0_i32_0 = arith.constant 0 : i32
    %c0_i32_1 = arith.constant 0 : i32
    %c0_i32_2 = arith.constant 0 : i32
    %c0_i32_3 = arith.constant 0 : i32
    return %arg0, %0, %c0_i32_0, %c0_i32_1, %c0_i32_2 : i32, i32, i32, i32, i32
  }
  func.func @transform_1(%arg0: i32, %arg1: i32) -> (i32, i32, i32, i32, i32) {
    %c1_i32 = arith.constant 1 : i32
    %0 = arith.addi %arg1, %c1_i32 : i32
    %c0_i32 = arith.constant 0 : i32
    %c0_i32_0 = arith.constant 0 : i32
    %c0_i32_1 = arith.constant 0 : i32
    %c0_i32_2 = arith.constant 0 : i32
    return %arg0, %0, %c0_i32, %c0_i32_0, %c0_i32_1 : i32, i32, i32, i32, i32
  }
  func.func @transform_2(%arg0: i32, %arg1: i32) -> (i32, i32, i32, i32, i32) {
    %c2_i32 = arith.constant 2 : i32
    %0 = arith.addi %arg1, %c2_i32 : i32
    %c0_i32 = arith.constant 0 : i32
    %c0_i32_0 = arith.constant 0 : i32
    %c0_i32_1 = arith.constant 0 : i32
    %c0_i32_2 = arith.constant 0 : i32
    return %arg0, %0, %c0_i32, %c0_i32_0, %c0_i32_1 : i32, i32, i32, i32, i32
  }
  func.func @transform_3(%arg0: i32, %arg1: i32) -> (i32, i32, i32) {
    %c0_i32 = arith.constant 0 : i32
    %c0_i32_0 = arith.constant 0 : i32
    %c0_i32_1 = arith.constant 0 : i32
    %c0_i32_2 = arith.constant 0 : i32
    return %c0_i32, %c0_i32_0, %c0_i32_1 : i32, i32, i32
  }
  func.func @transform_4(%arg0: i32, %arg1: i32) -> (i32, i32, i32, i32) {
    %c0_i32 = arith.constant 0 : i32
    %c0_i32_0 = arith.constant 0 : i32
    %c0_i32_1 = arith.constant 0 : i32
    return %arg0, %arg1, %c0_i32, %c0_i32_0 : i32, i32, i32, i32
  }
  func.func @transform_5(%arg0: i32, %arg1: i32) -> (i32, i32) {
    %c0_i32 = arith.constant 0 : i32
    %c0_i32_0 = arith.constant 0 : i32
    %c0_i32_1 = arith.constant 0 : i32
    return %c0_i32, %c0_i32_0 : i32, i32
  }
  func.func @transform_6(%arg0: i32, %arg1: i32) -> (i32, i32) {
    %c0_i32 = arith.constant 0 : i32
    %c0_i32_0 = arith.constant 0 : i32
    %c0_i32_1 = arith.constant 0 : i32
    return %c0_i32, %c0_i32_0 : i32, i32
  }
}

module attributes {stable_mosaic.version = 11 : i64} {
  func.func @bn_relu_kernel(%arg0: i32, %arg1: i32, %arg2: memref<1x1x64x128xbf16, #tpu.memory_space<vmem>>, %arg3: memref<1x128xf32, #tpu.memory_space<vmem>>, %arg4: memref<1x128xf32, #tpu.memory_space<vmem>>, %arg5: memref<1x1x64x128xbf16, #tpu.memory_space<vmem>>) attributes {dimension_semantics = [#tpu.dimension_semantics<parallel>, #tpu.dimension_semantics<parallel>], iteration_bounds = array<i64: 2, 8>, scalar_prefetch = 0 : i64, scratch_operands = 0 : i64, tpu.core_type = #tpu.core_type<tc>, window_params = [{transform_indices = @transform_0, window_bounds = array<i64: 1, 1, 64, 128>}, {pipeline_mode = #tpu.pipeline_mode<synchronous>, transform_indices = @transform_1, window_bounds = array<i64: 1, 128>}, {pipeline_mode = #tpu.pipeline_mode<synchronous>, transform_indices = @transform_2, window_bounds = array<i64: 1, 128>}, {transform_indices = @transform_3, window_bounds = array<i64: 1, 1, 64, 128>}]} {
    %c0 = arith.constant 0 : index
    %c0_0 = arith.constant 0 : index
    %c0_1 = arith.constant 0 : index
    %c0_2 = arith.constant 0 : index
    %0 = vector.load %arg2[%c0, %c0_0, %c0_1, %c0_2] : memref<1x1x64x128xbf16, #tpu.memory_space<vmem>>, vector<1x1x64x128xbf16>
    %1 = vector.shape_cast %0 : vector<1x1x64x128xbf16> to vector<64x128xbf16>
    %2 = arith.extf %1 : vector<64x128xbf16> to vector<64x128xf32>
    %c0_3 = arith.constant 0 : index
    %c0_4 = arith.constant 0 : index
    %3 = vector.load %arg3[%c0_3, %c0_4] : memref<1x128xf32, #tpu.memory_space<vmem>>, vector<1x128xf32>
    %4 = vector.broadcast %3 : vector<1x128xf32> to vector<64x128xf32>
    %5 = arith.mulf %2, %4 : vector<64x128xf32>
    %c0_5 = arith.constant 0 : index
    %c0_6 = arith.constant 0 : index
    %6 = vector.load %arg4[%c0_5, %c0_6] : memref<1x128xf32, #tpu.memory_space<vmem>>, vector<1x128xf32>
    %7 = vector.broadcast %6 : vector<1x128xf32> to vector<64x128xf32>
    %8 = arith.addf %5, %7 : vector<64x128xf32>
    %cst = arith.constant 0.000000e+00 : f32
    %9 = vector.broadcast %cst : f32 to vector<64x128xf32>
    %10 = arith.maximumf %8, %9 : vector<64x128xf32>
    %11 = arith.truncf %10 : vector<64x128xf32> to vector<64x128xbf16>
    %c0_7 = arith.constant 0 : index
    %c0_8 = arith.constant 0 : index
    %c0_9 = arith.constant 0 : index
    %c0_10 = arith.constant 0 : index
    %12 = vector.load %arg5[%c0_7, %c0_8, %c0_9, %c0_10] : memref<1x1x64x128xbf16, #tpu.memory_space<vmem>>, vector<1x1x64x128xbf16>
    %13 = vector.shape_cast %12 : vector<1x1x64x128xbf16> to vector<64x128xbf16>
    %14 = vector.shape_cast %11 : vector<64x128xbf16> to vector<1x1x64x128xbf16>
    tpu.vector_store %arg5[%c0_7, %c0_8, %c0_9, %c0_10], %14 {strides = array<i32>} : memref<1x1x64x128xbf16, #tpu.memory_space<vmem>>, vector<1x1x64x128xbf16>,
    return
  }
  func.func @transform_0(%arg0: i32, %arg1: i32) -> (i32, i32, i32, i32) {
    %c0_i32 = arith.constant 0 : i32
    %c0_i32_0 = arith.constant 0 : i32
    %c0_i32_1 = arith.constant 0 : i32
    return %arg0, %arg1, %c0_i32, %c0_i32_0 : i32, i32, i32, i32
  }
  func.func @transform_1(%arg0: i32, %arg1: i32) -> (i32, i32) {
    %c0_i32 = arith.constant 0 : i32
    %c0_i32_0 = arith.constant 0 : i32
    %c0_i32_1 = arith.constant 0 : i32
    return %c0_i32, %c0_i32_0 : i32, i32
  }
  func.func @transform_2(%arg0: i32, %arg1: i32) -> (i32, i32) {
    %c0_i32 = arith.constant 0 : i32
    %c0_i32_0 = arith.constant 0 : i32
    %c0_i32_1 = arith.constant 0 : i32
    return %c0_i32, %c0_i32_0 : i32, i32
  }
  func.func @transform_3(%arg0: i32, %arg1: i32) -> (i32, i32, i32, i32) {
    %c0_i32 = arith.constant 0 : i32
    %c0_i32_0 = arith.constant 0 : i32
    %c0_i32_1 = arith.constant 0 : i32
    return %arg0, %arg1, %c0_i32, %c0_i32_0 : i32, i32, i32, i32
  }
}

module attributes {stable_mosaic.version = 11 : i64} {
  func.func @conv_stats_kernel(%arg0: i32, %arg1: i32, %arg2: memref<1x1x10x10x128xbf16, #tpu.memory_space<vmem>>, %arg3: memref<1x1x10x10x128xbf16, #tpu.memory_space<vmem>>, %arg4: memref<1x1x10x10x128xbf16, #tpu.memory_space<vmem>>, %arg5: memref<27x128x128xbf16, #tpu.memory_space<vmem>>, %arg6: memref<1x1x64x128xbf16, #tpu.memory_space<vmem>>, %arg7: memref<1x128xf32, #tpu.memory_space<vmem>>, %arg8: memref<1x128xf32, #tpu.memory_space<vmem>>) attributes {dimension_semantics = [#tpu.dimension_semantics<arbitrary>, #tpu.dimension_semantics<arbitrary>], iteration_bounds = array<i64: 2, 8>, scalar_prefetch = 0 : i64, scratch_operands = 0 : i64, tpu.core_type = #tpu.core_type<tc>, window_params = [{transform_indices = @transform_0, window_bounds = array<i64: 1, 1, 10, 10, 128>}, {transform_indices = @transform_1, window_bounds = array<i64: 1, 1, 10, 10, 128>}, {transform_indices = @transform_2, window_bounds = array<i64: 1, 1, 10, 10, 128>}, {pipeline_mode = #tpu.pipeline_mode<synchronous>, transform_indices = @transform_3, window_bounds = array<i64: 27, 128, 128>}, {transform_indices = @transform_4, window_bounds = array<i64: 1, 1, 64, 128>}, {pipeline_mode = #tpu.pipeline_mode<synchronous>, transform_indices = @transform_5, window_bounds = array<i64: 1, 128>}, {pipeline_mode = #tpu.pipeline_mode<synchronous>, transform_indices = @transform_6, window_bounds = array<i64: 1, 128>}]} {
    %cst = arith.constant 0.000000e+00 : f32
    %0 = vector.broadcast %cst : f32 to vector<64x128xf32>
    %c0 = arith.constant 0 : index
    %c0_0 = arith.constant 0 : index
    %c0_1 = arith.constant 0 : index
    %c0_2 = arith.constant 0 : index
    %c0_3 = arith.constant 0 : index
    %1 = vector.load %arg2[%c0, %c0_0, %c0_1, %c0_2, %c0_3] : memref<1x1x10x10x128xbf16, #tpu.memory_space<vmem>>, vector<1x1x8x8x128xbf16>
    %2 = vector.shape_cast %1 : vector<1x1x8x8x128xbf16> to vector<8x8x128xbf16>
    %3 = vector.shape_cast %2 : vector<8x8x128xbf16> to vector<64x128xbf16>
    %c0_4 = arith.constant 0 : index
    %c0_5 = arith.constant 0 : index
    %c0_6 = arith.constant 0 : index
    %4 = vector.load %arg5[%c0_4, %c0_5, %c0_6] : memref<27x128x128xbf16, #tpu.memory_space<vmem>>, vector<1x128x128xbf16>
    %5 = vector.shape_cast %4 : vector<1x128x128xbf16> to vector<128x128xbf16>
    %cst_7 = arith.constant dense<0.000000e+00> : vector<64x128xf32>
    %6 = tpu.matmul %3, %5, %cst_7 {dimension_numbers = #tpu.dot_dimension_numbers<[1], [0], [0], [1], [0, 0, 1, 1], [], []>} : vector<64x128xbf16>, vector<128x128xbf16>, vector<64x128xf32> -> vector<64x128xf32>
    %7 = arith.addf %0, %6 : vector<64x128xf32>
    %c0_8 = arith.constant 0 : index
    %c0_9 = arith.constant 0 : index
    %c0_10 = arith.constant 0 : index
    %c1 = arith.constant 1 : index
    %c0_11 = arith.constant 0 : index
    %8 = vector.load %arg2[%c0_8, %c0_9, %c0_10, %c1, %c0_11] : memref<1x1x10x10x128xbf16, #tpu.memory_space<vmem>>, vector<1x1x8x8x128xbf16>
    %9 = vector.shape_cast %8 : vector<1x1x8x8x128xbf16> to vector<8x8x128xbf16>
    %10 = vector.shape_cast %9 : vector<8x8x128xbf16> to vector<64x128xbf16>
    %c1_12 = arith.constant 1 : index
    %c0_13 = arith.constant 0 : index
    %c0_14 = arith.constant 0 : index
    %11 = vector.load %arg5[%c1_12, %c0_13, %c0_14] : memref<27x128x128xbf16, #tpu.memory_space<vmem>>, vector<1x128x128xbf16>
    %12 = vector.shape_cast %11 : vector<1x128x128xbf16> to vector<128x128xbf16>
    %cst_15 = arith.constant dense<0.000000e+00> : vector<64x128xf32>
    %13 = tpu.matmul %10, %12, %cst_15 {dimension_numbers = #tpu.dot_dimension_numbers<[1], [0], [0], [1], [0, 0, 1, 1], [], []>} : vector<64x128xbf16>, vector<128x128xbf16>, vector<64x128xf32> -> vector<64x128xf32>
    %14 = arith.addf %7, %13 : vector<64x128xf32>
    %c0_16 = arith.constant 0 : index
    %c0_17 = arith.constant 0 : index
    %c0_18 = arith.constant 0 : index
    %c2 = arith.constant 2 : index
    %c0_19 = arith.constant 0 : index
    %15 = vector.load %arg2[%c0_16, %c0_17, %c0_18, %c2, %c0_19] : memref<1x1x10x10x128xbf16, #tpu.memory_space<vmem>>, vector<1x1x8x8x128xbf16>
    %16 = vector.shape_cast %15 : vector<1x1x8x8x128xbf16> to vector<8x8x128xbf16>
    %17 = vector.shape_cast %16 : vector<8x8x128xbf16> to vector<64x128xbf16>
    %c2_20 = arith.constant 2 : index
    %c0_21 = arith.constant 0 : index
    %c0_22 = arith.constant 0 : index
    %18 = vector.load %arg5[%c2_20, %c0_21, %c0_22] : memref<27x128x128xbf16, #tpu.memory_space<vmem>>, vector<1x128x128xbf16>
    %19 = vector.shape_cast %18 : vector<1x128x128xbf16> to vector<128x128xbf16>
    %cst_23 = arith.constant dense<0.000000e+00> : vector<64x128xf32>
    %20 = tpu.matmul %17, %19, %cst_23 {dimension_numbers = #tpu.dot_dimension_numbers<[1], [0], [0], [1], [0, 0, 1, 1], [], []>} : vector<64x128xbf16>, vector<128x128xbf16>, vector<64x128xf32> -> vector<64x128xf32>
    %21 = arith.addf %14, %20 : vector<64x128xf32>
    %c0_24 = arith.constant 0 : index
    %c0_25 = arith.constant 0 : index
    %c1_26 = arith.constant 1 : index
    %c0_27 = arith.constant 0 : index
    %c0_28 = arith.constant 0 : index
    %22 = vector.load %arg2[%c0_24, %c0_25, %c1_26, %c0_27, %c0_28] : memref<1x1x10x10x128xbf16, #tpu.memory_space<vmem>>, vector<1x1x8x8x128xbf16>
    %23 = vector.shape_cast %22 : vector<1x1x8x8x128xbf16> to vector<8x8x128xbf16>
    %24 = vector.shape_cast %23 : vector<8x8x128xbf16> to vector<64x128xbf16>
    %c3 = arith.constant 3 : index
    %c0_29 = arith.constant 0 : index
    %c0_30 = arith.constant 0 : index
    %25 = vector.load %arg5[%c3, %c0_29, %c0_30] : memref<27x128x128xbf16, #tpu.memory_space<vmem>>, vector<1x128x128xbf16>
    %26 = vector.shape_cast %25 : vector<1x128x128xbf16> to vector<128x128xbf16>
    %cst_31 = arith.constant dense<0.000000e+00> : vector<64x128xf32>
    %27 = tpu.matmul %24, %26, %cst_31 {dimension_numbers = #tpu.dot_dimension_numbers<[1], [0], [0], [1], [0, 0, 1, 1], [], []>} : vector<64x128xbf16>, vector<128x128xbf16>, vector<64x128xf32> -> vector<64x128xf32>
    %28 = arith.addf %21, %27 : vector<64x128xf32>
    %c0_32 = arith.constant 0 : index
    %c0_33 = arith.constant 0 : index
    %c1_34 = arith.constant 1 : index
    %c1_35 = arith.constant 1 : index
    %c0_36 = arith.constant 0 : index
    %29 = vector.load %arg2[%c0_32, %c0_33, %c1_34, %c1_35, %c0_36] : memref<1x1x10x10x128xbf16, #tpu.memory_space<vmem>>, vector<1x1x8x8x128xbf16>
    %30 = vector.shape_cast %29 : vector<1x1x8x8x128xbf16> to vector<8x8x128xbf16>
    %31 = vector.shape_cast %30 : vector<8x8x128xbf16> to vector<64x128xbf16>
    %c4 = arith.constant 4 : index
    %c0_37 = arith.constant 0 : index
    %c0_38 = arith.constant 0 : index
    %32 = vector.load %arg5[%c4, %c0_37, %c0_38] : memref<27x128x128xbf16, #tpu.memory_space<vmem>>, vector<1x128x128xbf16>
    %33 = vector.shape_cast %32 : vector<1x128x128xbf16> to vector<128x128xbf16>
    %cst_39 = arith.constant dense<0.000000e+00> : vector<64x128xf32>
    %34 = tpu.matmul %31, %33, %cst_39 {dimension_numbers = #tpu.dot_dimension_numbers<[1], [0], [0], [1], [0, 0, 1, 1], [], []>} : vector<64x128xbf16>, vector<128x128xbf16>, vector<64x128xf32> -> vector<64x128xf32>
    %35 = arith.addf %28, %34 : vector<64x128xf32>
    %c0_40 = arith.constant 0 : index
    %c0_41 = arith.constant 0 : index
    %c1_42 = arith.constant 1 : index
    %c2_43 = arith.constant 2 : index
    %c0_44 = arith.constant 0 : index
    %36 = vector.load %arg2[%c0_40, %c0_41, %c1_42, %c2_43, %c0_44] : memref<1x1x10x10x128xbf16, #tpu.memory_space<vmem>>, vector<1x1x8x8x128xbf16>
    %37 = vector.shape_cast %36 : vector<1x1x8x8x128xbf16> to vector<8x8x128xbf16>
    %38 = vector.shape_cast %37 : vector<8x8x128xbf16> to vector<64x128xbf16>
    %c5 = arith.constant 5 : index
    %c0_45 = arith.constant 0 : index
    %c0_46 = arith.constant 0 : index
    %39 = vector.load %arg5[%c5, %c0_45, %c0_46] : memref<27x128x128xbf16, #tpu.memory_space<vmem>>, vector<1x128x128xbf16>
    %40 = vector.shape_cast %39 : vector<1x128x128xbf16> to vector<128x128xbf16>
    %cst_47 = arith.constant dense<0.000000e+00> : vector<64x128xf32>
    %41 = tpu.matmul %38, %40, %cst_47 {dimension_numbers = #tpu.dot_dimension_numbers<[1], [0], [0], [1], [0, 0, 1, 1], [], []>} : vector<64x128xbf16>, vector<128x128xbf16>, vector<64x128xf32> -> vector<64x128xf32>
    %42 = arith.addf %35, %41 : vector<64x128xf32>
    %c0_48 = arith.constant 0 : index
    %c0_49 = arith.constant 0 : index
    %c2_50 = arith.constant 2 : index
    %c0_51 = arith.constant 0 : index
    %c0_52 = arith.constant 0 : index
    %43 = vector.load %arg2[%c0_48, %c0_49, %c2_50, %c0_51, %c0_52] : memref<1x1x10x10x128xbf16, #tpu.memory_space<vmem>>, vector<1x1x8x8x128xbf16>
    %44 = vector.shape_cast %43 : vector<1x1x8x8x128xbf16> to vector<8x8x128xbf16>
    %45 = vector.shape_cast %44 : vector<8x8x128xbf16> to vector<64x128xbf16>
    %c6 = arith.constant 6 : index
    %c0_53 = arith.constant 0 : index
    %c0_54 = arith.constant 0 : index
    %46 = vector.load %arg5[%c6, %c0_53, %c0_54] : memref<27x128x128xbf16, #tpu.memory_space<vmem>>, vector<1x128x128xbf16>
    %47 = vector.shape_cast %46 : vector<1x128x128xbf16> to vector<128x128xbf16>
    %cst_55 = arith.constant dense<0.000000e+00> : vector<64x128xf32>
    %48 = tpu.matmul %45, %47, %cst_55 {dimension_numbers = #tpu.dot_dimension_numbers<[1], [0], [0], [1], [0, 0, 1, 1], [], []>} : vector<64x128xbf16>, vector<128x128xbf16>, vector<64x128xf32> -> vector<64x128xf32>
    %49 = arith.addf %42, %48 : vector<64x128xf32>
    %c0_56 = arith.constant 0 : index
    %c0_57 = arith.constant 0 : index
    %c2_58 = arith.constant 2 : index
    %c1_59 = arith.constant 1 : index
    %c0_60 = arith.constant 0 : index
    %50 = vector.load %arg2[%c0_56, %c0_57, %c2_58, %c1_59, %c0_60] : memref<1x1x10x10x128xbf16, #tpu.memory_space<vmem>>, vector<1x1x8x8x128xbf16>
    %51 = vector.shape_cast %50 : vector<1x1x8x8x128xbf16> to vector<8x8x128xbf16>
    %52 = vector.shape_cast %51 : vector<8x8x128xbf16> to vector<64x128xbf16>
    %c7 = arith.constant 7 : index
    %c0_61 = arith.constant 0 : index
    %c0_62 = arith.constant 0 : index
    %53 = vector.load %arg5[%c7, %c0_61, %c0_62] : memref<27x128x128xbf16, #tpu.memory_space<vmem>>, vector<1x128x128xbf16>
    %54 = vector.shape_cast %53 : vector<1x128x128xbf16> to vector<128x128xbf16>
    %cst_63 = arith.constant dense<0.000000e+00> : vector<64x128xf32>
    %55 = tpu.matmul %52, %54, %cst_63 {dimension_numbers = #tpu.dot_dimension_numbers<[1], [0], [0], [1], [0, 0, 1, 1], [], []>} : vector<64x128xbf16>, vector<128x128xbf16>, vector<64x128xf32> -> vector<64x128xf32>
    %56 = arith.addf %49, %55 : vector<64x128xf32>
    %c0_64 = arith.constant 0 : index
    %c0_65 = arith.constant 0 : index
    %c2_66 = arith.constant 2 : index
    %c2_67 = arith.constant 2 : index
    %c0_68 = arith.constant 0 : index
    %57 = vector.load %arg2[%c0_64, %c0_65, %c2_66, %c2_67, %c0_68] : memref<1x1x10x10x128xbf16, #tpu.memory_space<vmem>>, vector<1x1x8x8x128xbf16>
    %58 = vector.shape_cast %57 : vector<1x1x8x8x128xbf16> to vector<8x8x128xbf16>
    %59 = vector.shape_cast %58 : vector<8x8x128xbf16> to vector<64x128xbf16>
    %c8 = arith.constant 8 : index
    %c0_69 = arith.constant 0 : index
    %c0_70 = arith.constant 0 : index
    %60 = vector.load %arg5[%c8, %c0_69, %c0_70] : memref<27x128x128xbf16, #tpu.memory_space<vmem>>, vector<1x128x128xbf16>
    %61 = vector.shape_cast %60 : vector<1x128x128xbf16> to vector<128x128xbf16>
    %cst_71 = arith.constant dense<0.000000e+00> : vector<64x128xf32>
    %62 = tpu.matmul %59, %61, %cst_71 {dimension_numbers = #tpu.dot_dimension_numbers<[1], [0], [0], [1], [0, 0, 1, 1], [], []>} : vector<64x128xbf16>, vector<128x128xbf16>, vector<64x128xf32> -> vector<64x128xf32>
    %63 = arith.addf %56, %62 : vector<64x128xf32>
    %c0_72 = arith.constant 0 : index
    %c0_73 = arith.constant 0 : index
    %c0_74 = arith.constant 0 : index
    %c0_75 = arith.constant 0 : index
    %c0_76 = arith.constant 0 : index
    %64 = vector.load %arg3[%c0_72, %c0_73, %c0_74, %c0_75, %c0_76] : memref<1x1x10x10x128xbf16, #tpu.memory_space<vmem>>, vector<1x1x8x8x128xbf16>
    %65 = vector.shape_cast %64 : vector<1x1x8x8x128xbf16> to vector<8x8x128xbf16>
    %66 = vector.shape_cast %65 : vector<8x8x128xbf16> to vector<64x128xbf16>
    %c9 = arith.constant 9 : index
    %c0_77 = arith.constant 0 : index
    %c0_78 = arith.constant 0 : index
    %67 = vector.load %arg5[%c9, %c0_77, %c0_78] : memref<27x128x128xbf16, #tpu.memory_space<vmem>>, vector<1x128x128xbf16>
    %68 = vector.shape_cast %67 : vector<1x128x128xbf16> to vector<128x128xbf16>
    %cst_79 = arith.constant dense<0.000000e+00> : vector<64x128xf32>
    %69 = tpu.matmul %66, %68, %cst_79 {dimension_numbers = #tpu.dot_dimension_numbers<[1], [0], [0], [1], [0, 0, 1, 1], [], []>} : vector<64x128xbf16>, vector<128x128xbf16>, vector<64x128xf32> -> vector<64x128xf32>
    %70 = arith.addf %63, %69 : vector<64x128xf32>
    %c0_80 = arith.constant 0 : index
    %c0_81 = arith.constant 0 : index
    %c0_82 = arith.constant 0 : index
    %c1_83 = arith.constant 1 : index
    %c0_84 = arith.constant 0 : index
    %71 = vector.load %arg3[%c0_80, %c0_81, %c0_82, %c1_83, %c0_84] : memref<1x1x10x10x128xbf16, #tpu.memory_space<vmem>>, vector<1x1x8x8x128xbf16>
    %72 = vector.shape_cast %71 : vector<1x1x8x8x128xbf16> to vector<8x8x128xbf16>
    %73 = vector.shape_cast %72 : vector<8x8x128xbf16> to vector<64x128xbf16>
    %c10 = arith.constant 10 : index
    %c0_85 = arith.constant 0 : index
    %c0_86 = arith.constant 0 : index
    %74 = vector.load %arg5[%c10, %c0_85, %c0_86] : memref<27x128x128xbf16, #tpu.memory_space<vmem>>, vector<1x128x128xbf16>
    %75 = vector.shape_cast %74 : vector<1x128x128xbf16> to vector<128x128xbf16>
    %cst_87 = arith.constant dense<0.000000e+00> : vector<64x128xf32>
    %76 = tpu.matmul %73, %75, %cst_87 {dimension_numbers = #tpu.dot_dimension_numbers<[1], [0], [0], [1], [0, 0, 1, 1], [], []>} : vector<64x128xbf16>, vector<128x128xbf16>, vector<64x128xf32> -> vector<64x128xf32>
    %77 = arith.addf %70, %76 : vector<64x128xf32>
    %c0_88 = arith.constant 0 : index
    %c0_89 = arith.constant 0 : index
    %c0_90 = arith.constant 0 : index
    %c2_91 = arith.constant 2 : index
    %c0_92 = arith.constant 0 : index
    %78 = vector.load %arg3[%c0_88, %c0_89, %c0_90, %c2_91, %c0_92] : memref<1x1x10x10x128xbf16, #tpu.memory_space<vmem>>, vector<1x1x8x8x128xbf16>
    %79 = vector.shape_cast %78 : vector<1x1x8x8x128xbf16> to vector<8x8x128xbf16>
    %80 = vector.shape_cast %79 : vector<8x8x128xbf16> to vector<64x128xbf16>
    %c11 = arith.constant 11 : index
    %c0_93 = arith.constant 0 : index
    %c0_94 = arith.constant 0 : index
    %81 = vector.load %arg5[%c11, %c0_93, %c0_94] : memref<27x128x128xbf16, #tpu.memory_space<vmem>>, vector<1x128x128xbf16>
    %82 = vector.shape_cast %81 : vector<1x128x128xbf16> to vector<128x128xbf16>
    %cst_95 = arith.constant dense<0.000000e+00> : vector<64x128xf32>
    %83 = tpu.matmul %80, %82, %cst_95 {dimension_numbers = #tpu.dot_dimension_numbers<[1], [0], [0], [1], [0, 0, 1, 1], [], []>} : vector<64x128xbf16>, vector<128x128xbf16>, vector<64x128xf32> -> vector<64x128xf32>
    %84 = arith.addf %77, %83 : vector<64x128xf32>
    %c0_96 = arith.constant 0 : index
    %c0_97 = arith.constant 0 : index
    %c1_98 = arith.constant 1 : index
    %c0_99 = arith.constant 0 : index
    %c0_100 = arith.constant 0 : index
    %85 = vector.load %arg3[%c0_96, %c0_97, %c1_98, %c0_99, %c0_100] : memref<1x1x10x10x128xbf16, #tpu.memory_space<vmem>>, vector<1x1x8x8x128xbf16>
    %86 = vector.shape_cast %85 : vector<1x1x8x8x128xbf16> to vector<8x8x128xbf16>
    %87 = vector.shape_cast %86 : vector<8x8x128xbf16> to vector<64x128xbf16>
    %c12 = arith.constant 12 : index
    %c0_101 = arith.constant 0 : index
    %c0_102 = arith.constant 0 : index
    %88 = vector.load %arg5[%c12, %c0_101, %c0_102] : memref<27x128x128xbf16, #tpu.memory_space<vmem>>, vector<1x128x128xbf16>
    %89 = vector.shape_cast %88 : vector<1x128x128xbf16> to vector<128x128xbf16>
    %cst_103 = arith.constant dense<0.000000e+00> : vector<64x128xf32>
    %90 = tpu.matmul %87, %89, %cst_103 {dimension_numbers = #tpu.dot_dimension_numbers<[1], [0], [0], [1], [0, 0, 1, 1], [], []>} : vector<64x128xbf16>, vector<128x128xbf16>, vector<64x128xf32> -> vector<64x128xf32>
    %91 = arith.addf %84, %90 : vector<64x128xf32>
    %c0_104 = arith.constant 0 : index
    %c0_105 = arith.constant 0 : index
    %c1_106 = arith.constant 1 : index
    %c1_107 = arith.constant 1 : index
    %c0_108 = arith.constant 0 : index
    %92 = vector.load %arg3[%c0_104, %c0_105, %c1_106, %c1_107, %c0_108] : memref<1x1x10x10x128xbf16, #tpu.memory_space<vmem>>, vector<1x1x8x8x128xbf16>
    %93 = vector.shape_cast %92 : vector<1x1x8x8x128xbf16> to vector<8x8x128xbf16>
    %94 = vector.shape_cast %93 : vector<8x8x128xbf16> to vector<64x128xbf16>
    %c13 = arith.constant 13 : index
    %c0_109 = arith.constant 0 : index
    %c0_110 = arith.constant 0 : index
    %95 = vector.load %arg5[%c13, %c0_109, %c0_110] : memref<27x128x128xbf16, #tpu.memory_space<vmem>>, vector<1x128x128xbf16>
    %96 = vector.shape_cast %95 : vector<1x128x128xbf16> to vector<128x128xbf16>
    %cst_111 = arith.constant dense<0.000000e+00> : vector<64x128xf32>
    %97 = tpu.matmul %94, %96, %cst_111 {dimension_numbers = #tpu.dot_dimension_numbers<[1], [0], [0], [1], [0, 0, 1, 1], [], []>} : vector<64x128xbf16>, vector<128x128xbf16>, vector<64x128xf32> -> vector<64x128xf32>
    %98 = arith.addf %91, %97 : vector<64x128xf32>
    %c0_112 = arith.constant 0 : index
    %c0_113 = arith.constant 0 : index
    %c1_114 = arith.constant 1 : index
    %c2_115 = arith.constant 2 : index
    %c0_116 = arith.constant 0 : index
    %99 = vector.load %arg3[%c0_112, %c0_113, %c1_114, %c2_115, %c0_116] : memref<1x1x10x10x128xbf16, #tpu.memory_space<vmem>>, vector<1x1x8x8x128xbf16>
    %100 = vector.shape_cast %99 : vector<1x1x8x8x128xbf16> to vector<8x8x128xbf16>
    %101 = vector.shape_cast %100 : vector<8x8x128xbf16> to vector<64x128xbf16>
    %c14 = arith.constant 14 : index
    %c0_117 = arith.constant 0 : index
    %c0_118 = arith.constant 0 : index
    %102 = vector.load %arg5[%c14, %c0_117, %c0_118] : memref<27x128x128xbf16, #tpu.memory_space<vmem>>, vector<1x128x128xbf16>
    %103 = vector.shape_cast %102 : vector<1x128x128xbf16> to vector<128x128xbf16>
    %cst_119 = arith.constant dense<0.000000e+00> : vector<64x128xf32>
    %104 = tpu.matmul %101, %103, %cst_119 {dimension_numbers = #tpu.dot_dimension_numbers<[1], [0], [0], [1], [0, 0, 1, 1], [], []>} : vector<64x128xbf16>, vector<128x128xbf16>, vector<64x128xf32> -> vector<64x128xf32>
    %105 = arith.addf %98, %104 : vector<64x128xf32>
    %c0_120 = arith.constant 0 : index
    %c0_121 = arith.constant 0 : index
    %c2_122 = arith.constant 2 : index
    %c0_123 = arith.constant 0 : index
    %c0_124 = arith.constant 0 : index
    %106 = vector.load %arg3[%c0_120, %c0_121, %c2_122, %c0_123, %c0_124] : memref<1x1x10x10x128xbf16, #tpu.memory_space<vmem>>, vector<1x1x8x8x128xbf16>
    %107 = vector.shape_cast %106 : vector<1x1x8x8x128xbf16> to vector<8x8x128xbf16>
    %108 = vector.shape_cast %107 : vector<8x8x128xbf16> to vector<64x128xbf16>
    %c15 = arith.constant 15 : index
    %c0_125 = arith.constant 0 : index
    %c0_126 = arith.constant 0 : index
    %109 = vector.load %arg5[%c15, %c0_125, %c0_126] : memref<27x128x128xbf16, #tpu.memory_space<vmem>>, vector<1x128x128xbf16>
    %110 = vector.shape_cast %109 : vector<1x128x128xbf16> to vector<128x128xbf16>
    %cst_127 = arith.constant dense<0.000000e+00> : vector<64x128xf32>
    %111 = tpu.matmul %108, %110, %cst_127 {dimension_numbers = #tpu.dot_dimension_numbers<[1], [0], [0], [1], [0, 0, 1, 1], [], []>} : vector<64x128xbf16>, vector<128x128xbf16>, vector<64x128xf32> -> vector<64x128xf32>
    %112 = arith.addf %105, %111 : vector<64x128xf32>
    %c0_128 = arith.constant 0 : index
    %c0_129 = arith.constant 0 : index
    %c2_130 = arith.constant 2 : index
    %c1_131 = arith.constant 1 : index
    %c0_132 = arith.constant 0 : index
    %113 = vector.load %arg3[%c0_128, %c0_129, %c2_130, %c1_131, %c0_132] : memref<1x1x10x10x128xbf16, #tpu.memory_space<vmem>>, vector<1x1x8x8x128xbf16>
    %114 = vector.shape_cast %113 : vector<1x1x8x8x128xbf16> to vector<8x8x128xbf16>
    %115 = vector.shape_cast %114 : vector<8x8x128xbf16> to vector<64x128xbf16>
    %c16 = arith.constant 16 : index
    %c0_133 = arith.constant 0 : index
    %c0_134 = arith.constant 0 : index
    %116 = vector.load %arg5[%c16, %c0_133, %c0_134] : memref<27x128x128xbf16, #tpu.memory_space<vmem>>, vector<1x128x128xbf16>
    %117 = vector.shape_cast %116 : vector<1x128x128xbf16> to vector<128x128xbf16>
    %cst_135 = arith.constant dense<0.000000e+00> : vector<64x128xf32>
    %118 = tpu.matmul %115, %117, %cst_135 {dimension_numbers = #tpu.dot_dimension_numbers<[1], [0], [0], [1], [0, 0, 1, 1], [], []>} : vector<64x128xbf16>, vector<128x128xbf16>, vector<64x128xf32> -> vector<64x128xf32>
    %119 = arith.addf %112, %118 : vector<64x128xf32>
    %c0_136 = arith.constant 0 : index
    %c0_137 = arith.constant 0 : index
    %c2_138 = arith.constant 2 : index
    %c2_139 = arith.constant 2 : index
    %c0_140 = arith.constant 0 : index
    %120 = vector.load %arg3[%c0_136, %c0_137, %c2_138, %c2_139, %c0_140] : memref<1x1x10x10x128xbf16, #tpu.memory_space<vmem>>, vector<1x1x8x8x128xbf16>
    %121 = vector.shape_cast %120 : vector<1x1x8x8x128xbf16> to vector<8x8x128xbf16>
    %122 = vector.shape_cast %121 : vector<8x8x128xbf16> to vector<64x128xbf16>
    %c17 = arith.constant 17 : index
    %c0_141 = arith.constant 0 : index
    %c0_142 = arith.constant 0 : index
    %123 = vector.load %arg5[%c17, %c0_141, %c0_142] : memref<27x128x128xbf16, #tpu.memory_space<vmem>>, vector<1x128x128xbf16>
    %124 = vector.shape_cast %123 : vector<1x128x128xbf16> to vector<128x128xbf16>
    %cst_143 = arith.constant dense<0.000000e+00> : vector<64x128xf32>
    %125 = tpu.matmul %122, %124, %cst_143 {dimension_numbers = #tpu.dot_dimension_numbers<[1], [0], [0], [1], [0, 0, 1, 1], [], []>} : vector<64x128xbf16>, vector<128x128xbf16>, vector<64x128xf32> -> vector<64x128xf32>
    %126 = arith.addf %119, %125 : vector<64x128xf32>
    %c0_144 = arith.constant 0 : index
    %c0_145 = arith.constant 0 : index
    %c0_146 = arith.constant 0 : index
    %c0_147 = arith.constant 0 : index
    %c0_148 = arith.constant 0 : index
    %127 = vector.load %arg4[%c0_144, %c0_145, %c0_146, %c0_147, %c0_148] : memref<1x1x10x10x128xbf16, #tpu.memory_space<vmem>>, vector<1x1x8x8x128xbf16>
    %128 = vector.shape_cast %127 : vector<1x1x8x8x128xbf16> to vector<8x8x128xbf16>
    %129 = vector.shape_cast %128 : vector<8x8x128xbf16> to vector<64x128xbf16>
    %c18 = arith.constant 18 : index
    %c0_149 = arith.constant 0 : index
    %c0_150 = arith.constant 0 : index
    %130 = vector.load %arg5[%c18, %c0_149, %c0_150] : memref<27x128x128xbf16, #tpu.memory_space<vmem>>, vector<1x128x128xbf16>
    %131 = vector.shape_cast %130 : vector<1x128x128xbf16> to vector<128x128xbf16>
    %cst_151 = arith.constant dense<0.000000e+00> : vector<64x128xf32>
    %132 = tpu.matmul %129, %131, %cst_151 {dimension_numbers = #tpu.dot_dimension_numbers<[1], [0], [0], [1], [0, 0, 1, 1], [], []>} : vector<64x128xbf16>, vector<128x128xbf16>, vector<64x128xf32> -> vector<64x128xf32>
    %133 = arith.addf %126, %132 : vector<64x128xf32>
    %c0_152 = arith.constant 0 : index
    %c0_153 = arith.constant 0 : index
    %c0_154 = arith.constant 0 : index
    %c1_155 = arith.constant 1 : index
    %c0_156 = arith.constant 0 : index
    %134 = vector.load %arg4[%c0_152, %c0_153, %c0_154, %c1_155, %c0_156] : memref<1x1x10x10x128xbf16, #tpu.memory_space<vmem>>, vector<1x1x8x8x128xbf16>
    %135 = vector.shape_cast %134 : vector<1x1x8x8x128xbf16> to vector<8x8x128xbf16>
    %136 = vector.shape_cast %135 : vector<8x8x128xbf16> to vector<64x128xbf16>
    %c19 = arith.constant 19 : index
    %c0_157 = arith.constant 0 : index
    %c0_158 = arith.constant 0 : index
    %137 = vector.load %arg5[%c19, %c0_157, %c0_158] : memref<27x128x128xbf16, #tpu.memory_space<vmem>>, vector<1x128x128xbf16>
    %138 = vector.shape_cast %137 : vector<1x128x128xbf16> to vector<128x128xbf16>
    %cst_159 = arith.constant dense<0.000000e+00> : vector<64x128xf32>
    %139 = tpu.matmul %136, %138, %cst_159 {dimension_numbers = #tpu.dot_dimension_numbers<[1], [0], [0], [1], [0, 0, 1, 1], [], []>} : vector<64x128xbf16>, vector<128x128xbf16>, vector<64x128xf32> -> vector<64x128xf32>
    %140 = arith.addf %133, %139 : vector<64x128xf32>
    %c0_160 = arith.constant 0 : index
    %c0_161 = arith.constant 0 : index
    %c0_162 = arith.constant 0 : index
    %c2_163 = arith.constant 2 : index
    %c0_164 = arith.constant 0 : index
    %141 = vector.load %arg4[%c0_160, %c0_161, %c0_162, %c2_163, %c0_164] : memref<1x1x10x10x128xbf16, #tpu.memory_space<vmem>>, vector<1x1x8x8x128xbf16>
    %142 = vector.shape_cast %141 : vector<1x1x8x8x128xbf16> to vector<8x8x128xbf16>
    %143 = vector.shape_cast %142 : vector<8x8x128xbf16> to vector<64x128xbf16>
    %c20 = arith.constant 20 : index
    %c0_165 = arith.constant 0 : index
    %c0_166 = arith.constant 0 : index
    %144 = vector.load %arg5[%c20, %c0_165, %c0_166] : memref<27x128x128xbf16, #tpu.memory_space<vmem>>, vector<1x128x128xbf16>
    %145 = vector.shape_cast %144 : vector<1x128x128xbf16> to vector<128x128xbf16>
    %cst_167 = arith.constant dense<0.000000e+00> : vector<64x128xf32>
    %146 = tpu.matmul %143, %145, %cst_167 {dimension_numbers = #tpu.dot_dimension_numbers<[1], [0], [0], [1], [0, 0, 1, 1], [], []>} : vector<64x128xbf16>, vector<128x128xbf16>, vector<64x128xf32> -> vector<64x128xf32>
    %147 = arith.addf %140, %146 : vector<64x128xf32>
    %c0_168 = arith.constant 0 : index
    %c0_169 = arith.constant 0 : index
    %c1_170 = arith.constant 1 : index
    %c0_171 = arith.constant 0 : index
    %c0_172 = arith.constant 0 : index
    %148 = vector.load %arg4[%c0_168, %c0_169, %c1_170, %c0_171, %c0_172] : memref<1x1x10x10x128xbf16, #tpu.memory_space<vmem>>, vector<1x1x8x8x128xbf16>
    %149 = vector.shape_cast %148 : vector<1x1x8x8x128xbf16> to vector<8x8x128xbf16>
    %150 = vector.shape_cast %149 : vector<8x8x128xbf16> to vector<64x128xbf16>
    %c21 = arith.constant 21 : index
    %c0_173 = arith.constant 0 : index
    %c0_174 = arith.constant 0 : index
    %151 = vector.load %arg5[%c21, %c0_173, %c0_174] : memref<27x128x128xbf16, #tpu.memory_space<vmem>>, vector<1x128x128xbf16>
    %152 = vector.shape_cast %151 : vector<1x128x128xbf16> to vector<128x128xbf16>
    %cst_175 = arith.constant dense<0.000000e+00> : vector<64x128xf32>
    %153 = tpu.matmul %150, %152, %cst_175 {dimension_numbers = #tpu.dot_dimension_numbers<[1], [0], [0], [1], [0, 0, 1, 1], [], []>} : vector<64x128xbf16>, vector<128x128xbf16>, vector<64x128xf32> -> vector<64x128xf32>
    %154 = arith.addf %147, %153 : vector<64x128xf32>
    %c0_176 = arith.constant 0 : index
    %c0_177 = arith.constant 0 : index
    %c1_178 = arith.constant 1 : index
    %c1_179 = arith.constant 1 : index
    %c0_180 = arith.constant 0 : index
    %155 = vector.load %arg4[%c0_176, %c0_177, %c1_178, %c1_179, %c0_180] : memref<1x1x10x10x128xbf16, #tpu.memory_space<vmem>>, vector<1x1x8x8x128xbf16>
    %156 = vector.shape_cast %155 : vector<1x1x8x8x128xbf16> to vector<8x8x128xbf16>
    %157 = vector.shape_cast %156 : vector<8x8x128xbf16> to vector<64x128xbf16>
    %c22 = arith.constant 22 : index
    %c0_181 = arith.constant 0 : index
    %c0_182 = arith.constant 0 : index
    %158 = vector.load %arg5[%c22, %c0_181, %c0_182] : memref<27x128x128xbf16, #tpu.memory_space<vmem>>, vector<1x128x128xbf16>
    %159 = vector.shape_cast %158 : vector<1x128x128xbf16> to vector<128x128xbf16>
    %cst_183 = arith.constant dense<0.000000e+00> : vector<64x128xf32>
    %160 = tpu.matmul %157, %159, %cst_183 {dimension_numbers = #tpu.dot_dimension_numbers<[1], [0], [0], [1], [0, 0, 1, 1], [], []>} : vector<64x128xbf16>, vector<128x128xbf16>, vector<64x128xf32> -> vector<64x128xf32>
    %161 = arith.addf %154, %160 : vector<64x128xf32>
    %c0_184 = arith.constant 0 : index
    %c0_185 = arith.constant 0 : index
    %c1_186 = arith.constant 1 : index
    %c2_187 = arith.constant 2 : index
    %c0_188 = arith.constant 0 : index
    %162 = vector.load %arg4[%c0_184, %c0_185, %c1_186, %c2_187, %c0_188] : memref<1x1x10x10x128xbf16, #tpu.memory_space<vmem>>, vector<1x1x8x8x128xbf16>
    %163 = vector.shape_cast %162 : vector<1x1x8x8x128xbf16> to vector<8x8x128xbf16>
    %164 = vector.shape_cast %163 : vector<8x8x128xbf16> to vector<64x128xbf16>
    %c23 = arith.constant 23 : index
    %c0_189 = arith.constant 0 : index
    %c0_190 = arith.constant 0 : index
    %165 = vector.load %arg5[%c23, %c0_189, %c0_190] : memref<27x128x128xbf16, #tpu.memory_space<vmem>>, vector<1x128x128xbf16>
    %166 = vector.shape_cast %165 : vector<1x128x128xbf16> to vector<128x128xbf16>
    %cst_191 = arith.constant dense<0.000000e+00> : vector<64x128xf32>
    %167 = tpu.matmul %164, %166, %cst_191 {dimension_numbers = #tpu.dot_dimension_numbers<[1], [0], [0], [1], [0, 0, 1, 1], [], []>} : vector<64x128xbf16>, vector<128x128xbf16>, vector<64x128xf32> -> vector<64x128xf32>
    %168 = arith.addf %161, %167 : vector<64x128xf32>
    %c0_192 = arith.constant 0 : index
    %c0_193 = arith.constant 0 : index
    %c2_194 = arith.constant 2 : index
    %c0_195 = arith.constant 0 : index
    %c0_196 = arith.constant 0 : index
    %169 = vector.load %arg4[%c0_192, %c0_193, %c2_194, %c0_195, %c0_196] : memref<1x1x10x10x128xbf16, #tpu.memory_space<vmem>>, vector<1x1x8x8x128xbf16>
    %170 = vector.shape_cast %169 : vector<1x1x8x8x128xbf16> to vector<8x8x128xbf16>
    %171 = vector.shape_cast %170 : vector<8x8x128xbf16> to vector<64x128xbf16>
    %c24 = arith.constant 24 : index
    %c0_197 = arith.constant 0 : index
    %c0_198 = arith.constant 0 : index
    %172 = vector.load %arg5[%c24, %c0_197, %c0_198] : memref<27x128x128xbf16, #tpu.memory_space<vmem>>, vector<1x128x128xbf16>
    %173 = vector.shape_cast %172 : vector<1x128x128xbf16> to vector<128x128xbf16>
    %cst_199 = arith.constant dense<0.000000e+00> : vector<64x128xf32>
    %174 = tpu.matmul %171, %173, %cst_199 {dimension_numbers = #tpu.dot_dimension_numbers<[1], [0], [0], [1], [0, 0, 1, 1], [], []>} : vector<64x128xbf16>, vector<128x128xbf16>, vector<64x128xf32> -> vector<64x128xf32>
    %175 = arith.addf %168, %174 : vector<64x128xf32>
    %c0_200 = arith.constant 0 : index
    %c0_201 = arith.constant 0 : index
    %c2_202 = arith.constant 2 : index
    %c1_203 = arith.constant 1 : index
    %c0_204 = arith.constant 0 : index
    %176 = vector.load %arg4[%c0_200, %c0_201, %c2_202, %c1_203, %c0_204] : memref<1x1x10x10x128xbf16, #tpu.memory_space<vmem>>, vector<1x1x8x8x128xbf16>
    %177 = vector.shape_cast %176 : vector<1x1x8x8x128xbf16> to vector<8x8x128xbf16>
    %178 = vector.shape_cast %177 : vector<8x8x128xbf16> to vector<64x128xbf16>
    %c25 = arith.constant 25 : index
    %c0_205 = arith.constant 0 : index
    %c0_206 = arith.constant 0 : index
    %179 = vector.load %arg5[%c25, %c0_205, %c0_206] : memref<27x128x128xbf16, #tpu.memory_space<vmem>>, vector<1x128x128xbf16>
    %180 = vector.shape_cast %179 : vector<1x128x128xbf16> to vector<128x128xbf16>
    %cst_207 = arith.constant dense<0.000000e+00> : vector<64x128xf32>
    %181 = tpu.matmul %178, %180, %cst_207 {dimension_numbers = #tpu.dot_dimension_numbers<[1], [0], [0], [1], [0, 0, 1, 1], [], []>} : vector<64x128xbf16>, vector<128x128xbf16>, vector<64x128xf32> -> vector<64x128xf32>
    %182 = arith.addf %175, %181 : vector<64x128xf32>
    %c0_208 = arith.constant 0 : index
    %c0_209 = arith.constant 0 : index
    %c2_210 = arith.constant 2 : index
    %c2_211 = arith.constant 2 : index
    %c0_212 = arith.constant 0 : index
    %183 = vector.load %arg4[%c0_208, %c0_209, %c2_210, %c2_211, %c0_212] : memref<1x1x10x10x128xbf16, #tpu.memory_space<vmem>>, vector<1x1x8x8x128xbf16>
    %184 = vector.shape_cast %183 : vector<1x1x8x8x128xbf16> to vector<8x8x128xbf16>
    %185 = vector.shape_cast %184 : vector<8x8x128xbf16> to vector<64x128xbf16>
    %c26 = arith.constant 26 : index
    %c0_213 = arith.constant 0 : index
    %c0_214 = arith.constant 0 : index
    %186 = vector.load %arg5[%c26, %c0_213, %c0_214] : memref<27x128x128xbf16, #tpu.memory_space<vmem>>, vector<1x128x128xbf16>
    %187 = vector.shape_cast %186 : vector<1x128x128xbf16> to vector<128x128xbf16>
    %cst_215 = arith.constant dense<0.000000e+00> : vector<64x128xf32>
    %188 = tpu.matmul %185, %187, %cst_215 {dimension_numbers = #tpu.dot_dimension_numbers<[1], [0], [0], [1], [0, 0, 1, 1], [], []>} : vector<64x128xbf16>, vector<128x128xbf16>, vector<64x128xf32> -> vector<64x128xf32>
    %189 = arith.addf %182, %188 : vector<64x128xf32>
    %190 = arith.truncf %189 : vector<64x128xf32> to vector<64x128xbf16>
    %c0_216 = arith.constant 0 : index
    %c0_217 = arith.constant 0 : index
    %c0_218 = arith.constant 0 : index
    %c0_219 = arith.constant 0 : index
    %191 = vector.load %arg6[%c0_216, %c0_217, %c0_218, %c0_219] : memref<1x1x64x128xbf16, #tpu.memory_space<vmem>>, vector<1x1x64x128xbf16>
    %192 = vector.shape_cast %191 : vector<1x1x64x128xbf16> to vector<64x128xbf16>
    %193 = vector.shape_cast %190 : vector<64x128xbf16> to vector<1x1x64x128xbf16>
    tpu.vector_store %arg6[%c0_216, %c0_217, %c0_218, %c0_219], %193 {strides = array<i32>} : memref<1x1x64x128xbf16, #tpu.memory_space<vmem>>, vector<1x1x64x128xbf16>,
    %cst_220 = arith.constant dense<0.000000e+00> : vector<128xf32>
    %194 = vector.multi_reduction <add>, %189, %cst_220 [0] : vector<64x128xf32> to vector<128xf32>
    %195 = vector.shape_cast %194 : vector<128xf32> to vector<1x128xf32>
    %196 = arith.mulf %189, %189 : vector<64x128xf32>
    %cst_221 = arith.constant dense<0.000000e+00> : vector<128xf32>
    %197 = vector.multi_reduction <add>, %196, %cst_221 [0] : vector<64x128xf32> to vector<128xf32>
    %198 = vector.shape_cast %197 : vector<128xf32> to vector<1x128xf32>
    %c0_i32 = arith.constant 0 : i32
    %199 = arith.cmpi eq, %arg0, %c0_i32 : i32
    %c0_i32_222 = arith.constant 0 : i32
    %200 = arith.cmpi eq, %arg1, %c0_i32_222 : i32
    %201 = arith.andi %199, %200 : i1
    %202 = arith.extui %201 : i1 to i32
    %c0_i32_223 = arith.constant 0 : i32
    %203 = arith.cmpi ne, %202, %c0_i32_223 : i32
    scf.if %203 {
      %c0_225 = arith.constant 0 : index
      %c0_226 = arith.constant 0 : index
      %207 = vector.load %arg7[%c0_225, %c0_226] : memref<1x128xf32, #tpu.memory_space<vmem>>, vector<1x128xf32>
      tpu.vector_store %arg7[%c0_225, %c0_226], %195 {strides = array<i32>} : memref<1x128xf32, #tpu.memory_space<vmem>>, vector<1x128xf32>,
      %c0_227 = arith.constant 0 : index
      %c0_228 = arith.constant 0 : index
      %208 = vector.load %arg8[%c0_227, %c0_228] : memref<1x128xf32, #tpu.memory_space<vmem>>, vector<1x128xf32>
      tpu.vector_store %arg8[%c0_227, %c0_228], %198 {strides = array<i32>} : memref<1x128xf32, #tpu.memory_space<vmem>>, vector<1x128xf32>,
    } else {
    }
    %true = arith.constant true
    %204 = arith.xori %201, %true : i1
    %205 = arith.extui %204 : i1 to i32
    %c0_i32_224 = arith.constant 0 : i32
    %206 = arith.cmpi ne, %205, %c0_i32_224 : i32
    scf.if %206 {
      %c0_225 = arith.constant 0 : index
      %c0_226 = arith.constant 0 : index
      %207 = vector.load %arg7[%c0_225, %c0_226] : memref<1x128xf32, #tpu.memory_space<vmem>>, vector<1x128xf32>
      %208 = arith.addf %207, %195 : vector<1x128xf32>
      %c0_227 = arith.constant 0 : index
      %c0_228 = arith.constant 0 : index
      %209 = vector.load %arg7[%c0_227, %c0_228] : memref<1x128xf32, #tpu.memory_space<vmem>>, vector<1x128xf32>
      tpu.vector_store %arg7[%c0_227, %c0_228], %208 {strides = array<i32>} : memref<1x128xf32, #tpu.memory_space<vmem>>, vector<1x128xf32>,
      %c0_229 = arith.constant 0 : index
      %c0_230 = arith.constant 0 : index
      %210 = vector.load %arg8[%c0_229, %c0_230] : memref<1x128xf32, #tpu.memory_space<vmem>>, vector<1x128xf32>
      %211 = arith.addf %210, %198 : vector<1x128xf32>
      %c0_231 = arith.constant 0 : index
      %c0_232 = arith.constant 0 : index
      %212 = vector.load %arg8[%c0_231, %c0_232] : memref<1x128xf32, #tpu.memory_space<vmem>>, vector<1x128xf32>
      tpu.vector_store %arg8[%c0_231, %c0_232], %211 {strides = array<i32>} : memref<1x128xf32, #tpu.memory_space<vmem>>, vector<1x128xf32>,
    } else {
    }
    return
  }
  func.func @transform_0(%arg0: i32, %arg1: i32) -> (i32, i32, i32, i32, i32) {
    %c0_i32 = arith.constant 0 : i32
    %0 = arith.addi %arg1, %c0_i32 : i32
    %c0_i32_0 = arith.constant 0 : i32
    %c0_i32_1 = arith.constant 0 : i32
    %c0_i32_2 = arith.constant 0 : i32
    %c0_i32_3 = arith.constant 0 : i32
    return %arg0, %0, %c0_i32_0, %c0_i32_1, %c0_i32_2 : i32, i32, i32, i32, i32
  }
  func.func @transform_1(%arg0: i32, %arg1: i32) -> (i32, i32, i32, i32, i32) {
    %c1_i32 = arith.constant 1 : i32
    %0 = arith.addi %arg1, %c1_i32 : i32
    %c0_i32 = arith.constant 0 : i32
    %c0_i32_0 = arith.constant 0 : i32
    %c0_i32_1 = arith.constant 0 : i32
    %c0_i32_2 = arith.constant 0 : i32
    return %arg0, %0, %c0_i32, %c0_i32_0, %c0_i32_1 : i32, i32, i32, i32, i32
  }
  func.func @transform_2(%arg0: i32, %arg1: i32) -> (i32, i32, i32, i32, i32) {
    %c2_i32 = arith.constant 2 : i32
    %0 = arith.addi %arg1, %c2_i32 : i32
    %c0_i32 = arith.constant 0 : i32
    %c0_i32_0 = arith.constant 0 : i32
    %c0_i32_1 = arith.constant 0 : i32
    %c0_i32_2 = arith.constant 0 : i32
    return %arg0, %0, %c0_i32, %c0_i32_0, %c0_i32_1 : i32, i32, i32, i32, i32
  }
  func.func @transform_3(%arg0: i32, %arg1: i32) -> (i32, i32, i32) {
    %c0_i32 = arith.constant 0 : i32
    %c0_i32_0 = arith.constant 0 : i32
    %c0_i32_1 = arith.constant 0 : i32
    %c0_i32_2 = arith.constant 0 : i32
    return %c0_i32, %c0_i32_0, %c0_i32_1 : i32, i32, i32
  }
  func.func @transform_4(%arg0: i32, %arg1: i32) -> (i32, i32, i32, i32) {
    %c0_i32 = arith.constant 0 : i32
    %c0_i32_0 = arith.constant 0 : i32
    %c0_i32_1 = arith.constant 0 : i32
    return %arg0, %arg1, %c0_i32, %c0_i32_0 : i32, i32, i32, i32
  }
  func.func @transform_5(%arg0: i32, %arg1: i32) -> (i32, i32) {
    %c0_i32 = arith.constant 0 : i32
    %c0_i32_0 = arith.constant 0 : i32
    %c0_i32_1 = arith.constant 0 : i32
    return %c0_i32, %c0_i32_0 : i32, i32
  }
  func.func @transform_6(%arg0: i32, %arg1: i32) -> (i32, i32) {
    %c0_i32 = arith.constant 0 : i32
    %c0_i32_0 = arith.constant 0 : i32
    %c0_i32_1 = arith.constant 0 : i32
    return %c0_i32, %c0_i32_0 : i32, i32
  }
}

module attributes {stable_mosaic.version = 11 : i64} {
  func.func @bn_relu_kernel(%arg0: i32, %arg1: i32, %arg2: memref<1x1x64x128xbf16, #tpu.memory_space<vmem>>, %arg3: memref<1x128xf32, #tpu.memory_space<vmem>>, %arg4: memref<1x128xf32, #tpu.memory_space<vmem>>, %arg5: memref<1x1x64x128xf32, #tpu.memory_space<vmem>>) attributes {dimension_semantics = [#tpu.dimension_semantics<parallel>, #tpu.dimension_semantics<parallel>], iteration_bounds = array<i64: 2, 8>, scalar_prefetch = 0 : i64, scratch_operands = 0 : i64, tpu.core_type = #tpu.core_type<tc>, window_params = [{transform_indices = @transform_0, window_bounds = array<i64: 1, 1, 64, 128>}, {pipeline_mode = #tpu.pipeline_mode<synchronous>, transform_indices = @transform_1, window_bounds = array<i64: 1, 128>}, {pipeline_mode = #tpu.pipeline_mode<synchronous>, transform_indices = @transform_2, window_bounds = array<i64: 1, 128>}, {transform_indices = @transform_3, window_bounds = array<i64: 1, 1, 64, 128>}]} {
    %c0 = arith.constant 0 : index
    %c0_0 = arith.constant 0 : index
    %c0_1 = arith.constant 0 : index
    %c0_2 = arith.constant 0 : index
    %0 = vector.load %arg2[%c0, %c0_0, %c0_1, %c0_2] : memref<1x1x64x128xbf16, #tpu.memory_space<vmem>>, vector<1x1x64x128xbf16>
    %1 = vector.shape_cast %0 : vector<1x1x64x128xbf16> to vector<64x128xbf16>
    %2 = arith.extf %1 : vector<64x128xbf16> to vector<64x128xf32>
    %c0_3 = arith.constant 0 : index
    %c0_4 = arith.constant 0 : index
    %3 = vector.load %arg3[%c0_3, %c0_4] : memref<1x128xf32, #tpu.memory_space<vmem>>, vector<1x128xf32>
    %4 = vector.broadcast %3 : vector<1x128xf32> to vector<64x128xf32>
    %5 = arith.mulf %2, %4 : vector<64x128xf32>
    %c0_5 = arith.constant 0 : index
    %c0_6 = arith.constant 0 : index
    %6 = vector.load %arg4[%c0_5, %c0_6] : memref<1x128xf32, #tpu.memory_space<vmem>>, vector<1x128xf32>
    %7 = vector.broadcast %6 : vector<1x128xf32> to vector<64x128xf32>
    %8 = arith.addf %5, %7 : vector<64x128xf32>
    %cst = arith.constant 0.000000e+00 : f32
    %9 = vector.broadcast %cst : f32 to vector<64x128xf32>
    %10 = arith.maximumf %8, %9 : vector<64x128xf32>
    %c0_7 = arith.constant 0 : index
    %c0_8 = arith.constant 0 : index
    %c0_9 = arith.constant 0 : index
    %c0_10 = arith.constant 0 : index
    %11 = vector.load %arg5[%c0_7, %c0_8, %c0_9, %c0_10] : memref<1x1x64x128xf32, #tpu.memory_space<vmem>>, vector<1x1x64x128xf32>
    %12 = vector.shape_cast %11 : vector<1x1x64x128xf32> to vector<64x128xf32>
    %13 = vector.shape_cast %10 : vector<64x128xf32> to vector<1x1x64x128xf32>
    tpu.vector_store %arg5[%c0_7, %c0_8, %c0_9, %c0_10], %13 {strides = array<i32>} : memref<1x1x64x128xf32, #tpu.memory_space<vmem>>, vector<1x1x64x128xf32>,
    return
  }
  func.func @transform_0(%arg0: i32, %arg1: i32) -> (i32, i32, i32, i32) {
    %c0_i32 = arith.constant 0 : i32
    %c0_i32_0 = arith.constant 0 : i32
    %c0_i32_1 = arith.constant 0 : i32
    return %arg0, %arg1, %c0_i32, %c0_i32_0 : i32, i32, i32, i32
  }
  func.func @transform_1(%arg0: i32, %arg1: i32) -> (i32, i32) {
    %c0_i32 = arith.constant 0 : i32
    %c0_i32_0 = arith.constant 0 : i32
    %c0_i32_1 = arith.constant 0 : i32
    return %c0_i32, %c0_i32_0 : i32, i32
  }
  func.func @transform_2(%arg0: i32, %arg1: i32) -> (i32, i32) {
    %c0_i32 = arith.constant 0 : i32
    %c0_i32_0 = arith.constant 0 : i32
    %c0_i32_1 = arith.constant 0 : i32
    return %c0_i32, %c0_i32_0 : i32, i32
  }
  func.func @transform_3(%arg0: i32, %arg1: i32) -> (i32, i32, i32, i32) {
    %c0_i32 = arith.constant 0 : i32
    %c0_i32_0 = arith.constant 0 : i32
    %c0_i32_1 = arith.constant 0 : i32
    return %arg0, %arg1, %c0_i32, %c0_i32_0 : i32, i32, i32, i32
  }
}

</mosaic_0001>

<bundles_post_ra>
// kernel: double_conv.5
= control target key start
LH: loop header
LB: loop body
LE: loop exit
PB: predicated region body
PF: predicated region fallthrough
CT: control target
= control target key end

     0   :  { %s569_s12 = smov 0   ;;  %s571_s13 = smov 0   ;;  %s633_s0 = inlined_call_operand.vmem [shape: bf16[2,8,64,128], index: 0, kind: input, shape index: {}]   ;;  %s634_s1 = inlined_call_operand.vmem [shape: f32[1,128], index: 1, kind: input, shape index: {}]   ;;  %s635_s2 = inlined_call_operand.vmem [shape: f32[1,128], index: 2, kind: input, shape index: {}]   ;;  %s636_s3 = inlined_call_operand.vmem [shape: bf16[2,8,64,128], index: 3, kind: output, shape index: {}]  }
   0x1   :  { %s573_s14 = smov 0   ;;  %s575_s15 = smov 0  }
   0x2   :  { %s577_s16 = smov 0  }
   0x3 LB: > { %s22_s17 = sadd.s32 1, %s539_s14  ;;  %s25_s18 = sadd.s32 1, %s543_s15  ;;  %s547_s16 = sphi %s577_s16, %s13_s16   ;;  %s543_s15 = sphi %s575_s15, %s640_s15   ;;  %s539_s14 = sphi %s573_s14, %s639_s14   ;;  %s535_s13 = sphi %s571_s13, %s638_s13   ;;  %s531_s12 = sphi %s569_s12, %s637_s12  }
   0x4   : > { %p23_p0 = scmp.ge.s32.totalorder %s22_s17, 8  ;;  %p400_p1 = scmp.ge.s32.totalorder %s547_s16, 1 }
   0x5   : > { %p157_p2 = scmp.lt.s32.totalorder %s547_s16, 17 }
   0x6   : > { %s642_s17 = smov (%p23_p0, %s22_s17), 0  ;;  %s644_s18 = smov (!%p23_p0, %s25_s18), %s543_s15 }
   0x7   : > { %p158_p3 = pnand %p400_p1, %p157_p2  ;;  %p27_p4 = scmp.ge.s32.totalorder %s644_s18, 2 }
   0x8   : > { %p189_p5 = scmp.lt.s32.totalorder (!%p158_p3), %s535_s13, 1  ;;  %p191_p6 = scmp.lt.s32.totalorder (!%p158_p3), %s531_s12, 7  ;;  %v407_v0 = vld [vmem:[%s634_s1] ss:$0 sm:$0xff] (!%p158_p3) }
   0x9   : > { %s646_s18 = smov (%p27_p4, %s644_s18), 0  ;;  %161 = sbr.rel (%p158_p3) target bundleno = 34 (0x22), region = 32 }
   0xa   : > { %v408_v9 = vld [vmem:[%s635_s2] ss:$0 sm:$0xff] (!%p158_p3) }
  0x10   : > { %s648_s13 = smov (!%p189_p5, %s535_s13), 1  ;;  %s650_s12 = smov (!%p191_p6, %s531_s12), 7 }
  0x11   : > { %s402_s19 = sshll.u32 %s648_s13, 6  ;;  %s401_s20 = sshll.u32 %s650_s12, 3 }
  0x12   : > { %s599_s21 = sadd.s32 %s402_s19, %s401_s20 }
  0x13   : > { %s403_s22 = sshll.u32 %s599_s21, 2 }
  0x14   : > { %s197_s25 = scalar_lea.vmem %s633_s0, %s403_s22  ;;  %s206_s5 = scalar_lea.vmem %s636_s3, %s403_s22 }
  0x15   : > { %v428_v1 = vld [vmem:[%s197_s25] sm:$0xff]   ;;  %v463_v2 = vld [vmem:[%s197_s25 + $0x8] sm:$0xff]   ;;  %v464_v3 = vld [vmem:[%s197_s25 + $0x10] sm:$0xff]  }
  0x16   : > { %v429_v4 = vunpack.c.l.bf16 %v428_v1  ;;  %v430_v5 = vunpack.c.h.bf16 %v428_v1  ;;  %v433_v6 = vunpack.c.l.bf16 %v463_v2  ;;  %v434_v7 = vunpack.c.h.bf16 %v463_v2  ;;  %v465_v8 = vld [vmem:[%s197_s25 + $0x18] sm:$0xff]  }
  0x17   : > { %v437_v10 = vunpack.c.l.bf16 %v464_v3  ;;  %v438_v11 = vunpack.c.h.bf16 %v464_v3  ;;  %v441_v12 = vunpack.c.l.bf16 %v465_v8  ;;  %v442_v13 = vunpack.c.h.bf16 %v465_v8 }
  0x18   : > { %v230_v14 = vmul.f32 %v429_v4, %v407_v0  ;;  %v231_v15 = vmul.f32 %v430_v5, %v407_v0  ;;  %v232_v16 = vmul.f32 %v433_v6, %v407_v0  ;;  %v233_v17 = vmul.f32 %v434_v7, %v407_v0 }
  0x19   : > { %v234_v18 = vmul.f32 %v437_v10, %v407_v0  ;;  %v235_v19 = vmul.f32 %v438_v11, %v407_v0  ;;  %v236_v20 = vmul.f32 %v441_v12, %v407_v0  ;;  %v237_v21 = vmul.f32 %v442_v13, %v407_v0 }
  0x1a   : > { %v245_v22 = vadd.f32 %v408_v9, %v230_v14  ;;  %v246_v23 = vadd.f32 %v408_v9, %v231_v15  ;;  %v247_v24 = vadd.f32 %v408_v9, %v232_v16  ;;  %v248_v25 = vadd.f32 %v408_v9, %v233_v17 }
  0x1b   : > { %v249_v26 = vadd.f32 %v408_v9, %v234_v18  ;;  %v250_v27 = vadd.f32 %v408_v9, %v235_v19  ;;  %v251_v28 = vadd.f32 %v408_v9, %v236_v20  ;;  %v252_v29 = vadd.f32 %v408_v9, %v237_v21 }
  0x1c   : > { %v253_v30 = vmax.f32 %v245_v22, 0.0  ;;  %v254_v31 = vmax.f32 %v246_v23, 0.0  ;;  %v255_v32 = vmax.f32 %v247_v24, 0.0  ;;  %v256_v33 = vmax.f32 %v248_v25, 0.0 }
  0x1d   : > { %v257_v34 = vmax.f32 %v249_v26, 0.0  ;;  %v258_v35 = vmax.f32 %v250_v27, 0.0  ;;  %v259_v36 = vmax.f32 %v251_v28, 0.0  ;;  %v260_v37 = vmax.f32 %v252_v29, 0.0 }
  0x1e   : > { %v446_v38 = vpack.c.bf16 %v254_v31, %v253_v30  ;;  %v451_v39 = vpack.c.bf16 %v256_v33, %v255_v32 }
  0x1f   : > { %v456_v40 = vpack.c.bf16 %v258_v35, %v257_v34  ;;  %v461_v41 = vpack.c.bf16 %v260_v37, %v259_v36 }
  0x20   : > { %447 = vst [vmem:[%s206_s5] sm:$0xff] %v446_v38   ;;  %466 = vst [vmem:[%s206_s5 + $0x8] sm:$0xff] %v451_v39  }
  0x21   : > { %467 = vst [vmem:[%s206_s5 + $0x10] sm:$0xff] %v456_v40   ;;  %468 = vst [vmem:[%s206_s5 + $0x18] sm:$0xff] %v461_v41  }
  0x22 PF: > { %s13_s16 = sadd.s32 1, %s547_s16   ;;  %s637_s12 = smov %s539_s14 }
  0x23   : > { %p10_p7 = scmp.ge.s32.totalorder %s13_s16, 18   ;;  %s638_s13 = smov %s543_s15 }
  0x24   : > { %s639_s14 = smov %s642_s17  ;;  %s640_s15 = smov %s646_s18 }
  0x25   :  { %12 = sbr.rel (!%p10_p7) target bundleno = 3 (0x3), region = 62 }

// kernel: double_conv.7
= control target key start
LH: loop header
LB: loop body
LE: loop exit
PB: predicated region body
PF: predicated region fallthrough
CT: control target
= control target key end

     0   :  { %s498_s12 = smov 0   ;;  %s500_s13 = smov 0   ;;  %s559_s0 = inlined_call_operand.vmem [shape: bf16[2,8,64,128], index: 0, kind: input, shape index: {}]   ;;  %s560_s1 = inlined_call_operand.vmem [shape: f32[1,128], index: 1, kind: input, shape index: {}]   ;;  %s561_s2 = inlined_call_operand.vmem [shape: f32[1,128], index: 2, kind: input, shape index: {}]   ;;  %s562_s3 = inlined_call_operand.vmem [shape: f32[2,8,64,128], index: 3, kind: output, shape index: {}]  }
   0x1   :  { %s502_s14 = smov 0   ;;  %s504_s15 = smov 0  }
   0x2   :  { %s506_s16 = smov 0  }
   0x3 LB: > { %s22_s17 = sadd.s32 1, %s468_s14  ;;  %s25_s18 = sadd.s32 1, %s472_s15  ;;  %s476_s16 = sphi %s506_s16, %s13_s16   ;;  %s472_s15 = sphi %s504_s15, %s566_s15   ;;  %s468_s14 = sphi %s502_s14, %s565_s14   ;;  %s464_s13 = sphi %s500_s13, %s564_s13   ;;  %s460_s12 = sphi %s498_s12, %s563_s12  }
   0x4   : > { %p23_p0 = scmp.ge.s32.totalorder %s22_s17, 8  ;;  %p368_p1 = scmp.ge.s32.totalorder %s476_s16, 1 }
   0x5   : > { %p157_p2 = scmp.lt.s32.totalorder %s476_s16, 17 }
   0x6   : > { %s568_s17 = smov (%p23_p0, %s22_s17), 0  ;;  %s570_s18 = smov (!%p23_p0, %s25_s18), %s472_s15 }
   0x7   : > { %p158_p3 = pnand %p368_p1, %p157_p2  ;;  %p27_p4 = scmp.ge.s32.totalorder %s570_s18, 2 }
   0x8   : > { %p189_p5 = scmp.lt.s32.totalorder (!%p158_p3), %s464_s13, 1  ;;  %p191_p6 = scmp.lt.s32.totalorder (!%p158_p3), %s460_s12, 7  ;;  %v375_v0 = vld [vmem:[%s560_s1] ss:$0 sm:$0xff] (!%p158_p3) }
   0x9   : > { %s572_s18 = smov (%p27_p4, %s570_s18), 0  ;;  %161 = sbr.rel (%p158_p3) target bundleno = 34 (0x22), region = 32 }
   0xa   : > { %v376_v9 = vld [vmem:[%s561_s2] ss:$0 sm:$0xff] (!%p158_p3) }
  0x10   : > { %s574_s13 = smov (!%p189_p5, %s464_s13), 1  ;;  %s576_s12 = smov (!%p191_p6, %s460_s12), 7 }
  0x11   : > { %s370_s19 = sshll.u32 %s574_s13, 6  ;;  %s369_s20 = sshll.u32 %s576_s12, 3 }
  0x12   : > { %s528_s21 = sadd.s32 %s370_s19, %s369_s20 }
  0x13   : > { %s371_s22 = sshll.u32 %s528_s21, 2  ;;  %s374_s30 = sshll.u32 %s528_s21, 3 }
  0x14   : > { %s197_s25 = scalar_lea.vmem %s559_s0, %s371_s22  ;;  %s206_s6 = scalar_lea.vmem %s562_s3, %s374_s30 }
  0x15   : > { %v380_v1 = vld [vmem:[%s197_s25] sm:$0xff]   ;;  %v395_v2 = vld [vmem:[%s197_s25 + $0x8] sm:$0xff]   ;;  %v396_v3 = vld [vmem:[%s197_s25 + $0x10] sm:$0xff]  }
  0x16   : > { %v381_v4 = vunpack.c.l.bf16 %v380_v1  ;;  %v382_v5 = vunpack.c.h.bf16 %v380_v1  ;;  %v385_v6 = vunpack.c.l.bf16 %v395_v2  ;;  %v386_v7 = vunpack.c.h.bf16 %v395_v2  ;;  %v397_v8 = vld [vmem:[%s197_s25 + $0x18] sm:$0xff]  }
  0x17   : > { %v389_v10 = vunpack.c.l.bf16 %v396_v3  ;;  %v390_v11 = vunpack.c.h.bf16 %v396_v3  ;;  %v393_v12 = vunpack.c.l.bf16 %v397_v8  ;;  %v394_v13 = vunpack.c.h.bf16 %v397_v8 }
  0x18   : > { %v230_v14 = vmul.f32 %v381_v4, %v375_v0  ;;  %v231_v15 = vmul.f32 %v382_v5, %v375_v0  ;;  %v232_v16 = vmul.f32 %v385_v6, %v375_v0  ;;  %v233_v17 = vmul.f32 %v386_v7, %v375_v0 }
  0x19   : > { %v234_v18 = vmul.f32 %v389_v10, %v375_v0  ;;  %v235_v19 = vmul.f32 %v390_v11, %v375_v0  ;;  %v236_v20 = vmul.f32 %v393_v12, %v375_v0  ;;  %v237_v21 = vmul.f32 %v394_v13, %v375_v0 }
  0x1a   : > { %v245_v22 = vadd.f32 %v376_v9, %v230_v14  ;;  %v246_v23 = vadd.f32 %v376_v9, %v231_v15  ;;  %v247_v24 = vadd.f32 %v376_v9, %v232_v16  ;;  %v248_v25 = vadd.f32 %v376_v9, %v233_v17 }
  0x1b   : > { %v249_v26 = vadd.f32 %v376_v9, %v234_v18  ;;  %v250_v27 = vadd.f32 %v376_v9, %v235_v19  ;;  %v251_v28 = vadd.f32 %v376_v9, %v236_v20  ;;  %v252_v29 = vadd.f32 %v376_v9, %v237_v21 }
  0x1c   : > { %v253_v30 = vmax.f32 %v245_v22, 0.0  ;;  %v254_v31 = vmax.f32 %v246_v23, 0.0  ;;  %v255_v32 = vmax.f32 %v247_v24, 0.0  ;;  %v256_v33 = vmax.f32 %v248_v25, 0.0 }
  0x1d   : > { %v257_v34 = vmax.f32 %v249_v26, 0.0  ;;  %v258_v35 = vmax.f32 %v250_v27, 0.0  ;;  %v259_v36 = vmax.f32 %v251_v28, 0.0  ;;  %v260_v37 = vmax.f32 %v252_v29, 0.0 }
  0x1e   : > { %261 = vst [vmem:[%s206_s6] sm:$0xff] %v253_v30  ;;  %262 = vst [vmem:[%s206_s6 + $0x8] sm:$0xff] %v254_v31 }
  0x1f   : > { %263 = vst [vmem:[%s206_s6 + $0x10] sm:$0xff] %v255_v32  ;;  %264 = vst [vmem:[%s206_s6 + $0x18] sm:$0xff] %v256_v33 }
  0x20   : > { %265 = vst [vmem:[%s206_s6 + $0x20] sm:$0xff] %v257_v34  ;;  %266 = vst [vmem:[%s206_s6 + $0x28] sm:$0xff] %v258_v35 }
  0x21   : > { %267 = vst [vmem:[%s206_s6 + $0x30] sm:$0xff] %v259_v36  ;;  %268 = vst [vmem:[%s206_s6 + $0x38] sm:$0xff] %v260_v37 }
  0x22 PF: > { %s13_s16 = sadd.s32 1, %s476_s16   ;;  %s563_s12 = smov %s468_s14 }
  0x23   : > { %p10_p7 = scmp.ge.s32.totalorder %s13_s16, 18   ;;  %s564_s13 = smov %s472_s15 }
  0x24   : > { %s565_s14 = smov %s568_s17  ;;  %s566_s15 = smov %s572_s18 }
  0x25   :  { %12 = sbr.rel (!%p10_p7) target bundleno = 3 (0x3), region = 62 }

// kernel: double_conv.4
= control target key start
LH: loop header
LB: loop body
LE: loop exit
PB: predicated region body
PF: predicated region fallthrough
CT: control target
= control target key end

     0   :  { %s6508_s21 = smov 0   ;;  %s6510_s22 = smov 0   ;;  %s7980_s0 = inlined_call_operand.vmem [shape: bf16[2,10,10,10,4], index: 0, kind: input, shape index: {}, may-alias: {0,1,2}]   ;;  %s7981_s1 = inlined_call_operand.vmem [shape: bf16[2,10,10,10,4], index: 1, kind: input, shape index: {}, may-alias: {0,1,2}]   ;;  %s7982_s2 = inlined_call_operand.vmem [shape: bf16[2,10,10,10,4], index: 2, kind: input, shape index: {}, may-alias: {0,1,2}]   ;;  %s7983_s3 = inlined_call_operand.vmem [shape: bf16[27,4,128], index: 3, kind: input, shape index: {}]   ;;  %s7984_s4 = inlined_call_operand.vmem [shape: bf16[2,8,64,128], index: 4, kind: output, shape index: {0}]   ;;  %s7985_s5 = inlined_call_operand.vmem [shape: f32[1,128], index: 5, kind: output, shape index: {1}]   ;;  %s7986_s6 = inlined_call_operand.vmem [shape: f32[1,128], index: 6, kind: output, shape index: {2}]  }
   0x1   :  { %s6512_s23 = smov 0   ;;  %s6514_s24 = smov 0  }
   0x2   :  { %s6516_s25 = smov 0  }
   0x3 LB: > { %s26_s26 = sadd.s32 1, %s6463_s23  ;;  %s29_s27 = sadd.s32 1, %s6467_s24  ;;  %s6471_s25 = sphi %s6516_s25, %s17_s25   ;;  %s6467_s24 = sphi %s6514_s24, %s7999_s24   ;;  %s6463_s23 = sphi %s6512_s23, %s7998_s23   ;;  %s6459_s22 = sphi %s6510_s22, %s7997_s22   ;;  %s6455_s21 = sphi %s6508_s21, %s7996_s21  }
   0x4   : > { %p27_p0 = scmp.ge.s32.totalorder %s26_s26, 8  ;;  %p5153_p1 = scmp.ge.s32.totalorder %s6471_s25, 1 }
   0x5   : > { %p267_p2 = scmp.lt.s32.totalorder %s6471_s25, 17 }
   0x6   : > { %s8001_s26 = smov (%p27_p0, %s26_s26), 0  ;;  %s8003_s27 = smov (!%p27_p0, %s29_s27), %s6467_s24 }
   0x7   : > { %p268_p3 = pnand %p5153_p1, %p267_p2  ;;  %p31_p4 = scmp.ge.s32.totalorder %s8003_s27, 2 }
   0x8   : > { %v5160_v0 = vld [vmem:[%s7983_s3 + $0x2] sm:$0x3] (!%p268_p3)  ;;  %vm525_vm0 = vcmask (!%p268_p3), 1041408   ;;  %v5396_v1 = vld [vmem:[%s7983_s3 + $0x1a] sm:$0x3] (!%p268_p3)  ;;  %p325_p5 = scmp.lt.s32.totalorder (!%p268_p3), %s6459_s22, 1 }
   0x9   : > { %s8005_s27 = smov (%p31_p4, %s8003_s27), 0  ;;  %271 = sbr.rel (%p268_p3) target bundleno = 521 (0x209), region = 36 }
   0xa   : > { %6322 = vmatprep.subr.msk.bf16.mxu1 (!%p268_p3), %vm525_vm0, %v5160_v0  ;;  %6335 = vmatprep.subr.msk.bf16.mxu0 (!%p268_p3), %vm525_vm0, %v5396_v1  ;;  %v527_v2 = vsel (!%p268_p3), %vm525_vm0, %v5160_v0, 0  ;;  %v6553_v3 = vsel (!%p268_p3), %vm525_vm0, %v5396_v1, 0  ;;  %p327_p6 = scmp.lt.s32.totalorder (!%p268_p3), %s6455_s21, 9  ;;  %s334_s8 = sadd.s32 (!%p268_p3), 1, %s6455_s21  ;;  %v374_v4 = vld [vmem:[%s7983_s3] sm:$0x3] (!%p268_p3) }
   0xb   : > { %5843 = vmatpush3.bf16.msra.mxu1 (!%p268_p3), %v527_v2  ;;  %5973 = vmatpush3.bf16.msra.mxu0 (!%p268_p3), %v6553_v3  ;;  %v5421_v5 = vld [vmem:[%s7983_s3 + $0x1c] sm:$0x3] (!%p268_p3)  ;;  %p337_p7 = scmp.lt.s32.totalorder (!%p268_p3), %s334_s8, 9  ;;  %v6576_v6 = vld [vmem:[%s7983_s3 + $0x1e] sm:$0x3] (!%p268_p3)  ;;  %v6590_v9 = vsel (!%p268_p3), %vm525_vm0, %v374_v4, 0 }
   0xc   : > { %6323 = vmatprep.subr.msk.bf16.mxu1 (!%p268_p3), %vm525_vm0, %v374_v4  ;;  %6337 = vmatprep.subr.msk.bf16.mxu0 (!%p268_p3), %vm525_vm0, %v5421_v5  ;;  %v6581_v7 = vld [vmem:[%s7983_s3 + $0x4] sm:$0x3] (!%p268_p3)  ;;  %v6586_v8 = vld [vmem:[%s7983_s3 + $0x20] sm:$0x3] (!%p268_p3)  ;;  %vm383_vm1 = vsmask.f32 (!%p268_p3), 3328 }
   0xd   : > { %vm384_vm2 = vsmask.f32 (!%p268_p3), 7440  ;;  %v6593_v10 = vsel (!%p268_p3), %vm525_vm0, %v5421_v5, 0  ;;  %v6597_v11 = vsel (!%p268_p3), %vm525_vm0, %v6576_v6, 0  ;;  %v6602_v12 = vld [vmem:[%s7983_s3 + $0x6] sm:$0x3] (!%p268_p3) }
   0xe   : > { %v6611_v13 = vsel (!%p268_p3), %vm525_vm0, %v6581_v7, 0  ;;  %v6615_v14 = vsel (!%p268_p3), %vm525_vm0, %v6586_v8, 0  ;;  %v6620_v15 = vld [vmem:[%s7983_s3 + $0x22] sm:$0x3] (!%p268_p3)  ;;  %v6625_v16 = vld [vmem:[%s7983_s3 + $0x8] sm:$0x3] (!%p268_p3)  ;;  %vm6679_vm4 = vmor (!%p268_p3), %vm383_vm1, %vm384_vm2 }
   0xf   : > { %vm512_vm3 = vcmask (!%p268_p3), 31744   ;;  %v6651_v28 = vsel (!%p268_p3), %vm525_vm0, %v6602_v12, 0  ;;  %v6655_v31 = vsel (!%p268_p3), %vm525_vm0, %v6620_v15, 0  ;;  %v6659_v32 = vsel (!%p268_p3), %vm525_vm0, %v6625_v16, 0  ;;  %p4983_p9 = scmp.eq.s32.totalorder (!%p268_p3), %s6459_s22, 0  ;;  %p4984_p10 = scmp.eq.s32.totalorder (!%p268_p3), %s6455_s21, 0 }
  0x10   : > { %s6559_s9 = scalar_select %p325_p5, %s6459_s22, 1  ;;  %vm718_vm5 = vcmask 1042432   ;;  %vm719_vm6 = vcmask 1046532  }
  0x11   : > { %s328_s12 = scalar_select %p327_p6, %s6455_s21, 9  ;;  %vm6779_vm7 = vmor %vm718_vm5, %vm719_vm6 }
  0x12   : > { %s6570_s15 = smul.u32 200, %s6559_s9  ;;  %s8007_s8 = smov (!%p337_p7, %s334_s8), 9 }
  0x13   : > { %s6350_s16 = smul.u32 20, %s328_s12  ;;  %p7927_p11 = pnand %p4984_p10, %p4983_p9 }
  0x14   : > { %s6352_s10 = smul.u32 20, %s8007_s8  ;;  %p358_p12 = scmp.lt.s32.totalorder %s6455_s21, 7 }
  0x15   : > { %s331_s30 = sadd.s32 %s6570_s15, %s6350_s16 }
  0x16   : > { %s5154_s7 = sshll.u32 %s331_s30, 2  ;;  %s341_s20 = sadd.s32 %s6352_s10, %s6570_s15 }
  0x17   : > { %s6607_s16 = scalar_lea.vmem %s7980_s0, %s5154_s7  ;;  %s5155_s28 = sshll.u32 %s341_s20, 2 }
  0x18   : > { %v6629_v17 = vld [vmem:[%s6607_s16] sm:$0xf]  ;;  %v6632_v18 = vld [vmem:[%s6607_s16 + $0x8] sm:$0xf]  ;;  %v6635_v19 = vld [vmem:[%s6607_s16 + $0x4] sm:$0x1]  ;;  %s6664_s7 = scalar_lea.vmem %s7981_s1, %s5155_s28 }
  0x19   : > { %v6638_v20 = vld [vmem:[%s6607_s16 + $0xc] sm:$0x1]  ;;  %v387_v21 = vshrl.u32 %v6629_v17, 16  ;;  %v390_v22 = vshll.u32 %v6629_v17, 16  ;;  %v396_v23 = vshll.u32 %v6635_v19, 16  ;;  %v401_v24 = vshrl.u32 %v6632_v18, 16 }
  0x1a   : > { %v404_v25 = vshll.u32 %v6632_v18, 16  ;;  %v410_v26 = vshll.u32 %v6638_v20, 16  ;;  %v6647_v27 = vld [vmem:[%s6607_s16 + $0x10] sm:$0xf]  ;;  %v6667_v36 = vld [vmem:[%s6607_s16 + $0x18] sm:$0xf] }
  0x1b   : > { %v389_v29 = vrot.slane %v387_v21, 4  ;;  %v392_v30 = vrot.slane %v390_v22, 5  ;;  %v398_v33 = vrot.slane %v396_v23, 5  ;;  %v403_v34 = vrot.slane %v401_v24, 4  ;;  %v6671_v40 = vld [vmem:[%s6607_s16 + $0x14] sm:$0x1] }
  0x1c   : > { %v406_v35 = vrot.slane %v404_v25, 5  ;;  %v415_v37 = vshrl.u32 %v6647_v27, 16  ;;  %v412_v39 = vrot.slane %v410_v26, 5  ;;  %v6674_v41 = vld [vmem:[%s6607_s16 + $0x1c] sm:$0x1]  ;;  %v418_v42 = vshll.u32 %v6647_v27, 16 }
  0x1d   : > { %v393_v38 = vor.u32 %v392_v30, %v389_v29  ;;  %v424_v46 = vshll.u32 %v6671_v40, 16  ;;  %v429_v47 = vshrl.u32 %v6667_v36, 16  ;;  %v432_v50 = vshll.u32 %v6667_v36, 16  ;;  %v5380_v52 = vld [vmem:[%s6664_s7 + $0x8] sm:$0xf]  ;;  %s345_s10 = sadd.s32 2, %s6455_s21 }
  0x1e   : > { %v407_v44 = vor.u32 %v406_v35, %v403_v34  ;;  %v417_v45 = vrot.slane %v415_v37, 4  ;;  %v420_v49 = vrot.slane %v418_v42, 5  ;;  %v438_v51 = vshll.u32 %v6674_v41, 16  ;;  %v6691_v57 = vld [vmem:[%s6664_s7 + $0xc] sm:$0x1]  ;;  %p6959_p8 = scmp.lt.s32.totalorder %s345_s10, 9 }
  0x1f   : > { %v394_v48 = vrot.slane %v393_v38, 4  ;;  %v431_v56 = vrot.slane %v429_v47, 4  ;;  %v426_v60 = vrot.slane %v424_v46, 5  ;;  %v434_v61 = vrot.slane %v432_v50, 5  ;;  %v5382_v62 = vld [vmem:[%s6664_s7 + $0x10] sm:$0xf] }
  0x20   : > { %v408_v53 = vrot.slane %v407_v44, 4  ;;  %v421_v59 = vor.u32 %v420_v49, %v417_v45  ;;  %v440_v0 = vrot.slane %v438_v51, 5  ;;  %v6699_v1 = vld [vmem:[%s6664_s7 + $0x14] sm:$0x1]  ;;  %v2511_v2 = vshrl.u32 %v5380_v52, 16  ;;  %s8009_s10 = smov (!%p6959_p8, %s345_s10), 9 }
  0x21   : > { %v399_v58 = vsel %vm6679_vm4, %v394_v48, %v398_v33  ;;  %v2514_v4 = vshll.u32 %v5380_v52, 16  ;;  %v435_v22 = vor.u32 %v434_v61, %v431_v56  ;;  %v2520_v23 = vshll.u32 %v6691_v57, 16  ;;  %v5384_v30 = vld [vmem:[%s6664_s7 + $0x18] sm:$0xf]  ;;  %v6708_v38 = vld [vmem:[%s6664_s7 + $0x1c] sm:$0x1] }
  0x22   : > { %v413_v63 = vsel %vm6679_vm4, %v408_v53, %v412_v39  ;;  %v422_v21 = vrot.slane %v421_v59, 4  ;;  %v2513_v24 = vrot.slane %v2511_v2, 4  ;;  %v2525_v26 = vshrl.u32 %v5382_v62, 16  ;;  %v5386_v46 = vld [vmem:[%s6664_s7 + $0x20] sm:$0xf]  ;;  %s6353_s12 = smul.u32 20, %s8009_s10 }
  0x23   : > { %v5161_v5 = vcombine.low %v399_v58, %v413_v63  ;;  %v2516_v25 = vrot.slane %v2514_v4, 5  ;;  %v2528_v29 = vshll.u32 %v5382_v62, 16  ;;  %v436_v34 = vrot.slane %v435_v22, 4  ;;  %v6716_v50 = vld [vmem:[%s6664_s7 + $0x24] sm:$0x1]  ;;  %s8011_s21 = smov (!%p358_p12, %s6455_s21), 7 }
  0x24   : > { %v427_v33 = vsel %vm6679_vm4, %v422_v21, %v426_v60  ;;  %v2522_v35 = vrot.slane %v2520_v23, 5  ;;  %v2534_v37 = vshll.u32 %v6699_v1, 16  ;;  %v2527_v42 = vrot.slane %v2525_v26, 4  ;;  %v6720_v63 = vld [vmem:[%s6607_s16 + $0x20] sm:$0xf]  ;;  %s7074_s8 = sadd.s32 %s6353_s12, %s6570_s15  ;;  %s5158_s12 = sshll.u32 %s6559_s9, 6 }
  0x25   : > { %5844 = vmatprep.mubr.msk.bf16.mxu1 %vm512_vm3, %v5161_v5  ;;  %v2517_v39 = vor.u32 %v2516_v25, %v2513_v24  ;;  %v2530_v44 = vrot.slane %v2528_v29, 5  ;;  %v2750_v45 = vrot.slane %v6691_v57, 5  ;;  %v441_v47 = vsel %vm6679_vm4, %v436_v34, %v440_v0  ;;  %v6727_v21 = vld [vmem:[%s6607_s16 + $0x28] sm:$0xf]  ;;  %v6732_v26 = vld [vmem:[%s6607_s16 + $0x24] sm:$0x1] }
  0x26   : > { %v2536_v48 = vrot.slane %v2534_v37, 5  ;;  %v2754_v49 = vrot.slane %v6699_v1, 5  ;;  %v2539_v51 = vshrl.u32 %v5384_v30, 16  ;;  %v5162_v52 = vcombine.low %v427_v33, %v441_v47  ;;  %v5391_v54 = vld [vmem:[%s6664_s7 + $0x34] sm:$0x1]  ;;  %s5156_s18 = sshll.u32 %s7074_s8, 2 }
  0x27   : > { %v2518_v53 = vrot.slane %v2517_v39, 4  ;;  %v2531_v56 = vor.u32 %v2530_v44, %v2527_v42  ;;  %v2542_v58 = vshll.u32 %v5384_v30, 16  ;;  %v2548_v60 = vshll.u32 %v6708_v38, 16  ;;  %s7111_s28 = scalar_lea.vmem %s7982_s2, %s5156_s18 }
  0x28   : > { %v2541_v59 = vrot.slane %v2539_v51, 4  ;;  %v2553_v61 = vshrl.u32 %v5386_v46, 16  ;;  %v2556_v62 = vshll.u32 %v5386_v46, 16  ;;  %5845 = vmatmul.mubr.msk.bf16.vlgmr.msra.gmra.mrb[0].mxu1 %vm512_vm3, %v5162_v52  ;;  %v2562_v5 = vshll.u32 %v6716_v50, 16  ;;  %v6748_v51 = vld [vmem:[%s6607_s16 + $0x30] sm:$0xf] }
  0x29   : > { %v2523_v0 = vsel %vm6679_vm4, %v2518_v53, %v2522_v35  ;;  %v2532_v2 = vrot.slane %v2531_v56, 4  ;;  %v2544_v4 = vrot.slane %v2542_v58, 5  ;;  %5853 = vmatpush3.bf16.msra.mxu1 %v6590_v9  ;;  %v2550_v22 = vrot.slane %v2548_v60, 5  ;;  %v6738_v35 = vld [vmem:[%s6607_s16 + $0x2c] sm:$0x1] }
  0x2a   : > { %v2555_v23 = vrot.slane %v2553_v61, 4  ;;  %v2558_v24 = vrot.slane %v2556_v62, 5  ;;  %v2758_v25 = vrot.slane %v6708_v38, 5  ;;  %v2564_v33 = vrot.slane %v2562_v5, 5  ;;  %6324 = vmatprep.subr.msk.bf16.mxu1 %vm525_vm0, %v6581_v7  ;;  %v6753_v58 = vld [vmem:[%s6607_s16 + $0x34] sm:$0x1] }
  0x2b   : > { %v2537_v29 = vsel %vm6679_vm4, %v2532_v2, %v2536_v48  ;;  %v2545_v30 = vor.u32 %v2544_v4, %v2541_v59  ;;  %v443_v39 = vshrl.u32 %v6720_v63, 16  ;;  %v446_v42 = vshll.u32 %v6720_v63, 16 }
  0x2c   : > { %v5397_v9 = vcombine.low %v2523_v0, %v2537_v29  ;;  %v2559_v37 = vor.u32 %v2558_v24, %v2555_v23  ;;  %v452_v46 = vshll.u32 %v6732_v26, 16  ;;  %v457_v47 = vshrl.u32 %v6727_v21, 16  ;;  %v6758_v0 = vld [vmem:[%s6607_s16 + $0x38] sm:$0xf]  ;;  %v6763_v23 = vld [vmem:[%s6607_s16 + $0x3c] sm:$0x1] }
  0x2d   : > { %v2546_v44 = vrot.slane %v2545_v30, 4  ;;  %v460_v48 = vshll.u32 %v6727_v21, 16  ;;  %v445_v52 = vrot.slane %v443_v39, 4  ;;  %v448_v53 = vrot.slane %v446_v42, 5  ;;  %v5405_v29 = vld [vmem:[%s6664_s7 + $0x8] sm:$0xe] }
  0x2e   : > { %5974 = vmatprep.mubr.msk.bf16.mxu0 %vm512_vm3, %v5397_v9  ;;  %v2560_v7 = vrot.slane %v2559_v37, 4  ;;  %v466_v56 = vshll.u32 %v6738_v35, 16  ;;  %v454_v60 = vrot.slane %v452_v46, 5  ;;  %v459_v61 = vrot.slane %v457_v47, 4  ;;  %v5406_v39 = vld [vmem:[%s6664_s7 + $0x10] sm:$0xe] }
  0x2f   : > { %v2551_v59 = vsel %vm6679_vm4, %v2546_v44, %v2550_v22  ;;  %v462_v62 = vrot.slane %v460_v48, 5  ;;  %v449_v4 = vor.u32 %v448_v53, %v445_v52  ;;  %v471_v24 = vshrl.u32 %v6748_v51, 16  ;;  %v5407_v42 = vld [vmem:[%s6664_s7 + $0x18] sm:$0xe]  ;;  %v5408_v48 = vld [vmem:[%s6664_s7 + $0x20] sm:$0xe] }
  0x30   : > { %v2565_v2 = vsel %vm6679_vm4, %v2560_v7, %v2564_v33  ;;  %v468_v5 = vrot.slane %v466_v56, 5  ;;  %v474_v9 = vshll.u32 %v6748_v51, 16  ;;  %v480_v37 = vshll.u32 %v6753_v58, 16  ;;  %v5409_v7 = vld [vmem:[%s6664_s7 + $0x28] sm:$0xe] }
  0x31   : > { %v5398_v30 = vcombine.low %v2551_v59, %v2565_v2  ;;  %v463_v22 = vor.u32 %v462_v62, %v459_v61  ;;  %v450_v44 = vrot.slane %v449_v4, 4  ;;  %v473_v33 = vrot.slane %v471_v24, 4  ;;  %v5389_v62 = vld [vmem:[%s6664_s7 + $0x2c] sm:$0x1] }
  0x32   : > { %v485_v46 = vshrl.u32 %v6758_v0, 16  ;;  %v488_v47 = vshll.u32 %v6758_v0, 16  ;;  %v476_v53 = vrot.slane %v474_v9, 5  ;;  %v482_v56 = vrot.slane %v480_v37, 5 }
  0x33   : > { %5975 = vmatmul.mubr.msk.bf16.vlgmr.msra.gmra.mrb[0].mxu0 %vm512_vm3, %v5398_v30  ;;  %v464_v52 = vrot.slane %v463_v22, 4  ;;  %v494_v59 = vshll.u32 %v6763_v23, 16  ;;  %v455_v2 = vsel %vm6679_vm4, %v450_v44, %v454_v60  ;;  %v5413_v30 = vrot.slane %v5405_v29, 9  ;;  %v5410_v44 = vld [vmem:[%s6664_s7 + $0x30] sm:$0xe] }
  0x34   : > { %5983 = vmatpush3.bf16.msra.mxu0 %v6593_v10  ;;  %v487_v4 = vrot.slane %v485_v46, 4  ;;  %v490_v24 = vrot.slane %v488_v47, 5  ;;  %v477_v9 = vor.u32 %v476_v53, %v473_v33  ;;  %v5414_v55 = vrot.slane %v5406_v39, 9  ;;  %v6802_v46 = vld [vmem:[%s6664_s7 + $0x3c] sm:$0x1] }
  0x35   : > { %v469_v22 = vsel %vm6679_vm4, %v464_v52, %v468_v5  ;;  %v496_v37 = vrot.slane %v494_v59, 5  ;;  %6338 = vmatprep.subr.msk.bf16.mxu0 %vm525_vm0, %v6576_v6  ;;  %v2751_v60 = vsel %vm6779_vm7, %v5413_v30, %v2750_v45  ;;  %v5415_v29 = vrot.slane %v5407_v42, 9  ;;  %v6810_v42 = vld [vmem:[%s6664_s7 + $0x44] sm:$0x1]  ;;  %v694_v53 = vld [vmem:[%s6607_s16] sm:$0xe] }
  0x36   : > { %v5163_v34 = vcombine.low %v455_v2, %v469_v22  ;;  %v491_v10 = vor.u32 %v490_v24, %v487_v4  ;;  %v478_v5 = vrot.slane %v477_v9, 4  ;;  %v2755_v39 = vsel %vm6779_vm7, %v5414_v55, %v2754_v49  ;;  %v5411_v55 = vld [vmem:[%s6664_s7 + $0x38] sm:$0xe]  ;;  %v5412_v49 = vld [vmem:[%s6664_s7 + $0x40] sm:$0xe] }
  0x37   : > { %v5416_v6 = vrot.slane %v5408_v48, 9  ;;  %v5417_v33 = vrot.slane %v5409_v7, 9  ;;  %v5422_v47 = vcombine.low %v2751_v60, %v2755_v39  ;;  %v2759_v45 = vsel %vm6779_vm7, %v5415_v29, %v2758_v25  ;;  %v696_v2 = vld [vmem:[%s6607_s16 + $0x10] sm:$0xe]  ;;  %v698_v29 = vld [vmem:[%s6607_s16 + $0x20] sm:$0xe] }
  0x38   : > { %5848 = vmatprep.mubr.msk.bf16.mxu1 %vm512_vm3, %v5163_v34  ;;  %v492_v57 = vrot.slane %v491_v10, 4  ;;  %v2766_v1 = vrot.slane %v5389_v62, 5  ;;  %v483_v48 = vsel %vm6679_vm4, %v478_v5, %v482_v56  ;;  %v7991_v7 = vrot.slane %v6716_v50, 5  ;;  %v695_v62 = vld [vmem:[%s6607_s16 + $0x8] sm:$0xe] }
  0x39   : > { %v5418_v52 = vrot.slane %v5410_v44, 9  ;;  %v2770_v38 = vrot.slane %v5391_v54, 5  ;;  %5984 = vmatprep.mubr.msk.bf16.mxu0 %vm512_vm3, %v5422_v47  ;;  %v5169_v59 = vcombine.low %v6629_v17, %v6632_v18  ;;  %v5170_v56 = vcombine.low %v6647_v27, %v6667_v36  ;;  %v697_v27 = vld [vmem:[%s6607_s16 + $0x18] sm:$0xe]  ;;  %v699_v39 = vld [vmem:[%s6607_s16 + $0x28] sm:$0xe] }
  0x3a   : > { %v2763_v34 = vsel %vm6779_vm7, %v5416_v6, %v7991_v7  ;;  %v497_v25 = vsel %vm6679_vm4, %v492_v57, %v496_v37  ;;  %v2767_v50 = vsel %vm6779_vm7, %v5417_v33, %v2766_v1  ;;  %v5419_v30 = vrot.slane %v5411_v55, 9  ;;  %v701_v7 = vld [vmem:[%s6607_s16 + $0x38] sm:$0xe] }
  0x3b   : > { %v5164_v54 = vcombine.low %v483_v48, %v497_v25  ;;  %v5423_v4 = vcombine.low %v2759_v45, %v2763_v34  ;;  %v2771_v24 = vsel %vm6779_vm7, %v5418_v52, %v2770_v38  ;;  %v731_v22 = vrot.slane %v6671_v40, 5  ;;  %v700_v45 = vld [vmem:[%s6607_s16 + $0x30] sm:$0xe]  ;;  %v6883_v38 = vld [vmem:[%s6664_s7 + $0x14] sm:$0x1] }
  0x3c   : > { %v5424_v9 = vcombine.low %v2767_v50, %v2771_v24  ;;  %v2774_v17 = vrot.slane %v6802_v46, 5  ;;  %v5420_v18 = vrot.slane %v5412_v49, 9  ;;  %v735_v36 = vrot.slane %v6674_v41, 5 }
  0x3d   : > { %5849 = vmatmul.mubr.msk.bf16.gmra.mrb[4].mxu1 %vm512_vm3, %v5164_v54  ;;  %v2604_v37 = vshll.u32 %v6802_v46, 16  ;;  %v2618_v10 = vshll.u32 %v6810_v42, 16  ;;  %v2778_v60 = vrot.slane %v6810_v42, 5  ;;  %v5177_v44 = vrot.slane %v694_v53, 9  ;;  %v5449_v53 = vld [vmem:[%s6664_s7 + $0x18] sm:$0xf] }
  0x3e   : > { %5854 = vmatprep.mubr.msk.bf16.mxu1 %vm512_vm3, %v5169_v59  ;;  %v2775_v40 = vsel %vm6779_vm7, %v5419_v30, %v2774_v17  ;;  %v5178_v5 = vrot.slane %v695_v62, 9  ;;  %v5179_v41 = vrot.slane %v696_v2, 9  ;;  %v5171_v33 = vcombine.low %v6720_v63, %v6727_v21  ;;  %v6892_v62 = vld [vmem:[%s6664_s7 + $0x1c] sm:$0x1]  ;;  %v5451_v30 = vld [vmem:[%s6664_s7 + $0x20] sm:$0xf] }
  0x3f   : > { %5985 = vmatmul.mubr.msk.bf16.vlgmr.msra.gmra.mrb[0].mxu0 %vm512_vm3, %v5423_v4  ;;  %v2779_v6 = vsel %vm6779_vm7, %v5420_v18, %v2778_v60  ;;  %v5172_v57 = vcombine.low %v6748_v51, %v6758_v0  ;;  %v5180_v47 = vrot.slane %v697_v27, 9  ;;  %v7992_v1 = vrot.slane %v6635_v19, 5  ;;  %v5453_v60 = vld [vmem:[%s6664_s7 + $0x28] sm:$0xf] }
  0x40   : > { %5993 = vmatpush3.bf16.msra.mxu0 %v6597_v11  ;;  %5988 = vmatprep.mubr.msk.bf16.mxu0 %vm512_vm3, %v5424_v9  ;;  %v7993_v63 = vrot.slane %v6638_v20, 5  ;;  %v5181_v49 = vrot.slane %v698_v29, 9  ;;  %v739_v48 = vrot.slane %v6732_v26, 5  ;;  %v5447_v11 = vld [vmem:[%s6664_s7 + $0x10] sm:$0xf]  ;;  %v5425_v34 = vcombine.low %v2775_v40, %v2779_v6 }
  0x41   : > { %v6861_v55 = vsel %vm6779_vm7, %v5177_v44, %v7992_v1  ;;  %6339 = vmatprep.subr.msk.bf16.mxu0 %vm525_vm0, %v6586_v8  ;;  %v6876_v19 = vsel %vm6779_vm7, %v5179_v41, %v731_v22  ;;  %v6880_v20 = vsel %vm6779_vm7, %v5180_v47, %v735_v36  ;;  %v5182_v52 = vrot.slane %v699_v39, 9  ;;  %v6398_v26 = vld [vmem:[%s6664_s7 + $0x10] ss:$8 sps:$4 sm:$0xff]  }
  0x42   : > { %v6867_v21 = vsel %vm6779_vm7, %v5178_v5, %v7993_v63  ;;  %v743_v8 = vrot.slane %v6738_v35, 5  ;;  %v5183_v59 = vrot.slane %v700_v45, 9  ;;  %v747_v50 = vrot.slane %v6753_v58, 5  ;;  %v6904_v58 = vld [vmem:[%s6664_s7 + $0x24] sm:$0x1] }
  0x43   : > { %v5186_v25 = vcombine.low %v6861_v55, %v6867_v21  ;;  %v5184_v2 = vrot.slane %v701_v7, 9  ;;  %v751_v54 = vrot.slane %v6763_v23, 5  ;;  %v3018_v4 = vshrl.u32 %v5447_v11, 16  ;;  %v6399_v63 = vld [vmem:[%s6664_s7 + $0x20] ss:$8 sps:$4 sm:$0xff]  }
  0x44   : > { %v3021_v24 = vshll.u32 %v5447_v11, 16  ;;  %v5187_v22 = vcombine.low %v6876_v19, %v6880_v20  ;;  %v6900_v9 = vsel %vm6779_vm7, %v5181_v49, %v739_v48  ;;  %v3027_v35 = vshll.u32 %v6883_v38, 16  ;;  %v5455_v11 = vld [vmem:[%s6664_s7 + $0x30] sm:$0xf]  ;;  %v5475_v19 = vld [vmem:[%s6664_s7 + $0x28] sm:$0xe] }
  0x45   : > { %v3032_v17 = vshrl.u32 %v5449_v53, 16  ;;  %5855 = vmatmul.mubr.msk.bf16.vlgmr.msra.gmra.mrb[0].mxu1 %vm512_vm3, %v5170_v56  ;;  %v6909_v23 = vsel %vm6779_vm7, %v5182_v52, %v743_v8  ;;  %v6913_v18 = vsel %vm6779_vm7, %v5183_v59, %v747_v50  ;;  %v3020_v27 = vrot.slane %v3018_v4, 4  ;;  %v6937_v8 = vld [vmem:[%s6664_s7 + $0x34] sm:$0x1]  ;;  %v6400_v59 = vld [vmem:[%s6664_s7 + $0x30] ss:$8 sps:$4 sm:$0xff]  }
  0x46   : > { %v3023_v36 = vrot.slane %v3021_v24, 5  ;;  %5863 = vmatpush3.bf16.msra.mxu1 %v6611_v13  ;;  %5858 = vmatprep.mubr.msk.bf16.mxu1 %vm512_vm3, %v5171_v33  ;;  %v6920_v29 = vsel %vm6779_vm7, %v5184_v2, %v751_v54  ;;  %v3029_v56 = vrot.slane %v3027_v35, 5  ;;  %v3035_v44 = vshll.u32 %v5449_v53, 16  ;;  %v6928_v33 = vld [vmem:[%s6664_s7 + $0x2c] sm:$0x1] }
  0x47   : > { %v3034_v40 = vrot.slane %v3032_v17, 4  ;;  %5989 = vmatmul.mubr.msk.bf16.gmra.mrb[4].mxu0 %vm512_vm3, %v5425_v34  ;;  %6325 = vmatprep.subr.msk.bf16.mxu1 %vm525_vm0, %v6602_v12  ;;  %v3041_v13 = vshll.u32 %v6892_v62, 16  ;;  %v3046_v41 = vshrl.u32 %v5451_v30, 16  ;;  %v3049_v39 = vshll.u32 %v5451_v30, 16  ;;  %v5457_v4 = vld [vmem:[%s6664_s7 + $0x38] sm:$0xf] }
  0x48   : > { %v3024_v5 = vor.u32 %v3023_v36, %v3020_v27  ;;  %5994 = vmatprep.mubr.msk.bf16.mxu0 %vm512_vm3, %v6398_v26  ;;  %v3037_v6 = vrot.slane %v3035_v44, 5  ;;  %v3055_v47 = vshll.u32 %v6904_v58, 16  ;;  %v3060_v45 = vshrl.u32 %v5453_v60, 16  ;;  %v6945_v17 = vld [vmem:[%s6664_s7 + $0x3c] sm:$0x1] }
  0x49   : > { %v3063_v1 = vshll.u32 %v5453_v60, 16  ;;  %v3043_v49 = vrot.slane %v3041_v13, 5  ;;  %v3048_v48 = vrot.slane %v3046_v41, 4  ;;  %v3051_v7 = vrot.slane %v3049_v39, 5  ;;  %v6972_v41 = vld [vmem:[%s6664_s7 + $0x44] sm:$0x1] }
  0x4a   : > { %v3025_v12 = vrot.slane %v3024_v5, 4  ;;  %v3038_v34 = vor.u32 %v3037_v6, %v3034_v40  ;;  %v6934_v52 = vrot.slane %v3055_v47, 5  ;;  %v3062_v53 = vrot.slane %v3060_v45, 4  ;;  %v5459_v5 = vld [vmem:[%s6664_s7 + $0x40] sm:$0xf] }
  0x4b   : > { %v3065_v26 = vrot.slane %v3063_v1, 5  ;;  %v3052_v2 = vor.u32 %v3051_v7, %v3048_v48  ;;  %v3069_v54 = vshll.u32 %v6928_v33, 16  ;;  %v3074_v24 = vshrl.u32 %v5455_v11, 16  ;;  %v5461_v6 = vld [vmem:[%s6664_s7 + $0x48] sm:$0xf] }
  0x4c   : > { %v3030_v50 = vsel %vm6679_vm4, %v3025_v12, %v3029_v56  ;;  %v3039_v30 = vrot.slane %v3038_v34, 4  ;;  %v3077_v27 = vshll.u32 %v5455_v11, 16  ;;  %v3083_v36 = vshll.u32 %v6937_v8, 16 }
  0x4d   : > { %v3066_v35 = vor.u32 %v3065_v26, %v3062_v53  ;;  %5859 = vmatmul.mubr.msk.bf16.gmra.mrb[4].mxu1 %vm512_vm3, %v5172_v57  ;;  %v6952_v60 = vrot.slane %v3052_v2, 4  ;;  %v6954_v56 = vrot.slane %v3069_v54, 5  ;;  %v3076_v40 = vrot.slane %v3074_v24, 4  ;;  %v5472_v24 = vld [vmem:[%s6664_s7 + $0x10] sm:$0xe] }
  0x4e   : > { %v3088_v44 = vshrl.u32 %v5457_v4, 16  ;;  %5864 = vmatprep.mubr.msk.bf16.mxu1 %vm512_vm3, %v5186_v25  ;;  %v3044_v51 = vsel %vm6679_vm4, %v3039_v30, %v3043_v49  ;;  %v3079_v57 = vrot.slane %v3077_v27, 5  ;;  %v6969_v13 = vrot.slane %v3083_v36, 5  ;;  %v5473_v30 = vld [vmem:[%s6664_s7 + $0x18] sm:$0xe] }
  0x4f   : > { %v3067_v0 = vrot.slane %v3066_v35, 4  ;;  %5995 = vmatmul.mubr.msk.bf16.vlgmr.msra.gmra.mrb[0].mxu0 %vm512_vm3, %v6399_v63  ;;  %v5188_v39 = vcombine.low %v6900_v9, %v6909_v23  ;;  %v5189_v55 = vcombine.low %v6913_v18, %v6920_v29  ;;  %v3091_v25 = vshll.u32 %v5457_v4, 16  ;;  %v6984_v63 = vld [vmem:[%s6664_s7 + $0x4c] sm:$0x1]  ;;  %v5252_v29 = vld [vmem:[%s7983_s3 + $0xa] sm:$0x3] }
  0x50   : > { %v3090_v21 = vrot.slane %v3088_v44, 4  ;;  %6003 = vmatpush3.bf16.msra.mxu0 %v6615_v14  ;;  %5998 = vmatprep.mubr.msk.bf16.mxu0 %vm512_vm3, %v6400_v59  ;;  %v5464_v47 = vcombine.low %v3030_v50, %v3044_v51  ;;  %v3080_v45 = vor.u32 %v3079_v57, %v3076_v40  ;;  %v3097_v1 = vshll.u32 %v6945_v17, 16  ;;  %v5211_v57 = vld [vmem:[%s6607_s16 + $0x8] sm:$0xf] }
  0x51   : > { %v3102_v9 = vshrl.u32 %v5459_v5, 16  ;;  %6340 = vmatprep.subr.msk.bf16.mxu0 %vm525_vm0, %v6620_v15  ;;  %v3058_v14 = vsel %vm6679_vm4, %v6952_v60, %v6934_v52  ;;  %v3093_v23 = vrot.slane %v3091_v25, 5  ;;  %v3105_v12 = vshll.u32 %v5459_v5, 16  ;;  %v6401_v15 = vld [vmem:[%s6664_s7 + $0x40] ss:$8 sps:$4 sm:$0xff]  }
  0x52   : > { %v3111_v49 = vshll.u32 %v6972_v41, 16  ;;  %v3081_v48 = vrot.slane %v3080_v45, 4  ;;  %v3099_v7 = vrot.slane %v3097_v1, 5  ;;  %v3116_v34 = vshrl.u32 %v5461_v6, 16  ;;  %v6402_v25 = vld [vmem:[%s6607_s16 + $0x8] ss:$8 sps:$4 sm:$0xff]  }
  0x53   : > { %v3104_v11 = vrot.slane %v3102_v9, 4  ;;  %v3094_v53 = vor.u32 %v3093_v23, %v3090_v21  ;;  %v3107_v26 = vrot.slane %v3105_v12, 5  ;;  %v3119_v52 = vshll.u32 %v5461_v6, 16  ;;  %v5213_v21 = vld [vmem:[%s6607_s16 + $0x10] sm:$0xf] }
  0x54   : > { %v3113_v59 = vrot.slane %v3111_v49, 5  ;;  %v3072_v50 = vsel %vm6679_vm4, %v3067_v0, %v6954_v56  ;;  %v3086_v2 = vsel %vm6679_vm4, %v3081_v48, %v6969_v13  ;;  %v3118_v54 = vrot.slane %v3116_v34, 4  ;;  %v5474_v56 = vld [vmem:[%s6664_s7 + $0x20] sm:$0xe]  ;;  %v5497_v13 = vld [vmem:[%s7983_s3 + $0x24] sm:$0x3] }
  0x55   : > { %v3125_v4 = vshll.u32 %v6984_v63, 16  ;;  %5865 = vmatmul.mubr.msk.bf16.vlgmr.msra.gmra.mrb[0].mxu1 %vm512_vm3, %v5187_v22  ;;  %v3095_v35 = vrot.slane %v3094_v53, 4  ;;  %v3108_v27 = vor.u32 %v3107_v26, %v3104_v11  ;;  %v3121_v36 = vrot.slane %v3119_v52, 5  ;;  %v7044_v9 = vld [vmem:[%s6607_s16 + $0xc] sm:$0x1] }
  0x56   : > { %v5480_v60 = vrot.slane %v5472_v24, 9  ;;  %5873 = vmatpush3.bf16.msra.mxu1 %v6651_v28  ;;  %5868 = vmatprep.mubr.msk.bf16.mxu1 %vm512_vm3, %v5188_v39  ;;  %v3257_v44 = vrot.slane %v6883_v38, 5  ;;  %v5481_v5 = vrot.slane %v5473_v30, 9  ;;  %v3261_v51 = vrot.slane %v6892_v62, 5  ;;  %v7054_v12 = vld [vmem:[%s6607_s16 + $0x14] sm:$0x1] }
  0x57   : > { %v3127_v40 = vrot.slane %v3125_v4, 5  ;;  %5999 = vmatmul.mubr.msk.bf16.gmra.mrb[4].mxu0 %vm512_vm3, %v6401_v15  ;;  %6326 = vmatprep.subr.msk.bf16.mxu1 %vm525_vm0, %v6625_v16  ;;  %v3100_v20 = vsel %vm6679_vm4, %v3095_v35, %v3099_v7  ;;  %v3109_v28 = vrot.slane %v3108_v27, 4  ;;  %v3122_v22 = vor.u32 %v3121_v36, %v3118_v54  ;;  %v5215_v48 = vld [vmem:[%s6607_s16 + $0x18] sm:$0xf]  ;;  %v7063_v53 = vld [vmem:[%s6607_s16 + $0x1c] sm:$0x1] }
  0x58   : > { %v5482_v0 = vrot.slane %v5474_v56, 9  ;;  %6004 = vmatprep.mubr.msk.bf16.mxu0 %vm512_vm3, %v5464_v47  ;;  %v5465_v38 = vcombine.low %v3058_v14, %v3072_v50  ;;  %v7029_v62 = vsel %vm6779_vm7, %v5480_v60, %v3257_v44  ;;  %v7033_v16 = vsel %vm6779_vm7, %v5481_v5, %v3261_v51  ;;  %v5217_v50 = vld [vmem:[%s6607_s16 + $0x20] sm:$0xf]  ;;  %v7085_v27 = vld [vmem:[%s6607_s16 + $0x24] sm:$0x1] }
  0x59   : > { %v3265_v39 = vrot.slane %v6904_v58, 5  ;;  %v5466_v6 = vcombine.low %v3086_v2, %v3100_v20  ;;  %v3114_v47 = vsel %vm6679_vm4, %v3109_v28, %v3113_v59  ;;  %v3123_v45 = vrot.slane %v3122_v22, 4  ;;  %v5476_v5 = vld [vmem:[%s6664_s7 + $0x30] sm:$0xe] }
  0x5a   : > { %v5483_v1 = vrot.slane %v5475_v19, 9  ;;  %v5489_v14 = vcombine.low %v7029_v62, %v7033_v16  ;;  %v3269_v23 = vrot.slane %v6928_v33, 5  ;;  %v991_v49 = vshrl.u32 %v5211_v57, 16  ;;  %v6404_v51 = vld [vmem:[%s6607_s16 + $0x28] ss:$8 sps:$4 sm:$0xff]  }
  0x5b   : > { %v7050_v58 = vsel %vm6779_vm7, %v5482_v0, %v3265_v39  ;;  %v3128_v7 = vsel %vm6679_vm4, %v3123_v45, %v3127_v40  ;;  %v7060_v11 = vsel %vm525_vm0, %v5497_v13, 0  ;;  %v994_v34 = vshll.u32 %v5211_v57, 16  ;;  %v5477_v0 = vld [vmem:[%s6664_s7 + $0x38] sm:$0xe]  ;;  %v7160_v62 = vld [vmem:[%s6607_s16 + $0x3c] sm:$0x1] }
  0x5c   : > { %v1005_v15 = vshrl.u32 %v5213_v21, 16  ;;  %v7067_v26 = vsel %vm6779_vm7, %v5483_v1, %v3269_v23  ;;  %v993_v33 = vrot.slane %v991_v49, 4  ;;  %v1000_v59 = vshll.u32 %v7044_v9, 16  ;;  %v5479_v1 = vld [vmem:[%s6664_s7 + $0x48] sm:$0xe] }
  0x5d   : > { %v1008_v52 = vshll.u32 %v5213_v21, 16  ;;  %5869 = vmatmul.mubr.msk.bf16.gmra.mrb[4].mxu1 %vm512_vm3, %v5189_v55  ;;  %v5467_v2 = vcombine.low %v3114_v47, %v3128_v7  ;;  %v5490_v54 = vcombine.low %v7050_v58, %v7067_v26  ;;  %v996_v4 = vrot.slane %v994_v34, 5  ;;  %v6403_v55 = vld [vmem:[%s6607_s16 + $0x18] ss:$8 sps:$4 sm:$0xff]   ;;  %v5219_v7 = vld [vmem:[%s6607_s16 + $0x28] sm:$0xf] }
  0x5e   : > { %v1007_v24 = vrot.slane %v1005_v15, 4  ;;  %5874 = vmatprep.mubr.msk.bf16.mxu1 %vm512_vm3, %v6402_v25  ;;  %v1014_v35 = vshll.u32 %v7054_v12, 16  ;;  %v1019_v36 = vshrl.u32 %v5215_v48, 16  ;;  %v1022_v18 = vshll.u32 %v5215_v48, 16  ;;  %v5478_v25 = vld [vmem:[%s6664_s7 + $0x40] sm:$0xe] }
  0x5f   : > { %v1010_v30 = vrot.slane %v1008_v52, 5  ;;  %6005 = vmatmul.mubr.msk.bf16.vlgmr.msra.gmra.mrb[0].mxu0 %vm512_vm3, %v5465_v38  ;;  %v997_v60 = vor.u32 %v996_v4, %v993_v33  ;;  %v1028_v56 = vshll.u32 %v7063_v53, 16  ;;  %v1033_v40 = vshrl.u32 %v5217_v50, 16  ;;  %v7116_v52 = vld [vmem:[%s6607_s16 + $0x2c] sm:$0x1] }
  0x60   : > { %v1036_v44 = vshll.u32 %v5217_v50, 16  ;;  %6013 = vmatpush3.bf16.msra.mxu0 %v6655_v31  ;;  %6008 = vmatprep.mubr.msk.bf16.mxu0 %vm512_vm3, %v5466_v6  ;;  %v1002_v19 = vrot.slane %v1000_v59, 5  ;;  %v1021_v28 = vrot.slane %v1019_v36, 4  ;;  %v1024_v22 = vrot.slane %v1022_v18, 5 }
  0x61   : > { %v1011_v20 = vor.u32 %v1010_v30, %v1007_v24  ;;  %6341 = vmatprep.subr.msk.bf16.mxu0 %vm525_vm0, %v5497_v13  ;;  %v998_v57 = vrot.slane %v997_v60, 4  ;;  %v1016_v38 = vrot.slane %v1014_v35, 5  ;;  %v1035_v39 = vrot.slane %v1033_v40, 4  ;;  %v5221_v30 = vld [vmem:[%s6607_s16 + $0x30] sm:$0xf] }
  0x62   : > { %v1038_v21 = vrot.slane %v1036_v44, 5  ;;  %v1025_v31 = vor.u32 %v1024_v22, %v1021_v28  ;;  %v1030_v45 = vrot.slane %v1028_v56, 5  ;;  %v1042_v6 = vshll.u32 %v7085_v27, 16  ;;  %v6405_v60 = vld [vmem:[%s6607_s16 + $0x38] ss:$8 sps:$4 sm:$0xff]  }
  0x63   : > { %v1012_v47 = vrot.slane %v1011_v20, 4  ;;  %v7104_v49 = vsel %vm525_vm0, %v5252_v29, 0  ;;  %v5484_v48 = vrot.slane %v5476_v5, 9  ;;  %v3273_v13 = vrot.slane %v6937_v8, 5  ;;  %v7141_v40 = vld [vmem:[%s6607_s16 + $0x34] sm:$0x1] }
  0x64   : > { %v1039_v23 = vor.u32 %v1038_v21, %v1035_v39  ;;  %v1003_v34 = vsel %vm6679_vm4, %v998_v57, %v1002_v19  ;;  %v1026_v15 = vrot.slane %v1025_v31, 4  ;;  %v1044_v33 = vrot.slane %v1042_v6, 5  ;;  %v5225_v57 = vld [vmem:[%s6607_s16 + $0x40] sm:$0xf]  ;;  %v7168_v21 = vld [vmem:[%s6607_s16 + $0x44] sm:$0x1] }
  0x65   : > { %v5485_v59 = vrot.slane %v5477_v0, 9  ;;  %5875 = vmatmul.mubr.msk.bf16.vlgmr.msra.gmra.mrb[0].mxu1 %vm512_vm3, %v6403_v55  ;;  %v1017_v8 = vsel %vm6679_vm4, %v1012_v47, %v1016_v38  ;;  %v7123_v4 = vsel %vm6779_vm7, %v5484_v48, %v3273_v13  ;;  %v3277_v24 = vrot.slane %v6945_v17, 5  ;;  %v5236_v48 = vld [vmem:[%s6607_s16 + $0x8] sm:$0xe] }
  0x66   : > { %v1040_v50 = vrot.slane %v1039_v23, 4  ;;  %5883 = vmatpush3.bf16.msra.mxu1 %v6659_v32  ;;  %5878 = vmatprep.mubr.msk.bf16.mxu1 %vm512_vm3, %v6404_v51  ;;  %v1031_v35 = vsel %vm6679_vm4, %v1026_v15, %v1030_v45  ;;  %v5486_v36 = vrot.slane %v5478_v25, 9  ;;  %v3281_v18 = vrot.slane %v6972_v41, 5  ;;  %v5223_v41 = vld [vmem:[%s6607_s16 + $0x38] sm:$0xf] }
  0x67   : > { %v5487_v55 = vrot.slane %v5479_v1, 9  ;;  %6009 = vmatmul.mubr.msk.bf16.gmra.mrb[4].mxu0 %vm512_vm3, %v5467_v2  ;;  %6327 = vmatprep.subr.msk.bf16.mxu1 %vm525_vm0, %v5252_v29  ;;  %v3278_v32 = vsel %vm6779_vm7, %v5485_v59, %v3277_v24  ;;  %v3285_v17 = vrot.slane %v6984_v63, 5  ;;  %v1047_v44 = vshrl.u32 %v5219_v7, 16  ;;  %v5506_v23 = vld [vmem:[%s7983_s3 + $0x26] sm:$0x3] }
  0x68   : > { %v1045_v56 = vsel %vm6679_vm4, %v1040_v50, %v1044_v33  ;;  %6014 = vmatprep.mubr.msk.bf16.mxu0 %vm512_vm3, %v5489_v14  ;;  %v5228_v2 = vcombine.low %v1003_v34, %v1017_v8  ;;  %v7152_v29 = vsel %vm6779_vm7, %v5486_v36, %v3281_v18  ;;  %v1050_v51 = vshll.u32 %v5219_v7, 16  ;;  %v5237_v33 = vld [vmem:[%s6607_s16 + $0x10] sm:$0xe]  ;;  %v5238_v24 = vld [vmem:[%s6607_s16 + $0x18] sm:$0xe] }
  0x69   : > { %v7148_v5 = vcombine.low %v1031_v35, %v1045_v56  ;;  %v7156_v63 = vsel %vm6779_vm7, %v5487_v55, %v3285_v17  ;;  %v1049_v19 = vrot.slane %v1047_v44, 4  ;;  %v1056_v20 = vshll.u32 %v7116_v52, 16  ;;  %v5239_v55 = vld [vmem:[%s6607_s16 + $0x20] sm:$0xe] }
  0x6a   : > { %v1061_v28 = vshrl.u32 %v5221_v30, 16  ;;  %v5491_v16 = vcombine.low %v7123_v4, %v3278_v32  ;;  %v1052_v14 = vrot.slane %v1050_v51, 5  ;;  %v1064_v22 = vshll.u32 %v5221_v30, 16 }
  0x6b   : > { %v1070_v0 = vshll.u32 %v7141_v40, 16  ;;  %v5492_v38 = vcombine.low %v7152_v29, %v7156_v63  ;;  %v1075_v25 = vshrl.u32 %v5223_v41, 16  ;;  %v1078_v47 = vshll.u32 %v5223_v41, 16 }
  0x6c   : > { %v1063_v39 = vrot.slane %v1061_v28, 4  ;;  %v1053_v31 = vor.u32 %v1052_v14, %v1049_v19  ;;  %v1058_v45 = vrot.slane %v1056_v20, 5  ;;  %v1066_v6 = vrot.slane %v1064_v22, 5 }
  0x6d   : > { %v1084_v1 = vshll.u32 %v7160_v62, 16  ;;  %5879 = vmatmul.mubr.msk.bf16.gmra.mrb[4].mxu1 %vm512_vm3, %v6405_v60  ;;  %v1077_v13 = vrot.slane %v1075_v25, 4  ;;  %v1080_v7 = vrot.slane %v1078_v47, 5  ;;  %v1089_v34 = vshrl.u32 %v5225_v57, 16 }
  0x6e   : > { %v1092_v15 = vshll.u32 %v5225_v57, 16  ;;  %5884 = vmatprep.mubr.msk.bf16.mxu1 %vm512_vm3, %v5228_v2  ;;  %v1054_v59 = vrot.slane %v1053_v31, 4  ;;  %v1067_v8 = vor.u32 %v1066_v6, %v1063_v39  ;;  %v1072_v50 = vrot.slane %v1070_v0, 5  ;;  %v5240_v57 = vld [vmem:[%s6607_s16 + $0x28] sm:$0xe] }
  0x6f   : > { %v1098_v4 = vshll.u32 %v7168_v21, 16  ;;  %6015 = vmatmul.mubr.msk.bf16.vlgmr.msra.gmra.mrb[0].mxu0 %vm512_vm3, %v5490_v54  ;;  %v1081_v30 = vor.u32 %v1080_v7, %v1077_v13  ;;  %v1086_v35 = vrot.slane %v1084_v1, 5  ;;  %v1091_v36 = vrot.slane %v1089_v34, 4  ;;  %v7229_v13 = vld [vmem:[%s7111_s28 + $0x4] sm:$0x1] }
  0x70   : > { %v1094_v18 = vrot.slane %v1092_v15, 5  ;;  %6023 = vmatpush3.bf16.msra.mxu0 %v7060_v11  ;;  %6018 = vmatprep.mubr.msk.bf16.mxu0 %vm512_vm3, %v5491_v16  ;;  %v1059_v60 = vsel %vm6679_vm4, %v1054_v59, %v1058_v45  ;;  %v1068_v56 = vrot.slane %v1067_v8, 4  ;;  %v5244_v17 = vrot.slane %v5236_v48, 9  ;;  %v5269_v11 = vld [vmem:[%s7983_s3 + $0xc] sm:$0x3] }
  0x71   : > { %v1100_v32 = vrot.slane %v1098_v4, 5  ;;  %v1082_v44 = vrot.slane %v1081_v30, 4  ;;  %6342 = vmatprep.subr.msk.bf16.mxu0 %vm525_vm0, %v5506_v23  ;;  %v1230_v26 = vrot.slane %v7044_v9, 5  ;;  %v5245_v54 = vrot.slane %v5237_v33, 9  ;;  %v6406_v16 = vld [vmem:[%s7111_s28] ss:$8 sps:$4 sm:$0xff]  }
  0x72   : > { %v1095_v58 = vor.u32 %v1094_v18, %v1091_v36  ;;  %v1073_v41 = vsel %vm6679_vm4, %v1068_v56, %v1072_v50  ;;  %v1234_v2 = vrot.slane %v7054_v12, 5  ;;  %v5246_v51 = vrot.slane %v5238_v24, 9  ;;  %v5242_v45 = vld [vmem:[%s6607_s16 + $0x38] sm:$0xe]  ;;  %v3507_v48 = vld [vmem:[%s7111_s28] sm:$0xf] }
  0x73   : > { %v1238_v19 = vrot.slane %v7063_v53, 5  ;;  %v5230_v20 = vcombine.low %v1059_v60, %v1073_v41  ;;  %v7200_v9 = vsel %vm525_vm0, %v5506_v23, 0  ;;  %v1231_v14 = vsel %vm6779_vm7, %v5244_v17, %v1230_v26  ;;  %v5241_v53 = vld [vmem:[%s6607_s16 + $0x30] sm:$0xe]  ;;  %v3509_v15 = vld [vmem:[%s7111_s28 + $0x8] sm:$0xf] }
  0x74   : > { %v1096_v28 = vrot.slane %v1095_v58, 4  ;;  %v1235_v22 = vsel %vm6779_vm7, %v5245_v54, %v1234_v2  ;;  %v5247_v0 = vrot.slane %v5239_v55, 9  ;;  %v1242_v12 = vrot.slane %v7085_v27, 5  ;;  %v5243_v27 = vld [vmem:[%s6607_s16 + $0x40] sm:$0xe] }
  0x75   : > { %5885 = vmatmul.mubr.msk.bf16.vlgmr.msra.gmra.mrb[0].mxu1 %vm512_vm3, %v7148_v5  ;;  %v1087_v39 = vsel %vm6679_vm4, %v1082_v44, %v1086_v35  ;;  %v7215_v25 = vsel %vm6779_vm7, %v5246_v51, %v1238_v19  ;;  %v7218_v47 = vsel %vm525_vm0, %v5269_v11, 0  ;;  %v5248_v31 = vrot.slane %v5240_v57, 9  ;;  %v6407_v8 = vld [vmem:[%s7111_s28 + $0x10] ss:$8 sps:$4 sm:$0xff]   ;;  %v6408_v35 = vld [vmem:[%s7111_s28 + $0x20] ss:$8 sps:$4 sm:$0xff]  }
  0x76   : > { %5893 = vmatpush3.bf16.msra.mxu1 %v7104_v49  ;;  %5888 = vmatprep.mubr.msk.bf16.mxu1 %vm512_vm3, %v5230_v20  ;;  %v1101_v5 = vsel %vm6679_vm4, %v1096_v28, %v1100_v32  ;;  %v5253_v6 = vcombine.low %v1231_v14, %v1235_v22  ;;  %v1246_v1 = vrot.slane %v7116_v52, 5  ;;  %v5249_v23 = vrot.slane %v5241_v53, 9  ;;  %v3511_v24 = vld [vmem:[%s7111_s28 + $0x10] sm:$0xf]  ;;  %v7267_v55 = vld [vmem:[%s7111_s28 + $0x14] sm:$0x1] }
  0x77   : > { %6019 = vmatmul.mubr.msk.bf16.gmra.mrb[4].mxu0 %vm512_vm3, %v5492_v38  ;;  %v7237_v49 = vsel %vm6779_vm7, %v5247_v0, %v1242_v12  ;;  %6328 = vmatprep.subr.msk.bf16.mxu1 %vm525_vm0, %v5269_v11  ;;  %v1250_v52 = vrot.slane %v7141_v40, 5  ;;  %v5250_v7 = vrot.slane %v5242_v45, 9  ;;  %v1254_v34 = vrot.slane %v7160_v62, 5  ;;  %v7255_v62 = vld [vmem:[%s7111_s28 + $0xc] sm:$0x1] }
  0x78   : > { %6024 = vmatprep.mubr.msk.bf16.mxu0 %vm512_vm3, %v6406_v16  ;;  %v7246_v29 = vsel %vm6779_vm7, %v5248_v31, %v1246_v1  ;;  %v5251_v63 = vrot.slane %v5243_v27, 9  ;;  %v1258_v38 = vrot.slane %v7168_v21, 5  ;;  %v3524_v33 = vshrl.u32 %v3507_v48, 16  ;;  %v3513_v60 = vld [vmem:[%s7111_s28 + $0x18] sm:$0xf] }
  0x79   : > { %v5231_v59 = vcombine.low %v1087_v39, %v1101_v5  ;;  %v7252_v40 = vsel %vm6779_vm7, %v5249_v23, %v1250_v52  ;;  %v3527_v50 = vshll.u32 %v3507_v48, 16  ;;  %v3533_v4 = vshll.u32 %v7229_v13, 16  ;;  %v7273_v58 = vld [vmem:[%s7111_s28 + $0x1c] sm:$0x1]  ;;  %v5523_v16 = vld [vmem:[%s7983_s3 + $0x28] sm:$0x3] }
  0x7a   : > { %v5254_v30 = vcombine.low %v7215_v25, %v7237_v49  ;;  %v7264_v21 = vsel %vm6779_vm7, %v5250_v7, %v1254_v34  ;;  %v3526_v36 = vrot.slane %v3524_v33, 4  ;;  %v3538_v18 = vshrl.u32 %v3509_v15, 16  ;;  %v6409_v5 = vld [vmem:[%s7111_s28 + $0x30] ss:$8 sps:$4 sm:$0xff]   ;;  %v5294_v23 = vld [vmem:[%s7983_s3 + $0xe] sm:$0x3] }
  0x7b   : > { %v5255_v56 = vcombine.low %v7246_v29, %v7252_v40  ;;  %v3529_v32 = vrot.slane %v3527_v50, 5  ;;  %v3535_v17 = vrot.slane %v3533_v4, 5  ;;  %v3541_v44 = vshll.u32 %v3509_v15, 16  ;;  %v3515_v15 = vld [vmem:[%s7111_s28 + $0x20] sm:$0xf] }
  0x7c   : > { %v3540_v26 = vrot.slane %v3538_v18, 4  ;;  %v3547_v54 = vshll.u32 %v7255_v62, 16  ;;  %v3552_v11 = vshrl.u32 %v3511_v24, 16  ;;  %v3555_v41 = vshll.u32 %v3511_v24, 16  ;;  %v7312_v33 = vld [vmem:[%s7111_s28 + $0x2c] sm:$0x1] }
  0x7d   : > { %5889 = vmatmul.mubr.msk.bf16.gmra.mrb[4].mxu1 %vm512_vm3, %v5231_v59  ;;  %v3530_v2 = vor.u32 %v3529_v32, %v3526_v36  ;;  %v3543_v51 = vrot.slane %v3541_v44, 5  ;;  %v3561_v19 = vshll.u32 %v7267_v55, 16  ;;  %v3566_v20 = vshrl.u32 %v3513_v60, 16  ;;  %v3519_v4 = vld [vmem:[%s7111_s28 + $0x30] sm:$0xf] }
  0x7e   : > { %5894 = vmatprep.mubr.msk.bf16.mxu1 %vm512_vm3, %v5253_v6  ;;  %v7281_v28 = vsel %vm6779_vm7, %v5251_v63, %v1258_v38  ;;  %v3554_v14 = vrot.slane %v3552_v11, 4  ;;  %v3557_v22 = vrot.slane %v3555_v41, 5  ;;  %v3569_v0 = vshll.u32 %v3513_v60, 16  ;;  %v7308_v63 = vld [vmem:[%s7111_s28 + $0x24] sm:$0x1] }
  0x7f   : > { %6025 = vmatmul.mubr.msk.bf16.vlgmr.msra.gmra.mrb[0].mxu0 %vm512_vm3, %v6407_v8  ;;  %v3531_v12 = vrot.slane %v3530_v2, 4  ;;  %v3544_v57 = vor.u32 %v3543_v51, %v3540_v26  ;;  %v3549_v53 = vrot.slane %v3547_v54, 5  ;;  %v3568_v39 = vrot.slane %v3566_v20, 4  ;;  %v3517_v38 = vld [vmem:[%s7111_s28 + $0x28] sm:$0xf] }
  0x80   : > { %6033 = vmatpush3.bf16.msra.mxu0 %v7200_v9  ;;  %6028 = vmatprep.mubr.msk.bf16.mxu0 %vm512_vm3, %v6408_v35  ;;  %v3558_v25 = vor.u32 %v3557_v22, %v3554_v14  ;;  %v3563_v31 = vrot.slane %v3561_v19, 5  ;;  %v3571_v45 = vrot.slane %v3569_v0, 5  ;;  %v3575_v27 = vshll.u32 %v7273_v58, 16  ;;  %v7318_v24 = vld [vmem:[%s7111_s28 + $0x34] sm:$0x1] }
  0x81   : > { %v3536_v6 = vsel %vm6679_vm4, %v3531_v12, %v3535_v17  ;;  %v3545_v1 = vrot.slane %v3544_v57, 4  ;;  %6343 = vmatprep.subr.msk.bf16.mxu0 %vm525_vm0, %v5523_v16  ;;  %v7295_v9 = vsel %vm525_vm0, %v5523_v16, 0  ;;  %v3763_v48 = vrot.slane %v7229_v13, 5  ;;  %v3521_v32 = vld [vmem:[%s7111_s28 + $0x38] sm:$0xf] }
  0x82   : > { %v3559_v49 = vrot.slane %v3558_v25, 4  ;;  %v3572_v52 = vor.u32 %v3571_v45, %v3568_v39  ;;  %v3577_v7 = vrot.slane %v3575_v27, 5  ;;  %v7302_v34 = vsel %vm525_vm0, %v5294_v23, 0  ;;  %v7329_v26 = vld [vmem:[%s7111_s28 + $0x3c] sm:$0x1] }
  0x83   : > { %v3550_v29 = vsel %vm6679_vm4, %v3545_v1, %v3549_v53  ;;  %v5256_v59 = vcombine.low %v7264_v21, %v7281_v28  ;;  %v3580_v50 = vshrl.u32 %v3515_v15, 16  ;;  %v3583_v35 = vshll.u32 %v3515_v15, 16  ;;  %v6410_v20 = vld [vmem:[%s6607_s16 + $0x10] ss:$8 sps:$4 sm:$0xff]   ;;  %v3737_v1 = vld [vmem:[%s7111_s28] sm:$0xe] }
  0x84   : > { %v5507_v8 = vcombine.low %v3536_v6, %v3550_v29  ;;  %v3573_v40 = vrot.slane %v3572_v52, 4  ;;  %v3589_v36 = vshll.u32 %v7308_v63, 16  ;;  %v3594_v18 = vshrl.u32 %v3517_v38, 16  ;;  %v5540_v29 = vld [vmem:[%s7983_s3 + $0x2a] sm:$0x3] }
  0x85   : > { %5895 = vmatmul.mubr.msk.bf16.vlgmr.msra.gmra.mrb[0].mxu1 %vm512_vm3, %v5254_v30  ;;  %v3597_v60 = vshll.u32 %v3517_v38, 16  ;;  %v3564_v21 = vsel %vm6679_vm4, %v3559_v49, %v3563_v31  ;;  %v3582_v17 = vrot.slane %v3580_v50, 4  ;;  %v3603_v44 = vshll.u32 %v7312_v33, 16  ;;  %v3739_v38 = vld [vmem:[%s7111_s28 + $0x10] sm:$0xe] }
  0x86   : > { %5903 = vmatpush3.bf16.msra.mxu1 %v7218_v47  ;;  %5898 = vmatprep.mubr.msk.bf16.mxu1 %vm512_vm3, %v5255_v56  ;;  %v3608_v30 = vshrl.u32 %v3519_v4, 16  ;;  %v3578_v54 = vsel %vm6679_vm4, %v3573_v40, %v3577_v7  ;;  %v3585_v47 = vrot.slane %v3583_v35, 5  ;;  %v3591_v11 = vrot.slane %v3589_v36, 5  ;;  %v3740_v50 = vld [vmem:[%s7111_s28 + $0x18] sm:$0xe] }
  0x87   : > { %6029 = vmatmul.mubr.msk.bf16.gmra.mrb[4].mxu0 %vm512_vm3, %v6409_v5  ;;  %6329 = vmatprep.subr.msk.bf16.mxu1 %vm525_vm0, %v5294_v23  ;;  %v3596_v56 = vrot.slane %v3594_v18, 4  ;;  %v3599_v41 = vrot.slane %v3597_v60, 5  ;;  %v3605_v2 = vrot.slane %v3603_v44, 5  ;;  %v3611_v19 = vshll.u32 %v3519_v4, 16  ;;  %v3738_v23 = vld [vmem:[%s7111_s28 + $0x8] sm:$0xe] }
  0x88   : > { %6034 = vmatprep.mubr.msk.bf16.mxu0 %vm512_vm3, %v5507_v8  ;;  %v3610_v51 = vrot.slane %v3608_v30, 4  ;;  %v3586_v28 = vor.u32 %v3585_v47, %v3582_v17  ;;  %v3617_v16 = vshll.u32 %v7318_v24, 16  ;;  %v3622_v14 = vshrl.u32 %v3521_v32, 16  ;;  %v6411_v35 = vld [vmem:[%s6607_s16 + $0x20] ss:$8 sps:$4 sm:$0xff]  }
  0x89   : > { %v3625_v22 = vshll.u32 %v3521_v32, 16  ;;  %v5508_v0 = vcombine.low %v3564_v21, %v3578_v54  ;;  %v3600_v12 = vor.u32 %v3599_v41, %v3596_v56  ;;  %v3613_v57 = vrot.slane %v3611_v19, 5  ;;  %v5278_v21 = vld [vmem:[%s6607_s16 + $0x10] sm:$0xf]  ;;  %v7368_v30 = vld [vmem:[%s6607_s16 + $0x14] sm:$0x1] }
  0x8a   : > { %v3631_v53 = vshll.u32 %v7329_v26, 16  ;;  %v3587_v39 = vrot.slane %v3586_v28, 4  ;;  %v3619_v25 = vrot.slane %v3617_v16, 5  ;;  %v3624_v31 = vrot.slane %v3622_v14, 4  ;;  %v6412_v41 = vld [vmem:[%s6607_s16 + $0x30] ss:$8 sps:$4 sm:$0xff]  }
  0x8b   : > { %v3627_v45 = vrot.slane %v3625_v22, 5  ;;  %v3601_v27 = vrot.slane %v3600_v12, 4  ;;  %v3614_v5 = vor.u32 %v3613_v57, %v3610_v51  ;;  %v5515_v7 = vrot.slane %v3737_v1, 9 }
  0x8c   : > { %v3633_v6 = vrot.slane %v3631_v53, 5  ;;  %v3592_v49 = vsel %vm6679_vm4, %v3587_v39, %v3591_v11  ;;  %v5516_v15 = vrot.slane %v3738_v23, 9  ;;  %v5517_v4 = vrot.slane %v3739_v38, 9  ;;  %v5282_v11 = vld [vmem:[%s6607_s16 + $0x20] sm:$0xf] }
  0x8d   : > { %5899 = vmatmul.mubr.msk.bf16.gmra.mrb[4].mxu1 %vm512_vm3, %v5256_v59  ;;  %v3628_v52 = vor.u32 %v3627_v45, %v3624_v31  ;;  %v3606_v8 = vsel %vm6679_vm4, %v3601_v27, %v3605_v2  ;;  %v3615_v40 = vrot.slane %v3614_v5, 4  ;;  %v3767_v59 = vrot.slane %v7255_v62, 5  ;;  %v7404_v5 = vld [vmem:[%s6607_s16 + $0x2c] sm:$0x1] }
  0x8e   : > { %5904 = vmatprep.mubr.msk.bf16.mxu1 %vm512_vm3, %v6410_v20  ;;  %v5509_v36 = vcombine.low %v3592_v49, %v3606_v8  ;;  %v3764_v60 = vsel %vm6779_vm7, %v5515_v7, %v3763_v48  ;;  %v3771_v32 = vrot.slane %v7267_v55, 5  ;;  %v5518_v44 = vrot.slane %v3740_v50, 9  ;;  %v5280_v48 = vld [vmem:[%s6607_s16 + $0x18] sm:$0xf]  ;;  %v7392_v20 = vld [vmem:[%s6607_s16 + $0x24] sm:$0x1] }
  0x8f   : > { %6035 = vmatmul.mubr.msk.bf16.vlgmr.msra.gmra.mrb[0].mxu0 %vm512_vm3, %v5508_v0  ;;  %v3629_v18 = vrot.slane %v3628_v52, 4  ;;  %v3620_v62 = vsel %vm6679_vm4, %v3615_v40, %v3619_v25  ;;  %v3768_v17 = vsel %vm6779_vm7, %v5516_v15, %v3767_v59  ;;  %v3775_v13 = vrot.slane %v7273_v58, 5  ;;  %v7383_v58 = vld [vmem:[%s6607_s16 + $0x1c] sm:$0x1]  ;;  %v5284_v0 = vld [vmem:[%s6607_s16 + $0x28] sm:$0xf] }
  0x90   : > { %6043 = vmatpush3.bf16.msra.mxu0 %v7295_v9  ;;  %6038 = vmatprep.mubr.msk.bf16.mxu0 %vm512_vm3, %v5509_v36  ;;  %v5524_v9 = vcombine.low %v3764_v60, %v3768_v17  ;;  %v7377_v54 = vsel %vm6779_vm7, %v5517_v4, %v3771_v32  ;;  %v7380_v47 = vsel %vm525_vm0, %v5540_v29, 0  ;;  %v1498_v51 = vshrl.u32 %v5278_v21, 16  ;;  %v5319_v25 = vld [vmem:[%s7983_s3 + $0x10] sm:$0x3]  ;;  %v6413_v7 = vld [vmem:[%s6607_s16 + $0x40] ss:$8 sps:$4 sm:$0xff]  }
  0x91   : > { %v3634_v55 = vsel %vm6679_vm4, %v3629_v18, %v3633_v6  ;;  %6344 = vmatprep.subr.msk.bf16.mxu0 %vm525_vm0, %v5540_v29  ;;  %v7389_v2 = vsel %vm6779_vm7, %v5518_v44, %v3775_v13  ;;  %v1501_v19 = vshll.u32 %v5278_v21, 16  ;;  %v1507_v16 = vshll.u32 %v7368_v30, 16  ;;  %v3741_v40 = vld [vmem:[%s7111_s28 + $0x20] sm:$0xe]  ;;  %v3743_v21 = vld [vmem:[%s7111_s28 + $0x30] sm:$0xe] }
  0x92   : > { %v5510_v56 = vcombine.low %v3620_v62, %v3634_v55  ;;  %v5525_v28 = vcombine.low %v7377_v54, %v7389_v2  ;;  %v1512_v14 = vshrl.u32 %v5280_v48, 16  ;;  %v1515_v22 = vshll.u32 %v5280_v48, 16  ;;  %v3744_v48 = vld [vmem:[%s7111_s28 + $0x38] sm:$0xe] }
  0x93   : > { %v1500_v12 = vrot.slane %v1498_v51, 4  ;;  %v1503_v57 = vrot.slane %v1501_v19, 5  ;;  %v1521_v53 = vshll.u32 %v7383_v58, 16  ;;  %v1526_v39 = vshrl.u32 %v5282_v11, 16 }
  0x94   : > { %v1509_v31 = vrot.slane %v1507_v16, 5  ;;  %v1514_v45 = vrot.slane %v1512_v14, 4  ;;  %v1517_v27 = vrot.slane %v1515_v22, 5  ;;  %v1529_v6 = vshll.u32 %v5282_v11, 16  ;;  %v7431_v22 = vld [vmem:[%s6607_s16 + $0x34] sm:$0x1] }
  0x95   : > { %5905 = vmatmul.mubr.msk.bf16.vlgmr.msra.gmra.mrb[0].mxu1 %vm512_vm3, %v6411_v35  ;;  %v1504_v1 = vor.u32 %v1503_v57, %v1500_v12  ;;  %v1523_v23 = vrot.slane %v1521_v53, 5  ;;  %v1528_v49 = vrot.slane %v1526_v39, 4  ;;  %v1535_v52 = vshll.u32 %v7392_v20, 16  ;;  %v3742_v35 = vld [vmem:[%s7111_s28 + $0x28] sm:$0xe] }
  0x96   : > { %5913 = vmatpush3.bf16.msra.mxu1 %v7302_v34  ;;  %5908 = vmatprep.mubr.msk.bf16.mxu1 %vm512_vm3, %v6412_v41  ;;  %v1518_v15 = vor.u32 %v1517_v27, %v1514_v45  ;;  %v1531_v29 = vrot.slane %v1529_v6, 5  ;;  %v1540_v38 = vshrl.u32 %v5284_v0, 16  ;;  %v1543_v8 = vshll.u32 %v5284_v0, 16  ;;  %v5286_v41 = vld [vmem:[%s6607_s16 + $0x30] sm:$0xf] }
  0x97   : > { %6039 = vmatmul.mubr.msk.bf16.gmra.mrb[4].mxu0 %vm512_vm3, %v5510_v56  ;;  %6330 = vmatprep.subr.msk.bf16.mxu1 %vm525_vm0, %v5319_v25  ;;  %v1505_v34 = vrot.slane %v1504_v1, 4  ;;  %v1537_v59 = vrot.slane %v1535_v52, 5  ;;  %v1549_v50 = vshll.u32 %v7404_v5, 16  ;;  %v7416_v4 = vsel %vm525_vm0, %v5319_v25, 0  ;;  %v7439_v39 = vld [vmem:[%s6607_s16 + $0x3c] sm:$0x1] }
  0x98   : > { %6044 = vmatprep.mubr.msk.bf16.mxu0 %vm512_vm3, %v5524_v9  ;;  %v1519_v36 = vrot.slane %v1518_v15, 4  ;;  %v1532_v18 = vor.u32 %v1531_v29, %v1528_v49  ;;  %v1542_v60 = vrot.slane %v1540_v38, 4  ;;  %v1545_v32 = vrot.slane %v1543_v8, 5  ;;  %v5290_v25 = vld [vmem:[%s6607_s16 + $0x40] sm:$0xf] }
  0x99   : > { %v1510_v62 = vsel %vm6679_vm4, %v1505_v34, %v1509_v31  ;;  %v1551_v17 = vrot.slane %v1549_v50, 5  ;;  %v5519_v44 = vrot.slane %v3741_v40, 9  ;;  %v3779_v13 = vrot.slane %v7308_v63, 5  ;;  %v5288_v63 = vld [vmem:[%s6607_s16 + $0x38] sm:$0xf] }
  0x9a   : > { %v1524_v55 = vsel %vm6679_vm4, %v1519_v36, %v1523_v23  ;;  %v1533_v9 = vrot.slane %v1532_v18, 4  ;;  %v1546_v11 = vor.u32 %v1545_v32, %v1542_v60  ;;  %v5520_v56 = vrot.slane %v3742_v35, 9  ;;  %v7447_v6 = vld [vmem:[%s6607_s16 + $0x44] sm:$0x1]  ;;  %v7469_v34 = vld [vmem:[%s6607_s16 + $0x4c] sm:$0x1] }
  0x9b   : > { %v5295_v51 = vcombine.low %v1510_v62, %v1524_v55  ;;  %v3780_v19 = vsel %vm6779_vm7, %v5519_v44, %v3779_v13  ;;  %v3783_v16 = vrot.slane %v7312_v33, 5  ;;  %v5521_v14 = vrot.slane %v3743_v21, 9  ;;  %v6414_v32 = vld [vmem:[%s7111_s28 + $0x8] ss:$8 sps:$4 sm:$0xff]  }
  0x9c   : > { %v1538_v0 = vsel %vm6679_vm4, %v1533_v9, %v1537_v59  ;;  %v1547_v12 = vrot.slane %v1546_v11, 4  ;;  %v3787_v57 = vrot.slane %v7318_v24, 5  ;;  %v5522_v53 = vrot.slane %v3744_v48, 9  ;;  %v5303_v13 = vld [vmem:[%s6607_s16 + $0x10] sm:$0xe] }
  0x9d   : > { %5909 = vmatmul.mubr.msk.bf16.gmra.mrb[4].mxu1 %vm512_vm3, %v6413_v7  ;;  %v3784_v33 = vsel %vm6779_vm7, %v5520_v56, %v3783_v16  ;;  %v3791_v31 = vrot.slane %v7329_v26, 5  ;;  %v1554_v45 = vshrl.u32 %v5286_v41, 16  ;;  %v1557_v27 = vshll.u32 %v5286_v41, 16  ;;  %v5292_v26 = vld [vmem:[%s6607_s16 + $0x48] sm:$0xf] }
  0x9e   : > { %5914 = vmatprep.mubr.msk.bf16.mxu1 %vm512_vm3, %v5295_v51  ;;  %v1552_v24 = vsel %vm6679_vm4, %v1547_v12, %v1551_v17  ;;  %v5526_v1 = vcombine.low %v3780_v19, %v3784_v33  ;;  %v3788_v23 = vsel %vm6779_vm7, %v5521_v14, %v3787_v57  ;;  %v1563_v49 = vshll.u32 %v7431_v22, 16  ;;  %v5304_v11 = vld [vmem:[%s6607_s16 + $0x18] sm:$0xe]  ;;  %v5305_v56 = vld [vmem:[%s6607_s16 + $0x20] sm:$0xe] }
  0x9f   : > { %6045 = vmatmul.mubr.msk.bf16.vlgmr.msra.gmra.mrb[0].mxu0 %vm512_vm3, %v5525_v28  ;;  %v5296_v52 = vcombine.low %v1538_v0, %v1552_v24  ;;  %v3792_v7 = vsel %vm6779_vm7, %v5522_v53, %v3791_v31  ;;  %v1556_v54 = vrot.slane %v1554_v45, 4  ;;  %v1559_v2 = vrot.slane %v1557_v27, 5  ;;  %v5565_v28 = vld [vmem:[%s7983_s3 + $0x2c] sm:$0x3]  ;;  %v5306_v14 = vld [vmem:[%s6607_s16 + $0x28] sm:$0xe] }
  0xa0   : > { %6053 = vmatpush3.bf16.msra.mxu0 %v7380_v47  ;;  %6048 = vmatprep.mubr.msk.bf16.mxu0 %vm512_vm3, %v5526_v1  ;;  %v5527_v15 = vcombine.low %v3788_v23, %v3792_v7  ;;  %v1565_v29 = vrot.slane %v1563_v49, 5  ;;  %v1568_v38 = vshrl.u32 %v5288_v63, 16  ;;  %v1571_v8 = vshll.u32 %v5288_v63, 16  ;;  %v5328_v63 = vld [vmem:[%s7983_s3 + $0x12] sm:$0x3] }
  0xa1   : > { %6345 = vmatprep.subr.msk.bf16.mxu0 %vm525_vm0, %v5565_v28  ;;  %v1560_v47 = vor.u32 %v1559_v2, %v1556_v54  ;;  %v1577_v40 = vshll.u32 %v7439_v39, 16  ;;  %v1582_v59 = vshrl.u32 %v5290_v25, 16  ;;  %v1585_v50 = vshll.u32 %v5290_v25, 16  ;;  %v6415_v23 = vld [vmem:[%s7111_s28 + $0x18] ss:$8 sps:$4 sm:$0xff]  }
  0xa2   : > { %v1570_v35 = vrot.slane %v1568_v38, 4  ;;  %v1573_v36 = vrot.slane %v1571_v8, 5  ;;  %v1591_v18 = vshll.u32 %v7447_v6, 16  ;;  %v1596_v60 = vshrl.u32 %v5292_v26, 16  ;;  %v5308_v38 = vld [vmem:[%s6607_s16 + $0x38] sm:$0xe] }
  0xa3   : > { %v1561_v21 = vrot.slane %v1560_v47, 4  ;;  %v1579_v62 = vrot.slane %v1577_v40, 5  ;;  %v1584_v17 = vrot.slane %v1582_v59, 4  ;;  %v1587_v44 = vrot.slane %v1585_v50, 5  ;;  %v5309_v50 = vld [vmem:[%s6607_s16 + $0x40] sm:$0xe] }
  0xa4   : > { %v1574_v48 = vor.u32 %v1573_v36, %v1570_v35  ;;  %v1598_v55 = vrot.slane %v1596_v60, 4  ;;  %v1599_v9 = vshll.u32 %v5292_v26, 16  ;;  %v1593_v19 = vrot.slane %v1591_v18, 5  ;;  %v5310_v35 = vld [vmem:[%s6607_s16 + $0x48] sm:$0xe] }
  0xa5   : > { %5915 = vmatmul.mubr.msk.bf16.vlgmr.msra.gmra.mrb[0].mxu1 %vm512_vm3, %v5296_v52  ;;  %v1566_v41 = vsel %vm6679_vm4, %v1561_v21, %v1565_v29  ;;  %v1588_v51 = vor.u32 %v1587_v44, %v1584_v17  ;;  %v1605_v16 = vshll.u32 %v7469_v34, 16  ;;  %v5311_v57 = vrot.slane %v5303_v13, 9  ;;  %v7521_v21 = vld [vmem:[%s7111_s28 + $0xc] sm:$0x1]  ;;  %v5551_v13 = vld [vmem:[%s7111_s28 + $0x10] sm:$0xf] }
  0xa6   : > { %5923 = vmatpush3.bf16.msra.mxu1 %v7416_v4  ;;  %v1575_v0 = vrot.slane %v1574_v48, 4  ;;  %v1601_v12 = vrot.slane %v1599_v9, 5  ;;  %v1737_v4 = vrot.slane %v7368_v30, 5  ;;  %v5312_v33 = vrot.slane %v5304_v11, 9 }
  0xa7   : > { %6049 = vmatmul.mubr.msk.bf16.gmra.mrb[4].mxu0 %vm512_vm3, %v5527_v15  ;;  %6331 = vmatprep.subr.msk.bf16.mxu1 %vm525_vm0, %v5328_v63  ;;  %v1589_v53 = vrot.slane %v1588_v51, 4  ;;  %v1607_v25 = vrot.slane %v1605_v16, 5  ;;  %v1741_v31 = vrot.slane %v7383_v58, 5  ;;  %v5313_v30 = vrot.slane %v5305_v56, 9  ;;  %v5307_v15 = vld [vmem:[%s6607_s16 + $0x30] sm:$0xe] }
  0xa8   : > { %6054 = vmatprep.mubr.msk.bf16.mxu0 %vm512_vm3, %v6414_v32  ;;  %v1580_v45 = vsel %vm6679_vm4, %v1575_v0, %v1579_v62  ;;  %v1602_v27 = vor.u32 %v1601_v12, %v1598_v55  ;;  %v1738_v24 = vsel %vm6779_vm7, %v5311_v57, %v1737_v4  ;;  %v4169_v49 = vsel %vm525_vm0, %v5565_v28, 0  ;;  %v6416_v28 = vld [vmem:[%s7111_s28 + $0x28] ss:$8 sps:$4 sm:$0xff]   ;;  %v7531_v55 = vld [vmem:[%s7111_s28 + $0x14] sm:$0x1] }
  0xa9   : > { %v5297_v1 = vcombine.low %v1566_v41, %v1580_v45  ;;  %v1742_v26 = vsel %vm6779_vm7, %v5312_v33, %v1741_v31  ;;  %v1745_v52 = vrot.slane %v7392_v20, 5  ;;  %v1594_v58 = vsel %vm6679_vm4, %v1589_v53, %v1593_v19  ;;  %v5549_v32 = vld [vmem:[%s7111_s28 + $0x8] sm:$0xf]  ;;  %v5553_v16 = vld [vmem:[%s7111_s28 + $0x18] sm:$0xf] }
  0xaa   : > { %v1603_v7 = vrot.slane %v1602_v27, 4  ;;  %v5314_v54 = vrot.slane %v5306_v14, 9  ;;  %v1749_v2 = vrot.slane %v7404_v5, 5  ;;  %v5320_v29 = vcombine.low %v1738_v24, %v1742_v26  ;;  %v7543_v57 = vld [vmem:[%s7111_s28 + $0x1c] sm:$0x1] }
  0xab   : > { %5918 = vmatprep.mubr.msk.bf16.mxu1 %vm512_vm3, %v5297_v1  ;;  %v5315_v8 = vrot.slane %v5307_v15, 9  ;;  %v1753_v20 = vrot.slane %v7431_v22, 5  ;;  %v1746_v40 = vsel %vm6779_vm7, %v5313_v30, %v1745_v52  ;;  %v5316_v59 = vrot.slane %v5308_v38, 9  ;;  %v5555_v33 = vld [vmem:[%s7111_s28 + $0x20] sm:$0xf] }
  0xac   : > { %v1608_v47 = vsel %vm6679_vm4, %v1603_v7, %v1607_v25  ;;  %v1757_v5 = vrot.slane %v7439_v39, 5  ;;  %v1750_v18 = vsel %vm6779_vm7, %v5314_v54, %v1749_v2  ;;  %v1912_v60 = vsel %vm525_vm0, %v5328_v63, 0  ;;  %v7548_v27 = vld [vmem:[%s7111_s28 + $0x24] sm:$0x1] }
  0xad   : > { %v5298_v36 = vcombine.low %v1594_v58, %v1608_v47  ;;  %v1754_v22 = vsel %vm6779_vm7, %v5315_v8, %v1753_v20  ;;  %v5317_v62 = vrot.slane %v5309_v50, 9  ;;  %v1761_v17 = vrot.slane %v7447_v6, 5  ;;  %v6417_v6 = vld [vmem:[%s7111_s28 + $0x38] ss:$8 sps:$4 sm:$0xff]  }
  0xae   : > { %v1758_v39 = vsel %vm6779_vm7, %v5316_v59, %v1757_v5  ;;  %v5318_v44 = vrot.slane %v5310_v35, 9  ;;  %v1765_v48 = vrot.slane %v7469_v34, 5  ;;  %v4031_v9 = vshrl.u32 %v5549_v32, 16  ;;  %v5590_v34 = vld [vmem:[%s7983_s3 + $0x2e] sm:$0x3] }
  0xaf   : > { %6055 = vmatmul.mubr.msk.bf16.vlgmr.msra.gmra.mrb[0].mxu0 %vm512_vm3, %v6415_v23  ;;  %5919 = vmatmul.mubr.msk.bf16.gmra.mrb[4].mxu1 %vm512_vm3, %v5298_v36  ;;  %v4034_v11 = vshll.u32 %v5549_v32, 16  ;;  %v4040_v56 = vshll.u32 %v7521_v21, 16  ;;  %v5321_v41 = vcombine.low %v1746_v40, %v1750_v18  ;;  %v4045_v51 = vshrl.u32 %v5551_v13, 16  ;;  %v5337_v35 = vld [vmem:[%s7983_s3 + $0x14] sm:$0x3] }
  0xb0   : > { %6063 = vmatpush3.bf16.msra.mxu0 %v4169_v49  ;;  %5924 = vmatprep.mubr.msk.bf16.mxu1 %vm512_vm3, %v5320_v29  ;;  %v4048_v19 = vshll.u32 %v5551_v13, 16  ;;  %v5322_v14 = vcombine.low %v1754_v22, %v1758_v39  ;;  %v4033_v63 = vrot.slane %v4031_v9, 4  ;;  %v4054_v25 = vshll.u32 %v7531_v55, 16  ;;  %v5557_v36 = vld [vmem:[%s7111_s28 + $0x28] sm:$0xf] }
  0xb1   : > { %6058 = vmatprep.mubr.msk.bf16.mxu0 %vm512_vm3, %v6416_v28  ;;  %v4036_v0 = vrot.slane %v4034_v11, 5  ;;  %v4042_v12 = vrot.slane %v4040_v56, 5  ;;  %6346 = vmatprep.subr.msk.bf16.mxu0 %vm525_vm0, %v5590_v34  ;;  %v4047_v4 = vrot.slane %v4045_v51, 4  ;;  %v4059_v31 = vshrl.u32 %v5553_v16, 16  ;;  %v6418_v13 = vld [vmem:[%s6664_s7] ss:$8 sps:$4 sm:$0xff]  }
  0xb2   : > { %v4050_v53 = vrot.slane %v4048_v19, 5  ;;  %v4062_v24 = vshll.u32 %v5553_v16, 16  ;;  %v4068_v30 = vshll.u32 %v7543_v57, 16  ;;  %v4073_v1 = vshrl.u32 %v5555_v33, 16 }
  0xb3   : > { %v4037_v45 = vor.u32 %v4036_v0, %v4033_v63  ;;  %v4056_v49 = vrot.slane %v4054_v25, 5  ;;  %v4061_v26 = vrot.slane %v4059_v31, 4  ;;  %v4076_v52 = vshll.u32 %v5555_v33, 16  ;;  %v5563_v31 = vld [vmem:[%s7111_s28 + $0x40] sm:$0xf] }
  0xb4   : > { %v4051_v23 = vor.u32 %v4050_v53, %v4047_v4  ;;  %v1762_v58 = vsel %vm6779_vm7, %v5317_v62, %v1761_v17  ;;  %v4064_v54 = vrot.slane %v4062_v24, 5  ;;  %v4075_v2 = vrot.slane %v4073_v1, 4  ;;  %v7574_v62 = vld [vmem:[%s7111_s28 + $0x2c] sm:$0x1]  ;;  %v5559_v17 = vld [vmem:[%s7111_s28 + $0x30] sm:$0xf] }
  0xb5   : > { %v4038_v7 = vrot.slane %v4037_v45, 4  ;;  %v1766_v15 = vsel %vm6779_vm7, %v5318_v44, %v1765_v48  ;;  %v4078_v28 = vrot.slane %v4076_v52, 5  ;;  %v4082_v38 = vshll.u32 %v7548_v27, 16  ;;  %v7579_v48 = vld [vmem:[%s7111_s28 + $0x34] sm:$0x1] }
  0xb6   : > { %v4052_v29 = vrot.slane %v4051_v23, 4  ;;  %v4065_v20 = vor.u32 %v4064_v54, %v4061_v26  ;;  %v4070_v47 = vrot.slane %v4068_v30, 5  ;;  %v4327_v40 = vsel %vm525_vm0, %v5590_v34, 0  ;;  %v5561_v34 = vld [vmem:[%s7111_s28 + $0x38] sm:$0xf] }
  0xb7   : > { %6059 = vmatmul.mubr.msk.bf16.gmra.mrb[4].mxu0 %vm512_vm3, %v6417_v6  ;;  %5925 = vmatmul.mubr.msk.bf16.vlgmr.msra.gmra.mrb[0].mxu1 %vm512_vm3, %v5321_v41  ;;  %v4043_v8 = vsel %vm6679_vm4, %v4038_v7, %v4042_v12  ;;  %v4079_v5 = vor.u32 %v4078_v28, %v4075_v2  ;;  %v4084_v50 = vrot.slane %v4082_v38, 5  ;;  %v4270_v18 = vrot.slane %v7521_v21, 5  ;;  %v7590_v12 = vld [vmem:[%s7111_s28 + $0x3c] sm:$0x1]  ;;  %v7594_v24 = vld [vmem:[%s7111_s28 + $0x44] sm:$0x1] }
  0xb8   : > { %5933 = vmatpush3.bf16.msra.mxu1 %v1912_v60  ;;  %5928 = vmatprep.mubr.msk.bf16.mxu1 %vm512_vm3, %v5322_v14  ;;  %v4057_v59 = vsel %vm6679_vm4, %v4052_v29, %v4056_v49  ;;  %v5323_v22 = vcombine.low %v1762_v58, %v1766_v15  ;;  %v4066_v39 = vrot.slane %v4065_v20, 4  ;;  %v7571_v60 = vsel %vm525_vm0, %v5337_v35, 0  ;;  %v6419_v29 = vld [vmem:[%s6664_s7 + $0x10] ss:$8 sps:$4 sm:$0xff]  }
  0xb9   : > { %v5566_v32 = vcombine.low %v4043_v8, %v4057_v59  ;;  %6332 = vmatprep.subr.msk.bf16.mxu1 %vm525_vm0, %v5337_v35  ;;  %v4080_v44 = vrot.slane %v4079_v5, 4  ;;  %v4087_v9 = vshrl.u32 %v5557_v36, 16  ;;  %v4090_v11 = vshll.u32 %v5557_v36, 16  ;;  %v5574_v35 = vld [vmem:[%s7111_s28 + $0x8] sm:$0xe] }
  0xba   : > { %v4096_v56 = vshll.u32 %v7574_v62, 16  ;;  %v4071_v41 = vsel %vm6679_vm4, %v4066_v39, %v4070_v47  ;;  %v4101_v6 = vshrl.u32 %v5559_v17, 16  ;;  %v4104_v51 = vshll.u32 %v5559_v17, 16  ;;  %v5575_v36 = vld [vmem:[%s7111_s28 + $0x10] sm:$0xe] }
  0xbb   : > { %6064 = vmatprep.mubr.msk.bf16.mxu0 %vm512_vm3, %v5566_v32  ;;  %v4110_v19 = vshll.u32 %v7579_v48, 16  ;;  %v4085_v16 = vsel %vm6679_vm4, %v4080_v44, %v4084_v50  ;;  %v4089_v14 = vrot.slane %v4087_v9, 4  ;;  %v4092_v63 = vrot.slane %v4090_v11, 5  ;;  %v5607_v9 = vld [vmem:[%s7983_s3 + $0x30] sm:$0x3] }
  0xbc   : > { %v4098_v0 = vrot.slane %v4096_v56, 5  ;;  %v5567_v4 = vcombine.low %v4071_v41, %v4085_v16  ;;  %v4103_v53 = vrot.slane %v4101_v6, 4  ;;  %v4106_v25 = vrot.slane %v4104_v51, 5  ;;  %v5576_v56 = vld [vmem:[%s7111_s28 + $0x18] sm:$0xe] }
  0xbd   : > { %v4112_v33 = vrot.slane %v4110_v19, 5  ;;  %v4093_v45 = vor.u32 %v4092_v63, %v4089_v14  ;;  %v4115_v30 = vshrl.u32 %v5561_v34, 16  ;;  %v4118_v1 = vshll.u32 %v5561_v34, 16  ;;  %v5577_v41 = vld [vmem:[%s7111_s28 + $0x20] sm:$0xe] }
  0xbe   : > { %v4124_v23 = vshll.u32 %v7590_v12, 16  ;;  %v4107_v49 = vor.u32 %v4106_v25, %v4103_v53  ;;  %v4129_v26 = vshrl.u32 %v5563_v31, 16  ;;  %v4132_v52 = vshll.u32 %v5563_v31, 16  ;;  %v1987_v34 = vld [vmem:[%s6664_s7] sm:$0xf] }
  0xbf   : > { %5929 = vmatmul.mubr.msk.bf16.gmra.mrb[4].mxu1 %vm512_vm3, %v5323_v22  ;;  %6065 = vmatmul.mubr.msk.bf16.vlgmr.msra.gmra.mrb[0].mxu0 %vm512_vm3, %v5567_v4  ;;  %v4138_v58 = vshll.u32 %v7594_v24, 16  ;;  %v4094_v7 = vrot.slane %v4093_v45, 4  ;;  %v4117_v54 = vrot.slane %v4115_v30, 4  ;;  %v4120_v2 = vrot.slane %v4118_v1, 5  ;;  %v7629_v16 = vld [vmem:[%s6664_s7 + $0x4] sm:$0x1] }
  0xc0   : > { %6073 = vmatpush3.bf16.msra.mxu0 %v4327_v40  ;;  %5934 = vmatprep.mubr.msk.bf16.mxu1 %vm512_vm3, %v6418_v13  ;;  %v4126_v15 = vrot.slane %v4124_v23, 5  ;;  %v4108_v28 = vrot.slane %v4107_v49, 4  ;;  %v4131_v38 = vrot.slane %v4129_v26, 4  ;;  %v4134_v8 = vrot.slane %v4132_v52, 5  ;;  %v6420_v40 = vld [vmem:[%s6664_s7 + $0x20] ss:$8 sps:$4 sm:$0xff]  }
  0xc1   : > { %v4140_v20 = vrot.slane %v4138_v58, 5  ;;  %v4099_v47 = vsel %vm6679_vm4, %v4094_v7, %v4098_v0  ;;  %v4121_v59 = vor.u32 %v4120_v2, %v4117_v54  ;;  %v4274_v22 = vrot.slane %v7531_v55, 5  ;;  %6347 = vmatprep.subr.msk.bf16.mxu0 %vm525_vm0, %v5607_v9  ;;  %v7639_v0 = vld [vmem:[%s6664_s7 + $0xc] sm:$0x1]  ;;  %v1991_v31 = vld [vmem:[%s6664_s7 + $0x10] sm:$0xf] }
  0xc2   : > { %v4113_v5 = vsel %vm6679_vm4, %v4108_v28, %v4112_v33  ;;  %v4135_v50 = vor.u32 %v4134_v8, %v4131_v38  ;;  %v4278_v32 = vrot.slane %v7543_v57, 5  ;;  %v5582_v44 = vrot.slane %v5574_v35, 9  ;;  %v7647_v45 = vld [vmem:[%s6664_s7 + $0x14] sm:$0x1]  ;;  %v6421_v30 = vld [vmem:[%s6664_s7 + $0x30] ss:$8 sps:$4 sm:$0xff]  }
  0xc3   : > { %v5568_v39 = vcombine.low %v4099_v47, %v4113_v5  ;;  %v4122_v17 = vrot.slane %v4121_v59, 4  ;;  %v5583_v13 = vrot.slane %v5575_v36, 9  ;;  %v4282_v55 = vrot.slane %v7548_v27, 5  ;;  %v1993_v26 = vld [vmem:[%s6664_s7 + $0x18] sm:$0xf] }
  0xc4   : > { %v4136_v11 = vrot.slane %v4135_v50, 4  ;;  %v4271_v6 = vsel %vm6779_vm7, %v5582_v44, %v4270_v18  ;;  %v5584_v19 = vrot.slane %v5576_v56, 9  ;;  %v5585_v21 = vrot.slane %v5577_v41, 9  ;;  %v1989_v18 = vld [vmem:[%s6664_s7 + $0x8] sm:$0xf] }
  0xc5   : > { %6068 = vmatprep.mubr.msk.bf16.mxu0 %vm512_vm3, %v5568_v39  ;;  %v4127_v57 = vsel %vm6679_vm4, %v4122_v17, %v4126_v15  ;;  %v4275_v51 = vsel %vm6779_vm7, %v5583_v13, %v4274_v22  ;;  %v7635_v63 = vsel %vm525_vm0, %v5607_v9, 0  ;;  %v2004_v25 = vshrl.u32 %v1987_v34, 16  ;;  %v7657_v2 = vld [vmem:[%s6664_s7 + $0x1c] sm:$0x1]  ;;  %v5354_v8 = vld [vmem:[%s7983_s3 + $0x16] sm:$0x3] }
  0xc6   : > { %v4141_v27 = vsel %vm6679_vm4, %v4136_v11, %v4140_v20  ;;  %v5591_v14 = vcombine.low %v4271_v6, %v4275_v51  ;;  %v4279_v53 = vsel %vm6779_vm7, %v5584_v19, %v4278_v32  ;;  %v2007_v33 = vshll.u32 %v1987_v34, 16  ;;  %v5578_v22 = vld [vmem:[%s7111_s28 + $0x28] sm:$0xe]  ;;  %v5579_v13 = vld [vmem:[%s7111_s28 + $0x30] sm:$0xe] }
  0xc7   : > { %5935 = vmatmul.mubr.msk.bf16.vlgmr.msra.gmra.mrb[0].mxu1 %vm512_vm3, %v6419_v29  ;;  %v5569_v4 = vcombine.low %v4127_v57, %v4141_v27  ;;  %v4283_v1 = vsel %vm6779_vm7, %v5585_v21, %v4282_v55  ;;  %v2013_v23 = vshll.u32 %v7629_v16, 16  ;;  %v2018_v49 = vshrl.u32 %v1989_v18, 16  ;;  %v5580_v55 = vld [vmem:[%s7111_s28 + $0x38] sm:$0xe]  ;;  %v5581_v34 = vld [vmem:[%s7111_s28 + $0x40] sm:$0xe] }
  0xc8   : > { %5943 = vmatpush3.bf16.msra.mxu1 %v7571_v60  ;;  %5938 = vmatprep.mubr.msk.bf16.mxu1 %vm512_vm3, %v6420_v40  ;;  %v2021_v60 = vshll.u32 %v1989_v18, 16  ;;  %v5592_v52 = vcombine.low %v4279_v53, %v4283_v1  ;;  %v2006_v58 = vrot.slane %v2004_v25, 4  ;;  %v2009_v7 = vrot.slane %v2007_v33, 5  ;;  %v7679_v53 = vld [vmem:[%s6664_s7 + $0x24] sm:$0x1] }
  0xc9   : > { %6069 = vmatmul.mubr.msk.bf16.gmra.mrb[4].mxu0 %vm512_vm3, %v5569_v4  ;;  %v2027_v54 = vshll.u32 %v7639_v0, 16  ;;  %v2015_v15 = vrot.slane %v2013_v23, 5  ;;  %v2020_v29 = vrot.slane %v2018_v49, 4  ;;  %v2032_v38 = vshrl.u32 %v1991_v31, 16  ;;  %6333 = vmatprep.subr.msk.bf16.mxu1 %vm525_vm0, %v5354_v8  ;;  %v1995_v4 = vld [vmem:[%s6664_s7 + $0x20] sm:$0xf] }
  0xca   : > { %6074 = vmatprep.mubr.msk.bf16.mxu0 %vm512_vm3, %v5591_v14  ;;  %v2023_v28 = vrot.slane %v2021_v60, 5  ;;  %v2010_v20 = vor.u32 %v2009_v7, %v2006_v58  ;;  %v2035_v59 = vshll.u32 %v1991_v31, 16  ;;  %v2041_v40 = vshll.u32 %v7647_v45, 16  ;;  %v1997_v1 = vld [vmem:[%s6664_s7 + $0x28] sm:$0xf] }
  0xcb   : > { %v2029_v47 = vrot.slane %v2027_v54, 5  ;;  %v2034_v50 = vrot.slane %v2032_v38, 4  ;;  %v2046_v35 = vshrl.u32 %v1993_v26, 16  ;;  %v2049_v36 = vshll.u32 %v1993_v26, 16  ;;  %v7689_v26 = vld [vmem:[%s6664_s7 + $0x2c] sm:$0x1] }
  0xcc   : > { %v2024_v5 = vor.u32 %v2023_v28, %v2020_v29  ;;  %v2011_v32 = vrot.slane %v2010_v20, 4  ;;  %v2037_v39 = vrot.slane %v2035_v59, 5  ;;  %v2043_v17 = vrot.slane %v2041_v40, 5  ;;  %v1999_v7 = vld [vmem:[%s6664_s7 + $0x30] sm:$0xf] }
  0xcd   : > { %v2055_v44 = vshll.u32 %v7657_v2, 16  ;;  %v2048_v11 = vrot.slane %v2046_v35, 4  ;;  %v2051_v56 = vrot.slane %v2049_v36, 5  ;;  %v2300_v41 = vsel %vm525_vm0, %v5354_v8, 0  ;;  %v7699_v54 = vld [vmem:[%s6664_s7 + $0x34] sm:$0x1] }
  0xce   : > { %v2025_v9 = vrot.slane %v2024_v5, 4  ;;  %v2016_v57 = vsel %vm6679_vm4, %v2011_v32, %v2015_v15  ;;  %v2038_v6 = vor.u32 %v2037_v39, %v2034_v50  ;;  %v5586_v19 = vrot.slane %v5578_v22, 9  ;;  %v2001_v38 = vld [vmem:[%s6664_s7 + $0x38] sm:$0xf]  ;;  %v5632_v40 = vld [vmem:[%s7983_s3 + $0x32] sm:$0x3] }
  0xcf   : > { %5939 = vmatmul.mubr.msk.bf16.gmra.mrb[4].mxu1 %vm512_vm3, %v6421_v30  ;;  %v2057_v51 = vrot.slane %v2055_v44, 5  ;;  %v2052_v14 = vor.u32 %v2051_v56, %v2048_v11  ;;  %v4286_v21 = vrot.slane %v7574_v62, 5  ;;  %v5587_v18 = vrot.slane %v5579_v13, 9  ;;  %v6422_v59 = vld [vmem:[%s7111_s28 + $0x10] ss:$8 sps:$4 sm:$0xff]  }
  0xd0   : > { %v2030_v27 = vsel %vm6679_vm4, %v2025_v9, %v2029_v47  ;;  %v2039_v33 = vrot.slane %v2038_v6, 4  ;;  %v4290_v31 = vrot.slane %v7579_v48, 5  ;;  %v5588_v30 = vrot.slane %v5580_v55, 9  ;;  %v7718_v11 = vld [vmem:[%s6664_s7 + $0x3c] sm:$0x1] }
  0xd1   : > { %6075 = vmatmul.mubr.msk.bf16.vlgmr.msra.gmra.mrb[0].mxu0 %vm512_vm3, %v5592_v52  ;;  %v5338_v25 = vcombine.low %v2016_v57, %v2030_v27  ;;  %v2053_v23 = vrot.slane %v2052_v14, 4  ;;  %v4287_v62 = vsel %vm6779_vm7, %v5586_v19, %v4286_v21  ;;  %v4294_v49 = vrot.slane %v7590_v12, 5  ;;  %v2217_v19 = vld [vmem:[%s6664_s7] sm:$0xe]  ;;  %v2218_v21 = vld [vmem:[%s6664_s7 + $0x8] sm:$0xe] }
  0xd2   : > { %6083 = vmatpush3.bf16.msra.mxu0 %v7635_v63  ;;  %v5589_v60 = vrot.slane %v5581_v34, 9  ;;  %v2044_v48 = vsel %vm6679_vm4, %v2039_v33, %v2043_v17  ;;  %v4291_v52 = vsel %vm6779_vm7, %v5587_v18, %v4290_v31  ;;  %v4298_v63 = vrot.slane %v7594_v24, 5  ;;  %v6423_v33 = vld [vmem:[%s7111_s28 + $0x20] ss:$8 sps:$4 sm:$0xff]  }
  0xd3   : > { %5944 = vmatprep.mubr.msk.bf16.mxu1 %vm512_vm3, %v5338_v25  ;;  %v2060_v58 = vshrl.u32 %v1995_v4, 16  ;;  %v2058_v12 = vsel %vm6679_vm4, %v2053_v23, %v2057_v51  ;;  %v5593_v15 = vcombine.low %v4287_v62, %v4291_v52  ;;  %v4295_v29 = vsel %vm6779_vm7, %v5588_v30, %v4294_v49  ;;  %6348 = vmatprep.subr.msk.bf16.mxu0 %vm525_vm0, %v5632_v40  ;;  %v2219_v30 = vld [vmem:[%s6664_s7 + $0x10] sm:$0xe] }
  0xd4   : > { %v2063_v28 = vshll.u32 %v1995_v4, 16  ;;  %v5339_v8 = vcombine.low %v2044_v48, %v2058_v12  ;;  %v4299_v20 = vsel %vm6779_vm7, %v5589_v60, %v4298_v63  ;;  %v2069_v24 = vshll.u32 %v7679_v53, 16  ;;  %v2220_v60 = vld [vmem:[%s6664_s7 + $0x18] sm:$0xe] }
  0xd5   : > { %v2062_v47 = vrot.slane %v2060_v58, 4  ;;  %6078 = vmatprep.mubr.msk.bf16.mxu0 %vm512_vm3, %v5593_v15  ;;  %v5594_v5 = vcombine.low %v4295_v29, %v4299_v20  ;;  %v2074_v35 = vshrl.u32 %v1997_v1, 16  ;;  %v2077_v36 = vshll.u32 %v1997_v1, 16 }
  0xd6   : > { %v2065_v50 = vrot.slane %v2063_v28, 5  ;;  %v2071_v22 = vrot.slane %v2069_v24, 5  ;;  %v2083_v32 = vshll.u32 %v7689_v26, 16  ;;  %v2088_v39 = vshrl.u32 %v1999_v7, 16 }
  0xd7   : > { %5945 = vmatmul.mubr.msk.bf16.vlgmr.msra.gmra.mrb[0].mxu1 %vm512_vm3, %v5339_v8  ;;  %v2091_v17 = vshll.u32 %v1999_v7, 16  ;;  %v2076_v13 = vrot.slane %v2074_v35, 4  ;;  %v2079_v9 = vrot.slane %v2077_v36, 5  ;;  %v2097_v56 = vshll.u32 %v7699_v54, 16  ;;  %v5371_v7 = vld [vmem:[%s7983_s3 + $0x18] sm:$0x3] }
  0xd8   : > { %5953 = vmatpush3.bf16.msra.mxu1 %v2300_v41  ;;  %v2066_v44 = vor.u32 %v2065_v50, %v2062_v47  ;;  %v2085_v55 = vrot.slane %v2083_v32, 5  ;;  %v2090_v57 = vrot.slane %v2088_v39, 4  ;;  %v2102_v51 = vshrl.u32 %v2001_v38, 16  ;;  %v6424_v47 = vld [vmem:[%s7111_s28 + $0x30] ss:$8 sps:$4 sm:$0xff]  }
  0xd9   : > { %6079 = vmatmul.mubr.msk.bf16.gmra.mrb[4].mxu0 %vm512_vm3, %v5594_v5  ;;  %v2093_v6 = vrot.slane %v2091_v17, 5  ;;  %v2080_v41 = vor.u32 %v2079_v9, %v2076_v13  ;;  %v2099_v27 = vrot.slane %v2097_v56, 5  ;;  %v2105_v14 = vshll.u32 %v2001_v38, 16  ;;  %6334 = vmatprep.subr.msk.bf16.mxu1 %vm525_vm0, %v5371_v7  ;;  %v2221_v35 = vld [vmem:[%s6664_s7 + $0x20] sm:$0xe] }
  0xda   : > { %v2067_v34 = vrot.slane %v2066_v44, 4  ;;  %6084 = vmatprep.mubr.msk.bf16.mxu0 %vm512_vm3, %v6422_v59  ;;  %v2104_v4 = vrot.slane %v2102_v51, 4  ;;  %v2111_v25 = vshll.u32 %v7718_v11, 16  ;;  %v4676_v31 = vsel %vm525_vm0, %v5632_v40, 0  ;;  %v6425_v17 = vld [vmem:[%s7111_s28 + $0x40] ss:$8 sps:$4 sm:$0xff]  }
  0xdb   : > { %v2094_v18 = vor.u32 %v2093_v6, %v2090_v57  ;;  %v2081_v23 = vrot.slane %v2080_v41, 4  ;;  %v2107_v62 = vrot.slane %v2105_v14, 5  ;;  %v5346_v49 = vrot.slane %v2217_v19, 9  ;;  %v2224_v13 = vld [vmem:[%s6664_s7 + $0x38] sm:$0xe] }
  0xdc   : > { %v2072_v1 = vsel %vm6679_vm4, %v2067_v34, %v2071_v22  ;;  %v2113_v52 = vrot.slane %v2111_v25, 5  ;;  %v2243_v63 = vrot.slane %v7629_v16, 5  ;;  %v5347_v58 = vrot.slane %v2218_v21, 9  ;;  %v2223_v22 = vld [vmem:[%s6664_s7 + $0x30] sm:$0xe] }
  0xdd   : > { %v2095_v48 = vrot.slane %v2094_v18, 4  ;;  %v2086_v12 = vsel %vm6679_vm4, %v2081_v23, %v2085_v55  ;;  %v2108_v15 = vor.u32 %v2107_v62, %v2104_v4  ;;  %v2247_v29 = vrot.slane %v7639_v0, 5  ;;  %v5616_v9 = vld [vmem:[%s7111_s28 + $0x10] sm:$0xf]  ;;  %v7779_v6 = vld [vmem:[%s7111_s28 + $0x14] sm:$0x1] }
  0xde   : > { %v5348_v28 = vrot.slane %v2219_v30, 9  ;;  %v5340_v38 = vcombine.low %v2072_v1, %v2086_v12  ;;  %v2244_v16 = vsel %vm6779_vm7, %v5346_v49, %v2243_v63  ;;  %v2251_v20 = vrot.slane %v7647_v45, 5  ;;  %v5618_v19 = vld [vmem:[%s7111_s28 + $0x18] sm:$0xf]  ;;  %v7786_v34 = vld [vmem:[%s7111_s28 + $0x1c] sm:$0x1] }
  0xdf   : > { %v2100_v8 = vsel %vm6679_vm4, %v2095_v48, %v2099_v27  ;;  %v2109_v24 = vrot.slane %v2108_v15, 4  ;;  %v2248_v59 = vsel %vm6779_vm7, %v5347_v58, %v2247_v29  ;;  %v5349_v0 = vrot.slane %v2220_v60, 9  ;;  %v5657_v18 = vld [vmem:[%s7983_s3 + $0x34] sm:$0x3]  ;;  %v5620_v4 = vld [vmem:[%s7111_s28 + $0x20] sm:$0xf] }
  0xe0   : > { %v2255_v40 = vrot.slane %v7657_v2, 5  ;;  %v7751_v5 = vrot.slane %v2604_v37, 5  ;;  %v7755_v50 = vrot.slane %v2618_v10, 5  ;;  %5948 = vmatprep.mubr.msk.bf16.mxu1 %vm512_vm3, %v5340_v38  ;;  %v5355_v45 = vcombine.low %v2244_v16, %v2248_v59  ;;  %v2222_v37 = vld [vmem:[%s6664_s7 + $0x28] sm:$0xe] }
  0xe1   : > { %6085 = vmatmul.mubr.msk.bf16.vlgmr.msra.gmra.mrb[0].mxu0 %vm512_vm3, %v6423_v33  ;;  %v2259_v36 = vrot.slane %v7679_v53, 5  ;;  %v2114_v46 = vsel %vm6679_vm4, %v2109_v24, %v2113_v52  ;;  %v2252_v42 = vsel %vm6779_vm7, %v5348_v28, %v2251_v20  ;;  %v5350_v10 = vrot.slane %v2221_v35, 9  ;;  %v7797_v1 = vld [vmem:[%s7111_s28 + $0x24] sm:$0x1]  ;;  %v5622_v49 = vld [vmem:[%s7111_s28 + $0x28] sm:$0xf] }
  0xe2   : > { %6093 = vmatpush3.bf16.msra.mxu0 %v4676_v31  ;;  %6088 = vmatprep.mubr.msk.bf16.mxu0 %vm512_vm3, %v6424_v47  ;;  %v2263_v2 = vrot.slane %v7689_v26, 5  ;;  %v5341_v32 = vcombine.low %v2100_v8, %v2114_v46  ;;  %v2256_v53 = vsel %vm6779_vm7, %v5349_v0, %v2255_v40  ;;  %v2419_v39 = vsel %vm525_vm0, %v5371_v7, 0  ;;  %v7807_v63 = vld [vmem:[%s7111_s28 + $0x2c] sm:$0x1] }
  0xe3   : > { %v5351_v44 = vrot.slane %v2222_v37, 9  ;;  %v2260_v56 = vsel %vm6779_vm7, %v5350_v10, %v2259_v36  ;;  %v5352_v55 = vrot.slane %v2223_v22, 9  ;;  %v2267_v26 = vrot.slane %v7699_v54, 5  ;;  %6349 = vmatprep.subr.msk.bf16.mxu0 %vm525_vm0, %v5657_v18  ;;  %v5624_v10 = vld [vmem:[%s7111_s28 + $0x30] sm:$0xf] }
  0xe4   : > { %v5353_v57 = vrot.slane %v2224_v13, 9  ;;  %5949 = vmatmul.mubr.msk.bf16.gmra.mrb[4].mxu1 %vm512_vm3, %v5341_v32  ;;  %v4538_v41 = vshrl.u32 %v5616_v9, 16  ;;  %v4541_v27 = vshll.u32 %v5616_v9, 16  ;;  %v5356_v14 = vcombine.low %v2252_v42, %v2256_v53  ;;  %v6430_v53 = vld [vmem:[%s7983_s3 + $0x1a] sm:$0x3] }
  0xe5   : > { %v2264_v51 = vsel %vm6779_vm7, %v5351_v44, %v2263_v2  ;;  %5954 = vmatprep.mubr.msk.bf16.mxu1 %vm512_vm3, %v5355_v45  ;;  %v2271_v54 = vrot.slane %v7718_v11, 5  ;;  %v4547_v21 = vshll.u32 %v7779_v6, 16  ;;  %v4552_v30 = vshrl.u32 %v5618_v19, 16  ;;  %v6426_v9 = vld [vmem:[%s6664_s7 + $0x8] ss:$8 sps:$4 sm:$0xff]  }
  0xe6   : > { %v5357_v25 = vcombine.low %v2260_v56, %v2264_v51  ;;  %v4540_v33 = vrot.slane %v4538_v41, 4  ;;  %v4543_v31 = vrot.slane %v4541_v27, 5  ;;  %v7801_v23 = vsel %vm6779_vm7, %v5352_v55, %v2267_v26  ;;  %v7832_v56 = vld [vmem:[%s7111_s28 + $0x3c] sm:$0x1] }
  0xe7   : > { %v4555_v11 = vshll.u32 %v5618_v19, 16  ;;  %v4561_v62 = vshll.u32 %v7786_v34, 16  ;;  %v4566_v60 = vshrl.u32 %v5620_v4, 16  ;;  %v4554_v52 = vrot.slane %v4552_v30, 4 }
  0xe8   : > { %v4544_v48 = vor.u32 %v4543_v31, %v4540_v33  ;;  %v4569_v58 = vshll.u32 %v5620_v4, 16  ;;  %v4575_v7 = vshll.u32 %v7797_v1, 16  ;;  %v4549_v12 = vrot.slane %v4547_v21, 5  ;;  %v5630_v33 = vld [vmem:[%s7111_s28 + $0x48] sm:$0xf] }
  0xe9   : > { %6089 = vmatmul.mubr.msk.bf16.gmra.mrb[4].mxu0 %vm512_vm3, %v6425_v17  ;;  %v4557_v15 = vrot.slane %v4555_v11, 5  ;;  %v4568_v29 = vrot.slane %v4566_v60, 4  ;;  %v4580_v28 = vshrl.u32 %v5622_v49, 16  ;;  %v2272_v38 = vsel %vm6779_vm7, %v5353_v57, %v2271_v54  ;;  %v5626_v17 = vld [vmem:[%s7111_s28 + $0x38] sm:$0xf] }
  0xea   : > { %v4545_v8 = vrot.slane %v4544_v48, 4  ;;  %v4571_v16 = vrot.slane %v4569_v58, 5  ;;  %v4583_v20 = vshll.u32 %v5622_v49, 16  ;;  %v4563_v24 = vrot.slane %v4561_v62, 5  ;;  %v7839_v54 = vld [vmem:[%s7111_s28 + $0x44] sm:$0x1] }
  0xeb   : > { %v4558_v47 = vor.u32 %v4557_v15, %v4554_v52  ;;  %v4582_v59 = vrot.slane %v4580_v28, 4  ;;  %v4589_v0 = vshll.u32 %v7807_v63, 16  ;;  %v4577_v45 = vrot.slane %v4575_v7, 5 }
  0xec   : > { %5955 = vmatmul.mubr.msk.bf16.vlgmr.msra.gmra.mrb[0].mxu1 %vm512_vm3, %v5356_v14  ;;  %v4572_v40 = vor.u32 %v4571_v16, %v4568_v29  ;;  %v4585_v35 = vrot.slane %v4583_v20, 5  ;;  %v4550_v36 = vsel %vm6679_vm4, %v4545_v8, %v4549_v12  ;;  %v4834_v37 = vsel %vm525_vm0, %v5657_v18, 0  ;;  %v5628_v14 = vld [vmem:[%s7111_s28 + $0x40] sm:$0xf] }
  0xed   : > { %5963 = vmatpush3.bf16.msra.mxu1 %v2419_v39  ;;  %5958 = vmatprep.mubr.msk.bf16.mxu1 %vm512_vm3, %v5357_v25  ;;  %v4559_v46 = vrot.slane %v4558_v47, 4  ;;  %v4591_v42 = vrot.slane %v4589_v0, 5  ;;  %v5358_v2 = vcombine.low %v7801_v23, %v2272_v38  ;;  %v7825_v39 = vld [vmem:[%s7111_s28 + $0x34] sm:$0x1]  ;;  %v4594_v44 = vshrl.u32 %v5624_v10, 16 }
  0xee   : > { %v4573_v22 = vrot.slane %v4572_v40, 4  ;;  %v4586_v32 = vor.u32 %v4585_v35, %v4582_v59  ;;  %6336 = vmatprep.subr.msk.bf16.mxu1 %vm525_vm0, %v6430_v53  ;;  %v4597_v55 = vshll.u32 %v5624_v10, 16  ;;  %v4603_v26 = vshll.u32 %v7825_v39, 16  ;;  %v7847_v23 = vld [vmem:[%s7111_s28 + $0x4c] sm:$0x1] }
  0xef   : > { %v4564_v13 = vsel %vm6679_vm4, %v4559_v46, %v4563_v24  ;;  %v4608_v57 = vshrl.u32 %v5626_v17, 16  ;;  %v4596_v27 = vrot.slane %v4594_v44, 4  ;;  %v4611_v25 = vshll.u32 %v5626_v17, 16  ;;  %v6427_v16 = vld [vmem:[%s6664_s7 + $0x18] ss:$8 sps:$4 sm:$0xff]  }
  0xf0   : > { %v5633_v51 = vcombine.low %v4550_v36, %v4564_v13  ;;  %v4578_v19 = vsel %vm6679_vm4, %v4573_v22, %v4577_v45  ;;  %v4587_v41 = vrot.slane %v4586_v32, 4  ;;  %v4599_v21 = vrot.slane %v4597_v55, 5  ;;  %v6428_v45 = vld [vmem:[%s6664_s7 + $0x28] ss:$8 sps:$4 sm:$0xff]   ;;  %v5642_v36 = vld [vmem:[%s7111_s28 + $0x18] sm:$0xe] }
  0xf1   : > { %v4605_v18 = vrot.slane %v4603_v26, 5  ;;  %v4610_v4 = vrot.slane %v4608_v57, 4  ;;  %v4617_v30 = vshll.u32 %v7832_v56, 16  ;;  %v4622_v11 = vshrl.u32 %v5628_v14, 16  ;;  %v5641_v35 = vld [vmem:[%s7111_s28 + $0x10] sm:$0xe] }
  0xf2   : > { %6094 = vmatprep.mubr.msk.bf16.mxu0 %vm512_vm3, %v5633_v51  ;;  %v4592_v31 = vsel %vm6679_vm4, %v4587_v41, %v4591_v42  ;;  %v4625_v62 = vshll.u32 %v5628_v14, 16  ;;  %v4600_v60 = vor.u32 %v4599_v21, %v4596_v27  ;;  %v4613_v48 = vrot.slane %v4611_v25, 5  ;;  %v5644_v17 = vld [vmem:[%s7111_s28 + $0x28] sm:$0xe]  ;;  %v5390_v51 = vld [vmem:[%s6664_s7 + $0x30] sm:$0xf] }
  0xf3   : > { %v5634_v49 = vcombine.low %v4578_v19, %v4592_v31  ;;  %v4631_v52 = vshll.u32 %v7839_v54, 16  ;;  %v4624_v58 = vrot.slane %v4622_v11, 4  ;;  %v4636_v12 = vshrl.u32 %v5630_v33, 16  ;;  %v5388_v13 = vld [vmem:[%s6664_s7 + $0x28] sm:$0xf] }
  0xf4   : > { %5959 = vmatmul.mubr.msk.bf16.gmra.mrb[4].mxu1 %vm512_vm3, %v5358_v2  ;;  %v4627_v7 = vrot.slane %v4625_v62, 5  ;;  %v4777_v15 = vrot.slane %v7779_v6, 5  ;;  %v4601_v29 = vrot.slane %v4600_v60, 4  ;;  %v4614_v28 = vor.u32 %v4613_v48, %v4610_v4  ;;  %v5643_v2 = vld [vmem:[%s7111_s28 + $0x20] sm:$0xe] }
  0xf5   : > { %6095 = vmatmul.mubr.msk.bf16.vlgmr.msra.gmra.mrb[0].mxu0 %vm512_vm3, %v5634_v49  ;;  %5964 = vmatprep.mubr.msk.bf16.mxu1 %vm512_vm3, %v6426_v9  ;;  %v4619_v38 = vrot.slane %v4617_v30, 5  ;;  %v4639_v8 = vshll.u32 %v5630_v33, 16  ;;  %v4633_v47 = vrot.slane %v4631_v52, 5  ;;  %v4638_v24 = vrot.slane %v4636_v12, 4  ;;  %v6431_v25 = vld [vmem:[%s6664_s7 + $0x2c] sm:$0x1] }
  0xf6   : > { %6103 = vmatpush3.bf16.msra.mxu0 %v4834_v37  ;;  %v4628_v20 = vor.u32 %v4627_v7, %v4624_v58  ;;  %v4645_v6 = vshll.u32 %v7847_v23, 16  ;;  %v4606_v59 = vsel %vm6679_vm4, %v4601_v29, %v4605_v18  ;;  %v4615_v0 = vrot.slane %v4614_v28, 4  ;;  %v5392_v30 = vld [vmem:[%s6664_s7 + $0x38] sm:$0xf]  ;;  %v5394_v11 = vld [vmem:[%s6664_s7 + $0x40] sm:$0xf] }
  0xf7   : > { %v4641_v40 = vrot.slane %v4639_v8, 5  ;;  %v5649_v37 = vrot.slane %v5641_v35, 9  ;;  %v5650_v10 = vrot.slane %v5642_v36, 9  ;;  %v4781_v53 = vrot.slane %v7786_v34, 5  ;;  %v6429_v52 = vld [vmem:[%s6664_s7 + $0x38] ss:$8 sps:$4 sm:$0xff]  }
  0xf8   : > { %v4629_v46 = vrot.slane %v4628_v20, 4  ;;  %v4647_v42 = vrot.slane %v4645_v6, 5  ;;  %v4620_v22 = vsel %vm6679_vm4, %v4615_v0, %v4619_v38  ;;  %v5651_v44 = vrot.slane %v5643_v2, 9  ;;  %v5646_v20 = vld [vmem:[%s7111_s28 + $0x38] sm:$0xe] }
  0xf9   : > { %v4642_v32 = vor.u32 %v4641_v40, %v4638_v24  ;;  %v5635_v9 = vcombine.low %v4606_v59, %v4620_v22  ;;  %v4778_v26 = vsel %vm6779_vm7, %v5649_v37, %v4777_v15  ;;  %v4785_v57 = vrot.slane %v7797_v1, 5  ;;  %v6432_v15 = vld [vmem:[%s6664_s7 + $0x34] sm:$0x1]  ;;  %v5647_v0 = vld [vmem:[%s7111_s28 + $0x40] sm:$0xe] }
  0xfa   : > { %v4634_v55 = vsel %vm6679_vm4, %v4629_v46, %v4633_v47  ;;  %v4782_v41 = vsel %vm6779_vm7, %v5650_v10, %v4781_v53  ;;  %v5652_v34 = vrot.slane %v5644_v17, 9  ;;  %v4789_v27 = vrot.slane %v7807_v63, 5  ;;  %v5648_v2 = vld [vmem:[%s7111_s28 + $0x48] sm:$0xe] }
  0xfb   : > { %v4643_v19 = vrot.slane %v4642_v32, 4  ;;  %6098 = vmatprep.mubr.msk.bf16.mxu0 %vm512_vm3, %v5635_v9  ;;  %v5658_v14 = vcombine.low %v4778_v26, %v4782_v41  ;;  %v4786_v21 = vsel %vm6779_vm7, %v5651_v44, %v4785_v57  ;;  %v2567_v1 = vshrl.u32 %v5388_v13, 16 }
  0xfc   : > { %5965 = vmatmul.mubr.msk.bf16.vlgmr.msra.gmra.mrb[0].mxu1 %vm512_vm3, %v6427_v16  ;;  %v2570_v18 = vshll.u32 %v5388_v13, 16  ;;  %v4790_v63 = vsel %vm6779_vm7, %v5652_v34, %v4789_v27  ;;  %v2576_v33 = vshll.u32 %v6431_v25, 16  ;;  %v2581_v31 = vshrl.u32 %v5390_v51, 16 }
  0xfd   : > { %6113 = vmatpush3.bf16.msra.mxu1 %v6553_v3  ;;  %v4648_v4 = vsel %vm6679_vm4, %v4643_v19, %v4647_v42  ;;  %5968 = vmatprep.mubr.msk.bf16.mxu1 %vm512_vm3, %v6428_v45  ;;  %v5659_v49 = vcombine.low %v4786_v21, %v4790_v63  ;;  %v2569_v60 = vrot.slane %v2567_v1, 4  ;;  %v5645_v3 = vld [vmem:[%s7111_s28 + $0x30] sm:$0xe]  ;;  %v2584_v12 = vshll.u32 %v5390_v51, 16  ;;  %s5157_s28 = sshll.u32 %s8011_s21, 3 }
  0xfe   : > { %v5636_v62 = vcombine.low %v4634_v55, %v4648_v4  ;;  %v2572_v48 = vrot.slane %v2570_v18, 5  ;;  %v2578_v58 = vrot.slane %v2576_v33, 5  ;;  %v2583_v7 = vrot.slane %v2581_v31, 4  ;;  %s362_s13 = sadd.s32 %s5158_s12, %s5157_s28 }
  0xff   : > { %v2590_v29 = vshll.u32 %v6432_v15, 16  ;;  %v2595_v38 = vshrl.u32 %v5392_v30, 16  ;;  %v2598_v8 = vshll.u32 %v5392_v30, 16  ;;  %v2609_v16 = vshrl.u32 %v5394_v11, 16  ;;  %s5159_s14 = sshll.u32 %s362_s13, 2 }
 0x100   : > { %6099 = vmatmul.mubr.msk.bf16.gmra.mrb[4].mxu0 %vm512_vm3, %v5636_v62  ;;  %v2573_v28 = vor.u32 %v2572_v48, %v2569_v60  ;;  %v2586_v47 = vrot.slane %v2584_v12, 5  ;;  %v2612_v6 = vshll.u32 %v5394_v11, 16  ;;  %v5653_v59 = vrot.slane %v5645_v3, 9  ;;  %s7937_s15 = scalar_lea.vmem %s7984_s4, %s5159_s14 }
 0x101   : > { %6104 = vmatprep.mubr.msk.bf16.mxu0 %vm512_vm3, %v5658_v14  ;;  %v2592_v24 = vrot.slane %v2590_v29, 5  ;;  %v2597_v45 = vrot.slane %v2595_v38, 4  ;;  %v2600_v35 = vrot.slane %v2598_v8, 5  ;;  %v2611_v36 = vrot.slane %v2609_v16, 4 }
 0x102   : > { %v2574_v40 = vrot.slane %v2573_v28, 4  ;;  %v2587_v46 = vor.u32 %v2586_v47, %v2583_v7  ;;  %v2614_v42 = vrot.slane %v2612_v6, 5  ;;  %v4793_v37 = vrot.slane %v7825_v39, 5 }
 0x103   : > { %v5654_v10 = vrot.slane %v5646_v20, 9  ;;  %v2601_v32 = vor.u32 %v2600_v35, %v2597_v45  ;;  %v4797_v53 = vrot.slane %v7832_v56, 5  ;;  %v5655_v17 = vrot.slane %v5647_v0, 9 }
 0x104   : > { %5969 = vmatmul.mubr.msk.bf16.gmra.mrb[4].mxu1 %vm512_vm3, %v6429_v52  ;;  %v2579_v22 = vsel %vm6679_vm4, %v2574_v40, %v2578_v58  ;;  %v2588_v44 = vrot.slane %v2587_v46, 4  ;;  %v2615_v13 = vor.u32 %v2614_v42, %v2611_v36  ;;  %v4794_v9 = vsel %vm6779_vm7, %v5653_v59, %v4793_v37 }
 0x105   : > { %v4801_v55 = vrot.slane %v7839_v54, 5  ;;  %v2602_v26 = vrot.slane %v2601_v32, 4  ;;  %v4798_v39 = vsel %vm6779_vm7, %v5654_v10, %v4797_v53  ;;  %v5656_v57 = vrot.slane %v5648_v2, 9 }
 0x106   : > { %v4805_v51 = vrot.slane %v7847_v23, 5  ;;  %v2593_v19 = vsel %vm6679_vm4, %v2588_v44, %v2592_v24  ;;  %v2616_v56 = vrot.slane %v2615_v13, 4  ;;  %v5660_v41 = vcombine.low %v4794_v9, %v4798_v39 }
 0x107   : > { %v5399_v34 = vcombine.low %v2579_v22, %v2593_v19  ;;  %v2607_v54 = vsel %vm6679_vm4, %v2602_v26, %v7751_v5  ;;  %v4802_v23 = vsel %vm6779_vm7, %v5655_v17, %v4801_v55 }
 0x108   : > { %6105 = vmatmul.mubr.msk.bf16.vlgmr.msra.gmra.mrb[0].mxu0 %vm512_vm3, %v5659_v49  ;;  %v2621_v27 = vsel %vm6679_vm4, %v2616_v56, %v7755_v50  ;;  %v4806_v14 = vsel %vm6779_vm7, %v5656_v57, %v4805_v51 }
 0x109   : > { %6108 = vmatprep.mubr.msk.bf16.mxu0 %vm512_vm3, %v5660_v41  ;;  %5978 = vmatprep.mubr.msk.bf16.mxu1 %vm512_vm3, %v5399_v34  ;;  %v5400_v21 = vcombine.low %v2607_v54, %v2621_v27  ;;  %v5661_v1 = vcombine.low %v4802_v23, %v4806_v14 }
 0x110   : > { %5979 = vmatmul.mubr.msk.bf16.vlgmr.msra.gmra.mrb[4].mxu1 %vm512_vm3, %v5400_v21  ;;  %6109 = vmatmul.mubr.msk.bf16.gmra.mrb[4].mxu0 %vm512_vm3, %v5661_v1 }
 0x1cf   : > { %v5966_v43 = vpop.f32.mrb[0].mxu1 }
 0x1d0   : > { %v2455_v5 = vpop.f32.mrb[1].mxu1 }
 0x1d1   : > { %v5967_v61 = vpop.f32.mrb[2].mxu1 }
 0x1d2   : > { %v2458_v50 = vpop.f32.mrb[3].mxu1 }
 0x1db   : > { %v6106_v18 = vpop.f32.mrb[0].mxu0 }
 0x1dc   : > { %v6114_v4 = vadd.f32 %v6106_v18, %v5966_v43  ;;  %v4870_v63 = vpop.f32.mrb[1].mxu0 }
 0x1dd   : > { %v6115_v25 = vadd.f32 %v4870_v63, %v2455_v5  ;;  %v6107_v33 = vpop.f32.mrb[2].mxu0 }
 0x1de   : > { %v6116_v31 = vadd.f32 %v6107_v33, %v5967_v61  ;;  %v4873_v30 = vpop.f32.mrb[3].mxu0  ;;  %v4964_v52 = vmul.f32 %v6114_v4, %v6114_v4 }
 0x1df   : > { %v6117_v11 = vadd.f32 %v4873_v30, %v2458_v50  ;;  %v4962_v49 = vmul.f32 %v6115_v25, %v6115_v25 }
 0x1e0   : > { %v5692_v62 = vpack.c.bf16 %v6116_v31, %v6114_v4  ;;  %v4965_v8 = vmul.f32 %v6116_v31, %v6116_v31 }
 0x1e1   : > { %v5687_v60 = vpack.c.bf16 %v6117_v11, %v6115_v25  ;;  %v4949_v48 = vadd.f32 %v6117_v11, %v6115_v25  ;;  %v4963_v3 = vmul.f32 %v6117_v11, %v6117_v11 }
 0x1e2   : > { %5704 = vst [vmem:[%s7937_s15 + $0x8] sm:$0xff] %v5692_v62  }
 0x1e3   : > { %5688 = vst [vmem:[%s7937_s15] sm:$0xff] %v5687_v60   ;;  %v4950_v58 = vadd.f32 %v6114_v4, %v4949_v48  ;;  %v4970_v7 = vadd.f32 %v4963_v3, %v4962_v49  ;;  %v5980_v12 = vpop.f32.mrb[4].mxu1  ;;  %v6110_v15 = vpop.f32.mrb[4].mxu0 }
 0x1e4   : > { %v2701_v29 = vpop.f32.mrb[5].mxu1  ;;  %v6118_v28 = vadd.f32 %v6110_v15, %v5980_v12  ;;  %v4886_v38 = vpop.f32.mrb[5].mxu0 }
 0x1e5   : > { %v4971_v16 = vadd.f32 %v4970_v7, %v4964_v52  ;;  %v5981_v20 = vpop.f32.mrb[6].mxu1  ;;  %v6119_v47 = vadd.f32 %v4886_v38, %v2701_v29  ;;  %v4951_v24 = vadd.f32 %v6116_v31, %v4950_v58  ;;  %v6111_v6 = vpop.f32.mrb[6].mxu0 }
 0x1e6   : > { %v2704_v59 = vpop.f32.mrb[7].mxu1  ;;  %v6120_v0 = vadd.f32 %v6111_v6, %v5981_v20  ;;  %v4889_v40 = vpop.f32.mrb[7].mxu0  ;;  %v4968_v32 = vmul.f32 %v6118_v28, %v6118_v28 }
 0x1e7   : > { %v4952_v45 = vadd.f32 %v6119_v47, %v4951_v24  ;;  %v4966_v35 = vmul.f32 %v6119_v47, %v6119_v47  ;;  %v4972_v36 = vadd.f32 %v4971_v16, %v4965_v8  ;;  %v6121_v46 = vadd.f32 %v4889_v40, %v2704_v59 }
 0x1e8   : > { %v5702_v42 = vpack.c.bf16 %v6120_v0, %v6118_v28  ;;  %v4969_v44 = vmul.f32 %v6120_v0, %v6120_v0 }
 0x1e9   : > { %v4973_v37 = vadd.f32 %v4972_v36, %v4966_v35  ;;  %v5697_v10 = vpack.c.bf16 %v6121_v46, %v6119_v47  ;;  %v4953_v2 = vadd.f32 %v6121_v46, %v4952_v45  ;;  %v4967_v22 = vmul.f32 %v6121_v46, %v6121_v46 }
 0x1ea   : > { %5706 = vst [vmem:[%s7937_s15 + $0x18] sm:$0xff] %v5702_v42  }
 0x1eb   : > { %5705 = vst [vmem:[%s7937_s15 + $0x10] sm:$0xff] %v5697_v10   ;;  %v4954_v53 = vadd.f32 %v6118_v28, %v4953_v2  ;;  %v4974_v17 = vadd.f32 %v4973_v37, %v4967_v22 }
 0x1ed   : > { %v4955_v13 = vadd.f32 %v6120_v0, %v4954_v53  ;;  %v4975_v9 = vadd.f32 %v4974_v17, %v4968_v32 }
 0x1ef   : > { %v4956_v55 = vrot.slane %v4955_v13, 4  ;;  %v4976_v26 = vadd.f32 %v4975_v9, %v4969_v44 }
 0x1f1   : > { %v4957_v39 = vadd.f32 %v4956_v55, %v4955_v13  ;;  %v4977_v57 = vrot.slane %v4976_v26, 4 }
 0x1f3   : > { %v4958_v51 = vrot.slane %v4957_v39, 2  ;;  %v4978_v19 = vadd.f32 %v4977_v57, %v4976_v26 }
 0x1f5   : > { %v4959_v56 = vadd.f32 %v4958_v51, %v4957_v39  ;;  %v4979_v41 = vrot.slane %v4978_v19, 2  ;;  %4988 = sbr.rel (%p7927_p11) target bundleno = 510 (0x1fe), region = 40 }
 0x1f7   : > { %v4960_v34 = vrot.slane %v4959_v56, 1  ;;  %v4980_v54 = vadd.f32 %v4979_v41, %v4978_v19 }
 0x1f9   : > { %v4961_v27 = vadd.f32 %v4960_v34, %v4959_v56  ;;  %v4981_v23 = vrot.slane %v4980_v54, 1 }
 0x1fb   : > { %v4982_v14 = vadd.f32 %v4981_v23, %v4980_v54  ;;  %4989 = vst [vmem:[%s7985_s5] sm:$0x1] (!%p7927_p11), %v4961_v27 }
 0x1fd   : > { %4990 = vst [vmem:[%s7986_s6] sm:$0x1] %v4982_v14 }
 0x1fe PF: > { %4993 = sbr.rel (!%p7927_p11) target bundleno = 521 (0x209), region = 44 }
 0x204   : > { %v4994_v21 = vld [vmem:[%s7985_s5] sm:$0x1] (%p7927_p11) }
 0x205   : > { %v4997_v1 = vld [vmem:[%s7986_s6] sm:$0x1]  ;;  %v4995_v43 = vadd.f32 %v4994_v21, %v4961_v27 }
 0x206   : > { %v4998_v5 = vadd.f32 %v4997_v1, %v4982_v14 }
 0x207   : > { %4996 = vst [vmem:[%s7985_s5] sm:$0x1] %v4995_v43 }
 0x208   : > { %4999 = vst [vmem:[%s7986_s6] sm:$0x1] %v4998_v5 }
 0x209 PF: > { %s17_s25 = sadd.s32 1, %s6471_s25   ;;  %s7996_s21 = smov %s6463_s23 }
 0x20a   : > { %p14_p13 = scmp.ge.s32.totalorder %s17_s25, 18   ;;  %s7997_s22 = smov %s6467_s24 }
 0x20b   : > { %s7998_s23 = smov %s8001_s26  ;;  %s7999_s24 = smov %s8005_s27 }
 0x20c   :  { %16 = sbr.rel (!%p14_p13) target bundleno = 3 (0x3), region = 128 }

// kernel: double_conv.6
= control target key start
LH: loop header
LB: loop body
LE: loop exit
PB: predicated region body
PF: predicated region fallthrough
CT: control target
= control target key end

     0   :  { %s9174_s21 = smov 0   ;;  %s9176_s22 = smov 0   ;;  %s10918_s0 = inlined_call_operand.vmem [shape: bf16[2,10,10,10,128], index: 0, kind: input, shape index: {}, may-alias: {0,1,2}]   ;;  %s10919_s1 = inlined_call_operand.vmem [shape: bf16[2,10,10,10,128], index: 1, kind: input, shape index: {}, may-alias: {0,1,2}]   ;;  %s10920_s2 = inlined_call_operand.vmem [shape: bf16[2,10,10,10,128], index: 2, kind: input, shape index: {}, may-alias: {0,1,2}]   ;;  %s10921_s3 = inlined_call_operand.vmem [shape: bf16[27,128,128], index: 3, kind: input, shape index: {}]   ;;  %s10922_s4 = inlined_call_operand.vmem [shape: bf16[2,8,64,128], index: 4, kind: output, shape index: {0}]   ;;  %s10923_s5 = inlined_call_operand.vmem [shape: f32[1,128], index: 5, kind: output, shape index: {1}]   ;;  %s10924_s6 = inlined_call_operand.vmem [shape: f32[1,128], index: 6, kind: output, shape index: {2}]  }
   0x1   :  { %s9178_s23 = smov 0   ;;  %s9180_s24 = smov 0  }
   0x2   :  { %s9182_s25 = smov 0  }
   0x3 LB: > { %s26_s26 = sadd.s32 1, %s9129_s23  ;;  %s29_s27 = sadd.s32 1, %s9133_s24  ;;  %s9137_s25 = sphi %s9182_s25, %s17_s25   ;;  %s9133_s24 = sphi %s9180_s24, %s10934_s24   ;;  %s9129_s23 = sphi %s9178_s23, %s10933_s23   ;;  %s9125_s22 = sphi %s9176_s22, %s10932_s22   ;;  %s9121_s21 = sphi %s9174_s21, %s10931_s21  }
   0x4   : > { %p27_p0 = scmp.ge.s32.totalorder %s26_s26, 8  ;;  %p6555_p1 = scmp.ge.s32.totalorder %s9137_s25, 1 }
   0x5   : > { %p267_p2 = scmp.lt.s32.totalorder %s9137_s25, 17 }
   0x6   : > { %s10936_s26 = smov (%p27_p0, %s26_s26), 0  ;;  %s10938_s27 = smov (!%p27_p0, %s29_s27), %s9133_s24 }
   0x7   : > { %p268_p3 = pnand %p6555_p1, %p267_p2  ;;  %p31_p4 = scmp.ge.s32.totalorder %s10938_s27, 2 }
   0x8   : > { %v8847_v0 = vld [vmem:[%s10921_s3 + $0x40] sm:$0xff] (!%p268_p3)   ;;  %p325_p5 = scmp.lt.s32.totalorder (!%p268_p3), %s9125_s22, 1  ;;  %p327_p6 = scmp.lt.s32.totalorder (!%p268_p3), %s9121_s21, 9  ;;  %v8849_v2 = vld [vmem:[%s10921_s3 + $0x48] sm:$0xff] (!%p268_p3)   ;;  %v8851_v4 = vld [vmem:[%s10921_s3 + $0x50] sm:$0xff] (!%p268_p3)   ;;  %vm820_vm3 = vcmask (!%p268_p3), 1042432  }
   0x9   : > { %s10940_s27 = smov (%p31_p4, %s10938_s27), 0  ;;  %271 = sbr.rel (%p268_p3) target bundleno = 725 (0x2d5), region = 36 }
   0xa   : > { %v8848_v1 = vld [vmem:[%s10921_s3 + $0x340] sm:$0xff] (!%p268_p3)   ;;  %7931 = vmatprep.subr.bf16.mxu1 (!%p268_p3), %v8847_v0  ;;  %v8850_v3 = vld [vmem:[%s10921_s3 + $0x348] sm:$0xff] (!%p268_p3)   ;;  %v8852_v5 = vld [vmem:[%s10921_s3 + $0x350] sm:$0xff] (!%p268_p3)   ;;  %s334_s20 = sadd.s32 (!%p268_p3), 1, %s9121_s21  ;;  %vm398_vm0 = vsmask.f32 (!%p268_p3), 3328 }
   0xb   : > { %8243 = vmatprep.subr.bf16.mxu0 (!%p268_p3), %v8848_v1  ;;  %7932 = vmatpush3.bf16.msra.mxu1 (!%p268_p3), %v8847_v0  ;;  %p337_p7 = scmp.lt.s32.totalorder (!%p268_p3), %s334_s20, 9  ;;  %v8853_v6 = vld [vmem:[%s10921_s3 + $0x58] sm:$0xff] (!%p268_p3)   ;;  %v8855_v8 = vld [vmem:[%s10921_s3 + $0x60] sm:$0xff] (!%p268_p3)   ;;  %v8857_v10 = vld [vmem:[%s10921_s3 + $0x68] sm:$0xff] (!%p268_p3)   ;;  %vm399_vm1 = vsmask.f32 (!%p268_p3), 7440 }
   0xc   : > { %8244 = vmatpush3.bf16.msra.mxu0 (!%p268_p3), %v8848_v1  ;;  %7933 = vmatprep.subr.bf16.mxu1 (!%p268_p3), %v8849_v2  ;;  %v8854_v7 = vld [vmem:[%s10921_s3 + $0x358] sm:$0xff] (!%p268_p3)   ;;  %v8856_v9 = vld [vmem:[%s10921_s3 + $0x360] sm:$0xff] (!%p268_p3)   ;;  %v8858_v13 = vld [vmem:[%s10921_s3 + $0x368] sm:$0xff] (!%p268_p3)   ;;  %vm821_vm4 = vcmask (!%p268_p3), 1046532   ;;  %s345_s15 = sadd.s32 (!%p268_p3), 2, %s9121_s21  ;;  %p6385_p9 = scmp.eq.s32.totalorder (!%p268_p3), %s9125_s22, 0 }
   0xd   : > { %8245 = vmatprep.subr.bf16.mxu0 (!%p268_p3), %v8850_v3  ;;  %v8859_v16 = vld [vmem:[%s10921_s3 + $0x70] sm:$0xff] (!%p268_p3)   ;;  %v8861_v34 = vld [vmem:[%s10921_s3 + $0x78] sm:$0xff] (!%p268_p3)   ;;  %vm9299_vm2 = vmor (!%p268_p3), %vm398_vm0, %vm399_vm1  ;;  %p9695_p8 = scmp.lt.s32.totalorder (!%p268_p3), %s345_s15, 9  ;;  %p6386_p10 = scmp.eq.s32.totalorder (!%p268_p3), %s9121_s21, 0 }
   0xe   : > { %v8860_v20 = vld [vmem:[%s10921_s3 + $0x370] sm:$0xff] (!%p268_p3)   ;;  %v8862_v45 = vld [vmem:[%s10921_s3 + $0x378] sm:$0xff] (!%p268_p3)   ;;  %v8863_v60 = vld [vmem:[%s10921_s3] sm:$0xff] (!%p268_p3)   ;;  %p358_p12 = scmp.lt.s32.totalorder (!%p268_p3), %s9121_s21, 7 }
   0xf   : > { %7934 = vmatpush3.bf16.msra.mxu1 (!%p268_p3), %v8849_v2  ;;  %v9330_v62 = vld [vmem:[%s10921_s3 + $0x380] sm:$0xff] (!%p268_p3)   ;;  %vm9473_vm5 = vmor (!%p268_p3), %vm820_vm3, %vm821_vm4  ;;  %p10871_p11 = pnand (!%p268_p3), %p6386_p10, %p6385_p9 }
  0x10   : > { %s9220_s10 = scalar_select %p325_p5, %s9125_s22, 1  ;;  %8246 = vmatpush3.bf16.msra.mxu0 %v8850_v3  ;;  %7935 = vmatprep.subr.bf16.mxu1 %v8851_v4  ;;  %v9095_v35 = vld [vmem:[%s10921_s3 + $0x6a0] sm:$0xff]  }
  0x11   : > { %s328_s13 = scalar_select %p327_p6, %s9121_s21, 9  ;;  %8247 = vmatprep.subr.bf16.mxu0 %v8852_v5 }
  0x12   : > { %s9230_s16 = smul.u32 200, %s9220_s10  ;;  %s10942_s20 = smov (!%p337_p7, %s334_s20), 9 }
  0x13   : > { %s8803_s19 = smul.u32 20, %s328_s13  ;;  %7936 = vmatpush3.bf16.msra.mxu1 %v8851_v4  ;;  %s10944_s15 = smov (!%p9695_p8, %s345_s15), 9 }
  0x14   : > { %8248 = vmatpush3.bf16.msra.mxu0 %v8852_v5  ;;  %7937 = vmatprep.subr.bf16.mxu1 %v8853_v6  ;;  %s8805_s13 = smul.u32 20, %s10942_s20  ;;  %s10946_s21 = smov (!%p358_p12, %s9121_s21), 7 }
  0x15   : > { %s331_s28 = sadd.s32 %s9230_s16, %s8803_s19  ;;  %8249 = vmatprep.subr.bf16.mxu0 %v8854_v7  ;;  %s8806_s29 = smul.u32 20, %s10944_s15 }
  0x16   : > { %s6556_s9 = sshll.u32 %s331_s28, 2  ;;  %s341_s28 = sadd.s32 %s8805_s13, %s9230_s16 }
  0x17   : > { %s9252_s19 = scalar_lea.vmem %s10918_s0, %s6556_s9  ;;  %7938 = vmatpush3.bf16.msra.mxu1 %v8853_v6  ;;  %s6557_s30 = sshll.u32 %s341_s28, 2 }
  0x18   : > { %8250 = vmatpush3.bf16.msra.mxu0 %v8854_v7  ;;  %7939 = vmatprep.subr.bf16.mxu1 %v8855_v8  ;;  %v9259_v11 = vld [vmem:[%s9252_s19] sm:$0xf]  ;;  %v9262_v12 = vld [vmem:[%s9252_s19 + $0x8] sm:$0xf]  ;;  %v9268_v14 = vld [vmem:[%s9252_s19 + $0x4] sm:$0x1]  ;;  %s9285_s17 = scalar_lea.vmem %s10919_s1, %s6557_s30  ;;  %s9859_s11 = sadd.s32 %s8806_s29, %s9230_s16 }
  0x19   : > { %8251 = vmatprep.subr.bf16.mxu0 %v8856_v9  ;;  %v9271_v15 = vld [vmem:[%s9252_s19 + $0xc] sm:$0x1]  ;;  %v402_v17 = vshrl.u32 %v9259_v11, 16  ;;  %v405_v18 = vshll.u32 %v9259_v11, 16  ;;  %v411_v19 = vshll.u32 %v9268_v14, 16  ;;  %v416_v21 = vshrl.u32 %v9262_v12, 16 }
  0x1a   : > { %v419_v22 = vshll.u32 %v9262_v12, 16  ;;  %v425_v23 = vshll.u32 %v9271_v15, 16  ;;  %v7014_v31 = vld [vmem:[%s9285_s17 + $0x8] sm:$0xf]  ;;  %v9292_v32 = vld [vmem:[%s9285_s17 + $0xc] sm:$0x1] }
  0x1b   : > { %7940 = vmatpush3.bf16.msra.mxu1 %v8855_v8  ;;  %v404_v24 = vrot.slane %v402_v17, 4  ;;  %v407_v25 = vrot.slane %v405_v18, 5  ;;  %v413_v26 = vrot.slane %v411_v19, 5  ;;  %v418_v27 = vrot.slane %v416_v21, 4  ;;  %v7016_v33 = vld [vmem:[%s9285_s17 + $0x10] sm:$0xf] }
  0x1c   : > { %8252 = vmatpush3.bf16.msra.mxu0 %v8856_v9  ;;  %7941 = vmatprep.subr.bf16.mxu1 %v8857_v10  ;;  %v421_v28 = vrot.slane %v419_v22, 5  ;;  %v427_v29 = vrot.slane %v425_v23, 5  ;;  %v9304_v37 = vld [vmem:[%s9285_s17 + $0x14] sm:$0x1]  ;;  %v3185_v38 = vshrl.u32 %v7014_v31, 16  ;;  %v3188_v39 = vshll.u32 %v7014_v31, 16 }
  0x1d   : > { %8253 = vmatprep.subr.bf16.mxu0 %v8858_v13  ;;  %v408_v30 = vor.u32 %v407_v25, %v404_v24  ;;  %v3194_v40 = vshll.u32 %v9292_v32, 16  ;;  %v3199_v42 = vshrl.u32 %v7016_v33, 16  ;;  %v3202_v43 = vshll.u32 %v7016_v33, 16  ;;  %v9314_v52 = vld [vmem:[%s9252_s19 + $0x10] sm:$0xf]  ;;  %s6558_s13 = sshll.u32 %s9859_s11, 2 }
  0x1e   : > { %v422_v36 = vor.u32 %v421_v28, %v418_v27  ;;  %v3208_v44 = vshll.u32 %v9304_v37, 16  ;;  %v3187_v47 = vrot.slane %v3185_v38, 4  ;;  %v3190_v48 = vrot.slane %v3188_v39, 5  ;;  %v9319_v57 = vld [vmem:[%s9252_s19 + $0x18] sm:$0xf]  ;;  %s9907_s7 = scalar_lea.vmem %s10920_s2, %s6558_s13  ;;  %s6559_s22 = sshll.u32 %s10946_s21, 3 }
  0x1f   : > { %7942 = vmatpush3.bf16.msra.mxu1 %v8857_v10  ;;  %v409_v41 = vrot.slane %v408_v30, 4  ;;  %v3201_v50 = vrot.slane %v3199_v42, 4  ;;  %v3204_v51 = vrot.slane %v3202_v43, 5  ;;  %v3196_v55 = vrot.slane %v3194_v40, 5  ;;  %v9322_v58 = vld [vmem:[%s9252_s19 + $0x14] sm:$0x1] }
  0x20   : > { %8254 = vmatpush3.bf16.msra.mxu0 %v8858_v13  ;;  %7943 = vmatprep.subr.bf16.mxu1 %v8859_v16  ;;  %v423_v46 = vrot.slane %v422_v36, 4  ;;  %v3191_v54 = vor.u32 %v3190_v48, %v3187_v47  ;;  %v3210_v56 = vrot.slane %v3208_v44, 5  ;;  %v9333_v63 = vld [vmem:[%s9252_s19 + $0x1c] sm:$0x1]  ;;  %v430_v0 = vshrl.u32 %v9314_v52, 16  ;;  %v8865_v44 = vld [vmem:[%s10921_s3 + $0x8] sm:$0xff]  }
  0x21   : > { %8255 = vmatprep.subr.bf16.mxu0 %v8860_v20  ;;  %v414_v49 = vsel %vm9299_vm2, %v409_v41, %v413_v26  ;;  %v3205_v61 = vor.u32 %v3204_v51, %v3201_v50  ;;  %v433_v1 = vshll.u32 %v9314_v52, 16  ;;  %v439_v3 = vshll.u32 %v9322_v58, 16  ;;  %v7018_v6 = vld [vmem:[%s9285_s17 + $0x18] sm:$0xf]  ;;  %v9343_v13 = vld [vmem:[%s9285_s17 + $0x1c] sm:$0x1] }
  0x22   : > { %v428_v53 = vsel %vm9299_vm2, %v423_v46, %v427_v29  ;;  %v3192_v2 = vrot.slane %v3191_v54, 4  ;;  %v444_v4 = vshrl.u32 %v9319_v57, 16  ;;  %v447_v5 = vshll.u32 %v9319_v57, 16  ;;  %v9351_v23 = vld [vmem:[%s9285_s17 + $0x24] sm:$0x1]  ;;  %s6560_s18 = sshll.u32 %s9220_s10, 6 }
  0x23   : > { %7944 = vmatpush3.bf16.msra.mxu1 %v8859_v16  ;;  %v6578_v59 = vcombine.low %v414_v49, %v428_v53  ;;  %v3206_v7 = vrot.slane %v3205_v61, 4  ;;  %v432_v8 = vrot.slane %v430_v0, 4  ;;  %v435_v9 = vrot.slane %v433_v1, 5  ;;  %v8867_v53 = vld [vmem:[%s10921_s3 + $0x10] sm:$0xff]   ;;  %v9373_v61 = vld [vmem:[%s9252_s19 + $0x20] sm:$0xf]  ;;  %s362_s28 = sadd.s32 %s6560_s18, %s6559_s22 }
  0x24   : > { %8256 = vmatpush3.bf16.msra.mxu0 %v8860_v20  ;;  %7945 = vmatprep.subr.bf16.mxu1 %v8861_v34  ;;  %v453_v10 = vshll.u32 %v9333_v63, 16  ;;  %v3197_v16 = vsel %vm9299_vm2, %v3192_v2, %v3196_v55  ;;  %v441_v17 = vrot.slane %v439_v3, 5  ;;  %v446_v18 = vrot.slane %v444_v4, 4  ;;  %v7020_v20 = vld [vmem:[%s9285_s17 + $0x20] sm:$0xf]  ;;  %v8866_v3 = vld [vmem:[%s10921_s3 + $0x388] sm:$0xff]  }
  0x25   : > { %8257 = vmatprep.subr.bf16.mxu0 %v8862_v45  ;;  %7947 = vmatprep.mubr.bf16.mxu1 %v6578_v59  ;;  %v449_v19 = vrot.slane %v447_v5, 5  ;;  %v3211_v21 = vsel %vm9299_vm2, %v3206_v7, %v3210_v56  ;;  %v436_v22 = vor.u32 %v435_v9, %v432_v8  ;;  %v3213_v27 = vshrl.u32 %v7018_v6, 16  ;;  %v9376_v0 = vld [vmem:[%s9252_s19 + $0x28] sm:$0xf]  ;;  %v9379_v1 = vld [vmem:[%s9252_s19 + $0x24] sm:$0x1] }
  0x26   : > { %v7046_v24 = vcombine.low %v3197_v16, %v3211_v21  ;;  %v455_v26 = vrot.slane %v453_v10, 5  ;;  %v3216_v29 = vshll.u32 %v7018_v6, 16  ;;  %v3222_v30 = vshll.u32 %v9343_v13, 16  ;;  %v8869_v7 = vld [vmem:[%s10921_s3 + $0x18] sm:$0xff]   ;;  %s6561_s29 = sshll.u32 %s362_s28, 2 }
  0x27   : > { %7946 = vmatpush3.bf16.msra.mxu1 %v8861_v34  ;;  %v450_v25 = vor.u32 %v449_v19, %v446_v18  ;;  %v437_v28 = vrot.slane %v436_v22, 4  ;;  %v3227_v31 = vshrl.u32 %v7020_v20, 16  ;;  %v3215_v34 = vrot.slane %v3213_v27, 4  ;;  %v8868_v18 = vld [vmem:[%s10921_s3 + $0x390] sm:$0xff]   ;;  %s364_s30 = scalar_lea.vmem %s10922_s4, %s6561_s29 }
  0x28   : > { %8258 = vmatpush3.bf16.msra.mxu0 %v8862_v45  ;;  %7955 = vmatprep.subr.bf16.mxu1 %v8863_v60  ;;  %v3230_v36 = vshll.u32 %v7020_v20, 16  ;;  %v3236_v38 = vshll.u32 %v9351_v23, 16  ;;  %v3218_v40 = vrot.slane %v3216_v29, 5  ;;  %v3224_v47 = vrot.slane %v3222_v30, 5  ;;  %v7024_v29 = vld [vmem:[%s9285_s17 + $0x30] sm:$0xf] }
  0x29   : > { %8267 = vmatprep.subr.bf16.mxu0 %v9330_v62  ;;  %8259 = vmatprep.mubr.bf16.mxu0 %v7046_v24  ;;  %v451_v33 = vrot.slane %v450_v25, 4  ;;  %v442_v39 = vsel %vm9299_vm2, %v437_v28, %v441_v17  ;;  %v3229_v41 = vrot.slane %v3227_v31, 4  ;;  %v3476_v50 = vrot.slane %v9292_v32, 5  ;;  %v9404_v28 = vld [vmem:[%s9285_s17 + $0x2c] sm:$0x1]  ;;  %v8871_v31 = vld [vmem:[%s10921_s3 + $0x20] sm:$0xff]  }
  0x2a   : > { %v3232_v43 = vrot.slane %v3230_v36, 5  ;;  %v3219_v46 = vor.u32 %v3218_v40, %v3215_v34  ;;  %v3238_v48 = vrot.slane %v3236_v38, 5  ;;  %v3480_v54 = vrot.slane %v9304_v37, 5  ;;  %v9408_v30 = vld [vmem:[%s9285_s17 + $0x34] sm:$0x1]  ;;  %v8870_v38 = vld [vmem:[%s10921_s3 + $0x398] sm:$0xff]  }
  0x2b   : > { %v456_v42 = vsel %vm9299_vm2, %v451_v33, %v455_v26  ;;  %v458_v4 = vshrl.u32 %v9373_v61, 16  ;;  %v461_v5 = vshll.u32 %v9373_v61, 16  ;;  %v467_v6 = vshll.u32 %v9379_v1, 16  ;;  %v7022_v26 = vld [vmem:[%s9285_s17 + $0x28] sm:$0xf]  ;;  %v8878_v37 = vld [vmem:[%s10921_s3 + $0x3b8] sm:$0xff]  }
  0x2c   : > { %v6579_v45 = vcombine.low %v442_v39, %v456_v42  ;;  %v3233_v49 = vor.u32 %v3232_v43, %v3229_v41  ;;  %v3220_v51 = vrot.slane %v3219_v46, 4  ;;  %v472_v8 = vshrl.u32 %v9376_v0, 16 }
  0x2d   : > { %v475_v9 = vshll.u32 %v9376_v0, 16  ;;  %v3484_v16 = vrot.slane %v9343_v13, 5  ;;  %v3488_v17 = vrot.slane %v9351_v23, 5  ;;  %v460_v19 = vrot.slane %v458_v4, 4  ;;  %v9435_v4 = vld [vmem:[%s9252_s19 + $0x3c] sm:$0x1] }
  0x2e   : > { %7948 = vmatmul.mubr.bf16.vlgmr.msra.gmra.mrb[0].mxu1 %v6579_v45  ;;  %v3234_v55 = vrot.slane %v3233_v49, 4  ;;  %v3225_v56 = vsel %vm9299_vm2, %v3220_v51, %v3224_v47  ;;  %v463_v20 = vrot.slane %v461_v5, 5  ;;  %v469_v21 = vrot.slane %v467_v6, 5  ;;  %v9419_v47 = vld [vmem:[%s9252_s19 + $0x30] sm:$0xf]  ;;  %v8881_v13 = vld [vmem:[%s10921_s3 + $0x3c0] sm:$0xff]  }
  0x2f   : > { %7956 = vmatpush3.bf16.msra.mxu1 %v8863_v60  ;;  %v9385_v60 = vld [vmem:[%s9252_s19 + $0x2c] sm:$0x1]  ;;  %v474_v22 = vrot.slane %v472_v8, 4  ;;  %v477_v24 = vrot.slane %v475_v9, 5  ;;  %v3244_v34 = vshll.u32 %v7022_v26, 16  ;;  %v3250_v36 = vshll.u32 %v9404_v28, 16 }
  0x30   : > { %7957 = vmatprep.subr.bf16.mxu1 %v8865_v44  ;;  %v3239_v59 = vsel %vm9299_vm2, %v3234_v55, %v3238_v48  ;;  %v481_v10 = vshll.u32 %v9385_v60, 16  ;;  %v464_v27 = vor.u32 %v463_v20, %v460_v19  ;;  %v3255_v40 = vshrl.u32 %v7024_v29, 16  ;;  %v8873_v48 = vld [vmem:[%s10921_s3 + $0x28] sm:$0xff]   ;;  %v8872_v8 = vld [vmem:[%s10921_s3 + $0x3a0] sm:$0xff]   ;;  %v7026_v20 = vld [vmem:[%s9285_s17 + $0x38] sm:$0xf] }
  0x31   : > { %v7047_v2 = vcombine.low %v3225_v56, %v3239_v59  ;;  %v478_v33 = vor.u32 %v477_v24, %v474_v22  ;;  %v3258_v41 = vshll.u32 %v7024_v29, 16  ;;  %v3264_v42 = vshll.u32 %v9408_v30, 16  ;;  %v9427_v56 = vld [vmem:[%s9252_s19 + $0x38] sm:$0xf] }
  0x32   : > { %v483_v25 = vrot.slane %v481_v10, 5  ;;  %v465_v39 = vrot.slane %v464_v27, 4  ;;  %v3246_v45 = vrot.slane %v3244_v34, 5  ;;  %v3252_v46 = vrot.slane %v3250_v36, 5  ;;  %v7028_v27 = vld [vmem:[%s9285_s17 + $0x40] sm:$0xf] }
  0x33   : > { %7958 = vmatpush3.bf16.msra.mxu1 %v8865_v44  ;;  %8260 = vmatmul.mubr.bf16.vlgmr.msra.gmra.mrb[0].mxu0 %v7047_v2  ;;  %v479_v43 = vrot.slane %v478_v33, 4  ;;  %v3257_v51 = vrot.slane %v3255_v40, 4  ;;  %v3266_v55 = vrot.slane %v3264_v42, 5  ;;  %v486_v5 = vshrl.u32 %v9419_v47, 16  ;;  %v9452_v36 = vld [vmem:[%s9285_s17 + $0x44] sm:$0x1] }
  0x34   : > { %7959 = vmatprep.subr.bf16.mxu1 %v8867_v53  ;;  %8268 = vmatpush3.bf16.msra.mxu0 %v9330_v62  ;;  %v3241_v62 = vshrl.u32 %v7022_v26, 16  ;;  %v470_v49 = vsel %vm9299_vm2, %v465_v39, %v469_v21  ;;  %v489_v6 = vshll.u32 %v9419_v47, 16  ;;  %v500_v19 = vshrl.u32 %v9427_v56, 16  ;;  %v9446_v21 = vld [vmem:[%s9285_s17 + $0x3c] sm:$0x1]  ;;  %v8874_v42 = vld [vmem:[%s10921_s3 + $0x3a8] sm:$0xff]  }
  0x35   : > { %8269 = vmatprep.subr.bf16.mxu0 %v8866_v3  ;;  %v484_v59 = vsel %vm9299_vm2, %v479_v43, %v483_v25  ;;  %v488_v24 = vrot.slane %v486_v5, 4  ;;  %v503_v26 = vshll.u32 %v9427_v56, 16  ;;  %v509_v34 = vshll.u32 %v9435_v4, 16  ;;  %v8875_v43 = vld [vmem:[%s10921_s3 + $0x30] sm:$0xff]  }
  0x36   : > { %v3243_v44 = vrot.slane %v3241_v62, 4  ;;  %v6580_v9 = vcombine.low %v470_v49, %v484_v59  ;;  %v491_v25 = vrot.slane %v489_v6, 5  ;;  %v502_v62 = vrot.slane %v500_v19, 4 }
  0x37   : > { %7960 = vmatpush3.bf16.msra.mxu1 %v8867_v53  ;;  %v3260_v53 = vrot.slane %v3258_v41, 5  ;;  %v505_v40 = vrot.slane %v503_v26, 5  ;;  %v3269_v41 = vshrl.u32 %v7026_v20, 16  ;;  %v3278_v49 = vshll.u32 %v9446_v21, 16 }
  0x38   : > { %7961 = vmatprep.subr.bf16.mxu1 %v8869_v7  ;;  %8270 = vmatpush3.bf16.msra.mxu0 %v8866_v3  ;;  %v3247_v2 = vor.u32 %v3246_v45, %v3243_v44  ;;  %v9432_v3 = vld [vmem:[%s9252_s19 + $0x34] sm:$0x1]  ;;  %v511_v45 = vrot.slane %v509_v34, 5  ;;  %v3283_v6 = vshrl.u32 %v7028_v27, 16  ;;  %v3492_v23 = vrot.slane %v9404_v28, 5 }
  0x39   : > { %8271 = vmatprep.subr.bf16.mxu0 %v8868_v18  ;;  %v495_v10 = vshll.u32 %v9432_v3, 16  ;;  %7951 = vmatprep.mubr.bf16.mxu1 %v6580_v9  ;;  %v3271_v59 = vrot.slane %v3269_v41, 4  ;;  %v3280_v5 = vrot.slane %v3278_v49, 5  ;;  %v3286_v9 = vshll.u32 %v7028_v27, 16  ;;  %v8876_v27 = vld [vmem:[%s10921_s3 + $0x3b0] sm:$0xff]  }
  0x3a   : > { %v3248_v22 = vrot.slane %v3247_v2, 4  ;;  %v7060_v41 = vld [vmem:[%s9285_s17 + $0x18] sm:$0xe]  ;;  %v3500_v28 = vrot.slane %v9446_v21, 5  ;;  %v833_v21 = vrot.slane %v9322_v58, 5 }
  0x3b   : > { %7962 = vmatpush3.bf16.msra.mxu1 %v8869_v7  ;;  %v3261_v7 = vor.u32 %v3260_v53, %v3257_v51  ;;  %v497_v33 = vrot.slane %v495_v10, 5  ;;  %v506_v53 = vor.u32 %v505_v40, %v502_v62  ;;  %v3292_v10 = vshll.u32 %v9452_v36, 16 }
  0x3c   : > { %7963 = vmatprep.subr.bf16.mxu1 %v8871_v31  ;;  %8272 = vmatpush3.bf16.msra.mxu0 %v8868_v18  ;;  %v3253_v39 = vsel %vm9299_vm2, %v3248_v22, %v3252_v46  ;;  %v492_v18 = vor.u32 %v491_v25, %v488_v24  ;;  %v3288_v22 = vrot.slane %v3286_v9, 5  ;;  %v8877_v24 = vld [vmem:[%s10921_s3 + $0x38] sm:$0xff]   ;;  %v7059_v25 = vld [vmem:[%s9285_s17 + $0x10] sm:$0xe] }
  0x3d   : > { %8273 = vmatprep.subr.bf16.mxu0 %v8870_v38  ;;  %v3262_v29 = vrot.slane %v3261_v7, 4  ;;  %v507_v7 = vrot.slane %v506_v53, 4  ;;  %v7067_v62 = vrot.slane %v7059_v25, 9  ;;  %v3294_v40 = vrot.slane %v3292_v10, 5  ;;  %v7064_v9 = vld [vmem:[%s9285_s17 + $0x38] sm:$0xe] }
  0x3e   : > { %v493_v51 = vrot.slane %v492_v18, 4  ;;  %v8886_v25 = vld [vmem:[%s10921_s3 + $0x3d0] sm:$0xff]  }
  0x3f   : > { %7964 = vmatpush3.bf16.msra.mxu1 %v8871_v31  ;;  %v3267_v44 = vsel %vm9299_vm2, %v3262_v29, %v3266_v55  ;;  %v3272_v31 = vshll.u32 %v7026_v20, 16  ;;  %v3285_v20 = vrot.slane %v3283_v6, 4  ;;  %v512_v29 = vsel %vm9299_vm2, %v507_v7, %v511_v45 }
  0x40   : > { %7965 = vmatprep.subr.bf16.mxu1 %v8873_v48  ;;  %8274 = vmatpush3.bf16.msra.mxu0 %v8870_v38  ;;  %v7048_v46 = vcombine.low %v3253_v39, %v3267_v44  ;;  %v498_v55 = vsel %vm9299_vm2, %v493_v51, %v497_v33  ;;  %v7058_v38 = vld [vmem:[%s9285_s17 + $0x8] sm:$0xe]  ;;  %v6590_v33 = vcombine.low %v9259_v11, %v9262_v12  ;;  %v7061_v44 = vld [vmem:[%s9285_s17 + $0x20] sm:$0xe]  ;;  %v7068_v12 = vrot.slane %v7060_v41, 9 }
  0x41   : > { %8275 = vmatprep.subr.bf16.mxu0 %v8872_v8  ;;  %v3274_v2 = vrot.slane %v3272_v31, 5  ;;  %v7066_v26 = vrot.slane %v7058_v38, 9  ;;  %v6581_v34 = vcombine.low %v498_v55, %v512_v29  ;;  %v3289_v18 = vor.u32 %v3288_v22, %v3285_v20  ;;  %v7065_v55 = vld [vmem:[%s9285_s17 + $0x40] sm:$0xe] }
  0x42   : > { %8263 = vmatprep.mubr.bf16.mxu0 %v7048_v46  ;;  %v3481_v11 = vsel %vm9473_vm5, %v7067_v62, %v3480_v54  ;;  %v7069_v49 = vrot.slane %v7061_v44, 9  ;;  %v6591_v54 = vcombine.low %v9314_v52, %v9319_v57  ;;  %v3485_v51 = vsel %vm9473_vm5, %v7068_v12, %v3484_v16  ;;  %v8883_v52 = vld [vmem:[%s10921_s3 + $0x88] sm:$0xff]   ;;  %v796_v22 = vld [vmem:[%s9252_s19] sm:$0xe]  ;;  %v8888_v62 = vld [vmem:[%s10921_s3 + $0x3d8] sm:$0xff]  }
  0x43   : > { %7966 = vmatpush3.bf16.msra.mxu1 %v8873_v48  ;;  %v3275_v19 = vor.u32 %v3274_v2, %v3271_v59  ;;  %v3477_v45 = vsel %vm9473_vm5, %v7066_v26, %v3476_v50  ;;  %v825_v57 = vrot.slane %v9268_v14, 5  ;;  %v8884_v14 = vld [vmem:[%s10921_s3 + $0x3c8] sm:$0xff]   ;;  %v7063_v59 = vld [vmem:[%s9285_s17 + $0x30] sm:$0xe]  ;;  %v3504_v6 = vrot.slane %v9452_v36, 5  ;;  %v8889_v29 = vld [vmem:[%s10921_s3 + $0xa0] sm:$0xff]  }
  0x44   : > { %7967 = vmatprep.subr.bf16.mxu1 %v8875_v43  ;;  %8276 = vmatpush3.bf16.msra.mxu0 %v8872_v8  ;;  %v8880_v8 = vld [vmem:[%s10921_s3 + $0x80] sm:$0xff]   ;;  %v7090_v50 = vcombine.low %v3477_v45, %v3481_v11  ;;  %v3489_v53 = vsel %vm9473_vm5, %v7069_v49, %v3488_v17  ;;  %v7062_v17 = vld [vmem:[%s9285_s17 + $0x28] sm:$0xe]  ;;  %v7072_v38 = vrot.slane %v7064_v9, 9  ;;  %v829_v20 = vrot.slane %v9271_v15, 5  ;;  %v8894_v49 = vld [vmem:[%s10921_s3 + $0xb0] sm:$0xff]  }
  0x45   : > { %8277 = vmatprep.subr.bf16.mxu0 %v8874_v42  ;;  %v3276_v39 = vrot.slane %v3275_v19, 4  ;;  %7952 = vmatmul.mubr.bf16.gmra.mrb[4].mxu1 %v6581_v34  ;;  %v7091_v16 = vcombine.low %v3485_v51, %v3489_v53  ;;  %v7070_v2 = vrot.slane %v7062_v17, 9  ;;  %v7073_v19 = vrot.slane %v7065_v55, 9  ;;  %v797_v15 = vld [vmem:[%s9252_s19 + $0x8] sm:$0xe] }
  0x46   : > { %7971 = vmatprep.mubr.bf16.mxu1 %v6590_v33  ;;  %v6602_v58 = vrot.slane %v796_v22, 9  ;;  %v6603_v26 = vrot.slane %v797_v15, 9  ;;  %v7140_v9 = vld [vmem:[%s9285_s17 + $0x18] sm:$0xf]  ;;  %v9629_v55 = vld [vmem:[%s9285_s17 + $0x1c] sm:$0x1] }
  0x47   : > { %7968 = vmatpush3.bf16.msra.mxu1 %v8875_v43  ;;  %v3281_v31 = vsel %vm9299_vm2, %v3276_v39, %v3280_v5  ;;  %v3290_v43 = vrot.slane %v3289_v18, 4  ;;  %v7071_v5 = vrot.slane %v7063_v59, 9  ;;  %v3493_v7 = vsel %vm9473_vm5, %v7070_v2, %v3492_v23  ;;  %v798_v18 = vld [vmem:[%s9252_s19 + $0x10] sm:$0xe]  ;;  %v8901_v59 = vld [vmem:[%s10921_s3 + $0x400] sm:$0xff]  }
  0x48   : > { %7969 = vmatprep.subr.bf16.mxu1 %v8877_v24  ;;  %8278 = vmatpush3.bf16.msra.mxu0 %v8874_v42  ;;  %v6592_v42 = vcombine.low %v9373_v61, %v9376_v0  ;;  %v8885_v61 = vld [vmem:[%s10921_s3 + $0x90] sm:$0xff]   ;;  %v3496_v0 = vrot.slane %v9408_v30, 5  ;;  %v6593_v30 = vcombine.low %v9419_v47, %v9427_v56  ;;  %v8887_v47 = vld [vmem:[%s10921_s3 + $0x98] sm:$0xff]   ;;  %v3501_v56 = vsel %vm9473_vm5, %v7072_v38, %v3500_v28 }
  0x49   : > { %8279 = vmatprep.subr.bf16.mxu0 %v8876_v27  ;;  %v3295_v32 = vsel %vm9299_vm2, %v3290_v43, %v3294_v40  ;;  %v826_v33 = vsel %vm9473_vm5, %v6602_v58, %v825_v57  ;;  %v830_v39 = vsel %vm9473_vm5, %v6603_v26, %v829_v20  ;;  %v6604_v41 = vrot.slane %v798_v18, 9  ;;  %v8890_v43 = vld [vmem:[%s10921_s3 + $0x3e0] sm:$0xff]   ;;  %v802_v57 = vld [vmem:[%s9252_s19 + $0x30] sm:$0xe] }
  0x4a   : > { %v7049_v46 = vcombine.low %v3281_v31, %v3295_v32  ;;  %v3497_v10 = vsel %vm9473_vm5, %v7071_v5, %v3496_v0  ;;  %v6626_v40 = vcombine.low %v826_v33, %v830_v39  ;;  %v8891_v31 = vld [vmem:[%s10921_s3 + $0xa8] sm:$0xff]   ;;  %v849_v0 = vrot.slane %v9432_v3, 5  ;;  %v7138_v28 = vld [vmem:[%s9285_s17 + $0x10] sm:$0xf]  ;;  %v8907_v39 = vld [vmem:[%s10921_s3 + $0xd8] sm:$0xff]  }
  0x4b   : > { %7970 = vmatpush3.bf16.msra.mxu1 %v8877_v24  ;;  %v7092_v36 = vcombine.low %v3493_v7, %v3497_v10  ;;  %v3505_v24 = vsel %vm9473_vm5, %v7073_v19, %v3504_v6  ;;  %v834_v45 = vsel %vm9473_vm5, %v6604_v41, %v833_v21  ;;  %v8892_v32 = vld [vmem:[%s10921_s3 + $0x3e8] sm:$0xff]   ;;  %v3848_v7 = vshrl.u32 %v7138_v28, 16  ;;  %v8905_v22 = vld [vmem:[%s10921_s3 + $0xd0] sm:$0xff]  }
  0x4c   : > { %7979 = vmatprep.subr.bf16.mxu1 %v8880_v8  ;;  %8264 = vmatmul.mubr.bf16.gmra.mrb[4].mxu0 %v7049_v46  ;;  %v7093_v34 = vcombine.low %v3501_v56, %v3505_v24  ;;  %v8897_v46 = vld [vmem:[%s10921_s3 + $0xb8] sm:$0xff]   ;;  %v8903_v5 = vld [vmem:[%s10921_s3 + $0xc8] sm:$0xff]   ;;  %v3851_v10 = vshll.u32 %v7138_v28, 16  ;;  %v3862_v19 = vshrl.u32 %v7140_v9, 16  ;;  %v3865_v20 = vshll.u32 %v7140_v9, 16 }
  0x4d   : > { %8280 = vmatpush3.bf16.msra.mxu0 %v8876_v27  ;;  %8283 = vmatprep.mubr.bf16.mxu0 %v7090_v50  ;;  %v837_v27 = vrot.slane %v9333_v63, 5  ;;  %v799_v63 = vld [vmem:[%s9252_s19 + $0x18] sm:$0xe]  ;;  %v841_v50 = vrot.slane %v9379_v1, 5  ;;  %v8902_v3 = vld [vmem:[%s9285_s17 + $0x20] ss:$8 sps:$4 sm:$0xff]  }
  0x4e   : > { %8281 = vmatprep.subr.bf16.mxu0 %v8878_v37  ;;  %7972 = vmatmul.mubr.bf16.vlgmr.msra.gmra.mrb[0].mxu1 %v6591_v54  ;;  %v6605_v44 = vrot.slane %v799_v63, 9  ;;  %v801_v54 = vld [vmem:[%s9252_s19 + $0x28] sm:$0xe]  ;;  %v8898_v1 = vld [vmem:[%s10921_s3 + $0x3f8] sm:$0xff]   ;;  %v3871_v21 = vshll.u32 %v9629_v55, 16  ;;  %v3853_v56 = vrot.slane %v3851_v10, 5 }
  0x4f   : > { %7980 = vmatpush3.bf16.msra.mxu1 %v8880_v8  ;;  %7975 = vmatprep.mubr.bf16.mxu1 %v6592_v42  ;;  %v8900_v8 = vld [vmem:[%s9285_s17 + $0x10] ss:$8 sps:$4 sm:$0xff]   ;;  %v845_v42 = vrot.slane %v9385_v60, 5  ;;  %v6607_v53 = vrot.slane %v801_v54, 9  ;;  %v8899_v60 = vld [vmem:[%s10921_s3 + $0xc0] sm:$0xff]   ;;  %v3864_v15 = vrot.slane %v3862_v19, 4 }
  0x50   : > { %7981 = vmatprep.subr.bf16.mxu1 %v8883_v52  ;;  %v838_v11 = vsel %vm9473_vm5, %v6605_v44, %v837_v27  ;;  %v8914_v24 = vld [vmem:[%s9285_s17 + $0x30] ss:$8 sps:$4 sm:$0xff]   ;;  %v3867_v58 = vrot.slane %v3865_v20, 5  ;;  %v7144_v63 = vld [vmem:[%s9285_s17 + $0x28] sm:$0xf] }
  0x51   : > { %8282 = vmatpush3.bf16.msra.mxu0 %v8878_v37  ;;  %v6627_v12 = vcombine.low %v834_v45, %v838_v11  ;;  %v800_v37 = vld [vmem:[%s9252_s19 + $0x20] sm:$0xe]  ;;  %v846_v23 = vsel %vm9473_vm5, %v6607_v53, %v845_v42  ;;  %v8919_v33 = vld [vmem:[%s9252_s19 + $0x8] ss:$8 sps:$4 sm:$0xff]   ;;  %v9664_v42 = vld [vmem:[%s9285_s17 + $0x2c] sm:$0x1] }
  0x52   : > { %8291 = vmatprep.subr.bf16.mxu0 %v8881_v13  ;;  %v6606_v51 = vrot.slane %v800_v37, 9  ;;  %v8909_v45 = vld [vmem:[%s10921_s3 + $0xe0] sm:$0xff]   ;;  %v8917_v10 = vld [vmem:[%s10921_s3 + $0xf8] sm:$0xff]  }
  0x53   : > { %7982 = vmatpush3.bf16.msra.mxu1 %v8883_v52  ;;  %v8895_v52 = vld [vmem:[%s10921_s3 + $0x3f0] sm:$0xff]   ;;  %v8916_v11 = vld [vmem:[%s9285_s17 + $0x40] ss:$8 sps:$4 sm:$0xff]  }
  0x54   : > { %8284 = vmatmul.mubr.bf16.vlgmr.msra.gmra.mrb[0].mxu0 %v7091_v16  ;;  %7983 = vmatprep.subr.bf16.mxu1 %v8885_v61  ;;  %v853_v16 = vrot.slane %v9435_v4, 5  ;;  %v9621_v4 = vld [vmem:[%s9285_s17 + $0x14] sm:$0x1] }
  0x55   : > { %8292 = vmatpush3.bf16.msra.mxu0 %v8881_v13  ;;  %8287 = vmatprep.mubr.bf16.mxu0 %v7092_v36  ;;  %v803_v13 = vld [vmem:[%s9252_s19 + $0x38] sm:$0xe]  ;;  %v3857_v38 = vshll.u32 %v9621_v4, 16  ;;  %v8904_v36 = vld [vmem:[%s10921_s3 + $0x408] sm:$0xff]  }
  0x56   : > { %8293 = vmatprep.subr.bf16.mxu0 %v8884_v14  ;;  %7976 = vmatmul.mubr.bf16.gmra.mrb[4].mxu1 %v6593_v30  ;;  %v6609_v17 = vrot.slane %v803_v13, 9 }
  0x57   : > { %7984 = vmatpush3.bf16.msra.mxu1 %v8885_v61  ;;  %7995 = vmatprep.mubr.bf16.mxu1 %v6626_v40  ;;  %v842_v61 = vsel %vm9473_vm5, %v6606_v51, %v841_v50  ;;  %v3859_v27 = vrot.slane %v3857_v38, 5  ;;  %v8906_v40 = vld [vmem:[%s10921_s3 + $0x410] sm:$0xff]   ;;  %v3893_v50 = vshll.u32 %v7144_v63, 16 }
  0x58   : > { %7985 = vmatprep.subr.bf16.mxu1 %v8887_v47  ;;  %v6628_v2 = vcombine.low %v842_v61, %v846_v23  ;;  %v854_v30 = vsel %vm9473_vm5, %v6609_v17, %v853_v16  ;;  %v8912_v61 = vld [vmem:[%s10921_s3 + $0x428] sm:$0xff]  }
  0x59   : > { %8294 = vmatpush3.bf16.msra.mxu0 %v8884_v14  ;;  %v6608_v14 = vrot.slane %v802_v57, 9  ;;  %v3895_v53 = vrot.slane %v3893_v50, 5  ;;  %v8910_v57 = vld [vmem:[%s10921_s3 + $0x420] sm:$0xff]  }
  0x5a   : > { %8295 = vmatprep.subr.bf16.mxu0 %v8886_v25 }
  0x5b   : > { %7986 = vmatpush3.bf16.msra.mxu1 %v8887_v47  ;;  %v850_v6 = vsel %vm9473_vm5, %v6608_v14, %v849_v0  ;;  %v3850_v47 = vrot.slane %v3848_v7, 4  ;;  %v8913_v0 = vld [vmem:[%s10921_s3 + $0xf0] sm:$0xff]  }
  0x5c   : > { %8288 = vmatmul.mubr.bf16.gmra.mrb[4].mxu0 %v7093_v34  ;;  %7987 = vmatprep.subr.bf16.mxu1 %v8889_v29  ;;  %v3873_v34 = vrot.slane %v3871_v21, 5  ;;  %v8915_v7 = vld [vmem:[%s10921_s3 + $0x430] sm:$0xff]  }
  0x5d   : > { %8296 = vmatpush3.bf16.msra.mxu0 %v8886_v25  ;;  %8307 = vmatprep.mubr.bf16.mxu0 %v8900_v8  ;;  %v6629_v25 = vcombine.low %v850_v6, %v854_v30  ;;  %v3854_v26 = vor.u32 %v3853_v56, %v3850_v47  ;;  %v4139_v56 = vrot.slane %v9621_v4, 5 }
  0x5e   : > { %8297 = vmatprep.subr.bf16.mxu0 %v8888_v62 }
  0x5f   : > { %7988 = vmatpush3.bf16.msra.mxu1 %v8889_v29  ;;  %v7142_v29 = vld [vmem:[%s9285_s17 + $0x20] sm:$0xf]  ;;  %v3855_v18 = vrot.slane %v3854_v26, 4 }
  0x60   : > { %7989 = vmatprep.subr.bf16.mxu1 %v8891_v31  ;;  %v3876_v44 = vshrl.u32 %v7142_v29, 16  ;;  %v3879_v8 = vshll.u32 %v7142_v29, 16  ;;  %v9720_v29 = vld [vmem:[%s9285_s17 + $0x44] sm:$0x1] }
  0x61   : > { %8298 = vmatpush3.bf16.msra.mxu0 %v8888_v62  ;;  %v3868_v62 = vor.u32 %v3867_v58, %v3864_v15  ;;  %v8918_v15 = vld [vmem:[%s10921_s3 + $0x438] sm:$0xff]  }
  0x62   : > { %8299 = vmatprep.subr.bf16.mxu0 %v8890_v43  ;;  %v3878_v37 = vrot.slane %v3876_v44, 4  ;;  %v3881_v54 = vrot.slane %v3879_v8, 5  ;;  %v8933_v44 = vld [vmem:[%s9252_s19 + $0x28] ss:$8 sps:$4 sm:$0xff]  }
  0x63   : > { %7990 = vmatpush3.bf16.msra.mxu1 %v8891_v31  ;;  %v3869_v41 = vrot.slane %v3868_v62, 4  ;;  %v8908_v31 = vld [vmem:[%s10921_s3 + $0x418] sm:$0xff]   ;;  %v8920_v62 = vld [vmem:[%s10921_s3 + $0x100] sm:$0xff]  }
  0x64   : > { %7991 = vmatprep.subr.bf16.mxu1 %v8894_v49  ;;  %v3882_v13 = vor.u32 %v3881_v54, %v3878_v37  ;;  %v8921_v37 = vld [vmem:[%s10921_s3 + $0x440] sm:$0xff]  }
  0x65   : > { %8300 = vmatpush3.bf16.msra.mxu0 %v8890_v43  ;;  %v3874_v43 = vsel %vm9299_vm2, %v3869_v41, %v3873_v34  ;;  %v8922_v34 = vld [vmem:[%s9252_s19 + $0x18] ss:$8 sps:$4 sm:$0xff]   ;;  %v3941_v41 = vshll.u32 %v9720_v29, 16 }
  0x66   : > { %8301 = vmatprep.subr.bf16.mxu0 %v8892_v32  ;;  %v9683_v14 = vrot.slane %v3882_v13, 4  ;;  %v6674_v13 = vld [vmem:[%s9252_s19 + $0x8] sm:$0xf] }
  0x67   : > { %7992 = vmatpush3.bf16.msra.mxu1 %v8894_v49  ;;  %v9661_v49 = vld [vmem:[%s9285_s17 + $0x24] sm:$0x1]  ;;  %v9738_v54 = vrot.slane %v3941_v41, 5  ;;  %v6680_v41 = vld [vmem:[%s9252_s19 + $0x20] sm:$0xf] }
  0x68   : > { %7993 = vmatprep.subr.bf16.mxu1 %v8897_v46 }
  0x69   : > { %8302 = vmatpush3.bf16.msra.mxu0 %v8892_v32  ;;  %v3890_v32 = vshrl.u32 %v7144_v63, 16 }
  0x6a   : > { %8303 = vmatprep.subr.bf16.mxu0 %v8895_v52 }
  0x6b   : > { %7994 = vmatpush3.bf16.msra.mxu1 %v8897_v46  ;;  %v3892_v51 = vrot.slane %v3890_v32, 4 }
  0x6c   : > { %8003 = vmatprep.subr.bf16.mxu1 %v8899_v60 }
  0x6d   : > { %8304 = vmatpush3.bf16.msra.mxu0 %v8895_v52  ;;  %v8911_v52 = vld [vmem:[%s10921_s3 + $0xe8] sm:$0xff]   ;;  %v3896_v23 = vor.u32 %v3895_v53, %v3892_v51 }
  0x6e   : > { %8305 = vmatprep.subr.bf16.mxu0 %v8898_v1  ;;  %7996 = vmatmul.mubr.bf16.vlgmr.msra.gmra.mrb[0].mxu1 %v6627_v12  ;;  %v3860_v12 = vsel %vm9299_vm2, %v3855_v18, %v3859_v27  ;;  %v7150_v27 = vld [vmem:[%s9285_s17 + $0x40] sm:$0xf]  ;;  %v9728_v18 = vld [vmem:[%s9285_s17 + $0x4c] sm:$0x1] }
  0x6f   : > { %8004 = vmatpush3.bf16.msra.mxu1 %v8899_v60  ;;  %7999 = vmatprep.mubr.bf16.mxu1 %v6628_v2  ;;  %v7170_v46 = vcombine.low %v3860_v12, %v3874_v43  ;;  %v3899_v60 = vshll.u32 %v9664_v42, 16  ;;  %v9687_v2 = vld [vmem:[%s9285_s17 + $0x34] sm:$0x1]  ;;  %v3897_v28 = vrot.slane %v3896_v23, 4  ;;  %v3932_v63 = vshrl.u32 %v7150_v27, 16 }
  0x70   : > { %8005 = vmatprep.subr.bf16.mxu1 %v8903_v5  ;;  %v3913_v21 = vshll.u32 %v9687_v2, 16 }
  0x71   : > { %8306 = vmatpush3.bf16.msra.mxu0 %v8898_v1  ;;  %v3885_v1 = vshll.u32 %v9661_v49, 16  ;;  %v3901_v17 = vrot.slane %v3899_v60, 5  ;;  %v3934_v50 = vrot.slane %v3932_v63, 4  ;;  %v9743_v60 = vld [vmem:[%s9252_s19 + $0xc] sm:$0x1] }
  0x72   : > { %8315 = vmatprep.subr.bf16.mxu0 %v8901_v59 }
  0x73   : > { %8006 = vmatpush3.bf16.msra.mxu1 %v8903_v5  ;;  %v9681_v16 = vrot.slane %v3885_v1, 5  ;;  %v7148_v5 = vld [vmem:[%s9285_s17 + $0x38] sm:$0xf] }
  0x74   : > { %8308 = vmatmul.mubr.bf16.vlgmr.msra.gmra.mrb[0].mxu0 %v8902_v3  ;;  %8007 = vmatprep.subr.bf16.mxu1 %v8905_v22  ;;  %v9691_v3 = vld [vmem:[%s9285_s17 + $0x3c] sm:$0x1]  ;;  %v3918_v9 = vshrl.u32 %v7148_v5, 16  ;;  %v3921_v38 = vshll.u32 %v7148_v5, 16 }
  0x75   : > { %8316 = vmatpush3.bf16.msra.mxu0 %v8901_v59  ;;  %8311 = vmatprep.mubr.bf16.mxu0 %v8914_v24  ;;  %v7146_v59 = vld [vmem:[%s9285_s17 + $0x30] sm:$0xf]  ;;  %v3927_v47 = vshll.u32 %v9691_v3, 16  ;;  %v4143_v24 = vrot.slane %v9629_v55, 5  ;;  %v3888_v58 = vsel %vm9299_vm2, %v9683_v14, %v9681_v16  ;;  %v9749_v16 = vld [vmem:[%s9252_s19 + $0x14] sm:$0x1] }
  0x76   : > { %8317 = vmatprep.subr.bf16.mxu0 %v8904_v36  ;;  %8000 = vmatmul.mubr.bf16.gmra.mrb[4].mxu1 %v6629_v25  ;;  %v3904_v6 = vshrl.u32 %v7146_v59, 16  ;;  %v3907_v30 = vshll.u32 %v7146_v59, 16  ;;  %v3902_v25 = vsel %vm9299_vm2, %v3897_v28, %v3901_v17  ;;  %v1197_v14 = vshrl.u32 %v6674_v13, 16  ;;  %v8925_v59 = vld [vmem:[%s10921_s3 + $0x110] sm:$0xff]  }
  0x77   : > { %8008 = vmatpush3.bf16.msra.mxu1 %v8905_v22  ;;  %8019 = vmatprep.mubr.bf16.mxu1 %v8919_v33  ;;  %v3923_v22 = vrot.slane %v3921_v38, 5  ;;  %v7152_v33 = vld [vmem:[%s9285_s17 + $0x48] sm:$0xf]  ;;  %v3929_v32 = vrot.slane %v3927_v47, 5  ;;  %v7171_v1 = vcombine.low %v3888_v58, %v3902_v25  ;;  %v1200_v17 = vshll.u32 %v6674_v13, 16 }
  0x78   : > { %8009 = vmatprep.subr.bf16.mxu1 %v8907_v39  ;;  %v3906_v19 = vrot.slane %v3904_v6, 4  ;;  %v3909_v20 = vrot.slane %v3907_v30, 5  ;;  %v3949_v12 = vshll.u32 %v7152_v33, 16  ;;  %v1206_v28 = vshll.u32 %v9743_v60, 16  ;;  %v7182_v58 = vld [vmem:[%s9285_s17 + $0x10] sm:$0xe] }
  0x79   : > { %8318 = vmatpush3.bf16.msra.mxu0 %v8904_v36  ;;  %v3920_v36 = vrot.slane %v3918_v9, 4  ;;  %v8924_v9 = vld [vmem:[%s10921_s3 + $0x448] sm:$0xff]   ;;  %v1202_v38 = vrot.slane %v1200_v17, 5  ;;  %v9802_v13 = vld [vmem:[%s9252_s19 + $0x24] sm:$0x1]  ;;  %v4147_v17 = vrot.slane %v9661_v49, 5 }
  0x7a   : > { %8319 = vmatprep.subr.bf16.mxu0 %v8906_v40  ;;  %v3910_v26 = vor.u32 %v3909_v20, %v3906_v19  ;;  %v3951_v53 = vrot.slane %v3949_v12, 5  ;;  %v1220_v19 = vshll.u32 %v9749_v16, 16  ;;  %v8936_v20 = vld [vmem:[%s9252_s19 + $0x38] ss:$8 sps:$4 sm:$0xff]  }
  0x7b   : > { %8010 = vmatpush3.bf16.msra.mxu1 %v8907_v39  ;;  %v3924_v39 = vor.u32 %v3923_v22, %v3920_v36 }
  0x7c   : > { %8312 = vmatmul.mubr.bf16.gmra.mrb[4].mxu0 %v8916_v11  ;;  %8011 = vmatprep.subr.bf16.mxu1 %v8909_v45  ;;  %v3911_v8 = vrot.slane %v3910_v26, 4  ;;  %v3946_v11 = vshrl.u32 %v7152_v33, 16  ;;  %v7183_v33 = vld [vmem:[%s9285_s17 + $0x18] sm:$0xe] }
  0x7d   : > { %8320 = vmatpush3.bf16.msra.mxu0 %v8906_v40  ;;  %8331 = vmatprep.mubr.bf16.mxu0 %v7170_v46  ;;  %v3935_v40 = vshll.u32 %v7150_v27, 16  ;;  %v3925_v43 = vrot.slane %v3924_v39, 4  ;;  %v1208_v27 = vrot.slane %v1206_v28, 5  ;;  %v1222_v39 = vrot.slane %v1220_v19, 5  ;;  %v8930_v28 = vld [vmem:[%s10921_s3 + $0x460] sm:$0xff]  }
  0x7e   : > { %8321 = vmatprep.subr.bf16.mxu0 %v8908_v31  ;;  %v3948_v51 = vrot.slane %v3946_v11, 4  ;;  %v7191_v63 = vrot.slane %v7183_v33, 9  ;;  %v4151_v19 = vrot.slane %v9664_v42, 5  ;;  %v9836_v33 = vld [vmem:[%s9252_s19 + $0x34] sm:$0x1] }
  0x7f   : > { %8012 = vmatpush3.bf16.msra.mxu1 %v8909_v45  ;;  %v3915_v45 = vrot.slane %v3913_v21, 5  ;;  %v3937_v46 = vrot.slane %v3935_v40, 5  ;;  %v3930_v5 = vsel %vm9299_vm2, %v3925_v43, %v3929_v32  ;;  %v6678_v40 = vld [vmem:[%s9252_s19 + $0x18] sm:$0xf]  ;;  %v8926_v43 = vld [vmem:[%s10921_s3 + $0x450] sm:$0xff]  }
  0x80   : > { %8013 = vmatprep.subr.bf16.mxu1 %v8911_v52  ;;  %v3952_v23 = vor.u32 %v3951_v53, %v3948_v51  ;;  %v4144_v4 = vsel %vm9473_vm5, %v7191_v63, %v4143_v24 }
  0x81   : > { %8322 = vmatpush3.bf16.msra.mxu0 %v8908_v31  ;;  %v8923_v31 = vld [vmem:[%s10921_s3 + $0x108] sm:$0xff]  }
  0x82   : > { %8323 = vmatprep.subr.bf16.mxu0 %v8910_v57  ;;  %v3953_v36 = vrot.slane %v3952_v23, 4 }
  0x83   : > { %8014 = vmatpush3.bf16.msra.mxu1 %v8911_v52  ;;  %v3955_v52 = vshll.u32 %v9728_v18, 16 }
  0x84   : > { %8015 = vmatprep.subr.bf16.mxu1 %v8913_v0 }
  0x85   : > { %8324 = vmatpush3.bf16.msra.mxu0 %v8910_v57  ;;  %v3938_v57 = vor.u32 %v3937_v46, %v3934_v50  ;;  %v9784_v46 = vld [vmem:[%s9252_s19 + $0x1c] sm:$0x1] }
  0x86   : > { %8325 = vmatprep.subr.bf16.mxu0 %v8912_v61  ;;  %v1234_v23 = vshll.u32 %v9784_v46, 16 }
  0x87   : > { %8016 = vmatpush3.bf16.msra.mxu1 %v8913_v0  ;;  %v6676_v0 = vld [vmem:[%s9252_s19 + $0x10] sm:$0xf]  ;;  %v3939_v21 = vrot.slane %v3938_v57, 4 }
  0x88   : > { %8017 = vmatprep.subr.bf16.mxu1 %v8917_v10  ;;  %v1211_v6 = vshrl.u32 %v6676_v0, 16  ;;  %v1214_v30 = vshll.u32 %v6676_v0, 16  ;;  %v8928_v0 = vld [vmem:[%s10921_s3 + $0x458] sm:$0xff]  }
  0x89   : > { %8326 = vmatpush3.bf16.msra.mxu0 %v8912_v61  ;;  %v3916_v61 = vsel %vm9299_vm2, %v3911_v8, %v3915_v45  ;;  %v8927_v8 = vld [vmem:[%s10921_s3 + $0x118] sm:$0xff]   ;;  %v3944_v45 = vsel %vm9299_vm2, %v3939_v21, %v9738_v54  ;;  %v1239_v54 = vshrl.u32 %v6680_v41, 16 }
  0x8a   : > { %8327 = vmatprep.subr.bf16.mxu0 %v8915_v7  ;;  %v1213_v22 = vrot.slane %v1211_v6, 4  ;;  %v1216_v47 = vrot.slane %v1214_v30, 5  ;;  %v7172_v25 = vcombine.low %v3916_v61, %v3930_v5  ;;  %v1248_v5 = vshll.u32 %v9802_v13, 16  ;;  %v7184_v30 = vld [vmem:[%s9285_s17 + $0x20] sm:$0xe] }
  0x8b   : > { %8018 = vmatpush3.bf16.msra.mxu1 %v8917_v10  ;;  %v1199_v10 = vrot.slane %v1197_v14, 4  ;;  %v1241_v61 = vrot.slane %v1239_v54, 4 }
  0x8c   : > { %8027 = vmatprep.subr.bf16.mxu1 %v8920_v62 }
  0x8d   : > { %8328 = vmatpush3.bf16.msra.mxu0 %v8915_v7  ;;  %v3957_v7 = vrot.slane %v3955_v52, 5  ;;  %v1203_v26 = vor.u32 %v1202_v38, %v1199_v10  ;;  %v1242_v52 = vshll.u32 %v6680_v41, 16  ;;  %v1236_v10 = vrot.slane %v1234_v23, 5  ;;  %v8934_v38 = vld [vmem:[%s10921_s3 + $0x130] sm:$0xff]  }
  0x8e   : > { %8329 = vmatprep.subr.bf16.mxu0 %v8918_v15  ;;  %8020 = vmatmul.mubr.bf16.vlgmr.msra.gmra.mrb[0].mxu1 %v8922_v34  ;;  %v1217_v34 = vor.u32 %v1216_v47, %v1213_v22  ;;  %v7192_v22 = vrot.slane %v7184_v30, 9  ;;  %v7188_v30 = vld [vmem:[%s9285_s17 + $0x40] sm:$0xe] }
  0x8f   : > { %8028 = vmatpush3.bf16.msra.mxu1 %v8920_v62  ;;  %8023 = vmatprep.mubr.bf16.mxu1 %v8933_v44  ;;  %v7190_v62 = vrot.slane %v7182_v58, 9  ;;  %v1225_v44 = vshrl.u32 %v6678_v40, 16  ;;  %v3958_v11 = vsel %vm9299_vm2, %v3953_v36, %v3957_v7  ;;  %v1244_v24 = vrot.slane %v1242_v52, 5  ;;  %v6682_v58 = vld [vmem:[%s9252_s19 + $0x28] sm:$0xf] }
  0x90   : > { %8029 = vmatprep.subr.bf16.mxu1 %v8923_v31  ;;  %v1218_v12 = vrot.slane %v1217_v34, 4  ;;  %v1250_v36 = vrot.slane %v1248_v5, 5  ;;  %v1256_v34 = vshll.u32 %v6682_v58, 16  ;;  %v7187_v52 = vld [vmem:[%s9285_s17 + $0x38] sm:$0xe] }
  0x91   : > { %8330 = vmatpush3.bf16.msra.mxu0 %v8918_v15  ;;  %v1204_v15 = vrot.slane %v1203_v26, 4  ;;  %v4140_v50 = vsel %vm9473_vm5, %v7190_v62, %v4139_v56  ;;  %v8929_v56 = vld [vmem:[%s10921_s3 + $0x120] sm:$0xff]   ;;  %v1245_v6 = vor.u32 %v1244_v24, %v1241_v61  ;;  %v1253_v62 = vshrl.u32 %v6682_v58, 16  ;;  %v9868_v61 = vld [vmem:[%s9252_s19 + $0x3c] sm:$0x1] }
  0x92   : > { %8339 = vmatprep.subr.bf16.mxu0 %v8921_v37  ;;  %v1223_v51 = vsel %vm9299_vm2, %v1218_v12, %v1222_v39  ;;  %v7214_v14 = vcombine.low %v4140_v50, %v4144_v4  ;;  %v8937_v12 = vld [vmem:[%s10921_s3 + $0x138] sm:$0xff]   ;;  %v8939_v4 = vld [vmem:[%s10921_s3 + $0x140] sm:$0xff]   ;;  %v1290_v49 = vshll.u32 %v9868_v61, 16 }
  0x93   : > { %8030 = vmatpush3.bf16.msra.mxu1 %v8923_v31  ;;  %v1228_v31 = vshll.u32 %v6678_v40, 16  ;;  %v1209_v32 = vsel %vm9299_vm2, %v1204_v15, %v1208_v27  ;;  %v1246_v21 = vrot.slane %v1245_v6, 4  ;;  %v6684_v27 = vld [vmem:[%s9252_s19 + $0x30] sm:$0xf]  ;;  %v1276_v15 = vshll.u32 %v9836_v33, 16 }
  0x94   : > { %8332 = vmatmul.mubr.bf16.vlgmr.msra.gmra.mrb[0].mxu0 %v7171_v1  ;;  %8031 = vmatprep.subr.bf16.mxu1 %v8925_v59  ;;  %v7173_v1 = vcombine.low %v3944_v45, %v3958_v11  ;;  %v6706_v57 = vcombine.low %v1209_v32, %v1223_v51  ;;  %v1267_v63 = vshrl.u32 %v6684_v27, 16  ;;  %v1270_v40 = vshll.u32 %v6684_v27, 16  ;;  %v8935_v11 = vld [vmem:[%s10921_s3 + $0x470] sm:$0xff]  }
  0x95   : > { %8340 = vmatpush3.bf16.msra.mxu0 %v8921_v37  ;;  %8335 = vmatprep.mubr.bf16.mxu0 %v7172_v25  ;;  %v1227_v37 = vrot.slane %v1225_v44, 4  ;;  %v1230_v53 = vrot.slane %v1228_v31, 5  ;;  %v9830_v25 = vld [vmem:[%s9252_s19 + $0x2c] sm:$0x1]  ;;  %v1251_v41 = vsel %vm9299_vm2, %v1246_v21, %v1250_v36  ;;  %v1255_v44 = vrot.slane %v1253_v62, 4  ;;  %v8940_v36 = vld [vmem:[%s10921_s3 + $0x480] sm:$0xff]  }
  0x96   : > { %8341 = vmatprep.subr.bf16.mxu0 %v8924_v9  ;;  %8024 = vmatmul.mubr.bf16.gmra.mrb[4].mxu1 %v8936_v20  ;;  %v8932_v20 = vld [vmem:[%s10921_s3 + $0x468] sm:$0xff]   ;;  %v1262_v39 = vshll.u32 %v9830_v25, 16  ;;  %v4155_v45 = vrot.slane %v9687_v2, 5  ;;  %v1269_v31 = vrot.slane %v1267_v63, 4  ;;  %v4159_v32 = vrot.slane %v9691_v3, 5 }
  0x97   : > { %8032 = vmatpush3.bf16.msra.mxu1 %v8925_v59  ;;  %v1231_v55 = vor.u32 %v1230_v53, %v1227_v37  ;;  %8043 = vmatprep.mubr.bf16.mxu1 %v6706_v57  ;;  %v8931_v59 = vld [vmem:[%s10921_s3 + $0x128] sm:$0xff]   ;;  %v4163_v2 = vrot.slane %v9720_v29, 5  ;;  %v1278_v54 = vrot.slane %v1276_v15, 5  ;;  %v7186_v51 = vld [vmem:[%s9285_s17 + $0x30] sm:$0xe] }
  0x98   : > { %8033 = vmatprep.subr.bf16.mxu1 %v8927_v8  ;;  %v1264_v37 = vrot.slane %v1262_v39, 5  ;;  %v7189_v62 = vld [vmem:[%s9285_s17 + $0x48] sm:$0xe] }
  0x99   : > { %8342 = vmatpush3.bf16.msra.mxu0 %v8924_v9  ;;  %v9818_v9 = vld [vmem:[%s9285_s17 + $0x28] sm:$0xe]  ;;  %v1232_v7 = vrot.slane %v1231_v55, 4  ;;  %v6688_v55 = vld [vmem:[%s9252_s19 + $0x40] sm:$0xf] }
  0x9a   : > { %8343 = vmatprep.subr.bf16.mxu0 %v8926_v43  ;;  %v7193_v47 = vrot.slane %v9818_v9, 9  ;;  %v1295_v6 = vshrl.u32 %v6688_v55, 16  ;;  %v1298_v21 = vshll.u32 %v6688_v55, 16  ;;  %v8946_v55 = vld [vmem:[%s10921_s3 + $0x498] sm:$0xff]  }
  0x9b   : > { %8034 = vmatpush3.bf16.msra.mxu1 %v8927_v8  ;;  %v1237_v26 = vsel %vm9299_vm2, %v1232_v7, %v1236_v10  ;;  %v1258_v8 = vrot.slane %v1256_v34, 5  ;;  %v4167_v7 = vrot.slane %v9728_v18, 5  ;;  %v1292_v18 = vrot.slane %v1290_v49, 5  ;;  %v8951_v49 = vld [vmem:[%s10921_s3 + $0x170] sm:$0xff]  }
  0x9c   : > { %8336 = vmatmul.mubr.bf16.gmra.mrb[4].mxu0 %v7173_v1  ;;  %8035 = vmatprep.subr.bf16.mxu1 %v8929_v56  ;;  %v6707_v3 = vcombine.low %v1237_v26, %v1251_v41  ;;  %v9865_v1 = vsel %vm9473_vm5, %v7192_v22, %v4147_v17  ;;  %v8938_v17 = vld [vmem:[%s10921_s3 + $0x478] sm:$0xff]   ;;  %v8941_v22 = vld [vmem:[%s10921_s3 + $0x148] sm:$0xff]   ;;  %v1297_v26 = vrot.slane %v1295_v6, 4  ;;  %v4152_v34 = vsel %vm9473_vm5, %v7193_v47, %v4151_v19 }
  0x9d   : > { %8344 = vmatpush3.bf16.msra.mxu0 %v8926_v43  ;;  %8355 = vmatprep.mubr.bf16.mxu0 %v7214_v14  ;;  %v1272_v43 = vrot.slane %v1270_v40, 5  ;;  %v1259_v50 = vor.u32 %v1258_v8, %v1255_v44  ;;  %v9872_v14 = vld [vmem:[%s9252_s19 + $0x44] sm:$0x1]  ;;  %v1300_v63 = vrot.slane %v1298_v21, 5  ;;  %v7196_v40 = vrot.slane %v7188_v30, 9  ;;  %v8950_v6 = vld [vmem:[%s10921_s3 + $0x4a8] sm:$0xff]  }
  0x9e   : > { %8345 = vmatprep.subr.bf16.mxu0 %v8928_v0  ;;  %v1304_v27 = vshll.u32 %v9872_v14, 16  ;;  %v6718_v44 = vld [vmem:[%s9252_s19 + $0x8] sm:$0xe]  ;;  %v6719_v8 = vld [vmem:[%s9252_s19 + $0x10] sm:$0xe]  ;;  %v1508_v21 = vrot.slane %v9836_v33, 5 }
  0x9f   : > { %8036 = vmatpush3.bf16.msra.mxu1 %v8929_v56  ;;  %v1273_v53 = vor.u32 %v1272_v43, %v1269_v31  ;;  %v6686_v56 = vld [vmem:[%s9252_s19 + $0x38] sm:$0xf]  ;;  %v1260_v57 = vrot.slane %v1259_v50, 4  ;;  %v1301_v19 = vor.u32 %v1300_v63, %v1297_v26  ;;  %v6726_v47 = vrot.slane %v6718_v44, 9  ;;  %v4493_v63 = vld [vmem:[%s9907_s7] sm:$0xf] }
  0xa0   : > { %8037 = vmatprep.subr.bf16.mxu1 %v8931_v59  ;;  %v1281_v23 = vshrl.u32 %v6686_v56, 16  ;;  %v1306_v41 = vrot.slane %v1304_v27, 5  ;;  %v1492_v31 = vrot.slane %v9749_v16, 5  ;;  %v7197_v50 = vrot.slane %v7189_v62, 9  ;;  %v6724_v62 = vld [vmem:[%s9252_s19 + $0x38] sm:$0xe] }
  0xa1   : > { %8346 = vmatpush3.bf16.msra.mxu0 %v8928_v0  ;;  %v1274_v24 = vrot.slane %v1273_v53, 4  ;;  %v7194_v0 = vrot.slane %v7186_v51, 9  ;;  %v1265_v5 = vsel %vm9299_vm2, %v1260_v57, %v1264_v37  ;;  %v8945_v53 = vld [vmem:[%s10921_s3 + $0x158] sm:$0xff]   ;;  %v8944_v57 = vld [vmem:[%s10921_s3 + $0x490] sm:$0xff]   ;;  %v4513_v44 = vshll.u32 %v4493_v63, 16 }
  0xa2   : > { %8347 = vmatprep.subr.bf16.mxu0 %v8930_v28 }
  0xa3   : > { %8038 = vmatpush3.bf16.msra.mxu1 %v8931_v59  ;;  %v1284_v59 = vshll.u32 %v6686_v56, 16  ;;  %v1279_v10 = vsel %vm9299_vm2, %v1274_v24, %v1278_v54  ;;  %v4156_v15 = vsel %vm9473_vm5, %v7194_v0, %v4155_v45  ;;  %v7215_v45 = vcombine.low %v9865_v1, %v4152_v34  ;;  %v8942_v54 = vld [vmem:[%s10921_s3 + $0x488] sm:$0xff]   ;;  %v8948_v0 = vld [vmem:[%s10921_s3 + $0x4a0] sm:$0xff]  }
  0xa4   : > { %8039 = vmatprep.subr.bf16.mxu1 %v8934_v38  ;;  %v6708_v58 = vcombine.low %v1265_v5, %v1279_v10  ;;  %v4168_v1 = vsel %vm9473_vm5, %v7197_v50, %v4167_v7  ;;  %v8949_v24 = vld [vmem:[%s10921_s3 + $0x168] sm:$0xff]   ;;  %v1496_v7 = vrot.slane %v9784_v46, 5  ;;  %v8952_v46 = vld [vmem:[%s10921_s3 + $0x4b0] sm:$0xff]   ;;  %v1512_v34 = vrot.slane %v9868_v61, 5 }
  0xa5   : > { %8348 = vmatpush3.bf16.msra.mxu0 %v8930_v28  ;;  %v1283_v28 = vrot.slane %v1281_v23, 4  ;;  %v8956_v23 = vld [vmem:[%s9907_s7] ss:$8 sps:$4 sm:$0xff]   ;;  %v4515_v61 = vrot.slane %v4513_v44, 5  ;;  %v8969_v44 = vld [vmem:[%s10921_s3 + $0x1b0] sm:$0xff]  }
  0xa6   : > { %8349 = vmatprep.subr.bf16.mxu0 %v8932_v20  ;;  %v6722_v5 = vld [vmem:[%s9252_s19 + $0x28] sm:$0xe] }
  0xa7   : > { %8040 = vmatpush3.bf16.msra.mxu1 %v8934_v38  ;;  %v7195_v38 = vrot.slane %v7187_v52, 9 }
  0xa8   : > { %8041 = vmatprep.subr.bf16.mxu1 %v8937_v12 }
  0xa9   : > { %8350 = vmatpush3.bf16.msra.mxu0 %v8932_v20  ;;  %v1286_v20 = vrot.slane %v1284_v59, 5  ;;  %v4160_v42 = vsel %vm9473_vm5, %v7195_v38, %v4159_v32  ;;  %v1302_v32 = vrot.slane %v1301_v19, 4  ;;  %v6720_v59 = vld [vmem:[%s9252_s19 + $0x18] sm:$0xe]  ;;  %v1500_v38 = vrot.slane %v9802_v13, 5  ;;  %v8955_v13 = vld [vmem:[%s10921_s3 + $0x180] sm:$0xff]  }
  0xaa   : > { %8351 = vmatprep.subr.bf16.mxu0 %v8935_v11  ;;  %v7216_v16 = vcombine.low %v4156_v15, %v4160_v42  ;;  %v6728_v30 = vrot.slane %v6720_v59, 9  ;;  %v4495_v15 = vld [vmem:[%s9907_s7 + $0x8] sm:$0xf]  ;;  %v4497_v59 = vld [vmem:[%s9907_s7 + $0x10] sm:$0xf] }
  0xab   : > { %8042 = vmatpush3.bf16.msra.mxu1 %v8937_v12  ;;  %v1287_v39 = vor.u32 %v1286_v20, %v1283_v28  ;;  %v6727_v12 = vrot.slane %v6719_v8, 9  ;;  %v6723_v28 = vld [vmem:[%s9252_s19 + $0x30] sm:$0xe]  ;;  %v1504_v20 = vrot.slane %v9830_v25, 5  ;;  %v9993_v8 = vld [vmem:[%s9907_s7 + $0x4] sm:$0x1] }
  0xac   : > { %8051 = vmatprep.subr.bf16.mxu1 %v8939_v4  ;;  %v1497_v25 = vsel %vm9473_vm5, %v6728_v30, %v1496_v7  ;;  %v4527_v42 = vshll.u32 %v4495_v15, 16  ;;  %v4541_v30 = vshll.u32 %v4497_v59, 16  ;;  %v8964_v7 = vld [vmem:[%s10921_s3 + $0x4d8] sm:$0xff]  }
  0xad   : > { %8352 = vmatpush3.bf16.msra.mxu0 %v8935_v11  ;;  %v1488_v11 = vrot.slane %v9743_v60, 5  ;;  %v1288_v9 = vrot.slane %v1287_v39, 4  ;;  %v8943_v60 = vld [vmem:[%s10921_s3 + $0x150] sm:$0xff]   ;;  %v1493_v51 = vsel %vm9473_vm5, %v6727_v12, %v1492_v31  ;;  %v1516_v39 = vrot.slane %v9872_v14, 5 }
  0xae   : > { %8353 = vmatprep.subr.bf16.mxu0 %v8938_v17  ;;  %8044 = vmatmul.mubr.bf16.vlgmr.msra.gmra.mrb[0].mxu1 %v6707_v3  ;;  %v4164_v3 = vsel %vm9473_vm5, %v7196_v40, %v4163_v2  ;;  %v8947_v2 = vld [vmem:[%s10921_s3 + $0x160] sm:$0xff]   ;;  %v6732_v14 = vrot.slane %v6724_v62, 9  ;;  %v4503_v62 = vld [vmem:[%s9907_s7 + $0x28] sm:$0xf] }
  0xaf   : > { %8052 = vmatpush3.bf16.msra.mxu1 %v8939_v4  ;;  %8047 = vmatprep.mubr.bf16.mxu1 %v6708_v58  ;;  %v1293_v43 = vsel %vm9299_vm2, %v1288_v9, %v1292_v18  ;;  %v1489_v37 = vsel %vm9473_vm5, %v6726_v47, %v1488_v11  ;;  %v1307_v4 = vsel %vm9299_vm2, %v1302_v32, %v1306_v41  ;;  %v8953_v58 = vld [vmem:[%s10921_s3 + $0x178] sm:$0xff]   ;;  %v6725_v40 = vld [vmem:[%s9252_s19 + $0x40] sm:$0xe]  ;;  %v4510_v41 = vshrl.u32 %v4493_v63, 16  ;;  %v9996_v47 = vld [vmem:[%s9907_s7 + $0xc] sm:$0x1] }
  0xb0   : > { %8053 = vmatprep.subr.bf16.mxu1 %v8941_v22  ;;  %v6709_v52 = vcombine.low %v1293_v43, %v1307_v4  ;;  %v6750_v56 = vcombine.low %v1489_v37, %v1493_v51  ;;  %v7217_v29 = vcombine.low %v4164_v3, %v4168_v1  ;;  %v8954_v18 = vld [vmem:[%s10921_s3 + $0x4b8] sm:$0xff]   ;;  %v4524_v11 = vshrl.u32 %v4495_v15, 16  ;;  %v8959_v43 = vld [vmem:[%s10921_s3 + $0x188] sm:$0xff]   ;;  %v8957_v32 = vld [vmem:[%s10921_s3 + $0x4c0] sm:$0xff]  }
  0xb1   : > { %8354 = vmatpush3.bf16.msra.mxu0 %v8938_v17  ;;  %v6721_v17 = vld [vmem:[%s9252_s19 + $0x20] sm:$0xe]  ;;  %v6733_v12 = vrot.slane %v6725_v40, 9  ;;  %v4519_v37 = vshll.u32 %v9993_v8, 16  ;;  %v8958_v51 = vld [vmem:[%s9907_s7 + $0x10] ss:$8 sps:$4 sm:$0xff]  }
  0xb2   : > { %8363 = vmatprep.subr.bf16.mxu0 %v8940_v36  ;;  %v6729_v10 = vrot.slane %v6721_v17, 9  ;;  %v4526_v31 = vrot.slane %v4524_v11, 4  ;;  %v8960_v4 = vld [vmem:[%s10921_s3 + $0x4c8] sm:$0xff]   ;;  %v8975_v1 = vld [vmem:[%s9252_s19 + $0x10] ss:$8 sps:$4 sm:$0xff]   ;;  %v4580_v40 = vshrl.u32 %v4503_v62, 16 }
  0xb3   : > { %8054 = vmatpush3.bf16.msra.mxu1 %v8941_v22  ;;  %v6731_v22 = vrot.slane %v6723_v28, 9  ;;  %v8970_v3 = vld [vmem:[%s9907_s7 + $0x20] ss:$8 sps:$4 sm:$0xff]   ;;  %v8972_v17 = vld [vmem:[%s9907_s7 + $0x30] ss:$8 sps:$4 sm:$0xff]   ;;  %v4583_v15 = vshll.u32 %v4503_v62, 16 }
  0xb4   : > { %8356 = vmatmul.mubr.bf16.vlgmr.msra.gmra.mrb[0].mxu0 %v7215_v45  ;;  %8055 = vmatprep.subr.bf16.mxu1 %v8943_v60  ;;  %v1501_v33 = vsel %vm9473_vm5, %v6729_v10, %v1500_v38  ;;  %v4512_v45 = vrot.slane %v4510_v41, 4  ;;  %v8968_v41 = vld [vmem:[%s10921_s3 + $0x4e8] sm:$0xff]  }
  0xb5   : > { %8364 = vmatpush3.bf16.msra.mxu0 %v8940_v36  ;;  %8359 = vmatprep.mubr.bf16.mxu0 %v7216_v16  ;;  %v6730_v36 = vrot.slane %v6722_v5, 9  ;;  %v1509_v27 = vsel %vm9473_vm5, %v6731_v22, %v1508_v21  ;;  %v6751_v9 = vcombine.low %v1497_v25, %v1501_v33  ;;  %v4533_v16 = vshll.u32 %v9996_v47, 16  ;;  %v4501_v33 = vld [vmem:[%s9907_s7 + $0x20] sm:$0xf] }
  0xb6   : > { %8365 = vmatprep.subr.bf16.mxu0 %v8942_v54  ;;  %8048 = vmatmul.mubr.bf16.gmra.mrb[4].mxu1 %v6709_v52  ;;  %v4516_v50 = vor.u32 %v4515_v61, %v4512_v45  ;;  %v1517_v52 = vsel %vm9473_vm5, %v6733_v12, %v1516_v39  ;;  %v4566_v39 = vshrl.u32 %v4501_v33, 16  ;;  %v4569_v63 = vshll.u32 %v4501_v33, 16  ;;  %v10066_v45 = vld [vmem:[%s9907_s7 + $0x2c] sm:$0x1] }
  0xb7   : > { %8056 = vmatpush3.bf16.msra.mxu1 %v8943_v60  ;;  %8067 = vmatprep.mubr.bf16.mxu1 %v6750_v56  ;;  %v1505_v26 = vsel %vm9473_vm5, %v6730_v36, %v1504_v20  ;;  %v4529_v60 = vrot.slane %v4527_v42, 5  ;;  %v8961_v56 = vld [vmem:[%s10921_s3 + $0x190] sm:$0xff]   ;;  %v8965_v20 = vld [vmem:[%s10921_s3 + $0x1a0] sm:$0xff]  }
  0xb8   : > { %8057 = vmatprep.subr.bf16.mxu1 %v8945_v53  ;;  %v6752_v19 = vcombine.low %v1505_v26, %v1509_v27  ;;  %v10039_v36 = vld [vmem:[%s9907_s7 + $0x14] sm:$0x1]  ;;  %v10049_v26 = vld [vmem:[%s9907_s7 + $0x1c] sm:$0x1]  ;;  %v4571_v12 = vrot.slane %v4569_v63, 5 }
  0xb9   : > { %8366 = vmatpush3.bf16.msra.mxu0 %v8942_v54  ;;  %v4530_v54 = vor.u32 %v4529_v60, %v4526_v31  ;;  %v4547_v27 = vshll.u32 %v10039_v36, 16  ;;  %v4505_v31 = vld [vmem:[%s9907_s7 + $0x30] sm:$0xf]  ;;  %v4507_v60 = vld [vmem:[%s9907_s7 + $0x38] sm:$0xf] }
  0xba   : > { %8367 = vmatprep.subr.bf16.mxu0 %v8944_v57 }
  0xbb   : > { %8058 = vmatpush3.bf16.msra.mxu1 %v8945_v53  ;;  %v1513_v53 = vsel %vm9473_vm5, %v6732_v14, %v1512_v34  ;;  %v10054_v34 = vld [vmem:[%s9907_s7 + $0x24] sm:$0x1]  ;;  %v4568_v14 = vrot.slane %v4566_v39, 4 }
  0xbc   : > { %8360 = vmatmul.mubr.bf16.gmra.mrb[4].mxu0 %v7217_v29  ;;  %8059 = vmatprep.subr.bf16.mxu1 %v8947_v2  ;;  %v4531_v29 = vrot.slane %v4530_v54, 4  ;;  %v4575_v61 = vshll.u32 %v10054_v34, 16 }
  0xbd   : > { %8368 = vmatpush3.bf16.msra.mxu0 %v8944_v57  ;;  %8379 = vmatprep.mubr.bf16.mxu0 %v8956_v23  ;;  %v4517_v57 = vrot.slane %v4516_v50, 4  ;;  %v8963_v23 = vld [vmem:[%s10921_s3 + $0x198] sm:$0xff]   ;;  %v4594_v50 = vshrl.u32 %v4505_v31, 16 }
  0xbe   : > { %8369 = vmatprep.subr.bf16.mxu0 %v8946_v55 }
  0xbf   : > { %8060 = vmatpush3.bf16.msra.mxu1 %v8947_v2  ;;  %v4535_v2 = vrot.slane %v4533_v16, 5 }
  0xc0   : > { %8061 = vmatprep.subr.bf16.mxu1 %v8949_v24 }
  0xc1   : > { %8370 = vmatpush3.bf16.msra.mxu0 %v8946_v55  ;;  %v4521_v55 = vrot.slane %v4519_v37, 5  ;;  %v4536_v28 = vsel %vm9299_vm2, %v4531_v29, %v4535_v2  ;;  %v4597_v37 = vshll.u32 %v4505_v31, 16  ;;  %v8976_v2 = vld [vmem:[%s10921_s3 + $0x1c0] sm:$0xff]  }
  0xc2   : > { %8371 = vmatprep.subr.bf16.mxu0 %v8948_v0 }
  0xc3   : > { %8062 = vmatpush3.bf16.msra.mxu1 %v8949_v24  ;;  %v6753_v24 = vcombine.low %v1513_v53, %v1517_v52  ;;  %v4522_v5 = vsel %vm9299_vm2, %v4517_v57, %v4521_v55  ;;  %v8971_v53 = vld [vmem:[%s10921_s3 + $0x4f0] sm:$0xff]   ;;  %v8973_v52 = vld [vmem:[%s10921_s3 + $0x1b8] sm:$0xff]   ;;  %v10086_v57 = vrot.slane %v4594_v50, 4  ;;  %v10088_v55 = vrot.slane %v4597_v37, 5 }
  0xc4   : > { %8063 = vmatprep.subr.bf16.mxu1 %v8951_v49  ;;  %v7270_v21 = vcombine.low %v4522_v5, %v4536_v28  ;;  %v8974_v5 = vld [vmem:[%s10921_s3 + $0x4f8] sm:$0xff]  }
  0xc5   : > { %8372 = vmatpush3.bf16.msra.mxu0 %v8948_v0  ;;  %v8962_v0 = vld [vmem:[%s10921_s3 + $0x4d0] sm:$0xff]  }
  0xc6   : > { %8373 = vmatprep.subr.bf16.mxu0 %v8950_v6 }
  0xc7   : > { %8064 = vmatpush3.bf16.msra.mxu1 %v8951_v49  ;;  %v4499_v49 = vld [vmem:[%s9907_s7 + $0x18] sm:$0xf] }
  0xc8   : > { %8065 = vmatprep.subr.bf16.mxu1 %v8953_v58  ;;  %v4552_v10 = vshrl.u32 %v4499_v49, 16  ;;  %v4555_v38 = vshll.u32 %v4499_v49, 16  ;;  %v6798_v49 = vld [vmem:[%s9252_s19 + $0x10] sm:$0xf] }
  0xc9   : > { %8374 = vmatpush3.bf16.msra.mxu0 %v8950_v6  ;;  %v4538_v6 = vshrl.u32 %v4497_v59, 16  ;;  %v10099_v59 = vld [vmem:[%s9907_s7 + $0x3c] sm:$0x1] }
  0xca   : > { %8375 = vmatprep.subr.bf16.mxu0 %v8952_v46  ;;  %v4557_v25 = vrot.slane %v4555_v38, 5  ;;  %v1863_v38 = vshll.u32 %v6798_v49, 16 }
  0xcb   : > { %8066 = vmatpush3.bf16.msra.mxu1 %v8953_v58  ;;  %v4540_v22 = vrot.slane %v4538_v6, 4  ;;  %v4543_v58 = vrot.slane %v4541_v30, 5  ;;  %v6800_v30 = vld [vmem:[%s9252_s19 + $0x18] sm:$0xf] }
  0xcc   : > { %8075 = vmatprep.subr.bf16.mxu1 %v8955_v13 }
  0xcd   : > { %8376 = vmatpush3.bf16.msra.mxu0 %v8952_v46  ;;  %v8966_v46 = vld [vmem:[%s10921_s3 + $0x4e0] sm:$0xff]   ;;  %v4544_v11 = vor.u32 %v4543_v58, %v4540_v22  ;;  %v1874_v22 = vshrl.u32 %v6800_v30, 16  ;;  %v1877_v58 = vshll.u32 %v6800_v30, 16 }
  0xce   : > { %8377 = vmatprep.subr.bf16.mxu0 %v8954_v18  ;;  %8068 = vmatmul.mubr.bf16.vlgmr.msra.gmra.mrb[0].mxu1 %v6751_v9  ;;  %v4561_v9 = vshll.u32 %v10049_v26, 16 }
  0xcf   : > { %8076 = vmatpush3.bf16.msra.mxu1 %v8955_v13  ;;  %8071 = vmatprep.mubr.bf16.mxu1 %v6752_v19  ;;  %v4554_v13 = vrot.slane %v4552_v10, 4  ;;  %v10063_v19 = vrot.slane %v4547_v27, 5  ;;  %v10071_v54 = vrot.slane %v4544_v11, 4  ;;  %v1860_v10 = vshrl.u32 %v6798_v49, 16 }
  0xd0   : > { %8077 = vmatprep.subr.bf16.mxu1 %v8959_v43  ;;  %v1876_v39 = vrot.slane %v1874_v22, 4  ;;  %v1879_v63 = vrot.slane %v1877_v58, 5  ;;  %v8985_v22 = vld [vmem:[%s10921_s3 + $0x1e0] sm:$0xff]  }
  0xd1   : > { %8378 = vmatpush3.bf16.msra.mxu0 %v8954_v18  ;;  %v8967_v18 = vld [vmem:[%s10921_s3 + $0x1a8] sm:$0xff]   ;;  %v4558_v42 = vor.u32 %v4557_v25, %v4554_v13  ;;  %v4550_v28 = vsel %vm9299_vm2, %v10071_v54, %v10063_v19  ;;  %v1862_v13 = vrot.slane %v1860_v10, 4  ;;  %v1865_v25 = vrot.slane %v1863_v38, 5 }
  0xd2   : > { %8387 = vmatprep.subr.bf16.mxu0 %v8957_v32  ;;  %v4805_v54 = vrot.slane %v9996_v47, 5 }
  0xd3   : > { %8078 = vmatpush3.bf16.msra.mxu1 %v8959_v43  ;;  %v4582_v43 = vrot.slane %v4580_v40, 4  ;;  %v10073_v16 = vrot.slane %v4558_v42, 4  ;;  %v8989_v40 = vld [vmem:[%s9252_s19 + $0x30] ss:$8 sps:$4 sm:$0xff]   ;;  %v1866_v11 = vor.u32 %v1865_v25, %v1862_v13  ;;  %v8979_v42 = vld [vmem:[%s10921_s3 + $0x1c8] sm:$0xff]  }
  0xd4   : > { %8380 = vmatmul.mubr.bf16.vlgmr.msra.gmra.mrb[0].mxu0 %v8958_v51  ;;  %8079 = vmatprep.subr.bf16.mxu1 %v8961_v56  ;;  %v10075_v51 = vrot.slane %v4561_v9, 5  ;;  %v8984_v13 = vld [vmem:[%s10921_s3 + $0x518] sm:$0xff]  }
  0xd5   : > { %8388 = vmatpush3.bf16.msra.mxu0 %v8957_v32  ;;  %8383 = vmatprep.mubr.bf16.mxu0 %v8970_v3  ;;  %v4585_v32 = vrot.slane %v4583_v15, 5  ;;  %v4611_v3 = vshll.u32 %v4507_v60, 16  ;;  %v4600_v15 = vor.u32 %v10088_v55, %v10086_v57  ;;  %v1867_v31 = vrot.slane %v1866_v11, 4  ;;  %v6802_v57 = vld [vmem:[%s9252_s19 + $0x20] sm:$0xf] }
  0xd6   : > { %8389 = vmatprep.subr.bf16.mxu0 %v8960_v4  ;;  %8072 = vmatmul.mubr.bf16.gmra.mrb[4].mxu1 %v6753_v24  ;;  %v4564_v6 = vsel %vm9299_vm2, %v10073_v16, %v10075_v51  ;;  %v1891_v30 = vshll.u32 %v6802_v57, 16  ;;  %v8986_v11 = vld [vmem:[%s10921_s3 + $0x520] sm:$0xff]  }
  0xd7   : > { %8080 = vmatpush3.bf16.msra.mxu1 %v8961_v56  ;;  %8091 = vmatprep.mubr.bf16.mxu1 %v8975_v1  ;;  %v4589_v56 = vshll.u32 %v10066_v45, 16  ;;  %v10084_v1 = vrot.slane %v4575_v61, 5  ;;  %v4586_v24 = vor.u32 %v4585_v32, %v4582_v43  ;;  %v1880_v61 = vor.u32 %v1879_v63, %v1876_v39  ;;  %v8981_v43 = vld [vmem:[%s10921_s3 + $0x1d0] sm:$0xff]  }
  0xd8   : > { %8081 = vmatprep.subr.bf16.mxu1 %v8963_v23  ;;  %v7271_v16 = vcombine.low %v4550_v28, %v4564_v6  ;;  %v1888_v6 = vshrl.u32 %v6802_v57, 16 }
  0xd9   : > { %8390 = vmatpush3.bf16.msra.mxu0 %v8960_v4  ;;  %v4608_v4 = vshrl.u32 %v4507_v60, 16  ;;  %v4587_v62 = vrot.slane %v4586_v24, 4  ;;  %v4801_v60 = vrot.slane %v9993_v8, 5  ;;  %v1881_v37 = vrot.slane %v1880_v61, 4  ;;  %v8980_v8 = vld [vmem:[%s10921_s3 + $0x508] sm:$0xff]  }
  0xda   : > { %8391 = vmatprep.subr.bf16.mxu0 %v8962_v0 }
  0xdb   : > { %8082 = vmatpush3.bf16.msra.mxu1 %v8963_v23  ;;  %v10090_v29 = vrot.slane %v4608_v4, 4  ;;  %v4572_v23 = vor.u32 %v4571_v12, %v4568_v14  ;;  %v8977_v12 = vld [vmem:[%s10921_s3 + $0x500] sm:$0xff]  }
  0xdc   : > { %8384 = vmatmul.mubr.bf16.gmra.mrb[4].mxu0 %v8972_v17  ;;  %8083 = vmatprep.subr.bf16.mxu1 %v8965_v20  ;;  %v10103_v17 = vld [vmem:[%s9252_s19 + $0x14] sm:$0x1] }
  0xdd   : > { %8392 = vmatpush3.bf16.msra.mxu0 %v8962_v0  ;;  %8403 = vmatprep.mubr.bf16.mxu0 %v7270_v21  ;;  %v10096_v0 = vld [vmem:[%s9907_s7 + $0x34] sm:$0x1]  ;;  %v1869_v21 = vshll.u32 %v10103_v17, 16  ;;  %v4573_v27 = vrot.slane %v4572_v23, 4  ;;  %v8983_v23 = vld [vmem:[%s10921_s3 + $0x1d8] sm:$0xff]  }
  0xde   : > { %8393 = vmatprep.subr.bf16.mxu0 %v8964_v7 }
  0xdf   : > { %8084 = vmatpush3.bf16.msra.mxu1 %v8965_v20  ;;  %v4613_v20 = vrot.slane %v4611_v3, 5  ;;  %v1871_v19 = vrot.slane %v1869_v21, 5  ;;  %v4578_v32 = vsel %vm9299_vm2, %v4573_v27, %v10084_v1  ;;  %v1890_v27 = vrot.slane %v1888_v6, 4 }
  0xe0   : > { %8085 = vmatprep.subr.bf16.mxu1 %v8967_v18 }
  0xe1   : > { %8394 = vmatpush3.bf16.msra.mxu0 %v8964_v7  ;;  %v10118_v7 = vld [vmem:[%s9252_s19 + $0x1c] sm:$0x1]  ;;  %v4614_v9 = vor.u32 %v4613_v20, %v10090_v29  ;;  %v1872_v47 = vsel %vm9299_vm2, %v1867_v31, %v1871_v19  ;;  %v8992_v29 = vld [vmem:[%s9252_s19 + $0x40] ss:$8 sps:$4 sm:$0xff]  }
  0xe2   : > { %8395 = vmatprep.subr.bf16.mxu0 %v8966_v46  ;;  %v1883_v33 = vshll.u32 %v10118_v7, 16 }
  0xe3   : > { %8086 = vmatpush3.bf16.msra.mxu1 %v8967_v18  ;;  %v8978_v18 = vld [vmem:[%s9252_s19 + $0x20] ss:$8 sps:$4 sm:$0xff]   ;;  %v4615_v3 = vrot.slane %v4614_v9, 4  ;;  %v10195_v9 = vld [vmem:[%s9252_s19 + $0x3c] sm:$0x1] }
  0xe4   : > { %8087 = vmatprep.subr.bf16.mxu1 %v8969_v44  ;;  %v1885_v14 = vrot.slane %v1883_v33, 5  ;;  %v10178_v33 = vld [vmem:[%s9252_s19 + $0x24] sm:$0x1] }
  0xe5   : > { %8396 = vmatpush3.bf16.msra.mxu0 %v8966_v46  ;;  %v4591_v46 = vrot.slane %v4589_v56, 5  ;;  %v4601_v56 = vrot.slane %v4600_v15, 4  ;;  %v8987_v15 = vld [vmem:[%s10921_s3 + $0x1e8] sm:$0xff]  }
  0xe6   : > { %8397 = vmatprep.subr.bf16.mxu0 %v8968_v41  ;;  %v1886_v1 = vsel %vm9299_vm2, %v1881_v37, %v1885_v14  ;;  %v1897_v14 = vshll.u32 %v10178_v33, 16 }
  0xe7   : > { %8088 = vmatpush3.bf16.msra.mxu1 %v8969_v44  ;;  %v4617_v44 = vshll.u32 %v10099_v59, 16  ;;  %v4592_v50 = vsel %vm9299_vm2, %v4587_v62, %v4591_v46  ;;  %v6830_v28 = vcombine.low %v1872_v47, %v1886_v1  ;;  %v1893_v62 = vrot.slane %v1891_v30, 5 }
  0xe8   : > { %8089 = vmatprep.subr.bf16.mxu1 %v8973_v52  ;;  %v7272_v55 = vcombine.low %v4578_v32, %v4592_v50  ;;  %v10200_v50 = vld [vmem:[%s9907_s7 + $0x10] sm:$0xe]  ;;  %v4813_v47 = vrot.slane %v10049_v26, 5  ;;  %v1899_v57 = vrot.slane %v1897_v14, 5 }
  0xe9   : > { %8398 = vmatpush3.bf16.msra.mxu0 %v8968_v41  ;;  %v4603_v41 = vshll.u32 %v10096_v0, 16  ;;  %v4619_v4 = vrot.slane %v4617_v44, 5  ;;  %v10188_v44 = vld [vmem:[%s9252_s19 + $0x34] sm:$0x1] }
  0xea   : > { %8399 = vmatprep.subr.bf16.mxu0 %v8971_v53 }
  0xeb   : > { %8090 = vmatpush3.bf16.msra.mxu1 %v8973_v52  ;;  %v4605_v51 = vrot.slane %v4603_v41, 5  ;;  %v4776_v52 = vld [vmem:[%s9907_s7 + $0x8] sm:$0xe]  ;;  %v4620_v38 = vsel %vm9299_vm2, %v4615_v3, %v4619_v4  ;;  %v6806_v41 = vld [vmem:[%s9252_s19 + $0x30] sm:$0xf]  ;;  %v4809_v3 = vrot.slane %v10039_v36, 5 }
  0xec   : > { %8099 = vmatprep.subr.bf16.mxu1 %v8976_v2  ;;  %v7283_v49 = vrot.slane %v4776_v52, 9  ;;  %v1916_v19 = vshrl.u32 %v6806_v41, 16  ;;  %v1919_v61 = vshll.u32 %v6806_v41, 16  ;;  %v8988_v52 = vld [vmem:[%s10921_s3 + $0x528] sm:$0xff]   ;;  %v8993_v36 = vld [vmem:[%s10921_s3 + $0x1f8] sm:$0xff]  }
  0xed   : > { %8400 = vmatpush3.bf16.msra.mxu0 %v8971_v53  ;;  %v4775_v53 = vld [vmem:[%s9907_s7] sm:$0xe]  ;;  %v4606_v10 = vsel %vm9299_vm2, %v4601_v56, %v4605_v51  ;;  %v8990_v56 = vld [vmem:[%s10921_s3 + $0x1f0] sm:$0xff]  }
  0xee   : > { %8401 = vmatprep.subr.bf16.mxu0 %v8974_v5  ;;  %8092 = vmatmul.mubr.bf16.vlgmr.msra.gmra.mrb[0].mxu1 %v8978_v18  ;;  %v7282_v24 = vrot.slane %v4775_v53, 9  ;;  %v4806_v46 = vsel %vm9473_vm5, %v7283_v49, %v4805_v54  ;;  %v7273_v25 = vcombine.low %v4606_v10, %v4620_v38  ;;  %v10181_v18 = vld [vmem:[%s9252_s19 + $0x2c] sm:$0x1]  ;;  %v1918_v37 = vrot.slane %v1916_v19, 4  ;;  %v10223_v10 = vld [vmem:[%s9252_s19 + $0x44] sm:$0x1] }
  0xef   : > { %8100 = vmatpush3.bf16.msra.mxu1 %v8976_v2  ;;  %8095 = vmatprep.mubr.bf16.mxu1 %v8989_v40  ;;  %v6804_v2 = vld [vmem:[%s9252_s19 + $0x28] sm:$0xf]  ;;  %v1921_v54 = vrot.slane %v1919_v61, 5  ;;  %v1939_v53 = vshll.u32 %v10195_v9, 16 }
  0xf0   : > { %8101 = vmatprep.subr.bf16.mxu1 %v8979_v42  ;;  %v1902_v20 = vshrl.u32 %v6804_v2, 16  ;;  %v1905_v21 = vshll.u32 %v6804_v2, 16  ;;  %v4802_v58 = vsel %vm9473_vm5, %v7282_v24, %v4801_v60  ;;  %v6810_v2 = vld [vmem:[%s9252_s19 + $0x40] sm:$0xf] }
  0xf1   : > { %8402 = vmatpush3.bf16.msra.mxu0 %v8974_v5  ;;  %v8982_v5 = vld [vmem:[%s10921_s3 + $0x510] sm:$0xff]   ;;  %v7306_v39 = vcombine.low %v4802_v58, %v4806_v46  ;;  %v1922_v1 = vor.u32 %v1921_v54, %v1918_v37  ;;  %v1941_v30 = vrot.slane %v1939_v53, 5  ;;  %v1947_v38 = vshll.u32 %v6810_v2, 16  ;;  %v10229_v58 = vld [vmem:[%s9252_s19 + $0x4c] sm:$0x1] }
  0xf2   : > { %8411 = vmatprep.subr.bf16.mxu0 %v8977_v12  ;;  %v1904_v63 = vrot.slane %v1902_v20, 4  ;;  %v1907_v40 = vrot.slane %v1905_v21, 5  ;;  %v8991_v20 = vld [vmem:[%s10921_s3 + $0x530] sm:$0xff]   ;;  %v1967_v19 = vshll.u32 %v10229_v58, 16 }
  0xf3   : > { %8102 = vmatpush3.bf16.msra.mxu1 %v8979_v42  ;;  %v6808_v42 = vld [vmem:[%s9252_s19 + $0x38] sm:$0xf]  ;;  %v1923_v21 = vrot.slane %v1922_v1, 4 }
  0xf4   : > { %8404 = vmatmul.mubr.bf16.vlgmr.msra.gmra.mrb[0].mxu0 %v7271_v16  ;;  %8103 = vmatprep.subr.bf16.mxu1 %v8981_v43  ;;  %v1930_v31 = vshrl.u32 %v6808_v42, 16  ;;  %v1933_v60 = vshll.u32 %v6808_v42, 16  ;;  %v1908_v32 = vor.u32 %v1907_v40, %v1904_v63  ;;  %v10203_v16 = vld [vmem:[%s9907_s7 + $0x18] sm:$0xe]  ;;  %v4821_v63 = vrot.slane %v10066_v45, 5  ;;  %v8995_v45 = vld [vmem:[%s10921_s3 + $0x200] sm:$0xff]  }
  0xf5   : > { %8412 = vmatpush3.bf16.msra.mxu0 %v8977_v12  ;;  %8407 = vmatprep.mubr.bf16.mxu0 %v7272_v55  ;;  %v1911_v12 = vshll.u32 %v10181_v18, 16  ;;  %v7284_v55 = vrot.slane %v10200_v50, 9  ;;  %v7285_v49 = vrot.slane %v10203_v16, 9  ;;  %v1953_v40 = vshll.u32 %v10223_v10, 16  ;;  %v6843_v16 = vld [vmem:[%s9252_s19 + $0x18] sm:$0xe] }
  0xf6   : > { %8413 = vmatprep.subr.bf16.mxu0 %v8980_v8  ;;  %8096 = vmatmul.mubr.bf16.gmra.mrb[4].mxu1 %v8992_v29  ;;  %v1932_v51 = vrot.slane %v1930_v31, 4  ;;  %v1935_v4 = vrot.slane %v1933_v60, 5  ;;  %v1909_v26 = vrot.slane %v1908_v32, 4  ;;  %v6842_v32 = vld [vmem:[%s9252_s19 + $0x10] sm:$0xe] }
  0xf7   : > { %8104 = vmatpush3.bf16.msra.mxu1 %v8981_v43  ;;  %8115 = vmatprep.mubr.bf16.mxu1 %v6830_v28  ;;  %v1894_v43 = vor.u32 %v1893_v62, %v1890_v27  ;;  %v1913_v24 = vrot.slane %v1911_v12, 5  ;;  %v1944_v28 = vshrl.u32 %v6810_v2, 16  ;;  %v1949_v27 = vrot.slane %v1947_v38, 5  ;;  %v4780_v12 = vld [vmem:[%s9907_s7 + $0x28] sm:$0xe] }
  0xf8   : > { %8105 = vmatprep.subr.bf16.mxu1 %v8983_v23  ;;  %v1936_v29 = vor.u32 %v1935_v4, %v1932_v51  ;;  %v4810_v37 = vsel %vm9473_vm5, %v7284_v55, %v4809_v3  ;;  %v4814_v54 = vsel %vm9473_vm5, %v7285_v49, %v4813_v47  ;;  %v7287_v4 = vrot.slane %v4780_v12, 9  ;;  %v4781_v2 = vld [vmem:[%s9907_s7 + $0x30] sm:$0xe] }
  0xf9   : > { %8414 = vmatpush3.bf16.msra.mxu0 %v8980_v8  ;;  %v1925_v8 = vshll.u32 %v10188_v44, 16  ;;  %v1946_v46 = vrot.slane %v1944_v28, 4  ;;  %v1955_v53 = vrot.slane %v1953_v40, 5  ;;  %v2151_v47 = vrot.slane %v10103_v17, 5  ;;  %v8999_v49 = vld [vmem:[%s10921_s3 + $0x210] sm:$0xff]  }
  0xfa   : > { %8415 = vmatprep.subr.bf16.mxu0 %v8982_v5  ;;  %v6851_v55 = vrot.slane %v6843_v16, 9  ;;  %v4822_v17 = vsel %vm9473_vm5, %v7287_v4, %v4821_v63  ;;  %v9003_v63 = vld [vmem:[%s10921_s3 + $0x220] sm:$0xff]   ;;  %v9012_v40 = vld [vmem:[%s9907_s7 + $0x8] ss:$8 sps:$4 sm:$0xff]   ;;  %v2163_v12 = vrot.slane %v10181_v18, 5 }
  0xfb   : > { %8106 = vmatpush3.bf16.msra.mxu1 %v8983_v23  ;;  %v1895_v23 = vrot.slane %v1894_v43, 4  ;;  %v1927_v6 = vrot.slane %v1925_v8, 5  ;;  %v1950_v60 = vor.u32 %v1949_v27, %v1946_v46  ;;  %v8997_v8 = vld [vmem:[%s10921_s3 + $0x208] sm:$0xff]   ;;  %v9000_v27 = vld [vmem:[%s10921_s3 + $0x550] sm:$0xff]  }
  0xfc   : > { %8408 = vmatmul.mubr.bf16.gmra.mrb[4].mxu0 %v7273_v25  ;;  %8107 = vmatprep.subr.bf16.mxu1 %v8985_v22  ;;  %v4779_v25 = vld [vmem:[%s9907_s7 + $0x20] sm:$0xe]  ;;  %v9008_v18 = vld [vmem:[%s10921_s3 + $0x570] sm:$0xff]  }
  0xfd   : > { %8416 = vmatpush3.bf16.msra.mxu0 %v8982_v5  ;;  %8427 = vmatprep.mubr.bf16.mxu0 %v7306_v39  ;;  %v6812_v5 = vld [vmem:[%s9252_s19 + $0x48] sm:$0xf]  ;;  %v4817_v39 = vrot.slane %v10054_v34, 5  ;;  %v1900_v41 = vsel %vm9299_vm2, %v1895_v23, %v1899_v57  ;;  %v8994_v34 = vld [vmem:[%s10921_s3 + $0x538] sm:$0xff]   ;;  %v1928_v61 = vsel %vm9299_vm2, %v1923_v21, %v1927_v6  ;;  %v7286_v31 = vrot.slane %v4779_v25, 9 }
  0xfe   : > { %8417 = vmatprep.subr.bf16.mxu0 %v8984_v13  ;;  %v1961_v62 = vshll.u32 %v6812_v5, 16  ;;  %v1951_v3 = vrot.slane %v1950_v60, 4  ;;  %v6850_v57 = vrot.slane %v6842_v32, 9  ;;  %v4782_v23 = vld [vmem:[%s9907_s7 + $0x38] sm:$0xe]  ;;  %v7288_v6 = vrot.slane %v4781_v2, 9 }
  0xff   : > { %8108 = vmatpush3.bf16.msra.mxu1 %v8985_v22  ;;  %v1937_v22 = vrot.slane %v1936_v29, 4  ;;  %v2155_v29 = vrot.slane %v10118_v7, 5  ;;  %v8998_v21 = vld [vmem:[%s10921_s3 + $0x548] sm:$0xff]   ;;  %v6847_v60 = vld [vmem:[%s9252_s19 + $0x38] sm:$0xe] }
 0x100   : > { %8109 = vmatprep.subr.bf16.mxu1 %v8987_v15  ;;  %v1963_v42 = vrot.slane %v1961_v62, 5  ;;  %v1956_v7 = vsel %vm9299_vm2, %v1951_v3, %v1955_v53  ;;  %v2152_v38 = vsel %vm9473_vm5, %v6850_v57, %v2151_v47  ;;  %v9002_v62 = vld [vmem:[%s10921_s3 + $0x558] sm:$0xff]   ;;  %v7354_v32 = vld [vmem:[%s9907_s7 + $0x8] sm:$0xf]  ;;  %v6855_v16 = vrot.slane %v6847_v60, 9 }
 0x101   : > { %8418 = vmatpush3.bf16.msra.mxu0 %v8984_v13  ;;  %v1958_v13 = vshrl.u32 %v6812_v5, 16  ;;  %v1942_v14 = vsel %vm9299_vm2, %v1937_v22, %v1941_v30  ;;  %v4818_v5 = vsel %vm9473_vm5, %v7286_v31, %v4817_v39  ;;  %v7289_v30 = vrot.slane %v4782_v23, 9  ;;  %v6846_v31 = vld [vmem:[%s9252_s19 + $0x30] sm:$0xe]  ;;  %v6848_v47 = vld [vmem:[%s9252_s19 + $0x40] sm:$0xe] }
 0x102   : > { %8419 = vmatprep.subr.bf16.mxu0 %v8986_v11  ;;  %v6832_v51 = vcombine.low %v1928_v61, %v1942_v14  ;;  %v7308_v22 = vcombine.low %v4818_v5, %v4822_v17  ;;  %v2159_v61 = vrot.slane %v10178_v33, 5  ;;  %v2171_v33 = vrot.slane %v10195_v9, 5  ;;  %v9010_v9 = vld [vmem:[%s10921_s3 + $0x578] sm:$0xff]   ;;  %v10350_v2 = vld [vmem:[%s9907_s7 + $0xc] sm:$0x1]  ;;  %v9013_v17 = vld [vmem:[%s10921_s3 + $0x580] sm:$0xff]  }
 0x103   : > { %8110 = vmatpush3.bf16.msra.mxu1 %v8987_v15  ;;  %v1960_v15 = vrot.slane %v1958_v13, 4  ;;  %v5173_v4 = vshrl.u32 %v7354_v32, 16  ;;  %v5176_v53 = vshll.u32 %v7354_v32, 16  ;;  %v2175_v3 = vrot.slane %v10223_v10, 5  ;;  %v10353_v23 = vld [vmem:[%s9907_s7 + $0x14] sm:$0x1] }
 0x104   : > { %8111 = vmatprep.subr.bf16.mxu1 %v8990_v56  ;;  %v2172_v57 = vsel %vm9473_vm5, %v6855_v16, %v2171_v33 }
 0x105   : > { %8420 = vmatpush3.bf16.msra.mxu0 %v8986_v11  ;;  %v1914_v11 = vsel %vm9299_vm2, %v1909_v26, %v1913_v24  ;;  %v1964_v43 = vor.u32 %v1963_v42, %v1960_v15  ;;  %v7307_v24 = vcombine.low %v4810_v37, %v4814_v54  ;;  %v4829_v26 = vrot.slane %v10099_v59, 5  ;;  %v9001_v59 = vld [vmem:[%s10921_s3 + $0x218] sm:$0xff]   ;;  %v9004_v15 = vld [vmem:[%s10921_s3 + $0x560] sm:$0xff]   ;;  %v6845_v42 = vld [vmem:[%s9252_s19 + $0x28] sm:$0xe] }
 0x106   : > { %8421 = vmatprep.subr.bf16.mxu0 %v8988_v52  ;;  %v6831_v50 = vcombine.low %v1900_v41, %v1914_v11  ;;  %v9005_v41 = vld [vmem:[%s10921_s3 + $0x228] sm:$0xff]   ;;  %v6844_v11 = vld [vmem:[%s9252_s19 + $0x20] sm:$0xe]  ;;  %v6853_v14 = vrot.slane %v6845_v42, 9  ;;  %v6854_v37 = vrot.slane %v6846_v31, 9  ;;  %v2167_v54 = vrot.slane %v10188_v44, 5 }
 0x107   : > { %8112 = vmatpush3.bf16.msra.mxu1 %v8990_v56  ;;  %v8996_v56 = vld [vmem:[%s10921_s3 + $0x540] sm:$0xff]   ;;  %v1965_v1 = vrot.slane %v1964_v43, 4  ;;  %v4830_v25 = vsel %vm9473_vm5, %v7289_v30, %v4829_v26  ;;  %v9009_v43 = vld [vmem:[%s10921_s3 + $0x238] sm:$0xff]   ;;  %v5182_v30 = vshll.u32 %v10350_v2, 16  ;;  %v7362_v31 = vld [vmem:[%s9907_s7 + $0x28] sm:$0xf] }
 0x108   : > { %8113 = vmatprep.subr.bf16.mxu1 %v8993_v36  ;;  %v5229_v33 = vshrl.u32 %v7362_v31, 16 }
 0x109   : > { %8422 = vmatpush3.bf16.msra.mxu0 %v8988_v52  ;;  %v1969_v52 = vrot.slane %v1967_v19, 5  ;;  %v9006_v19 = vld [vmem:[%s10921_s3 + $0x568] sm:$0xff]  }
 0x10a   : > { %8423 = vmatprep.subr.bf16.mxu0 %v8991_v20 }
 0x10b   : > { %8114 = vmatpush3.bf16.msra.mxu1 %v8993_v36  ;;  %v1970_v28 = vsel %vm9299_vm2, %v1965_v1, %v1969_v52  ;;  %v4825_v36 = vrot.slane %v10096_v0, 5  ;;  %v2168_v1 = vsel %vm9473_vm5, %v6854_v37, %v2167_v54  ;;  %v10402_v37 = vld [vmem:[%s9907_s7 + $0x24] sm:$0x1] }
 0x10c   : > { %8123 = vmatprep.subr.bf16.mxu1 %v8995_v45  ;;  %v6833_v46 = vcombine.low %v1956_v7, %v1970_v28  ;;  %v9015_v7 = vld [vmem:[%s10921_s3 + $0x248] sm:$0xff]   ;;  %v6876_v28 = vcombine.low %v2168_v1, %v2172_v57  ;;  %v5224_v1 = vshll.u32 %v10402_v37, 16  ;;  %v9025_v57 = vld [vmem:[%s10921_s3 + $0x270] sm:$0xff]  }
 0x10d   : > { %8424 = vmatpush3.bf16.msra.mxu0 %v8991_v20  ;;  %v2156_v20 = vsel %vm9473_vm5, %v6851_v55, %v2155_v29  ;;  %v4826_v13 = vsel %vm9473_vm5, %v7288_v6, %v4825_v36  ;;  %v6849_v55 = vld [vmem:[%s9252_s19 + $0x48] sm:$0xe]  ;;  %v6856_v36 = vrot.slane %v6848_v47, 9  ;;  %v2179_v6 = vrot.slane %v10229_v58, 5  ;;  %v9017_v58 = vld [vmem:[%s10921_s3 + $0x250] sm:$0xff]  }
 0x10e   : > { %8425 = vmatprep.subr.bf16.mxu0 %v8994_v34  ;;  %8116 = vmatmul.mubr.bf16.vlgmr.msra.gmra.mrb[0].mxu1 %v6831_v50  ;;  %v6874_v0 = vcombine.low %v2152_v38, %v2156_v20  ;;  %v7309_v39 = vcombine.low %v4826_v13, %v4830_v25  ;;  %v7356_v50 = vld [vmem:[%s9907_s7 + $0x10] sm:$0xf]  ;;  %v6857_v26 = vrot.slane %v6849_v55, 9  ;;  %v5196_v38 = vshll.u32 %v10353_v23, 16  ;;  %v9014_v20 = vld [vmem:[%s9907_s7 + $0x18] ss:$8 sps:$4 sm:$0xff]  }
 0x10f   : > { %8124 = vmatpush3.bf16.msra.mxu1 %v8995_v45  ;;  %8119 = vmatprep.mubr.bf16.mxu1 %v6832_v51  ;;  %v6852_v45 = vrot.slane %v6844_v11, 9  ;;  %v2164_v51 = vsel %vm9473_vm5, %v6853_v14, %v2163_v12  ;;  %v5187_v44 = vshrl.u32 %v7356_v50, 16  ;;  %v5190_v52 = vshll.u32 %v7356_v50, 16  ;;  %v9026_v13 = vld [vmem:[%s9907_s7 + $0x28] ss:$8 sps:$4 sm:$0xff]   ;;  %v9021_v11 = vld [vmem:[%s10921_s3 + $0x260] sm:$0xff]  }
 0x110   : > { %8125 = vmatprep.subr.bf16.mxu1 %v8997_v8  ;;  %v5184_v25 = vrot.slane %v5182_v30, 5  ;;  %v7360_v14 = vld [vmem:[%s9907_s7 + $0x20] sm:$0xf]  ;;  %v10397_v12 = vld [vmem:[%s9907_s7 + $0x1c] sm:$0x1] }
 0x111   : > { %8426 = vmatpush3.bf16.msra.mxu0 %v8994_v34  ;;  %v9007_v34 = vld [vmem:[%s10921_s3 + $0x230] sm:$0xff]   ;;  %v5189_v10 = vrot.slane %v5187_v44, 4  ;;  %v5192_v5 = vrot.slane %v5190_v52, 5  ;;  %v5215_v54 = vshrl.u32 %v7360_v14, 16  ;;  %v5218_v16 = vshll.u32 %v7360_v14, 16 }
 0x112   : > { %8435 = vmatprep.subr.bf16.mxu0 %v8996_v56  ;;  %v7364_v50 = vld [vmem:[%s9907_s7 + $0x30] sm:$0xf]  ;;  %v7368_v52 = vld [vmem:[%s9907_s7 + $0x40] sm:$0xf] }
 0x113   : > { %8126 = vmatpush3.bf16.msra.mxu1 %v8997_v8  ;;  %v2160_v8 = vsel %vm9473_vm5, %v6852_v45, %v2159_v61  ;;  %v9020_v45 = vld [vmem:[%s10921_s3 + $0x598] sm:$0xff]   ;;  %v5246_v44 = vshll.u32 %v7364_v50, 16  ;;  %v5217_v47 = vrot.slane %v5215_v54, 4  ;;  %v5220_v55 = vrot.slane %v5218_v16, 5  ;;  %v2505_v30 = vld [vmem:[%s9285_s17] sm:$0xf] }
 0x114   : > { %8428 = vmatmul.mubr.bf16.vlgmr.msra.gmra.mrb[0].mxu0 %v7307_v24  ;;  %8127 = vmatprep.subr.bf16.mxu1 %v8999_v49  ;;  %v6875_v29 = vcombine.low %v2160_v8, %v2164_v51  ;;  %v5175_v24 = vrot.slane %v5173_v4, 4  ;;  %v9028_v61 = vld [vmem:[%s9907_s7 + $0x38] ss:$8 sps:$4 sm:$0xff]   ;;  %v9023_v4 = vld [vmem:[%s10921_s3 + $0x268] sm:$0xff]  }
 0x115   : > { %8436 = vmatpush3.bf16.msra.mxu0 %v8996_v56  ;;  %8431 = vmatprep.mubr.bf16.mxu0 %v7308_v22  ;;  %v9011_v56 = vld [vmem:[%s10921_s3 + $0x240] sm:$0xff]   ;;  %v5193_v22 = vor.u32 %v5192_v5, %v5189_v10  ;;  %v7366_v8 = vld [vmem:[%s9907_s7 + $0x38] sm:$0xf]  ;;  %v10424_v10 = vrot.slane %v5229_v33, 4 }
 0x116   : > { %8437 = vmatprep.subr.bf16.mxu0 %v8998_v21  ;;  %8120 = vmatmul.mubr.bf16.gmra.mrb[4].mxu1 %v6833_v46  ;;  %v9016_v46 = vld [vmem:[%s10921_s3 + $0x588] sm:$0xff]   ;;  %v9022_v51 = vld [vmem:[%s10921_s3 + $0x5a0] sm:$0xff]  }
 0x117   : > { %8128 = vmatpush3.bf16.msra.mxu1 %v8999_v49  ;;  %8139 = vmatprep.mubr.bf16.mxu1 %v6874_v0  ;;  %v5178_v49 = vrot.slane %v5176_v53, 5  ;;  %v2176_v0 = vsel %vm9473_vm5, %v6856_v36, %v2175_v3  ;;  %v5243_v53 = vshrl.u32 %v7364_v50, 16  ;;  %v5210_v3 = vshll.u32 %v10397_v12, 16  ;;  %v10432_v36 = vld [vmem:[%s9907_s7 + $0x34] sm:$0x1] }
 0x118   : > { %8129 = vmatprep.subr.bf16.mxu1 %v9001_v59 }
 0x119   : > { %8438 = vmatpush3.bf16.msra.mxu0 %v8998_v21  ;;  %v5179_v21 = vor.u32 %v5178_v49, %v5175_v24  ;;  %v5260_v24 = vshll.u32 %v7366_v8, 16  ;;  %v9024_v49 = vld [vmem:[%s10921_s3 + $0x5a8] sm:$0xff]  }
 0x11a   : > { %8439 = vmatprep.subr.bf16.mxu0 %v9000_v27 }
 0x11b   : > { %8130 = vmatpush3.bf16.msra.mxu1 %v9001_v59  ;;  %v2180_v59 = vsel %vm9473_vm5, %v6857_v26, %v2179_v6  ;;  %v5245_v26 = vrot.slane %v5243_v53, 4  ;;  %v5248_v6 = vrot.slane %v5246_v44, 5 }
 0x11c   : > { %8432 = vmatmul.mubr.bf16.gmra.mrb[4].mxu0 %v7309_v39  ;;  %8131 = vmatprep.subr.bf16.mxu1 %v9003_v63  ;;  %v5180_v39 = vrot.slane %v5179_v21, 4  ;;  %v2507_v21 = vld [vmem:[%s9285_s17 + $0x8] sm:$0xf] }
 0x11d   : > { %8440 = vmatpush3.bf16.msra.mxu0 %v9000_v27  ;;  %8451 = vmatprep.mubr.bf16.mxu0 %v9012_v40  ;;  %v5198_v27 = vrot.slane %v5196_v38, 5  ;;  %v9031_v40 = vld [vmem:[%s9285_s17] ss:$8 sps:$4 sm:$0xff]   ;;  %v10436_v38 = vld [vmem:[%s9907_s7 + $0x3c] sm:$0x1] }
 0x11e   : > { %8441 = vmatprep.subr.bf16.mxu0 %v9002_v62  ;;  %v5185_v42 = vsel %vm9299_vm2, %v5180_v39, %v5184_v25  ;;  %v2539_v25 = vshll.u32 %v2507_v21, 16  ;;  %v5221_v39 = vor.u32 %v5220_v55, %v5217_v47  ;;  %v5468_v47 = vrot.slane %v10353_v23, 5  ;;  %v9035_v55 = vld [vmem:[%s10921_s3 + $0x288] sm:$0xff]  }
 0x11f   : > { %8132 = vmatpush3.bf16.msra.mxu1 %v9003_v63  ;;  %v5194_v63 = vrot.slane %v5193_v22, 4  ;;  %v2522_v22 = vshrl.u32 %v2505_v30, 16 }
 0x120   : > { %8133 = vmatprep.subr.bf16.mxu1 %v9005_v41  ;;  %v5222_v44 = vrot.slane %v5221_v39, 4  ;;  %v9048_v39 = vld [vmem:[%s9285_s17 + $0x30] ss:$8 sps:$4 sm:$0xff]  }
 0x121   : > { %8442 = vmatpush3.bf16.msra.mxu0 %v9002_v62  ;;  %v6877_v62 = vcombine.low %v2176_v0, %v2180_v59  ;;  %v5262_v59 = vrot.slane %v5260_v24, 5 }
 0x122   : > { %8443 = vmatprep.subr.bf16.mxu0 %v9004_v15 }
 0x123   : > { %8134 = vmatpush3.bf16.msra.mxu1 %v9005_v41  ;;  %v9018_v41 = vld [vmem:[%s10921_s3 + $0x590] sm:$0xff]  }
 0x124   : > { %8135 = vmatprep.subr.bf16.mxu1 %v9007_v34 }
 0x125   : > { %8444 = vmatpush3.bf16.msra.mxu0 %v9004_v15  ;;  %v9019_v15 = vld [vmem:[%s10921_s3 + $0x258] sm:$0xff]  }
 0x126   : > { %8445 = vmatprep.subr.bf16.mxu0 %v9006_v19 }
 0x127   : > { %8136 = vmatpush3.bf16.msra.mxu1 %v9007_v34  ;;  %v7358_v34 = vld [vmem:[%s9907_s7 + $0x18] sm:$0xf] }
 0x128   : > { %8137 = vmatprep.subr.bf16.mxu1 %v9009_v43  ;;  %v5204_v32 = vshll.u32 %v7358_v34, 16 }
 0x129   : > { %8446 = vmatpush3.bf16.msra.mxu0 %v9006_v19  ;;  %v5199_v19 = vsel %vm9299_vm2, %v5194_v63, %v5198_v27  ;;  %v9027_v27 = vld [vmem:[%s10921_s3 + $0x5b0] sm:$0xff]  }
 0x12a   : > { %8447 = vmatprep.subr.bf16.mxu0 %v9008_v18  ;;  %v7386_v60 = vcombine.low %v5185_v42, %v5199_v19 }
 0x12b   : > { %8138 = vmatpush3.bf16.msra.mxu1 %v9009_v43  ;;  %v5201_v43 = vshrl.u32 %v7358_v34, 16  ;;  %v2541_v34 = vrot.slane %v2539_v25, 5  ;;  %v2511_v25 = vld [vmem:[%s9285_s17 + $0x18] sm:$0xf] }
 0x12c   : > { %8147 = vmatprep.subr.bf16.mxu1 %v9011_v56 }
 0x12d   : > { %8448 = vmatpush3.bf16.msra.mxu0 %v9008_v18  ;;  %v5232_v18 = vshll.u32 %v7362_v31, 16  ;;  %v5252_v31 = vshll.u32 %v10432_v36, 16 }
 0x12e   : > { %8449 = vmatprep.subr.bf16.mxu0 %v9010_v9  ;;  %8140 = vmatmul.mubr.bf16.vlgmr.msra.gmra.mrb[0].mxu1 %v6875_v29  ;;  %v5257_v29 = vshrl.u32 %v7366_v8, 16  ;;  %v9030_v8 = vld [vmem:[%s10921_s3 + $0x5b8] sm:$0xff]  }
 0x12f   : > { %8148 = vmatpush3.bf16.msra.mxu1 %v9011_v56  ;;  %8143 = vmatprep.mubr.bf16.mxu1 %v6876_v28  ;;  %v10414_v56 = vrot.slane %v5204_v32, 5  ;;  %v10426_v5 = vrot.slane %v5232_v18, 5  ;;  %v10429_v28 = vld [vmem:[%s9907_s7 + $0x2c] sm:$0x1]  ;;  %v5266_v32 = vshll.u32 %v10436_v38, 16 }
 0x130   : > { %8149 = vmatprep.subr.bf16.mxu1 %v9015_v7  ;;  %v5259_v0 = vrot.slane %v5257_v29, 4  ;;  %v5238_v14 = vshll.u32 %v10429_v28, 16 }
 0x131   : > { %8450 = vmatpush3.bf16.msra.mxu0 %v9010_v9  ;;  %v10412_v9 = vrot.slane %v5201_v43, 4  ;;  %v5249_v43 = vor.u32 %v5248_v6, %v5245_v26 }
 0x132   : > { %8459 = vmatprep.subr.bf16.mxu0 %v9013_v17  ;;  %v5263_v54 = vor.u32 %v5262_v59, %v5259_v0  ;;  %v9037_v0 = vld [vmem:[%s10921_s3 + $0x290] sm:$0xff]  }
 0x133   : > { %8150 = vmatpush3.bf16.msra.mxu1 %v9015_v7  ;;  %v5274_v7 = vshll.u32 %v7368_v52, 16  ;;  %v5250_v24 = vrot.slane %v5249_v43, 4  ;;  %v9039_v43 = vld [vmem:[%s10921_s3 + $0x298] sm:$0xff]  }
 0x134   : > { %8452 = vmatmul.mubr.bf16.vlgmr.msra.gmra.mrb[0].mxu0 %v9014_v20  ;;  %8151 = vmatprep.subr.bf16.mxu1 %v9017_v58  ;;  %v10439_v20 = vld [vmem:[%s9907_s7 + $0x44] sm:$0x1] }
 0x135   : > { %8460 = vmatpush3.bf16.msra.mxu0 %v9013_v17  ;;  %8455 = vmatprep.mubr.bf16.mxu0 %v9026_v13  ;;  %v5271_v17 = vshrl.u32 %v7368_v52, 16  ;;  %v2536_v13 = vshrl.u32 %v2507_v21, 16  ;;  %v5280_v50 = vshll.u32 %v10439_v20, 16 }
 0x136   : > { %8461 = vmatprep.subr.bf16.mxu0 %v9016_v46  ;;  %8144 = vmatmul.mubr.bf16.gmra.mrb[4].mxu1 %v6877_v62  ;;  %v5207_v62 = vor.u32 %v10414_v56, %v10412_v9  ;;  %v9045_v56 = vld [vmem:[%s9285_s17 + $0x20] ss:$8 sps:$4 sm:$0xff]  }
 0x137   : > { %8152 = vmatpush3.bf16.msra.mxu1 %v9017_v58  ;;  %8163 = vmatprep.mubr.bf16.mxu1 %v9031_v40  ;;  %v9029_v58 = vld [vmem:[%s10921_s3 + $0x278] sm:$0xff]   ;;  %v5273_v63 = vrot.slane %v5271_v17, 4  ;;  %v5276_v40 = vrot.slane %v5274_v7, 5  ;;  %v2538_v19 = vrot.slane %v2536_v13, 4  ;;  %v5264_v17 = vrot.slane %v5263_v54, 4 }
 0x138   : > { %8153 = vmatprep.subr.bf16.mxu1 %v9019_v15  ;;  %v5208_v53 = vrot.slane %v5207_v62, 4  ;;  %v9036_v62 = vld [vmem:[%s10921_s3 + $0x5c8] sm:$0xff]  }
 0x139   : > { %8462 = vmatpush3.bf16.msra.mxu0 %v9016_v46  ;;  %v2525_v46 = vshll.u32 %v2505_v30, 16  ;;  %v5277_v16 = vor.u32 %v5276_v40, %v5273_v63  ;;  %v2542_v9 = vor.u32 %v2541_v34, %v2538_v19 }
 0x13a   : > { %8463 = vmatprep.subr.bf16.mxu0 %v9018_v41 }
 0x13b   : > { %8154 = vmatpush3.bf16.msra.mxu1 %v9019_v15  ;;  %v10451_v15 = vld [vmem:[%s9285_s17 + $0x4] sm:$0x1]  ;;  %v2527_v42 = vrot.slane %v2525_v46, 5  ;;  %v2543_v21 = vrot.slane %v2542_v9, 4  ;;  %v7399_v46 = vld [vmem:[%s9907_s7 + $0x10] sm:$0xe] }
 0x13c   : > { %8456 = vmatmul.mubr.bf16.gmra.mrb[4].mxu0 %v9028_v61  ;;  %8155 = vmatprep.subr.bf16.mxu1 %v9021_v11  ;;  %v5226_v61 = vrot.slane %v5224_v1, 5  ;;  %v2531_v33 = vshll.u32 %v10451_v15, 16  ;;  %v5254_v1 = vrot.slane %v5252_v31, 5  ;;  %v2567_v31 = vshll.u32 %v2511_v25, 16 }
 0x13d   : > { %8464 = vmatpush3.bf16.msra.mxu0 %v9018_v41  ;;  %8475 = vmatprep.mubr.bf16.mxu0 %v7386_v60  ;;  %v10454_v41 = vld [vmem:[%s9285_s17 + $0xc] sm:$0x1]  ;;  %v5235_v60 = vor.u32 %v10426_v5, %v10424_v10  ;;  %v5282_v10 = vrot.slane %v5280_v50, 5  ;;  %v9033_v5 = vld [vmem:[%s10921_s3 + $0x5c0] sm:$0xff]  }
 0x13e   : > { %8465 = vmatprep.subr.bf16.mxu0 %v9020_v45  ;;  %v2545_v18 = vshll.u32 %v10454_v41, 16  ;;  %v2533_v7 = vrot.slane %v2531_v33, 5  ;;  %v5227_v6 = vsel %vm9299_vm2, %v5222_v44, %v5226_v61  ;;  %v5255_v13 = vsel %vm9299_vm2, %v5250_v24, %v5254_v1  ;;  %v2513_v33 = vld [vmem:[%s9285_s17 + $0x20] sm:$0xf] }
 0x13f   : > { %8156 = vmatpush3.bf16.msra.mxu1 %v9021_v11  ;;  %v2524_v11 = vrot.slane %v2522_v22, 4  ;;  %v5236_v29 = vrot.slane %v5235_v60, 4  ;;  %v7398_v22 = vld [vmem:[%s9907_s7 + $0x8] sm:$0xe]  ;;  %v9038_v60 = vld [vmem:[%s10921_s3 + $0x5d0] sm:$0xff]   ;;  %v2569_v9 = vrot.slane %v2567_v31, 5 }
 0x140   : > { %8157 = vmatprep.subr.bf16.mxu1 %v9023_v4  ;;  %v2547_v23 = vrot.slane %v2545_v18, 5  ;;  %v7406_v34 = vrot.slane %v7398_v22, 9  ;;  %v2515_v18 = vld [vmem:[%s9285_s17 + $0x28] sm:$0xf]  ;;  %v2581_v1 = vshll.u32 %v2513_v33, 16 }
 0x141   : > { %8466 = vmatpush3.bf16.msra.mxu0 %v9020_v45  ;;  %v5212_v45 = vrot.slane %v5210_v3, 5  ;;  %v2528_v52 = vor.u32 %v2527_v42, %v2524_v11  ;;  %v5240_v3 = vrot.slane %v5238_v14, 5  ;;  %v2564_v14 = vshrl.u32 %v2511_v25, 16 }
 0x142   : > { %8467 = vmatprep.subr.bf16.mxu0 %v9022_v51  ;;  %v2548_v40 = vsel %vm9299_vm2, %v2543_v21, %v2547_v23  ;;  %v5476_v23 = vrot.slane %v10402_v37, 5  ;;  %v2583_v22 = vrot.slane %v2581_v1, 5  ;;  %v9055_v37 = vld [vmem:[%s10921_s3 + $0x2d0] sm:$0xff]  }
 0x143   : > { %8158 = vmatpush3.bf16.msra.mxu1 %v9023_v4  ;;  %v9034_v4 = vld [vmem:[%s9285_s17 + $0x10] ss:$8 sps:$4 sm:$0xff]   ;;  %v5213_v26 = vsel %vm9299_vm2, %v5208_v53, %v5212_v45  ;;  %v2529_v30 = vrot.slane %v2528_v52, 4  ;;  %v5241_v59 = vsel %vm9299_vm2, %v5236_v29, %v5240_v3  ;;  %v7407_v45 = vrot.slane %v7399_v46, 9  ;;  %v10523_v53 = vld [vmem:[%s9285_s17 + $0x1c] sm:$0x1] }
 0x144   : > { %8159 = vmatprep.subr.bf16.mxu1 %v9025_v57  ;;  %v7388_v19 = vcombine.low %v5241_v59, %v5255_v13  ;;  %v2566_v52 = vrot.slane %v2564_v14, 4  ;;  %v2578_v3 = vshrl.u32 %v2513_v33, 16  ;;  %v7401_v14 = vld [vmem:[%s9907_s7 + $0x20] sm:$0xe]  ;;  %v9049_v33 = vld [vmem:[%s10921_s3 + $0x2b8] sm:$0xff]  }
 0x145   : > { %8468 = vmatpush3.bf16.msra.mxu0 %v9022_v51  ;;  %v9032_v51 = vld [vmem:[%s10921_s3 + $0x280] sm:$0xff]   ;;  %v2534_v63 = vsel %vm9299_vm2, %v2529_v30, %v2533_v7  ;;  %v10544_v30 = vld [vmem:[%s9285_s17 + $0x2c] sm:$0x1] }
 0x146   : > { %8469 = vmatprep.subr.bf16.mxu0 %v9024_v49  ;;  %v6930_v61 = vcombine.low %v2534_v63, %v2548_v40  ;;  %v2570_v7 = vor.u32 %v2569_v9, %v2566_v52  ;;  %v2580_v21 = vrot.slane %v2578_v3, 4 }
 0x147   : > { %8160 = vmatpush3.bf16.msra.mxu1 %v9025_v57  ;;  %v5464_v57 = vrot.slane %v10350_v2, 5  ;;  %v5278_v2 = vrot.slane %v5277_v16, 4 }
 0x148   : > { %8161 = vmatprep.subr.bf16.mxu1 %v9029_v58  ;;  %v2584_v31 = vor.u32 %v2583_v22, %v2580_v21  ;;  %v2787_v22 = vld [vmem:[%s9285_s17] sm:$0xe] }
 0x149   : > { %8470 = vmatpush3.bf16.msra.mxu0 %v9024_v49  ;;  %v5268_v49 = vrot.slane %v5266_v32, 5  ;;  %v5283_v50 = vsel %vm9299_vm2, %v5278_v2, %v5282_v10  ;;  %v2573_v10 = vshll.u32 %v10523_v53, 16  ;;  %v9043_v2 = vld [vmem:[%s10921_s3 + $0x2a8] sm:$0xff]  }
 0x14a   : > { %8471 = vmatprep.subr.bf16.mxu0 %v9027_v27  ;;  %v2585_v9 = vrot.slane %v2584_v31, 4  ;;  %v5488_v31 = vrot.slane %v10436_v38, 5 }
 0x14b   : > { %8162 = vmatpush3.bf16.msra.mxu1 %v9029_v58  ;;  %v2509_v58 = vld [vmem:[%s9285_s17 + $0x10] sm:$0xf]  ;;  %v5269_v32 = vsel %vm9299_vm2, %v5264_v17, %v5268_v49  ;;  %v2575_v25 = vrot.slane %v2573_v10, 5 }
 0x14c   : > { %8171 = vmatprep.subr.bf16.mxu1 %v9032_v51  ;;  %v2550_v11 = vshrl.u32 %v2509_v58, 16  ;;  %v2553_v42 = vshll.u32 %v2509_v58, 16  ;;  %v7389_v44 = vcombine.low %v5269_v32, %v5283_v50  ;;  %v2517_v17 = vld [vmem:[%s9285_s17 + $0x30] sm:$0xf]  ;;  %v10568_v32 = vld [vmem:[%s9907_s7 + $0x28] sm:$0xe] }
 0x14d   : > { %8472 = vmatpush3.bf16.msra.mxu0 %v9027_v27  ;;  %v7387_v27 = vcombine.low %v5213_v26, %v5227_v6  ;;  %v10540_v26 = vld [vmem:[%s9285_s17 + $0x24] sm:$0x1]  ;;  %v2519_v6 = vld [vmem:[%s9285_s17 + $0x38] sm:$0xf]  ;;  %v2609_v63 = vshll.u32 %v2517_v17, 16  ;;  %v7410_v10 = vrot.slane %v10568_v32, 9 }
 0x14e   : > { %8473 = vmatprep.subr.bf16.mxu0 %v9030_v8  ;;  %8164 = vmatmul.mubr.bf16.vlgmr.msra.gmra.mrb[0].mxu1 %v9034_v4  ;;  %v2552_v54 = vrot.slane %v2550_v11, 4  ;;  %v2555_v16 = vrot.slane %v2553_v42, 5  ;;  %v10520_v4 = vld [vmem:[%s9285_s17 + $0x14] sm:$0x1]  ;;  %v2620_v40 = vshrl.u32 %v2519_v6, 16  ;;  %v9044_v11 = vld [vmem:[%s10921_s3 + $0x5e8] sm:$0xff]  }
 0x14f   : > { %8172 = vmatpush3.bf16.msra.mxu1 %v9032_v51  ;;  %8167 = vmatprep.mubr.bf16.mxu1 %v9045_v56  ;;  %v5469_v51 = vsel %vm9473_vm5, %v7407_v45, %v5468_v47  ;;  %v9041_v56 = vld [vmem:[%s10921_s3 + $0x2a0] sm:$0xff]   ;;  %v2595_v47 = vshll.u32 %v2515_v18, 16  ;;  %v2559_v49 = vshll.u32 %v10520_v4, 16  ;;  %v2571_v42 = vrot.slane %v2570_v7, 4  ;;  %v10571_v50 = vld [vmem:[%s9907_s7 + $0x30] sm:$0xe] }
 0x150   : > { %8173 = vmatprep.subr.bf16.mxu1 %v9035_v55  ;;  %v2556_v24 = vor.u32 %v2555_v16, %v2552_v54  ;;  %v2623_v45 = vshll.u32 %v2519_v6, 16 }
 0x151   : > { %8474 = vmatpush3.bf16.msra.mxu0 %v9030_v8  ;;  %v5465_v8 = vsel %vm9473_vm5, %v7406_v34, %v5464_v57  ;;  %v2592_v57 = vshrl.u32 %v2515_v18, 16  ;;  %v2597_v58 = vrot.slane %v2595_v47, 5  ;;  %v2561_v13 = vrot.slane %v2559_v49, 5 }
 0x152   : > { %8483 = vmatprep.subr.bf16.mxu0 %v9033_v5  ;;  %v7430_v29 = vcombine.low %v5465_v8, %v5469_v51  ;;  %v10549_v59 = vrot.slane %v2556_v24, 4  ;;  %v2601_v34 = vshll.u32 %v10544_v30, 16  ;;  %v2611_v18 = vrot.slane %v2609_v63, 5  ;;  %v9047_v51 = vld [vmem:[%s10921_s3 + $0x5f0] sm:$0xff]   ;;  %v9051_v24 = vld [vmem:[%s10921_s3 + $0x2c0] sm:$0xff]  }
 0x153   : > { %8174 = vmatpush3.bf16.msra.mxu1 %v9035_v55  ;;  %v9040_v55 = vld [vmem:[%s10921_s3 + $0x5d8] sm:$0xff]   ;;  %v2594_v46 = vrot.slane %v2592_v57, 4  ;;  %v2622_v8 = vrot.slane %v2620_v40, 4  ;;  %v7409_v47 = vrot.slane %v7401_v14, 9  ;;  %v9052_v63 = vld [vmem:[%s10921_s3 + $0x600] sm:$0xff]  }
 0x154   : > { %8476 = vmatmul.mubr.bf16.vlgmr.msra.gmra.mrb[0].mxu0 %v7387_v27  ;;  %8175 = vmatprep.subr.bf16.mxu1 %v9037_v0  ;;  %v2606_v27 = vshrl.u32 %v2517_v17, 16  ;;  %v2603_v1 = vrot.slane %v2601_v34, 5  ;;  %v2562_v49 = vsel %vm9299_vm2, %v10549_v59, %v2561_v13  ;;  %v7411_v17 = vrot.slane %v10571_v50, 9 }
 0x155   : > { %8484 = vmatpush3.bf16.msra.mxu0 %v9033_v5  ;;  %8479 = vmatprep.mubr.bf16.mxu0 %v7388_v19  ;;  %v5472_v5 = vrot.slane %v10397_v12, 5  ;;  %v2587_v19 = vshll.u32 %v10540_v26, 16  ;;  %v5477_v12 = vsel %vm9473_vm5, %v7409_v47, %v5476_v23  ;;  %v2817_v34 = vrot.slane %v10454_v41, 5  ;;  %v9061_v47 = vld [vmem:[%s10921_s3 + $0x2e8] sm:$0xff]  }
 0x156   : > { %8485 = vmatprep.subr.bf16.mxu0 %v9036_v62  ;;  %8168 = vmatmul.mubr.bf16.gmra.mrb[4].mxu1 %v9048_v39  ;;  %v10555_v39 = vld [vmem:[%s9285_s17 + $0x34] sm:$0x1]  ;;  %v2608_v54 = vrot.slane %v2606_v27, 4 }
 0x157   : > { %8176 = vmatpush3.bf16.msra.mxu1 %v9037_v0  ;;  %8187 = vmatprep.mubr.bf16.mxu1 %v6930_v61  ;;  %v9042_v0 = vld [vmem:[%s10921_s3 + $0x5e0] sm:$0xff]   ;;  %v7400_v61 = vld [vmem:[%s9907_s7 + $0x18] sm:$0xe]  ;;  %v2615_v16 = vshll.u32 %v10555_v39, 16 }
 0x158   : > { %8177 = vmatprep.subr.bf16.mxu1 %v9039_v43  ;;  %v7408_v57 = vrot.slane %v7400_v61, 9 }
 0x159   : > { %8486 = vmatpush3.bf16.msra.mxu0 %v9036_v62  ;;  %v9046_v62 = vld [vmem:[%s10921_s3 + $0x2b0] sm:$0xff]   ;;  %v2617_v7 = vrot.slane %v2615_v16, 5 }
 0x15a   : > { %8487 = vmatprep.subr.bf16.mxu0 %v9038_v60  ;;  %v5473_v13 = vsel %vm9473_vm5, %v7408_v57, %v5472_v5  ;;  %v9060_v57 = vld [vmem:[%s10921_s3 + $0x620] sm:$0xff]  }
 0x15b   : > { %8178 = vmatpush3.bf16.msra.mxu1 %v9039_v43  ;;  %v10565_v43 = vld [vmem:[%s9285_s17 + $0x3c] sm:$0x1] }
 0x15c   : > { %8480 = vmatmul.mubr.bf16.gmra.mrb[4].mxu0 %v7389_v44  ;;  %8179 = vmatprep.subr.bf16.mxu1 %v9041_v56  ;;  %v2625_v44 = vrot.slane %v2623_v45, 5  ;;  %v2629_v52 = vshll.u32 %v10565_v43, 16  ;;  %v7431_v45 = vcombine.low %v5473_v13, %v5477_v12 }
 0x15d   : > { %8488 = vmatpush3.bf16.msra.mxu0 %v9038_v60  ;;  %8499 = vmatprep.mubr.bf16.mxu0 %v7430_v29  ;;  %v2598_v60 = vor.u32 %v2597_v58, %v2594_v46  ;;  %v5484_v29 = vrot.slane %v10432_v36, 5  ;;  %v2576_v36 = vsel %vm9299_vm2, %v2571_v42, %v2575_v25  ;;  %v9053_v25 = vld [vmem:[%s10921_s3 + $0x2c8] sm:$0xff]   ;;  %v6942_v42 = vrot.slane %v2787_v22, 9 }
 0x15e   : > { %8489 = vmatprep.subr.bf16.mxu0 %v9040_v55  ;;  %v2626_v6 = vor.u32 %v2625_v44, %v2622_v8  ;;  %v2631_v21 = vrot.slane %v2629_v52, 5  ;;  %v6931_v59 = vcombine.low %v2562_v49, %v2576_v36  ;;  %v9056_v52 = vld [vmem:[%s10921_s3 + $0x610] sm:$0xff]   ;;  %v2791_v36 = vld [vmem:[%s9285_s17 + $0x20] sm:$0xe]  ;;  %v2833_v22 = vrot.slane %v10544_v30, 5 }
 0x15f   : > { %8180 = vmatpush3.bf16.msra.mxu1 %v9041_v56  ;;  %v2589_v56 = vrot.slane %v2587_v19, 5  ;;  %v2599_v3 = vrot.slane %v2598_v60, 4  ;;  %v5485_v61 = vsel %vm9473_vm5, %v7411_v17, %v5484_v29  ;;  %v5492_v60 = vrot.slane %v10439_v20, 5  ;;  %v9057_v20 = vld [vmem:[%s10921_s3 + $0x2d8] sm:$0xff]   ;;  %v9063_v49 = vld [vmem:[%s10921_s3 + $0x2f0] sm:$0xff]  }
 0x160   : > { %8181 = vmatprep.subr.bf16.mxu1 %v9043_v2  ;;  %v2627_v5 = vrot.slane %v2626_v6, 4  ;;  %v2790_v29 = vld [vmem:[%s9285_s17 + $0x18] sm:$0xe]  ;;  %v2821_v17 = vrot.slane %v10520_v4, 5  ;;  %v6946_v4 = vrot.slane %v2791_v36, 9 }
 0x161   : > { %8490 = vmatpush3.bf16.msra.mxu0 %v9040_v55  ;;  %v5480_v55 = vrot.slane %v10429_v28, 5  ;;  %v9050_v28 = vld [vmem:[%s10921_s3 + $0x5f8] sm:$0xff]   ;;  %v2590_v46 = vsel %vm9299_vm2, %v2585_v9, %v2589_v56  ;;  %v2604_v58 = vsel %vm9299_vm2, %v2599_v3, %v2603_v1  ;;  %v9059_v3 = vld [vmem:[%s10921_s3 + $0x2e0] sm:$0xff]  }
 0x162   : > { %8491 = vmatprep.subr.bf16.mxu0 %v9042_v0  ;;  %v6932_v40 = vcombine.low %v2590_v46, %v2604_v58  ;;  %v2632_v41 = vsel %vm9299_vm2, %v2627_v5, %v2631_v21  ;;  %v9058_v9 = vld [vmem:[%s10921_s3 + $0x618] sm:$0xff]   ;;  %v2829_v21 = vrot.slane %v10540_v26, 5  ;;  %v7478_v46 = vld [vmem:[%s9907_s7 + $0x10] sm:$0xf] }
 0x163   : > { %8182 = vmatpush3.bf16.msra.mxu1 %v9043_v2  ;;  %v2612_v2 = vor.u32 %v2611_v18, %v2608_v54  ;;  %v5481_v23 = vsel %vm9473_vm5, %v7410_v10, %v5480_v55  ;;  %v9068_v1 = vld [vmem:[%s9907_s7 + $0x10] ss:$8 sps:$4 sm:$0xff]   ;;  %v5836_v30 = vshrl.u32 %v7478_v46, 16  ;;  %v5839_v13 = vshll.u32 %v7478_v46, 16 }
 0x164   : > { %8183 = vmatprep.subr.bf16.mxu1 %v9046_v62  ;;  %v7432_v18 = vcombine.low %v5481_v23, %v5485_v61  ;;  %v2789_v55 = vld [vmem:[%s9285_s17 + $0x10] sm:$0xe]  ;;  %v9065_v6 = vld [vmem:[%s10921_s3 + $0x2f8] sm:$0xff]  }
 0x165   : > { %8492 = vmatpush3.bf16.msra.mxu0 %v9042_v0  ;;  %v2788_v0 = vld [vmem:[%s9285_s17 + $0x8] sm:$0xe]  ;;  %v2613_v27 = vrot.slane %v2612_v2, 4  ;;  %v6944_v10 = vrot.slane %v2789_v55, 9  ;;  %v6945_v2 = vrot.slane %v2790_v29, 9 }
 0x166   : > { %8493 = vmatprep.subr.bf16.mxu0 %v9044_v11  ;;  %v6943_v19 = vrot.slane %v2788_v0, 9  ;;  %v7480_v58 = vld [vmem:[%s9907_s7 + $0x18] sm:$0xf]  ;;  %v7482_v55 = vld [vmem:[%s9907_s7 + $0x20] sm:$0xf] }
 0x167   : > { %8184 = vmatpush3.bf16.msra.mxu1 %v9046_v62  ;;  %v2813_v62 = vrot.slane %v10451_v15, 5  ;;  %v7405_v15 = vld [vmem:[%s9907_s7 + $0x40] sm:$0xe]  ;;  %v2618_v14 = vsel %vm9299_vm2, %v2613_v27, %v2617_v7  ;;  %v2792_v7 = vld [vmem:[%s9285_s17 + $0x28] sm:$0xe]  ;;  %v5853_v27 = vshll.u32 %v7480_v58, 16 }
 0x168   : > { %8185 = vmatprep.subr.bf16.mxu1 %v9049_v33  ;;  %v7413_v50 = vrot.slane %v7405_v15, 9  ;;  %v2818_v16 = vsel %vm9473_vm5, %v6943_v19, %v2817_v34  ;;  %v6933_v8 = vcombine.low %v2618_v14, %v2632_v41  ;;  %v6947_v0 = vrot.slane %v2792_v7, 9  ;;  %v2794_v5 = vld [vmem:[%s9285_s17 + $0x38] sm:$0xe]  ;;  %v10703_v34 = vld [vmem:[%s9907_s7 + $0x14] sm:$0x1] }
 0x169   : > { %8494 = vmatpush3.bf16.msra.mxu0 %v9044_v11  ;;  %v7404_v11 = vld [vmem:[%s9907_s7 + $0x38] sm:$0xe]  ;;  %v2814_v54 = vsel %vm9473_vm5, %v6942_v42, %v2813_v62  ;;  %v9067_v62 = vld [vmem:[%s10921_s3 + $0x300] sm:$0xff]   ;;  %v2837_v19 = vrot.slane %v10555_v39, 5  ;;  %v10706_v15 = vld [vmem:[%s9907_s7 + $0x1c] sm:$0x1] }
 0x16a   : > { %8495 = vmatprep.subr.bf16.mxu0 %v9047_v51  ;;  %v7412_v32 = vrot.slane %v7404_v11, 9  ;;  %v6966_v38 = vcombine.low %v2814_v54, %v2818_v16  ;;  %v5493_v44 = vsel %vm9473_vm5, %v7413_v50, %v5492_v60  ;;  %v2834_v12 = vsel %vm9473_vm5, %v6947_v0, %v2833_v22  ;;  %v9066_v11 = vld [vmem:[%s10921_s3 + $0x638] sm:$0xff]   ;;  %v9071_v39 = vld [vmem:[%s10921_s3 + $0x308] sm:$0xff]  }
 0x16b   : > { %8186 = vmatpush3.bf16.msra.mxu1 %v9049_v33  ;;  %v9054_v33 = vld [vmem:[%s10921_s3 + $0x608] sm:$0xff]   ;;  %v5855_v61 = vrot.slane %v5853_v27, 5  ;;  %v2841_v60 = vrot.slane %v10565_v43, 5  ;;  %v5845_v50 = vshll.u32 %v10703_v34, 16  ;;  %v5859_v54 = vshll.u32 %v10706_v15, 16  ;;  %v9073_v43 = vld [vmem:[%s10921_s3 + $0x310] sm:$0xff]  }
 0x16c   : > { %8195 = vmatprep.subr.bf16.mxu1 %v9051_v24  ;;  %v9070_v16 = vld [vmem:[%s9907_s7 + $0x20] ss:$8 sps:$4 sm:$0xff]   ;;  %v5864_v36 = vshrl.u32 %v7482_v55, 16  ;;  %v9076_v7 = vld [vmem:[%s10921_s3 + $0x658] sm:$0xff]  }
 0x16d   : > { %8496 = vmatpush3.bf16.msra.mxu0 %v9047_v51  ;;  %v5489_v51 = vsel %vm9473_vm5, %v7412_v32, %v5488_v31  ;;  %v6949_v31 = vrot.slane %v2794_v5, 9  ;;  %v9069_v32 = vld [vmem:[%s10921_s3 + $0x640] sm:$0xff]  }
 0x16e   : > { %8497 = vmatprep.subr.bf16.mxu0 %v9050_v28  ;;  %8188 = vmatmul.mubr.bf16.vlgmr.msra.gmra.mrb[0].mxu1 %v6931_v59  ;;  %v7433_v56 = vcombine.low %v5489_v51, %v5493_v44  ;;  %v2822_v59 = vsel %vm9473_vm5, %v6944_v10, %v2821_v17  ;;  %v5847_v44 = vrot.slane %v5845_v50, 5  ;;  %v9083_v10 = vld [vmem:[%s9907_s7 + $0x40] ss:$8 sps:$4 sm:$0xff]   ;;  %v7486_v17 = vld [vmem:[%s9907_s7 + $0x30] sm:$0xf] }
 0x16f   : > { %8196 = vmatpush3.bf16.msra.mxu1 %v9051_v24  ;;  %8191 = vmatprep.mubr.bf16.mxu1 %v6932_v40  ;;  %v9062_v24 = vld [vmem:[%s10921_s3 + $0x628] sm:$0xff]   ;;  %v2793_v40 = vld [vmem:[%s9285_s17 + $0x30] sm:$0xe]  ;;  %v2842_v51 = vsel %vm9473_vm5, %v6949_v31, %v2841_v60 }
 0x170   : > { %8197 = vmatprep.subr.bf16.mxu1 %v9053_v25  ;;  %v6948_v41 = vrot.slane %v2793_v40, 9 }
 0x171   : > { %8498 = vmatpush3.bf16.msra.mxu0 %v9050_v28  ;;  %v2825_v28 = vrot.slane %v10523_v53, 5  ;;  %v9064_v53 = vld [vmem:[%s10921_s3 + $0x630] sm:$0xff]  }
 0x172   : > { %8507 = vmatprep.subr.bf16.mxu0 %v9052_v63 }
 0x173   : > { %8198 = vmatpush3.bf16.msra.mxu1 %v9053_v25  ;;  %v2826_v26 = vsel %vm9473_vm5, %v6945_v2, %v2825_v28  ;;  %v5850_v25 = vshrl.u32 %v7480_v58, 16  ;;  %v7488_v2 = vld [vmem:[%s9907_s7 + $0x38] sm:$0xf]  ;;  %v9077_v28 = vld [vmem:[%s10921_s3 + $0x320] sm:$0xff]   ;;  %v5892_v58 = vshrl.u32 %v7486_v17, 16 }
 0x174   : > { %8500 = vmatmul.mubr.bf16.vlgmr.msra.gmra.mrb[0].mxu0 %v7431_v45  ;;  %8199 = vmatprep.subr.bf16.mxu1 %v9055_v37  ;;  %v6967_v42 = vcombine.low %v2822_v59, %v2826_v26  ;;  %v5838_v45 = vrot.slane %v5836_v30, 4  ;;  %v5906_v0 = vshrl.u32 %v7488_v2, 16  ;;  %v9078_v59 = vld [vmem:[%s10921_s3 + $0x660] sm:$0xff]   ;;  %v9079_v26 = vld [vmem:[%s10921_s3 + $0x328] sm:$0xff]  }
 0x175   : > { %8508 = vmatpush3.bf16.msra.mxu0 %v9052_v63  ;;  %8503 = vmatprep.mubr.bf16.mxu0 %v7432_v18  ;;  %v2830_v63 = vsel %vm9473_vm5, %v6946_v4, %v2829_v21  ;;  %v5852_v23 = vrot.slane %v5850_v25, 4  ;;  %v5867_v21 = vshll.u32 %v7482_v55, 16  ;;  %v5895_v4 = vshll.u32 %v7486_v17, 16  ;;  %v10758_v30 = vld [vmem:[%s9907_s7 + $0x24] sm:$0x1]  ;;  %v9086_v17 = vld [vmem:[%s10921_s3 + $0x678] sm:$0xff]  }
 0x176   : > { %8509 = vmatprep.subr.bf16.mxu0 %v9054_v33  ;;  %8192 = vmatmul.mubr.bf16.gmra.mrb[4].mxu1 %v6933_v8  ;;  %v6968_v14 = vcombine.low %v2830_v63, %v2834_v12  ;;  %v9072_v8 = vld [vmem:[%s10921_s3 + $0x648] sm:$0xff]   ;;  %v5894_v12 = vrot.slane %v5892_v58, 4  ;;  %v5908_v5 = vrot.slane %v5906_v0, 4 }
 0x177   : > { %8200 = vmatpush3.bf16.msra.mxu1 %v9055_v37  ;;  %8211 = vmatprep.mubr.bf16.mxu1 %v6966_v38  ;;  %v5841_v37 = vrot.slane %v5839_v13, 5  ;;  %v5856_v18 = vor.u32 %v5855_v61, %v5852_v23  ;;  %v9081_v38 = vld [vmem:[%s9907_s7 + $0x30] ss:$8 sps:$4 sm:$0xff]   ;;  %v5866_v13 = vrot.slane %v5864_v36, 4  ;;  %v5869_v25 = vrot.slane %v5867_v21, 5  ;;  %v9080_v61 = vld [vmem:[%s10921_s3 + $0x668] sm:$0xff]  }
 0x178   : > { %8201 = vmatprep.subr.bf16.mxu1 %v9057_v20  ;;  %v10761_v63 = vld [vmem:[%s9907_s7 + $0x2c] sm:$0x1]  ;;  %v5897_v40 = vrot.slane %v5895_v4, 5  ;;  %v7492_v23 = vld [vmem:[%s9907_s7 + $0x48] sm:$0xf] }
 0x179   : > { %8510 = vmatpush3.bf16.msra.mxu0 %v9054_v33  ;;  %v5842_v33 = vor.u32 %v5841_v37, %v5838_v45  ;;  %v9082_v45 = vld [vmem:[%s10921_s3 + $0x330] sm:$0xff]   ;;  %v7490_v37 = vld [vmem:[%s9907_s7 + $0x40] sm:$0xf]  ;;  %v5887_v60 = vshll.u32 %v10761_v63, 16 }
 0x17a   : > { %8511 = vmatprep.subr.bf16.mxu0 %v9056_v52  ;;  %v9088_v36 = vld [vmem:[%s9285_s17 + $0x18] ss:$8 sps:$4 sm:$0xff]  }
 0x17b   : > { %8202 = vmatpush3.bf16.msra.mxu1 %v9057_v20  ;;  %v2838_v20 = vsel %vm9473_vm5, %v6948_v41, %v2837_v19  ;;  %v10767_v19 = vld [vmem:[%s9907_s7 + $0x3c] sm:$0x1]  ;;  %v5873_v41 = vshll.u32 %v10758_v30, 16 }
 0x17c   : > { %8504 = vmatmul.mubr.bf16.gmra.mrb[4].mxu0 %v7433_v56  ;;  %8203 = vmatprep.subr.bf16.mxu1 %v9059_v3  ;;  %v5843_v56 = vrot.slane %v5842_v33, 4  ;;  %v5934_v33 = vshrl.u32 %v7492_v23, 16 }
 0x17d   : > { %8512 = vmatpush3.bf16.msra.mxu0 %v9056_v52  ;;  %8523 = vmatprep.mubr.bf16.mxu0 %v9068_v1  ;;  %v5861_v52 = vrot.slane %v5859_v54, 5  ;;  %v9087_v1 = vld [vmem:[%s9285_s17 + $0x8] ss:$8 sps:$4 sm:$0xff]   ;;  %v5915_v54 = vshll.u32 %v10767_v19, 16 }
 0x17e   : > { %8513 = vmatprep.subr.bf16.mxu0 %v9058_v9  ;;  %v5848_v29 = vsel %vm9299_vm2, %v5843_v56, %v5847_v44 }
 0x17f   : > { %8204 = vmatpush3.bf16.msra.mxu1 %v9059_v3  ;;  %v5857_v3 = vrot.slane %v5856_v18, 4  ;;  %v5937_v18 = vshll.u32 %v7492_v23, 16 }
 0x180   : > { %8205 = vmatprep.subr.bf16.mxu1 %v9061_v47 }
 0x181   : > { %8514 = vmatpush3.bf16.msra.mxu0 %v9058_v9  ;;  %v6969_v9 = vcombine.low %v2838_v20, %v2842_v51  ;;  %v5875_v51 = vrot.slane %v5873_v41, 5 }
 0x182   : > { %8515 = vmatprep.subr.bf16.mxu0 %v9060_v57 }
 0x183   : > { %8206 = vmatpush3.bf16.msra.mxu1 %v9061_v47  ;;  %v9074_v47 = vld [vmem:[%s10921_s3 + $0x650] sm:$0xff]  }
 0x184   : > { %8207 = vmatprep.subr.bf16.mxu1 %v9063_v49 }
 0x185   : > { %8516 = vmatpush3.bf16.msra.mxu0 %v9060_v57  ;;  %v9075_v57 = vld [vmem:[%s10921_s3 + $0x318] sm:$0xff]  }
 0x186   : > { %8517 = vmatprep.subr.bf16.mxu0 %v9062_v24 }
 0x187   : > { %8208 = vmatpush3.bf16.msra.mxu1 %v9063_v49  ;;  %v7484_v49 = vld [vmem:[%s9907_s7 + $0x28] sm:$0xf] }
 0x188   : > { %8209 = vmatprep.subr.bf16.mxu1 %v9065_v6  ;;  %v5878_v22 = vshrl.u32 %v7484_v49, 16  ;;  %v5881_v46 = vshll.u32 %v7484_v49, 16  ;;  %v5939_v49 = vrot.slane %v5937_v18, 5  ;;  %v9096_v18 = vld [vmem:[%s10921_s3 + $0x6a8] sm:$0xff]  }
 0x189   : > { %8518 = vmatpush3.bf16.msra.mxu0 %v9062_v24  ;;  %v5862_v24 = vsel %vm9299_vm2, %v5857_v3, %v5861_v52  ;;  %v5889_v52 = vrot.slane %v5887_v60, 5 }
 0x18a   : > { %8519 = vmatprep.subr.bf16.mxu0 %v9064_v53  ;;  %v5880_v27 = vrot.slane %v5878_v22, 4 }
 0x18b   : > { %8210 = vmatpush3.bf16.msra.mxu1 %v9065_v6  ;;  %v7510_v6 = vcombine.low %v5848_v29, %v5862_v24  ;;  %v5936_v24 = vrot.slane %v5934_v33, 4 }
 0x18c   : > { %8219 = vmatprep.subr.bf16.mxu1 %v9067_v62 }
 0x18d   : > { %8520 = vmatpush3.bf16.msra.mxu0 %v9064_v53  ;;  %v5909_v53 = vshll.u32 %v7488_v2, 16  ;;  %v7526_v2 = vld [vmem:[%s9907_s7 + $0x30] sm:$0xe] }
 0x18e   : > { %8521 = vmatprep.subr.bf16.mxu0 %v9066_v11  ;;  %8212 = vmatmul.mubr.bf16.vlgmr.msra.gmra.mrb[0].mxu1 %v6967_v42  ;;  %v10764_v42 = vld [vmem:[%s9907_s7 + $0x34] sm:$0x1] }
 0x18f   : > { %8220 = vmatpush3.bf16.msra.mxu1 %v9067_v62  ;;  %8215 = vmatprep.mubr.bf16.mxu1 %v6968_v14  ;;  %v5883_v62 = vrot.slane %v5881_v46, 5  ;;  %v5870_v14 = vor.u32 %v5869_v25, %v5866_v13  ;;  %v9091_v46 = vld [vmem:[%s9285_s17 + $0x28] ss:$8 sps:$4 sm:$0xff]   ;;  %v6143_v13 = vrot.slane %v10764_v42, 5 }
 0x190   : > { %8221 = vmatprep.subr.bf16.mxu1 %v9071_v39 }
 0x191   : > { %8522 = vmatpush3.bf16.msra.mxu0 %v9066_v11  ;;  %v5911_v11 = vrot.slane %v5909_v53, 5  ;;  %v5884_v31 = vor.u32 %v5883_v62, %v5880_v27  ;;  %v5871_v20 = vrot.slane %v5870_v14, 4  ;;  %v5940_v53 = vor.u32 %v5939_v49, %v5936_v24  ;;  %v9092_v14 = vld [vmem:[%s9285_s17 + $0x38] ss:$8 sps:$4 sm:$0xff]  }
 0x192   : > { %8531 = vmatprep.subr.bf16.mxu0 %v9069_v32  ;;  %v6147_v27 = vrot.slane %v10767_v19, 5  ;;  %v6139_v49 = vrot.slane %v10761_v63, 5 }
 0x193   : > { %8222 = vmatpush3.bf16.msra.mxu1 %v9071_v39  ;;  %v5898_v39 = vor.u32 %v5897_v40, %v5894_v12  ;;  %v5912_v50 = vor.u32 %v5911_v11, %v5908_v5  ;;  %v5885_v44 = vrot.slane %v5884_v31, 4  ;;  %v7522_v11 = vld [vmem:[%s9907_s7 + $0x10] sm:$0xe]  ;;  %v5941_v23 = vrot.slane %v5940_v53, 4 }
 0x194   : > { %8524 = vmatmul.mubr.bf16.vlgmr.msra.gmra.mrb[0].mxu0 %v9070_v16  ;;  %8223 = vmatprep.subr.bf16.mxu1 %v9073_v43  ;;  %v5920_v16 = vshrl.u32 %v7490_v37, 16  ;;  %v7530_v41 = vrot.slane %v7522_v11, 9  ;;  %v6127_v31 = vrot.slane %v10703_v34, 5 }
 0x195   : > { %8532 = vmatpush3.bf16.msra.mxu0 %v9069_v32  ;;  %8527 = vmatprep.mubr.bf16.mxu0 %v9081_v38  ;;  %v5901_v32 = vshll.u32 %v10764_v42, 16  ;;  %v9084_v38 = vld [vmem:[%s10921_s3 + $0x670] sm:$0xff]   ;;  %v5913_v3 = vrot.slane %v5912_v50, 4 }
 0x196   : > { %8533 = vmatprep.subr.bf16.mxu0 %v9072_v8  ;;  %8216 = vmatmul.mubr.bf16.gmra.mrb[4].mxu1 %v6969_v9  ;;  %v5899_v9 = vrot.slane %v5898_v39, 4  ;;  %v5922_v55 = vrot.slane %v5920_v16, 4  ;;  %v6131_v39 = vrot.slane %v10706_v15, 5  ;;  %v9094_v16 = vld [vmem:[%s10921_s3 + $0x698] sm:$0xff]   ;;  %v6128_v34 = vsel %vm9473_vm5, %v7530_v41, %v6127_v31 }
 0x197   : > { %8224 = vmatpush3.bf16.msra.mxu1 %v9073_v43  ;;  %8235 = vmatprep.mubr.bf16.mxu1 %v9087_v1  ;;  %v5923_v43 = vshll.u32 %v7490_v37, 16  ;;  %v5903_v56 = vrot.slane %v5901_v32, 5  ;;  %v5917_v1 = vrot.slane %v5915_v54, 5 }
 0x198   : > { %8225 = vmatprep.subr.bf16.mxu1 %v9075_v57 }
 0x199   : > { %8534 = vmatpush3.bf16.msra.mxu0 %v9072_v8  ;;  %v9085_v8 = vld [vmem:[%s10921_s3 + $0x338] sm:$0xff]   ;;  %v5925_v29 = vrot.slane %v5923_v43, 5  ;;  %v5904_v58 = vsel %vm9299_vm2, %v5899_v9, %v5903_v56  ;;  %v5918_v4 = vsel %vm9299_vm2, %v5913_v3, %v5917_v1  ;;  %v7524_v3 = vld [vmem:[%s9907_s7 + $0x20] sm:$0xe]  ;;  %v7525_v1 = vld [vmem:[%s9907_s7 + $0x28] sm:$0xe] }
 0x19a   : > { %8535 = vmatprep.subr.bf16.mxu0 %v9074_v47  ;;  %v7512_v12 = vcombine.low %v5904_v58, %v5918_v4  ;;  %v9098_v56 = vld [vmem:[%s10921_s3 + $0x6b8] sm:$0xff]   ;;  %v7533_v24 = vrot.slane %v7525_v1, 9 }
 0x19b   : > { %8226 = vmatpush3.bf16.msra.mxu1 %v9075_v57  ;;  %v10788_v57 = vld [vmem:[%s9907_s7 + $0x44] sm:$0x1]  ;;  %v5926_v0 = vor.u32 %v5925_v29, %v5922_v55  ;;  %v6135_v29 = vrot.slane %v10758_v30, 5 }
 0x19c   : > { %8528 = vmatmul.mubr.bf16.gmra.mrb[4].mxu0 %v9083_v10  ;;  %8227 = vmatprep.subr.bf16.mxu1 %v9077_v28  ;;  %v9089_v10 = vld [vmem:[%s10921_s3 + $0x680] sm:$0xff]   ;;  %v5929_v21 = vshll.u32 %v10788_v57, 16 }
 0x19d   : > { %8536 = vmatpush3.bf16.msra.mxu0 %v9074_v47  ;;  %8547 = vmatprep.mubr.bf16.mxu0 %v7510_v6  ;;  %v10791_v47 = vld [vmem:[%s9907_s7 + $0x4c] sm:$0x1]  ;;  %v5890_v6 = vsel %vm9299_vm2, %v5885_v44, %v5889_v52  ;;  %v5927_v37 = vrot.slane %v5926_v0, 4 }
 0x19e   : > { %8537 = vmatprep.subr.bf16.mxu0 %v9076_v7  ;;  %v5943_v22 = vshll.u32 %v10791_v47, 16  ;;  %v5931_v40 = vrot.slane %v5929_v21, 5  ;;  %v6155_v44 = vrot.slane %v10791_v47, 5  ;;  %v7532_v47 = vrot.slane %v7524_v3, 9 }
 0x19f   : > { %8228 = vmatpush3.bf16.msra.mxu1 %v9077_v28  ;;  %v7527_v28 = vld [vmem:[%s9907_s7 + $0x38] sm:$0xe] }
 0x1a0   : > { %8229 = vmatprep.subr.bf16.mxu1 %v9079_v26  ;;  %v7535_v25 = vrot.slane %v7527_v28, 9  ;;  %v5945_v5 = vrot.slane %v5943_v22, 5  ;;  %v5932_v50 = vsel %vm9299_vm2, %v5927_v37, %v5931_v40 }
 0x1a1   : > { %8538 = vmatpush3.bf16.msra.mxu0 %v9076_v7  ;;  %v5876_v7 = vsel %vm9299_vm2, %v5871_v20, %v5875_v51  ;;  %v7529_v20 = vld [vmem:[%s9907_s7 + $0x48] sm:$0xe]  ;;  %v6151_v51 = vrot.slane %v10788_v57, 5 }
 0x1a2   : > { %8539 = vmatprep.subr.bf16.mxu0 %v9078_v59  ;;  %v7511_v62 = vcombine.low %v5876_v7, %v5890_v6  ;;  %v6148_v19 = vsel %vm9473_vm5, %v7535_v25, %v6147_v27  ;;  %v5946_v54 = vsel %vm9299_vm2, %v5941_v23, %v5945_v5  ;;  %v7537_v9 = vrot.slane %v7529_v20, 9 }
 0x1a3   : > { %8230 = vmatpush3.bf16.msra.mxu1 %v9079_v26  ;;  %v7534_v26 = vrot.slane %v7526_v2, 9  ;;  %v7513_v43 = vcombine.low %v5932_v50, %v5946_v54  ;;  %v6140_v2 = vsel %vm9473_vm5, %v7533_v24, %v6139_v49 }
 0x1a4   : > { %8231 = vmatprep.subr.bf16.mxu1 %v9082_v45  ;;  %v6156_v57 = vsel %vm9473_vm5, %v7537_v9, %v6155_v44 }
 0x1a5   : > { %8540 = vmatpush3.bf16.msra.mxu0 %v9078_v59  ;;  %v9090_v59 = vld [vmem:[%s10921_s3 + $0x688] sm:$0xff]   ;;  %v6144_v42 = vsel %vm9473_vm5, %v7534_v26, %v6143_v13 }
 0x1a6   : > { %8541 = vmatprep.subr.bf16.mxu0 %v9080_v61  ;;  %v7556_v32 = vcombine.low %v6144_v42, %v6148_v19 }
 0x1a7   : > { %8232 = vmatpush3.bf16.msra.mxu1 %v9082_v45  ;;  %v7523_v45 = vld [vmem:[%s9907_s7 + $0x18] sm:$0xe] }
 0x1a8   : > { %8233 = vmatprep.subr.bf16.mxu1 %v9085_v8  ;;  %v7531_v60 = vrot.slane %v7523_v45, 9 }
 0x1a9   : > { %8542 = vmatpush3.bf16.msra.mxu0 %v9080_v61  ;;  %v9093_v61 = vld [vmem:[%s10921_s3 + $0x690] sm:$0xff]  }
 0x1aa   : > { %8543 = vmatprep.subr.bf16.mxu0 %v9084_v38  ;;  %v6132_v15 = vsel %vm9473_vm5, %v7531_v60, %v6131_v39 }
 0x1ab   : > { %8234 = vmatpush3.bf16.msra.mxu1 %v9085_v8  ;;  %v7554_v33 = vcombine.low %v6128_v34, %v6132_v15  ;;  %v9097_v8 = vld [vmem:[%s10921_s3 + $0x6b0] sm:$0xff]  }
 0x1ac   : > { %8579 = vmatprep.subr.bf16.mxu1 %v9089_v10 }
 0x1ad   : > { %8544 = vmatpush3.bf16.msra.mxu0 %v9084_v38  ;;  %v7528_v38 = vld [vmem:[%s9907_s7 + $0x40] sm:$0xe] }
 0x1ae   : > { %8545 = vmatprep.subr.bf16.mxu0 %v9086_v17  ;;  %8236 = vmatmul.mubr.bf16.vlgmr.msra.gmra.mrb[0].mxu1 %v9088_v36  ;;  %v7536_v52 = vrot.slane %v7528_v38, 9 }
 0x1af   : > { %8587 = vmatpush3.bf16.msra.mxu1 %v9089_v10  ;;  %8239 = vmatprep.mubr.bf16.mxu1 %v9091_v46 }
 0x1b0   : > { %8580 = vmatprep.subr.bf16.mxu1 %v9090_v59  ;;  %v6152_v55 = vsel %vm9473_vm5, %v7536_v52, %v6151_v51 }
 0x1b1   : > { %8546 = vmatpush3.bf16.msra.mxu0 %v9086_v17  ;;  %v6136_v17 = vsel %vm9473_vm5, %v7532_v47, %v6135_v29 }
 0x1b2   : > { %8555 = vmatprep.subr.bf16.mxu0 %v9089_v10  ;;  %v7555_v28 = vcombine.low %v6136_v17, %v6140_v2 }
 0x1b3   : > { %8588 = vmatpush3.bf16.msra.mxu1 %v9090_v59 }
 0x1b4   : > { %8548 = vmatmul.mubr.bf16.vlgmr.msra.gmra.mrb[0].mxu0 %v7511_v62  ;;  %8581 = vmatprep.subr.bf16.mxu1 %v9093_v61 }
 0x1b5   : > { %8556 = vmatpush3.bf16.msra.mxu0 %v9089_v10  ;;  %8551 = vmatprep.mubr.bf16.mxu0 %v7512_v12  ;;  %v7557_v10 = vcombine.low %v6152_v55, %v6156_v57 }
 0x1b6   : > { %8557 = vmatprep.subr.bf16.mxu0 %v9090_v59  ;;  %8240 = vmatmul.mubr.bf16.gmra.mrb[4].mxu1 %v9092_v14 }
 0x1b7   : > { %8589 = vmatpush3.bf16.msra.mxu1 %v9093_v61  ;;  %8575 = vmatprep.mubr.bf16.mxu1 %v7556_v32 }
 0x1b8   : > { %8582 = vmatprep.subr.bf16.mxu1 %v9094_v16 }
 0x1b9   : > { %8558 = vmatpush3.bf16.msra.mxu0 %v9090_v59 }
 0x1ba   : > { %8559 = vmatprep.subr.bf16.mxu0 %v9093_v61 }
 0x1bb   : > { %8590 = vmatpush3.bf16.msra.mxu1 %v9094_v16 }
 0x1bc   : > { %8552 = vmatmul.mubr.bf16.gmra.mrb[4].mxu0 %v7513_v43  ;;  %8583 = vmatprep.subr.bf16.mxu1 %v9095_v35 }
 0x1bd   : > { %8560 = vmatpush3.bf16.msra.mxu0 %v9093_v61  ;;  %8571 = vmatprep.mubr.bf16.mxu0 %v7554_v33 }
 0x1be   : > { %8561 = vmatprep.subr.bf16.mxu0 %v9094_v16 }
 0x1bf   : > { %8591 = vmatpush3.bf16.msra.mxu1 %v9095_v35 }
 0x1c0   : > { %8584 = vmatprep.subr.bf16.mxu1 %v9096_v18 }
 0x1c1   : > { %8562 = vmatpush3.bf16.msra.mxu0 %v9094_v16 }
 0x1c2   : > { %8563 = vmatprep.subr.bf16.mxu0 %v9095_v35 }
 0x1c3   : > { %8592 = vmatpush3.bf16.msra.mxu1 %v9096_v18 }
 0x1c4   : > { %8585 = vmatprep.subr.bf16.mxu1 %v9097_v8 }
 0x1c5   : > { %8564 = vmatpush3.bf16.msra.mxu0 %v9095_v35 }
 0x1c6   : > { %8565 = vmatprep.subr.bf16.mxu0 %v9096_v18 }
 0x1c7   : > { %8593 = vmatpush3.bf16.msra.mxu1 %v9097_v8 }
 0x1c8   : > { %8586 = vmatprep.subr.bf16.mxu1 %v9098_v56 }
 0x1c9   : > { %8566 = vmatpush3.bf16.msra.mxu0 %v9096_v18 }
 0x1ca   : > { %8567 = vmatprep.subr.bf16.mxu0 %v9097_v8 }
 0x1cb   : > { %8594 = vmatpush3.bf16.msra.mxu1 %v9098_v56 }
 0x1cd   : > { %8568 = vmatpush3.bf16.msra.mxu0 %v9097_v8 }
 0x1ce   : > { %8569 = vmatprep.subr.bf16.mxu0 %v9098_v56  ;;  %8576 = vmatmul.mubr.bf16.vlgmr.msra.gmra.mrb[8].mxu1 %v7557_v10 }
 0x1d1   : > { %8570 = vmatpush3.bf16.msra.mxu0 %v9098_v56 }
 0x1d4   : > { %8572 = vmatmul.mubr.bf16.vlgmr.msra.gmra.mrb[0].mxu0 %v7555_v28 }
 0x281   : > { %v8237_v30 = vpop.f32.mrb[0].mxu1 }
 0x282   : > { %v3129_v63 = vpop.f32.mrb[1].mxu1 }
 0x283   : > { %v8238_v36 = vpop.f32.mrb[2].mxu1 }
 0x284   : > { %v3132_v7 = vpop.f32.mrb[3].mxu1 }
 0x289   : > { %v8241_v48 = vpop.f32.mrb[4].mxu1 }
 0x28a   : > { %v3145_v6 = vpop.f32.mrb[5].mxu1 }
 0x28b   : > { %v8242_v21 = vpop.f32.mrb[6].mxu1 }
 0x28c   : > { %v3148_v22 = vpop.f32.mrb[7].mxu1 }
 0x28f   : > { %v8553_v46 = vpop.f32.mrb[4].mxu0 }
 0x290   : > { %v8599_v58 = vadd.f32 %v8553_v46, %v8241_v48  ;;  %v6078_v4 = vpop.f32.mrb[5].mxu0 }
 0x291   : > { %v8601_v0 = vadd.f32 %v6078_v4, %v3145_v6  ;;  %v8554_v53 = vpop.f32.mrb[6].mxu0 }
 0x292   : > { %v8603_v59 = vadd.f32 %v8554_v53, %v8242_v21  ;;  %v6081_v26 = vpop.f32.mrb[7].mxu0 }
 0x293   : > { %v8605_v13 = vadd.f32 %v6081_v26, %v3148_v22 }
 0x2a1   : > { %v8577_v25 = vpop.f32.mrb[8].mxu1 }
 0x2a2   : > { %v8600_v27 = vadd.f32 %v8599_v58, %v8577_v25  ;;  %v6288_v62 = vpop.f32.mrb[9].mxu1 }
 0x2a3   : > { %v8602_v12 = vadd.f32 %v8601_v0, %v6288_v62  ;;  %v8578_v40 = vpop.f32.mrb[10].mxu1 }
 0x2a4   : > { %v8604_v5 = vadd.f32 %v8603_v59, %v8578_v40  ;;  %v6291_v11 = vpop.f32.mrb[11].mxu1  ;;  %v6370_v56 = vmul.f32 %v8600_v27, %v8600_v27 }
 0x2a5   : > { %v8606_v45 = vadd.f32 %v8605_v13, %v6291_v11  ;;  %v6368_v38 = vmul.f32 %v8602_v12, %v8602_v12 }
 0x2a6   : > { %v7602_v23 = vpack.c.bf16 %v8604_v5, %v8600_v27  ;;  %v6371_v55 = vmul.f32 %v8604_v5, %v8604_v5 }
 0x2a7   : > { %v8573_v37 = vpop.f32.mrb[0].mxu0  ;;  %v7597_v61 = vpack.c.bf16 %v8606_v45, %v8602_v12  ;;  %v6369_v52 = vmul.f32 %v8606_v45, %v8606_v45 }
 0x2a8   : > { %v8595_v42 = vadd.f32 %v8573_v37, %v8237_v30  ;;  %v6272_v19 = vpop.f32.mrb[1].mxu0  ;;  %7606 = vst [vmem:[%s364_s30 + $0x18] sm:$0xff] %v7602_v23  }
 0x2a9   : > { %v8596_v14 = vadd.f32 %v6272_v19, %v3129_v63  ;;  %v8574_v41 = vpop.f32.mrb[2].mxu0  ;;  %7605 = vst [vmem:[%s364_s30 + $0x10] sm:$0xff] %v7597_v61  }
 0x2aa   : > { %v8597_v31 = vadd.f32 %v8574_v41, %v8238_v36  ;;  %v6275_v60 = vpop.f32.mrb[3].mxu0  ;;  %v6366_v15 = vmul.f32 %v8595_v42, %v8595_v42 }
 0x2ab   : > { %v8598_v39 = vadd.f32 %v6275_v60, %v3132_v7  ;;  %v6364_v50 = vmul.f32 %v8596_v14, %v8596_v14 }
 0x2ac   : > { %v7592_v32 = vpack.c.bf16 %v8597_v31, %v8595_v42  ;;  %v6367_v33 = vmul.f32 %v8597_v31, %v8597_v31 }
 0x2ad   : > { %v7587_v54 = vpack.c.bf16 %v8598_v39, %v8596_v14  ;;  %v6351_v16 = vadd.f32 %v8598_v39, %v8596_v14  ;;  %v6365_v34 = vmul.f32 %v8598_v39, %v8598_v39 }
 0x2ae   : > { %7604 = vst [vmem:[%s364_s30 + $0x8] sm:$0xff] %v7592_v32  }
 0x2af   : > { %7588 = vst [vmem:[%s364_s30] sm:$0xff] %v7587_v54   ;;  %v6352_v43 = vadd.f32 %v8595_v42, %v6351_v16  ;;  %v6372_v35 = vadd.f32 %v6365_v34, %v6364_v50 }
 0x2b1   : > { %v6373_v18 = vadd.f32 %v6372_v35, %v6366_v15  ;;  %v6353_v8 = vadd.f32 %v8597_v31, %v6352_v43 }
 0x2b3   : > { %v6354_v20 = vadd.f32 %v8602_v12, %v6353_v8  ;;  %v6374_v51 = vadd.f32 %v6373_v18, %v6367_v33 }
 0x2b5   : > { %v6355_v44 = vadd.f32 %v8606_v45, %v6354_v20  ;;  %v6375_v9 = vadd.f32 %v6374_v51, %v6368_v38 }
 0x2b7   : > { %v6356_v3 = vadd.f32 %v8600_v27, %v6355_v44  ;;  %v6376_v1 = vadd.f32 %v6375_v9, %v6369_v52 }
 0x2b9   : > { %v6357_v57 = vadd.f32 %v8604_v5, %v6356_v3  ;;  %v6377_v47 = vadd.f32 %v6376_v1, %v6370_v56 }
 0x2bb   : > { %v6358_v29 = vrot.slane %v6357_v57, 4  ;;  %v6378_v24 = vadd.f32 %v6377_v47, %v6371_v55 }
 0x2bd   : > { %v6359_v49 = vadd.f32 %v6358_v29, %v6357_v57  ;;  %v6379_v10 = vrot.slane %v6378_v24, 4 }
 0x2bf   : > { %v6360_v17 = vrot.slane %v6359_v49, 2  ;;  %v6380_v2 = vadd.f32 %v6379_v10, %v6378_v24 }
 0x2c1   : > { %v6361_v28 = vadd.f32 %v6360_v17, %v6359_v49  ;;  %v6381_v30 = vrot.slane %v6380_v2, 2  ;;  %6390 = sbr.rel (%p10871_p11) target bundleno = 714 (0x2ca), region = 40 }
 0x2c3   : > { %v6362_v63 = vrot.slane %v6361_v28, 1  ;;  %v6382_v36 = vadd.f32 %v6381_v30, %v6380_v2 }
 0x2c5   : > { %v6363_v7 = vadd.f32 %v6362_v63, %v6361_v28  ;;  %v6383_v48 = vrot.slane %v6382_v36, 1 }
 0x2c7   : > { %v6384_v6 = vadd.f32 %v6383_v48, %v6382_v36  ;;  %6391 = vst [vmem:[%s10923_s5] sm:$0x1] (!%p10871_p11), %v6363_v7 }
 0x2c9   : > { %6392 = vst [vmem:[%s10924_s6] sm:$0x1] %v6384_v6 }
 0x2ca PF: > { %6395 = sbr.rel (!%p10871_p11) target bundleno = 725 (0x2d5), region = 44 }
 0x2d0   : > { %v6396_v21 = vld [vmem:[%s10923_s5] sm:$0x1] (%p10871_p11) }
 0x2d1   : > { %v6399_v22 = vld [vmem:[%s10924_s6] sm:$0x1]  ;;  %v6397_v46 = vadd.f32 %v6396_v21, %v6363_v7 }
 0x2d2   : > { %v6400_v58 = vadd.f32 %v6399_v22, %v6384_v6 }
 0x2d3   : > { %6398 = vst [vmem:[%s10923_s5] sm:$0x1] %v6397_v46 }
 0x2d4   : > { %6401 = vst [vmem:[%s10924_s6] sm:$0x1] %v6400_v58 }
 0x2d5 PF: > { %s17_s25 = sadd.s32 1, %s9137_s25   ;;  %s10931_s21 = smov %s9129_s23 }
 0x2d6   : > { %p14_p13 = scmp.ge.s32.totalorder %s17_s25, 18   ;;  %s10932_s22 = smov %s9133_s24 }
 0x2d7   : > { %s10933_s23 = smov %s10936_s26  ;;  %s10934_s24 = smov %s10940_s27 }
 0x2d8   :  { %16 = sbr.rel (!%p14_p13) target bundleno = 3 (0x3), region = 128 }

</bundles_post_ra>
